<compile_context>
chip_gen: v6e
topology: v6e:2x2x1
jax: 0.10.0
libtpu: 0.0.40
codegen_flags: <defaults>
</compile_context>

<pallas_src>
import functools

import jax
import jax.numpy as jnp
import numpy as np
from jax import lax
from jax.experimental import pallas as pl
from jax.experimental.pallas import tpu as pltpu

BN_EPS = 1e-5
# Contraction-channel threshold above which K already fills the MXU, so we
# skip the lane-axis im2col concat and use 9 accumulating dots instead.
_SPLIT_K_MIN_K = 256


@functools.lru_cache(maxsize=None)
def _vmem_limit_bytes():
    """VMEM limit with headroom for Mosaic internal scratch / double-buffers.

    v7x: 64 MiB physical per TensorCore -> cap at 48 MiB.
    v5e/v6e: 128 MiB physical -> raise the 32 MiB scoped default to ~100 MiB.
    """
    mib = 1024 * 1024
    try:
        phys = int(pltpu.get_tpu_info().vmem_capacity_bytes)
    except Exception:
        phys = 64 * mib
    return int(max(32 * mib, min(phys - 16 * mib, 100 * mib)))


def _cparams(n_axes=1):
    return pltpu.CompilerParams(
        dimension_semantics=("parallel",) * n_axes,
        vmem_limit_bytes=_vmem_limit_bytes())


# --------------------------------------------------------------------------
# Kernels
# --------------------------------------------------------------------------
def _conv1_kernel(*refs, taps, Ho, Wo, Cin, P, Psc, split_k):
    """3x3 conv1 (stride folded into the phase layout) + BN1 partial sums,
    with the 1x1 shortcut conv fused into the same dot (center-tap columns)."""
    has_sc = Psc > 0
    it = iter(refs)
    xph_ref = next(it)
    wm_ref = next(it)                                   # (9*Cin, P[+Psc])
    ws_ref = next(it) if (has_sc and split_k) else None  # (Cin, Psc) split path
    c1_ref = next(it)
    sc_ref = next(it) if has_sc else None
    s1_ref = next(it)
    q1_ref = next(it)
    if has_sc:
        ssc_ref = next(it)
        qsc_ref = next(it)

    x = xph_ref[...]                                    # (ss, Hph, Wph, Cin) bf16
    M = Ho * Wo
    patches = [x[ph, r:r + Ho, c:c + Wo, :].reshape(M, Cin) for (ph, r, c) in taps]

    if split_k:
        # K=Cin already fills the MXU; 9 accumulating dots, no im2col slab.
        acc_main = jnp.dot(patches[0], wm_ref[0:Cin, :],
                           preferred_element_type=jnp.float32)
        for t in range(1, 9):
            acc_main = acc_main + jnp.dot(
                patches[t], wm_ref[t * Cin:(t + 1) * Cin, :],
                preferred_element_type=jnp.float32)
        acc_sc = (jnp.dot(patches[4], ws_ref[...],
                          preferred_element_type=jnp.float32) if has_sc else None)
    else:
        # Single big-K dot; shortcut columns live in wm's extra Psc columns
        # (nonzero only on the center-tap rows), so one dot serves both.
        pat = jnp.concatenate(patches, axis=-1)          # (M, 9*Cin)
        acc = jnp.dot(pat, wm_ref[...], preferred_element_type=jnp.float32)
        acc_main = acc[:, :P] if has_sc else acc
        acc_sc = acc[:, P:P + Psc] if has_sc else None

    c1_ref[0] = acc_main.reshape(Ho, Wo, P).astype(c1_ref.dtype)
    s1_ref[0] = jnp.sum(acc_main, axis=0, keepdims=True)
    q1_ref[0] = jnp.sum(acc_main * acc_main, axis=0, keepdims=True)
    if has_sc:
        sc_ref[0] = acc_sc.reshape(Ho, Wo, Psc).astype(sc_ref.dtype)
        ssc_ref[0] = jnp.sum(acc_sc, axis=0, keepdims=True)
        qsc_ref[0] = jnp.sum(acc_sc * acc_sc, axis=0, keepdims=True)


def _conv2_kernel(c1_ref, sc1_ref, b1_ref, w2_ref, c2_ref, s2_ref, q2_ref,
                  pad_ref, *, Ho, Wo, split_k):
    """3x3 conv2 with BN1 affine + relu fused into the input load, padding
    rebuilt in an 8-aligned VMEM scratch, plus BN2 partial sums."""
    P = c1_ref.shape[-1]
    Wpad = pad_ref.shape[1]

    y1 = c1_ref[0].astype(jnp.float32) * sc1_ref[...] + b1_ref[...]
    y1 = jnp.maximum(y1, 0.0).astype(jnp.bfloat16)       # (Ho, Wo, P)

    # Zero only the border strips of the aligned scratch each step (cheap and
    # independent of grid splitting), then write the interior once.
    zrow = jnp.zeros((1, Wpad, P), jnp.bfloat16)
    pad_ref[0:1] = zrow
    pad_ref[Ho + 1:Ho + 2] = zrow
    pad_ref[:, 0:1] = jnp.zeros((Ho + 2, 1, P), jnp.bfloat16)
    pad_ref[:, Wo + 1:Wpad] = jnp.zeros((Ho + 2, Wpad - (Wo + 1), P), jnp.bfloat16)
    pad_ref[1:Ho + 1, 1:Wo + 1] = y1

    M = Ho * Wo
    patches = [pad_ref[ky:ky + Ho, kx:kx + Wo, :].reshape(M, P)
               for ky in range(3) for kx in range(3)]

    if split_k:
        acc = jnp.dot(patches[0], w2_ref[0:P, :], preferred_element_type=jnp.float32)
        for t in range(1, 9):
            acc = acc + jnp.dot(patches[t], w2_ref[t * P:(t + 1) * P, :],
                                preferred_element_type=jnp.float32)
    else:
        pat = jnp.concatenate(patches, axis=-1)           # (M, 9*P)
        acc = jnp.dot(pat, w2_ref[...], preferred_element_type=jnp.float32)

    c2_ref[0] = acc.reshape(Ho, Wo, P).astype(c2_ref.dtype)
    s2_ref[0] = jnp.sum(acc, axis=0, keepdims=True)
    q2_ref[0] = jnp.sum(acc * acc, axis=0, keepdims=True)


def _epilogue_sc_kernel(c2_ref, s2_ref, b2_ref, sc_ref, ss_ref, bs_ref, o_ref):
    y = (c2_ref[...].astype(jnp.float32) * s2_ref[...] + b2_ref[...]
         + sc_ref[...].astype(jnp.float32) * ss_ref[...] + bs_ref[...])
    o_ref[...] = jnp.maximum(y, 0.0).astype(o_ref.dtype)


def _epilogue_id_kernel(c2_ref, s2_ref, b2_ref, res_ref, o_ref):
    y = (c2_ref[...].astype(jnp.float32) * s2_ref[...] + b2_ref[...]
         + res_ref[...].astype(jnp.float32))
    o_ref[...] = jnp.maximum(y, 0.0).astype(o_ref.dtype)


# --------------------------------------------------------------------------
# Wrappers
# --------------------------------------------------------------------------
def _conv_taps(stride):
    # tap (ky, kx) -> (phase index, row offset, col offset) in the phase tensor.
    # Index 4 (ky=kx=1, the center tap) is exactly the 1x1/stride shortcut read.
    taps = []
    for ky in range(3):
        for kx in range(3):
            taps.append(((ky % stride) * stride + (kx % stride),
                         ky // stride, kx // stride))
    return tuple(taps)


def _build_phase_input(x_bf16, stride):
    """Zero-pad by 1 and decompose into stride x stride phases.

    Returns (N*stride^2, Hph, Wph, C) with
      out[n*stride^2 + pr*stride + pc, i, j] == x_pad[n, stride*i + pr, stride*j + pc].
    """
    xp = jnp.pad(x_bf16, ((0, 0), (1, 1), (1, 1), (0, 0)))
    N, Hp, Wp, C = xp.shape
    if stride == 1:
        return xp
    assert stride == 2 and Hp % 2 == 0 and Wp % 2 == 0, "stride-2 path needs even H, W"
    xr = xp.reshape(N, Hp // 2, 2, Wp // 2, 2, C)
    xr = jnp.transpose(xr, (0, 2, 4, 1, 3, 5))            # (N, pr, pc, i, j, C)
    return xr.reshape(N * 4, Hp // 2, Wp // 2, C)


def conv1_block(xph, w_main, w_sc, N, Ho, Wo, *, taps, Cin, P, Psc, split_k):
    total, Hph, Wph, _ = xph.shape
    ss = total // N
    has_sc = Psc > 0

    kernel = functools.partial(_conv1_kernel, taps=taps, Ho=Ho, Wo=Wo,
                               Cin=Cin, P=P, Psc=Psc, split_k=split_k)

    in_specs = [pl.BlockSpec((ss, Hph, Wph, Cin), lambda n: (n, 0, 0, 0)),
                pl.BlockSpec(w_main.shape, lambda n: (0, 0))]
    args = [xph, w_main]
    if has_sc and split_k:
        in_specs.append(pl.BlockSpec(w_sc.shape, lambda n: (0, 0)))
        args.append(w_sc)

    out_shape = [jax.ShapeDtypeStruct((N, Ho, Wo, P), jnp.bfloat16)]
    out_specs = [pl.BlockSpec((1, Ho, Wo, P), lambda n: (n, 0, 0, 0))]
    if has_sc:
        out_shape.append(jax.ShapeDtypeStruct((N, Ho, Wo, Psc), jnp.bfloat16))
        out_specs.append(pl.BlockSpec((1, Ho, Wo, Psc), lambda n: (n, 0, 0, 0)))
    out_shape += [jax.ShapeDtypeStruct((N, 1, P), jnp.float32)] * 2
    out_specs += [pl.BlockSpec((1, 1, P), lambda n: (n, 0, 0))] * 2
    if has_sc:
        out_shape += [jax.ShapeDtypeStruct((N, 1, Psc), jnp.float32)] * 2
        out_specs += [pl.BlockSpec((1, 1, Psc), lambda n: (n, 0, 0))] * 2

    return pl.pallas_call(
        kernel,
        out_shape=tuple(out_shape),
        grid=(N,),
        in_specs=in_specs,
        out_specs=tuple(out_specs),
        compiler_params=_cparams(1),
    )(*args)


def conv2_block(c1, scale1, bias1, w2m, split_k):
    N, Ho, Wo, P = c1.shape
    Wpad = -(-(Wo + 2) // 8) * 8                          # 8-aligned padded width
    kernel = functools.partial(_conv2_kernel, Ho=Ho, Wo=Wo, split_k=split_k)
    return pl.pallas_call(
        kernel,
        out_shape=(jax.ShapeDtypeStruct((N, Ho, Wo, P), jnp.bfloat16),
                   jax.ShapeDtypeStruct((N, 1, P), jnp.float32),
                   jax.ShapeDtypeStruct((N, 1, P), jnp.float32)),
        grid=(N,),
        in_specs=[pl.BlockSpec((1, Ho, Wo, P), lambda n: (n, 0, 0, 0)),
                  pl.BlockSpec((1, P), lambda n: (0, 0)),
                  pl.BlockSpec((1, P), lambda n: (0, 0)),
                  pl.BlockSpec((9 * P, P), lambda n: (0, 0))],
        out_specs=(pl.BlockSpec((1, Ho, Wo, P), lambda n: (n, 0, 0, 0)),
                   pl.BlockSpec((1, 1, P), lambda n: (n, 0, 0)),
                   pl.BlockSpec((1, 1, P), lambda n: (n, 0, 0))),
        scratch_shapes=[pltpu.VMEM((Ho + 2, Wpad, P), jnp.bfloat16)],
        compiler_params=_cparams(1),
    )(c1, scale1, bias1, w2m)


def _pick_row_tile(R, bytes_per_row, budget=24 * 1024 * 1024):
    """Largest legal row tile (divides R, mult. of 8 or == R) within a VMEM budget."""
    cap = max(8, budget // max(bytes_per_row, 1))
    if R <= cap:
        return R
    t = (cap // 8) * 8
    while t >= 8:
        if R % t == 0:
            return t
        t -= 8
    return R


def epilogue(c2, scale2, bias2, res, res_scale=None, res_bias=None):
    """out = relu(c2*scale2 + bias2 + (res*res_scale + res_bias | res)).

    Lane-dense (N*Ho, Wo*P) 2-D view, large row tiles, bf16 output."""
    N, Ho, Wo, P = c2.shape
    R, L = N * Ho, Wo * P
    # double-buffered bf16 c2 + bf16 res + bf16 out per row (scale/bias rows tiny)
    TR = _pick_row_tile(R, 12 * L)

    c2f = c2.reshape(R, L)
    resf = res.astype(jnp.bfloat16).reshape(R, L)
    s2r = jnp.tile(scale2, (1, Wo))                       # channel pattern repeats / P
    b2r = jnp.tile(bias2, (1, Wo))

    row_spec = pl.BlockSpec((TR, L), lambda r: (r, 0))
    vec_spec = pl.BlockSpec((1, L), lambda r: (0, 0))
    grid = (R // TR,)

    if res_scale is not None:
        ssr = jnp.tile(res_scale, (1, Wo))
        bsr = jnp.tile(res_bias, (1, Wo))
        out = pl.pallas_call(
            _epilogue_sc_kernel,
            out_shape=jax.ShapeDtypeStruct((R, L), jnp.bfloat16),
            grid=grid,
            in_specs=[row_spec, vec_spec, vec_spec, row_spec, vec_spec, vec_spec],
            out_specs=row_spec,
            compiler_params=_cparams(1),
        )(c2f, s2r, b2r, resf, ssr, bsr)
    else:
        out = pl.pallas_call(
            _epilogue_id_kernel,
            out_shape=jax.ShapeDtypeStruct((R, L), jnp.bfloat16),
            grid=grid,
            in_specs=[row_spec, vec_spec, vec_spec, row_spec],
            out_specs=row_spec,
            compiler_params=_cparams(1),
        )(c2f, s2r, b2r, resf)
    return out.reshape(N, Ho, Wo, P)


def _bn_fold(sums, sumsqs, gamma, beta, count, eps=BN_EPS):
    """Fold per-image partial sums into BN scale/bias (tiny O(C) glue)."""
    total = jnp.sum(sums, axis=(0, 1))
    total2 = jnp.sum(sumsqs, axis=(0, 1))
    mean = total / count
    var = jnp.maximum(total2 / count - mean * mean, 0.0)   # biased var (training BN)
    scale = gamma * lax.rsqrt(var + eps)
    bias = beta - mean * scale
    return scale.reshape(1, -1), bias.reshape(1, -1)


# --------------------------------------------------------------------------
# BasicBlock forward (Pallas)
# --------------------------------------------------------------------------
@functools.partial(jax.jit, static_argnames=("stride",))
def basic_block_forward(x_nchw, params, stride):
    x = jnp.transpose(x_nchw, (0, 2, 3, 1)).astype(jnp.float32)   # NCHW -> NHWC
    N, H, W, Cin = x.shape
    P = params["w1"].shape[-1]
    has_sc = (stride != 1) or (Cin != P)
    Psc = P if has_sc else 0
    Ho = (H - 1) // stride + 1
    Wo = (W - 1) // stride + 1

    x_bf16 = x.astype(jnp.bfloat16)
    xph = _build_phase_input(x_bf16, stride)
    taps = _conv_taps(stride)

    split_k1 = Cin >= _SPLIT_K_MIN_K
    split_k2 = P >= _SPLIT_K_MIN_K

    w1m = params["w1"].reshape(9 * Cin, P).astype(jnp.bfloat16)
    w2m = params["w2"].reshape(9 * P, P).astype(jnp.bfloat16)

    w_sc = None
    if has_sc:
        ws = params["ws"].astype(jnp.bfloat16)                    # (Cin, P)
        if split_k1:
            w_main, w_sc = w1m, ws
        else:
            # Fuse shortcut into extra output columns (only center-tap rows nonzero).
            sc_cols = jnp.zeros((9 * Cin, Psc), jnp.bfloat16)
            sc_cols = sc_cols.at[4 * Cin:5 * Cin, :].set(ws)
            w_main = jnp.concatenate([w1m, sc_cols], axis=1)      # (9*Cin, P+Psc)
    else:
        w_main = w1m

    outs = conv1_block(xph, w_main, w_sc, N, Ho, Wo, taps=taps,
                       Cin=Cin, P=P, Psc=Psc, split_k=split_k1)
    cnt = float(N * Ho * Wo)
    if has_sc:
        c1, sc, s1, q1, ssc, qsc = outs
        scale_s, bias_s = _bn_fold(ssc, qsc, params["gs"], params["bs"], cnt)
    else:
        c1, s1, q1 = outs
    scale1, bias1 = _bn_fold(s1, q1, params["g1"], params["b1"], cnt)

    c2, s2, q2 = conv2_block(c1, scale1, bias1, w2m, split_k2)
    scale2, bias2 = _bn_fold(s2, q2, params["g2"], params["b2"], cnt)

    if has_sc:
        out = epilogue(c2, scale2, bias2, sc, scale_s, bias_s)
    else:
        out = epilogue(c2, scale2, bias2, x_bf16)
    # bf16 -> f32 upcast fuses into the final layout transpose.
    return jnp.transpose(out, (0, 3, 1, 2)).astype(x_nchw.dtype)  # NHWC -> NCHW


# --------------------------------------------------------------------------
# Pure-JAX reference (training-mode forward, matches PyTorch BasicBlock)
# --------------------------------------------------------------------------
def _ref_conv(x, w, stride, pad):
    return lax.conv_general_dilated(
        x, w, (stride, stride), ((pad, pad), (pad, pad)),
        dimension_numbers=("NHWC", "HWIO", "NHWC"),
        precision=lax.Precision.HIGHEST)


def _ref_bn(y, gamma, beta, eps=BN_EPS):
    mean = jnp.mean(y, axis=(0, 1, 2))
    var = jnp.var(y, axis=(0, 1, 2))        # biased, as PyTorch training-mode BN
    return (y - mean) * lax.rsqrt(var + eps) * gamma + beta


def ref_basic_block(x_nchw, params, stride):
    x = jnp.transpose(x_nchw, (0, 2, 3, 1)).astype(jnp.float32)
    Cin = x.shape[-1]
    P = params["w1"].shape[-1]
    has_sc = (stride != 1) or (Cin != P)
    out = _ref_conv(x, params["w1"], stride, 1)
    out = jax.nn.relu(_ref_bn(out, params["g1"], params["b1"]))
    out = _ref_conv(out, params["w2"], 1, 1)
    out = _ref_bn(out, params["g2"], params["b2"])
    if has_sc:
        sc = _ref_conv(x, params["ws"][None, None], stride, 0)
        sc = _ref_bn(sc, params["gs"], params["bs"])
    else:
        sc = x
    return jnp.transpose(jax.nn.relu(out + sc), (0, 3, 1, 2))


# --------------------------------------------------------------------------
# Deterministic parameter init
# --------------------------------------------------------------------------
def make_params(key, in_planes, planes, stride):
    ks = jax.random.split(key, 9)
    p = {
        "w1": 0.1 * jax.random.normal(ks[0], (3, 3, in_planes, planes), jnp.float32),
        "g1": 1.0 + 0.1 * jax.random.normal(ks[1], (planes,), jnp.float32),
        "b1": 0.1 * jax.random.normal(ks[2], (planes,), jnp.float32),
        "w2": 0.1 * jax.random.normal(ks[3], (3, 3, planes, planes), jnp.float32),
        "g2": 1.0 + 0.1 * jax.random.normal(ks[4], (planes,), jnp.float32),
        "b2": 0.1 * jax.random.normal(ks[5], (planes,), jnp.float32),
    }
    if stride != 1 or in_planes != planes:
        p["ws"] = 0.1 * jax.random.normal(ks[6], (in_planes, planes), jnp.float32)
        p["gs"] = 1.0 + 0.1 * jax.random.normal(ks[7], (planes,), jnp.float32)
        p["bs"] = 0.1 * jax.random.normal(ks[8], (planes,), jnp.float32)
    return p


# --------------------------------------------------------------------------
if __name__ == "__main__":
    key = jax.random.PRNGKey(0)
    kx, kp1, kp2 = jax.random.split(key, 3)

    N, Cin, H, W = 2, 4, 16, 16
    x_nchw = jax.random.normal(kx, (N, Cin, H, W), jnp.float32)

    # Case 1: identity shortcut (stride=1, in_planes == planes)
    p1 = make_params(kp1, Cin, Cin, 1)
    out1 = jax.block_until_ready(basic_block_forward(x_nchw, p1, stride=1))
    ref1 = ref_basic_block(x_nchw, p1, 1)
    assert out1.shape == (N, Cin, H, W)
    np.testing.assert_allclose(np.asarray(out1), np.asarray(ref1),
                               rtol=2e-2, atol=2e-2)

    # Case 2: downsampling shortcut (stride=2, planes=8 -> fused 1x1 conv + BN)
    planes = 8
    p2 = make_params(kp2, Cin, planes, 2)
    out2 = jax.block_until_ready(basic_block_forward(x_nchw, p2, stride=2))
    ref2 = ref_basic_block(x_nchw, p2, 2)
    assert out2.shape == (N, planes, H // 2, W // 2)
    np.testing.assert_allclose(np.asarray(out2), np.asarray(ref2),
                               rtol=2e-2, atol=2e-2)

    print("KERNEL_OK")
</pallas_src>

<mosaic_0001>
module attributes {stable_mosaic.version = 11 : i64} {
  func.func @_conv1_kernel(%arg0: i32, %arg1: memref<1x18x18x4xbf16, #tpu.memory_space<vmem>>, %arg2: memref<36x4xbf16, #tpu.memory_space<vmem>>, %arg3: memref<1x16x16x4xbf16, #tpu.memory_space<vmem>>, %arg4: memref<1x1x4xf32, #tpu.memory_space<vmem>>, %arg5: memref<1x1x4xf32, #tpu.memory_space<vmem>>) attributes {dimension_semantics = [#tpu.dimension_semantics<parallel>], iteration_bounds = array<i64: 2>, scalar_prefetch = 0 : i64, scratch_operands = 0 : i64, tpu.core_type = #tpu.core_type<tc>, window_params = [{transform_indices = @transform_0, window_bounds = array<i64: 1, 18, 18, 4>}, {pipeline_mode = #tpu.pipeline_mode<synchronous>, transform_indices = @transform_1, window_bounds = array<i64: 36, 4>}, {transform_indices = @transform_2, window_bounds = array<i64: 1, 16, 16, 4>}, {transform_indices = @transform_3, window_bounds = array<i64: 1, 1, 4>}, {transform_indices = @transform_4, window_bounds = array<i64: 1, 1, 4>}]} {
    %c0 = arith.constant 0 : index
    %c0_0 = arith.constant 0 : index
    %c0_1 = arith.constant 0 : index
    %c0_2 = arith.constant 0 : index
    %0 = vector.load %arg1[%c0, %c0_0, %c0_1, %c0_2] : memref<1x18x18x4xbf16, #tpu.memory_space<vmem>>, vector<1x18x18x4xbf16>
    %1 = vector.extract_strided_slice %0 {offsets = [0, 0, 0, 0], sizes = [1, 16, 16, 4], strides = [1, 1, 1, 1]} : vector<1x18x18x4xbf16> to vector<1x16x16x4xbf16>
    %2 = vector.shape_cast %1 : vector<1x16x16x4xbf16> to vector<16x16x4xbf16>
    %3 = vector.shape_cast %2 : vector<16x16x4xbf16> to vector<256x4xbf16>
    %4 = vector.extract_strided_slice %0 {offsets = [0, 0, 1, 0], sizes = [1, 16, 16, 4], strides = [1, 1, 1, 1]} : vector<1x18x18x4xbf16> to vector<1x16x16x4xbf16>
    %5 = vector.shape_cast %4 : vector<1x16x16x4xbf16> to vector<16x16x4xbf16>
    %6 = vector.shape_cast %5 : vector<16x16x4xbf16> to vector<256x4xbf16>
    %7 = vector.extract_strided_slice %0 {offsets = [0, 0, 2, 0], sizes = [1, 16, 16, 4], strides = [1, 1, 1, 1]} : vector<1x18x18x4xbf16> to vector<1x16x16x4xbf16>
    %8 = vector.shape_cast %7 : vector<1x16x16x4xbf16> to vector<16x16x4xbf16>
    %9 = vector.shape_cast %8 : vector<16x16x4xbf16> to vector<256x4xbf16>
    %10 = vector.extract_strided_slice %0 {offsets = [0, 1, 0, 0], sizes = [1, 16, 16, 4], strides = [1, 1, 1, 1]} : vector<1x18x18x4xbf16> to vector<1x16x16x4xbf16>
    %11 = vector.shape_cast %10 : vector<1x16x16x4xbf16> to vector<16x16x4xbf16>
    %12 = vector.shape_cast %11 : vector<16x16x4xbf16> to vector<256x4xbf16>
    %13 = vector.extract_strided_slice %0 {offsets = [0, 1, 1, 0], sizes = [1, 16, 16, 4], strides = [1, 1, 1, 1]} : vector<1x18x18x4xbf16> to vector<1x16x16x4xbf16>
    %14 = vector.shape_cast %13 : vector<1x16x16x4xbf16> to vector<16x16x4xbf16>
    %15 = vector.shape_cast %14 : vector<16x16x4xbf16> to vector<256x4xbf16>
    %16 = vector.extract_strided_slice %0 {offsets = [0, 1, 2, 0], sizes = [1, 16, 16, 4], strides = [1, 1, 1, 1]} : vector<1x18x18x4xbf16> to vector<1x16x16x4xbf16>
    %17 = vector.shape_cast %16 : vector<1x16x16x4xbf16> to vector<16x16x4xbf16>
    %18 = vector.shape_cast %17 : vector<16x16x4xbf16> to vector<256x4xbf16>
    %19 = vector.extract_strided_slice %0 {offsets = [0, 2, 0, 0], sizes = [1, 16, 16, 4], strides = [1, 1, 1, 1]} : vector<1x18x18x4xbf16> to vector<1x16x16x4xbf16>
    %20 = vector.shape_cast %19 : vector<1x16x16x4xbf16> to vector<16x16x4xbf16>
    %21 = vector.shape_cast %20 : vector<16x16x4xbf16> to vector<256x4xbf16>
    %22 = vector.extract_strided_slice %0 {offsets = [0, 2, 1, 0], sizes = [1, 16, 16, 4], strides = [1, 1, 1, 1]} : vector<1x18x18x4xbf16> to vector<1x16x16x4xbf16>
    %23 = vector.shape_cast %22 : vector<1x16x16x4xbf16> to vector<16x16x4xbf16>
    %24 = vector.shape_cast %23 : vector<16x16x4xbf16> to vector<256x4xbf16>
    %25 = vector.extract_strided_slice %0 {offsets = [0, 2, 2, 0], sizes = [1, 16, 16, 4], strides = [1, 1, 1, 1]} : vector<1x18x18x4xbf16> to vector<1x16x16x4xbf16>
    %26 = vector.shape_cast %25 : vector<1x16x16x4xbf16> to vector<16x16x4xbf16>
    %27 = vector.shape_cast %26 : vector<16x16x4xbf16> to vector<256x4xbf16>
    %28 = tpu.concatenate %3, %6, %9, %12, %15, %18, %21, %24, %27 in 1 : vector<256x4xbf16>, vector<256x4xbf16>, vector<256x4xbf16>, vector<256x4xbf16>, vector<256x4xbf16>, vector<256x4xbf16>, vector<256x4xbf16>, vector<256x4xbf16>, vector<256x4xbf16> -> vector<256x36xbf16>
    %c0_3 = arith.constant 0 : index
    %c0_4 = arith.constant 0 : index
    %29 = vector.load %arg2[%c0_3, %c0_4] : memref<36x4xbf16, #tpu.memory_space<vmem>>, vector<36x4xbf16>
    %cst = arith.constant dense<0.000000e+00> : vector<256x4xf32>
    %30 = tpu.matmul %28, %29, %cst {dimension_numbers = #tpu.dot_dimension_numbers<[1], [0], [0], [1], [0, 0, 1, 1], [], []>} : vector<256x36xbf16>, vector<36x4xbf16>, vector<256x4xf32> -> vector<256x4xf32>
    %31 = vector.shape_cast %30 : vector<256x4xf32> to vector<16x16x4xf32>
    %32 = arith.truncf %31 : vector<16x16x4xf32> to vector<16x16x4xbf16>
    %c0_5 = arith.constant 0 : index
    %c0_6 = arith.constant 0 : index
    %c0_7 = arith.constant 0 : index
    %c0_8 = arith.constant 0 : index
    %33 = vector.load %arg3[%c0_5, %c0_6, %c0_7, %c0_8] : memref<1x16x16x4xbf16, #tpu.memory_space<vmem>>, vector<1x16x16x4xbf16>
    %34 = vector.shape_cast %33 : vector<1x16x16x4xbf16> to vector<16x16x4xbf16>
    %35 = vector.shape_cast %32 : vector<16x16x4xbf16> to vector<1x16x16x4xbf16>
    tpu.vector_store %arg3[%c0_5, %c0_6, %c0_7, %c0_8], %35 {strides = array<i32>} : memref<1x16x16x4xbf16, #tpu.memory_space<vmem>>, vector<1x16x16x4xbf16>,
    %cst_9 = arith.constant dense<0.000000e+00> : vector<4xf32>
    %36 = vector.multi_reduction <add>, %30, %cst_9 [0] : vector<256x4xf32> to vector<4xf32>
    %37 = vector.shape_cast %36 : vector<4xf32> to vector<1x4xf32>
    %c0_10 = arith.constant 0 : index
    %c0_11 = arith.constant 0 : index
    %c0_12 = arith.constant 0 : index
    %38 = vector.load %arg4[%c0_10, %c0_11, %c0_12] : memref<1x1x4xf32, #tpu.memory_space<vmem>>, vector<1x1x4xf32>
    %39 = vector.shape_cast %38 : vector<1x1x4xf32> to vector<1x4xf32>
    %40 = vector.shape_cast %37 : vector<1x4xf32> to vector<1x1x4xf32>
    tpu.vector_store %arg4[%c0_10, %c0_11, %c0_12], %40 {strides = array<i32>} : memref<1x1x4xf32, #tpu.memory_space<vmem>>, vector<1x1x4xf32>,
    %41 = arith.mulf %30, %30 : vector<256x4xf32>
    %cst_13 = arith.constant dense<0.000000e+00> : vector<4xf32>
    %42 = vector.multi_reduction <add>, %41, %cst_13 [0] : vector<256x4xf32> to vector<4xf32>
    %43 = vector.shape_cast %42 : vector<4xf32> to vector<1x4xf32>
    %c0_14 = arith.constant 0 : index
    %c0_15 = arith.constant 0 : index
    %c0_16 = arith.constant 0 : index
    %44 = vector.load %arg5[%c0_14, %c0_15, %c0_16] : memref<1x1x4xf32, #tpu.memory_space<vmem>>, vector<1x1x4xf32>
    %45 = vector.shape_cast %44 : vector<1x1x4xf32> to vector<1x4xf32>
    %46 = vector.shape_cast %43 : vector<1x4xf32> to vector<1x1x4xf32>
    tpu.vector_store %arg5[%c0_14, %c0_15, %c0_16], %46 {strides = array<i32>} : memref<1x1x4xf32, #tpu.memory_space<vmem>>, vector<1x1x4xf32>,
    return
  }
  func.func @transform_0(%arg0: i32) -> (i32, i32, i32, i32) {
    %c0_i32 = arith.constant 0 : i32
    %c0_i32_0 = arith.constant 0 : i32
    %c0_i32_1 = arith.constant 0 : i32
    %c0_i32_2 = arith.constant 0 : i32
    return %arg0, %c0_i32, %c0_i32_0, %c0_i32_1 : i32, i32, i32, i32
  }
  func.func @transform_1(%arg0: i32) -> (i32, i32) {
    %c0_i32 = arith.constant 0 : i32
    %c0_i32_0 = arith.constant 0 : i32
    %c0_i32_1 = arith.constant 0 : i32
    return %c0_i32, %c0_i32_0 : i32, i32
  }
  func.func @transform_2(%arg0: i32) -> (i32, i32, i32, i32) {
    %c0_i32 = arith.constant 0 : i32
    %c0_i32_0 = arith.constant 0 : i32
    %c0_i32_1 = arith.constant 0 : i32
    %c0_i32_2 = arith.constant 0 : i32
    return %arg0, %c0_i32, %c0_i32_0, %c0_i32_1 : i32, i32, i32, i32
  }
  func.func @transform_3(%arg0: i32) -> (i32, i32, i32) {
    %c0_i32 = arith.constant 0 : i32
    %c0_i32_0 = arith.constant 0 : i32
    %c0_i32_1 = arith.constant 0 : i32
    return %arg0, %c0_i32, %c0_i32_0 : i32, i32, i32
  }
  func.func @transform_4(%arg0: i32) -> (i32, i32, i32) {
    %c0_i32 = arith.constant 0 : i32
    %c0_i32_0 = arith.constant 0 : i32
    %c0_i32_1 = arith.constant 0 : i32
    return %arg0, %c0_i32, %c0_i32_0 : i32, i32, i32
  }
}

module attributes {stable_mosaic.version = 11 : i64} {
  func.func @_conv2_kernel(%arg0: i32, %arg1: memref<1x16x16x4xbf16, #tpu.memory_space<vmem>>, %arg2: memref<1x4xf32, #tpu.memory_space<vmem>>, %arg3: memref<1x4xf32, #tpu.memory_space<vmem>>, %arg4: memref<36x4xbf16, #tpu.memory_space<vmem>>, %arg5: memref<1x16x16x4xbf16, #tpu.memory_space<vmem>>, %arg6: memref<1x1x4xf32, #tpu.memory_space<vmem>>, %arg7: memref<1x1x4xf32, #tpu.memory_space<vmem>>, %arg8: memref<18x24x4xbf16, #tpu.memory_space<vmem>>) attributes {dimension_semantics = [#tpu.dimension_semantics<parallel>], iteration_bounds = array<i64: 2>, scalar_prefetch = 0 : i64, scratch_operands = 1 : i64, tpu.core_type = #tpu.core_type<tc>, window_params = [{transform_indices = @transform_0, window_bounds = array<i64: 1, 16, 16, 4>}, {pipeline_mode = #tpu.pipeline_mode<synchronous>, transform_indices = @transform_1, window_bounds = array<i64: 1, 4>}, {pipeline_mode = #tpu.pipeline_mode<synchronous>, transform_indices = @transform_2, window_bounds = array<i64: 1, 4>}, {pipeline_mode = #tpu.pipeline_mode<synchronous>, transform_indices = @transform_3, window_bounds = array<i64: 36, 4>}, {transform_indices = @transform_4, window_bounds = array<i64: 1, 16, 16, 4>}, {transform_indices = @transform_5, window_bounds = array<i64: 1, 1, 4>}, {transform_indices = @transform_6, window_bounds = array<i64: 1, 1, 4>}]} {
    %c0 = arith.constant 0 : index
    %c0_0 = arith.constant 0 : index
    %c0_1 = arith.constant 0 : index
    %c0_2 = arith.constant 0 : index
    %0 = vector.load %arg1[%c0, %c0_0, %c0_1, %c0_2] : memref<1x16x16x4xbf16, #tpu.memory_space<vmem>>, vector<1x16x16x4xbf16>
    %1 = vector.shape_cast %0 : vector<1x16x16x4xbf16> to vector<16x16x4xbf16>
    %2 = arith.extf %1 : vector<16x16x4xbf16> to vector<16x16x4xf32>
    %c0_3 = arith.constant 0 : index
    %c0_4 = arith.constant 0 : index
    %3 = vector.load %arg2[%c0_3, %c0_4] : memref<1x4xf32, #tpu.memory_space<vmem>>, vector<1x4xf32>
    %4 = vector.shape_cast %3 : vector<1x4xf32> to vector<1x1x4xf32>
    %5 = vector.broadcast %4 : vector<1x1x4xf32> to vector<16x16x4xf32>
    %6 = arith.mulf %2, %5 : vector<16x16x4xf32>
    %c0_5 = arith.constant 0 : index
    %c0_6 = arith.constant 0 : index
    %7 = vector.load %arg3[%c0_5, %c0_6] : memref<1x4xf32, #tpu.memory_space<vmem>>, vector<1x4xf32>
    %8 = vector.shape_cast %7 : vector<1x4xf32> to vector<1x1x4xf32>
    %9 = vector.broadcast %8 : vector<1x1x4xf32> to vector<16x16x4xf32>
    %10 = arith.addf %6, %9 : vector<16x16x4xf32>
    %cst = arith.constant 0.000000e+00 : f32
    %11 = vector.broadcast %cst : f32 to vector<16x16x4xf32>
    %12 = arith.maximumf %10, %11 : vector<16x16x4xf32>
    %13 = arith.truncf %12 : vector<16x16x4xf32> to vector<16x16x4xbf16>
    %cst_7 = arith.constant 0.000000e+00 : bf16
    %14 = vector.broadcast %cst_7 : bf16 to vector<1x24x4xbf16>
    %c0_8 = arith.constant 0 : index
    %c0_9 = arith.constant 0 : index
    %c0_10 = arith.constant 0 : index
    %15 = vector.load %arg8[%c0_8, %c0_9, %c0_10] : memref<18x24x4xbf16, #tpu.memory_space<vmem>>, vector<1x24x4xbf16>
    tpu.vector_store %arg8[%c0_8, %c0_9, %c0_10], %14 {strides = array<i32>} : memref<18x24x4xbf16, #tpu.memory_space<vmem>>, vector<1x24x4xbf16>,
    %c17 = arith.constant 17 : index
    %c0_11 = arith.constant 0 : index
    %c0_12 = arith.constant 0 : index
    %16 = vector.load %arg8[%c17, %c0_11, %c0_12] : memref<18x24x4xbf16, #tpu.memory_space<vmem>>, vector<1x24x4xbf16>
    tpu.vector_store %arg8[%c17, %c0_11, %c0_12], %14 {strides = array<i32>} : memref<18x24x4xbf16, #tpu.memory_space<vmem>>, vector<1x24x4xbf16>,
    %cst_13 = arith.constant 0.000000e+00 : bf16
    %17 = vector.broadcast %cst_13 : bf16 to vector<18x1x4xbf16>
    %c0_14 = arith.constant 0 : index
    %c0_15 = arith.constant 0 : index
    %c0_16 = arith.constant 0 : index
    %18 = vector.load %arg8[%c0_14, %c0_15, %c0_16] : memref<18x24x4xbf16, #tpu.memory_space<vmem>>, vector<18x1x4xbf16>
    tpu.vector_store %arg8[%c0_14, %c0_15, %c0_16], %17 {strides = array<i32>} : memref<18x24x4xbf16, #tpu.memory_space<vmem>>, vector<18x1x4xbf16>,
    %cst_17 = arith.constant 0.000000e+00 : bf16
    %19 = vector.broadcast %cst_17 : bf16 to vector<18x7x4xbf16>
    %c0_18 = arith.constant 0 : index
    %c17_19 = arith.constant 17 : index
    %c0_20 = arith.constant 0 : index
    %20 = vector.load %arg8[%c0_18, %c17_19, %c0_20] : memref<18x24x4xbf16, #tpu.memory_space<vmem>>, vector<18x7x4xbf16>
    tpu.vector_store %arg8[%c0_18, %c17_19, %c0_20], %19 {strides = array<i32>} : memref<18x24x4xbf16, #tpu.memory_space<vmem>>, vector<18x7x4xbf16>,
    %c1 = arith.constant 1 : index
    %c1_21 = arith.constant 1 : index
    %c0_22 = arith.constant 0 : index
    %21 = vector.load %arg8[%c1, %c1_21, %c0_22] : memref<18x24x4xbf16, #tpu.memory_space<vmem>>, vector<16x16x4xbf16>
    tpu.vector_store %arg8[%c1, %c1_21, %c0_22], %13 {strides = array<i32>} : memref<18x24x4xbf16, #tpu.memory_space<vmem>>, vector<16x16x4xbf16>,
    %c0_23 = arith.constant 0 : index
    %c0_24 = arith.constant 0 : index
    %c0_25 = arith.constant 0 : index
    %22 = vector.load %arg8[%c0_23, %c0_24, %c0_25] : memref<18x24x4xbf16, #tpu.memory_space<vmem>>, vector<16x16x4xbf16>
    %23 = vector.shape_cast %22 : vector<16x16x4xbf16> to vector<256x4xbf16>
    %c0_26 = arith.constant 0 : index
    %c1_27 = arith.constant 1 : index
    %c0_28 = arith.constant 0 : index
    %24 = vector.load %arg8[%c0_26, %c1_27, %c0_28] : memref<18x24x4xbf16, #tpu.memory_space<vmem>>, vector<16x16x4xbf16>
    %25 = vector.shape_cast %24 : vector<16x16x4xbf16> to vector<256x4xbf16>
    %c0_29 = arith.constant 0 : index
    %c2 = arith.constant 2 : index
    %c0_30 = arith.constant 0 : index
    %26 = vector.load %arg8[%c0_29, %c2, %c0_30] : memref<18x24x4xbf16, #tpu.memory_space<vmem>>, vector<16x16x4xbf16>
    %27 = vector.shape_cast %26 : vector<16x16x4xbf16> to vector<256x4xbf16>
    %c1_31 = arith.constant 1 : index
    %c0_32 = arith.constant 0 : index
    %c0_33 = arith.constant 0 : index
    %28 = vector.load %arg8[%c1_31, %c0_32, %c0_33] : memref<18x24x4xbf16, #tpu.memory_space<vmem>>, vector<16x16x4xbf16>
    %29 = vector.shape_cast %28 : vector<16x16x4xbf16> to vector<256x4xbf16>
    %c1_34 = arith.constant 1 : index
    %c1_35 = arith.constant 1 : index
    %c0_36 = arith.constant 0 : index
    %30 = vector.load %arg8[%c1_34, %c1_35, %c0_36] : memref<18x24x4xbf16, #tpu.memory_space<vmem>>, vector<16x16x4xbf16>
    %31 = vector.shape_cast %30 : vector<16x16x4xbf16> to vector<256x4xbf16>
    %c1_37 = arith.constant 1 : index
    %c2_38 = arith.constant 2 : index
    %c0_39 = arith.constant 0 : index
    %32 = vector.load %arg8[%c1_37, %c2_38, %c0_39] : memref<18x24x4xbf16, #tpu.memory_space<vmem>>, vector<16x16x4xbf16>
    %33 = vector.shape_cast %32 : vector<16x16x4xbf16> to vector<256x4xbf16>
    %c2_40 = arith.constant 2 : index
    %c0_41 = arith.constant 0 : index
    %c0_42 = arith.constant 0 : index
    %34 = vector.load %arg8[%c2_40, %c0_41, %c0_42] : memref<18x24x4xbf16, #tpu.memory_space<vmem>>, vector<16x16x4xbf16>
    %35 = vector.shape_cast %34 : vector<16x16x4xbf16> to vector<256x4xbf16>
    %c2_43 = arith.constant 2 : index
    %c1_44 = arith.constant 1 : index
    %c0_45 = arith.constant 0 : index
    %36 = vector.load %arg8[%c2_43, %c1_44, %c0_45] : memref<18x24x4xbf16, #tpu.memory_space<vmem>>, vector<16x16x4xbf16>
    %37 = vector.shape_cast %36 : vector<16x16x4xbf16> to vector<256x4xbf16>
    %c2_46 = arith.constant 2 : index
    %c2_47 = arith.constant 2 : index
    %c0_48 = arith.constant 0 : index
    %38 = vector.load %arg8[%c2_46, %c2_47, %c0_48] : memref<18x24x4xbf16, #tpu.memory_space<vmem>>, vector<16x16x4xbf16>
    %39 = vector.shape_cast %38 : vector<16x16x4xbf16> to vector<256x4xbf16>
    %40 = tpu.concatenate %23, %25, %27, %29, %31, %33, %35, %37, %39 in 1 : vector<256x4xbf16>, vector<256x4xbf16>, vector<256x4xbf16>, vector<256x4xbf16>, vector<256x4xbf16>, vector<256x4xbf16>, vector<256x4xbf16>, vector<256x4xbf16>, vector<256x4xbf16> -> vector<256x36xbf16>
    %c0_49 = arith.constant 0 : index
    %c0_50 = arith.constant 0 : index
    %41 = vector.load %arg4[%c0_49, %c0_50] : memref<36x4xbf16, #tpu.memory_space<vmem>>, vector<36x4xbf16>
    %cst_51 = arith.constant dense<0.000000e+00> : vector<256x4xf32>
    %42 = tpu.matmul %40, %41, %cst_51 {dimension_numbers = #tpu.dot_dimension_numbers<[1], [0], [0], [1], [0, 0, 1, 1], [], []>} : vector<256x36xbf16>, vector<36x4xbf16>, vector<256x4xf32> -> vector<256x4xf32>
    %43 = vector.shape_cast %42 : vector<256x4xf32> to vector<16x16x4xf32>
    %44 = arith.truncf %43 : vector<16x16x4xf32> to vector<16x16x4xbf16>
    %c0_52 = arith.constant 0 : index
    %c0_53 = arith.constant 0 : index
    %c0_54 = arith.constant 0 : index
    %c0_55 = arith.constant 0 : index
    %45 = vector.load %arg5[%c0_52, %c0_53, %c0_54, %c0_55] : memref<1x16x16x4xbf16, #tpu.memory_space<vmem>>, vector<1x16x16x4xbf16>
    %46 = vector.shape_cast %45 : vector<1x16x16x4xbf16> to vector<16x16x4xbf16>
    %47 = vector.shape_cast %44 : vector<16x16x4xbf16> to vector<1x16x16x4xbf16>
    tpu.vector_store %arg5[%c0_52, %c0_53, %c0_54, %c0_55], %47 {strides = array<i32>} : memref<1x16x16x4xbf16, #tpu.memory_space<vmem>>, vector<1x16x16x4xbf16>,
    %cst_56 = arith.constant dense<0.000000e+00> : vector<4xf32>
    %48 = vector.multi_reduction <add>, %42, %cst_56 [0] : vector<256x4xf32> to vector<4xf32>
    %49 = vector.shape_cast %48 : vector<4xf32> to vector<1x4xf32>
    %c0_57 = arith.constant 0 : index
    %c0_58 = arith.constant 0 : index
    %c0_59 = arith.constant 0 : index
    %50 = vector.load %arg6[%c0_57, %c0_58, %c0_59] : memref<1x1x4xf32, #tpu.memory_space<vmem>>, vector<1x1x4xf32>
    %51 = vector.shape_cast %50 : vector<1x1x4xf32> to vector<1x4xf32>
    %52 = vector.shape_cast %49 : vector<1x4xf32> to vector<1x1x4xf32>
    tpu.vector_store %arg6[%c0_57, %c0_58, %c0_59], %52 {strides = array<i32>} : memref<1x1x4xf32, #tpu.memory_space<vmem>>, vector<1x1x4xf32>,
    %53 = arith.mulf %42, %42 : vector<256x4xf32>
    %cst_60 = arith.constant dense<0.000000e+00> : vector<4xf32>
    %54 = vector.multi_reduction <add>, %53, %cst_60 [0] : vector<256x4xf32> to vector<4xf32>
    %55 = vector.shape_cast %54 : vector<4xf32> to vector<1x4xf32>
    %c0_61 = arith.constant 0 : index
    %c0_62 = arith.constant 0 : index
    %c0_63 = arith.constant 0 : index
    %56 = vector.load %arg7[%c0_61, %c0_62, %c0_63] : memref<1x1x4xf32, #tpu.memory_space<vmem>>, vector<1x1x4xf32>
    %57 = vector.shape_cast %56 : vector<1x1x4xf32> to vector<1x4xf32>
    %58 = vector.shape_cast %55 : vector<1x4xf32> to vector<1x1x4xf32>
    tpu.vector_store %arg7[%c0_61, %c0_62, %c0_63], %58 {strides = array<i32>} : memref<1x1x4xf32, #tpu.memory_space<vmem>>, vector<1x1x4xf32>,
    return
  }
  func.func @transform_0(%arg0: i32) -> (i32, i32, i32, i32) {
    %c0_i32 = arith.constant 0 : i32
    %c0_i32_0 = arith.constant 0 : i32
    %c0_i32_1 = arith.constant 0 : i32
    %c0_i32_2 = arith.constant 0 : i32
    return %arg0, %c0_i32, %c0_i32_0, %c0_i32_1 : i32, i32, i32, i32
  }
  func.func @transform_1(%arg0: i32) -> (i32, i32) {
    %c0_i32 = arith.constant 0 : i32
    %c0_i32_0 = arith.constant 0 : i32
    %c0_i32_1 = arith.constant 0 : i32
    return %c0_i32, %c0_i32_0 : i32, i32
  }
  func.func @transform_2(%arg0: i32) -> (i32, i32) {
    %c0_i32 = arith.constant 0 : i32
    %c0_i32_0 = arith.constant 0 : i32
    %c0_i32_1 = arith.constant 0 : i32
    return %c0_i32, %c0_i32_0 : i32, i32
  }
  func.func @transform_3(%arg0: i32) -> (i32, i32) {
    %c0_i32 = arith.constant 0 : i32
    %c0_i32_0 = arith.constant 0 : i32
    %c0_i32_1 = arith.constant 0 : i32
    return %c0_i32, %c0_i32_0 : i32, i32
  }
  func.func @transform_4(%arg0: i32) -> (i32, i32, i32, i32) {
    %c0_i32 = arith.constant 0 : i32
    %c0_i32_0 = arith.constant 0 : i32
    %c0_i32_1 = arith.constant 0 : i32
    %c0_i32_2 = arith.constant 0 : i32
    return %arg0, %c0_i32, %c0_i32_0, %c0_i32_1 : i32, i32, i32, i32
  }
  func.func @transform_5(%arg0: i32) -> (i32, i32, i32) {
    %c0_i32 = arith.constant 0 : i32
    %c0_i32_0 = arith.constant 0 : i32
    %c0_i32_1 = arith.constant 0 : i32
    return %arg0, %c0_i32, %c0_i32_0 : i32, i32, i32
  }
  func.func @transform_6(%arg0: i32) -> (i32, i32, i32) {
    %c0_i32 = arith.constant 0 : i32
    %c0_i32_0 = arith.constant 0 : i32
    %c0_i32_1 = arith.constant 0 : i32
    return %arg0, %c0_i32, %c0_i32_0 : i32, i32, i32
  }
}

module attributes {stable_mosaic.version = 11 : i64} {
  func.func @_epilogue_id_kernel(%arg0: i32, %arg1: memref<32x64xbf16, #tpu.memory_space<vmem>>, %arg2: memref<1x64xf32, #tpu.memory_space<vmem>>, %arg3: memref<1x64xf32, #tpu.memory_space<vmem>>, %arg4: memref<32x64xbf16, #tpu.memory_space<vmem>>, %arg5: memref<32x64xbf16, #tpu.memory_space<vmem>>) attributes {dimension_semantics = [#tpu.dimension_semantics<parallel>], iteration_bounds = array<i64: 1>, scalar_prefetch = 0 : i64, scratch_operands = 0 : i64, tpu.core_type = #tpu.core_type<tc>, window_params = [{transform_indices = @transform_0, window_bounds = array<i64: 32, 64>}, {pipeline_mode = #tpu.pipeline_mode<synchronous>, transform_indices = @transform_1, window_bounds = array<i64: 1, 64>}, {pipeline_mode = #tpu.pipeline_mode<synchronous>, transform_indices = @transform_2, window_bounds = array<i64: 1, 64>}, {transform_indices = @transform_3, window_bounds = array<i64: 32, 64>}, {transform_indices = @transform_4, window_bounds = array<i64: 32, 64>}]} {
    %c0 = arith.constant 0 : index
    %c0_0 = arith.constant 0 : index
    %0 = vector.load %arg1[%c0, %c0_0] : memref<32x64xbf16, #tpu.memory_space<vmem>>, vector<32x64xbf16>
    %1 = arith.extf %0 : vector<32x64xbf16> to vector<32x64xf32>
    %c0_1 = arith.constant 0 : index
    %c0_2 = arith.constant 0 : index
    %2 = vector.load %arg2[%c0_1, %c0_2] : memref<1x64xf32, #tpu.memory_space<vmem>>, vector<1x64xf32>
    %3 = vector.broadcast %2 : vector<1x64xf32> to vector<32x64xf32>
    %4 = arith.mulf %1, %3 : vector<32x64xf32>
    %c0_3 = arith.constant 0 : index
    %c0_4 = arith.constant 0 : index
    %5 = vector.load %arg3[%c0_3, %c0_4] : memref<1x64xf32, #tpu.memory_space<vmem>>, vector<1x64xf32>
    %6 = vector.broadcast %5 : vector<1x64xf32> to vector<32x64xf32>
    %7 = arith.addf %4, %6 : vector<32x64xf32>
    %c0_5 = arith.constant 0 : index
    %c0_6 = arith.constant 0 : index
    %8 = vector.load %arg4[%c0_5, %c0_6] : memref<32x64xbf16, #tpu.memory_space<vmem>>, vector<32x64xbf16>
    %9 = arith.extf %8 : vector<32x64xbf16> to vector<32x64xf32>
    %10 = arith.addf %7, %9 : vector<32x64xf32>
    %cst = arith.constant 0.000000e+00 : f32
    %11 = vector.broadcast %cst : f32 to vector<32x64xf32>
    %12 = arith.maximumf %10, %11 : vector<32x64xf32>
    %13 = arith.truncf %12 : vector<32x64xf32> to vector<32x64xbf16>
    %c0_7 = arith.constant 0 : index
    %c0_8 = arith.constant 0 : index
    %14 = vector.load %arg5[%c0_7, %c0_8] : memref<32x64xbf16, #tpu.memory_space<vmem>>, vector<32x64xbf16>
    tpu.vector_store %arg5[%c0_7, %c0_8], %13 {strides = array<i32>} : memref<32x64xbf16, #tpu.memory_space<vmem>>, vector<32x64xbf16>,
    return
  }
  func.func @transform_0(%arg0: i32) -> (i32, i32) {
    %c0_i32 = arith.constant 0 : i32
    %c0_i32_0 = arith.constant 0 : i32
    return %arg0, %c0_i32 : i32, i32
  }
  func.func @transform_1(%arg0: i32) -> (i32, i32) {
    %c0_i32 = arith.constant 0 : i32
    %c0_i32_0 = arith.constant 0 : i32
    %c0_i32_1 = arith.constant 0 : i32
    return %c0_i32, %c0_i32_0 : i32, i32
  }
  func.func @transform_2(%arg0: i32) -> (i32, i32) {
    %c0_i32 = arith.constant 0 : i32
    %c0_i32_0 = arith.constant 0 : i32
    %c0_i32_1 = arith.constant 0 : i32
    return %c0_i32, %c0_i32_0 : i32, i32
  }
  func.func @transform_3(%arg0: i32) -> (i32, i32) {
    %c0_i32 = arith.constant 0 : i32
    %c0_i32_0 = arith.constant 0 : i32
    return %arg0, %c0_i32 : i32, i32
  }
  func.func @transform_4(%arg0: i32) -> (i32, i32) {
    %c0_i32 = arith.constant 0 : i32
    %c0_i32_0 = arith.constant 0 : i32
    return %arg0, %c0_i32 : i32, i32
  }
}

</mosaic_0001>

<bundles_post_ra>
// kernel: basic_block_forward.5
= control target key start
LH: loop header
LB: loop body
LE: loop exit
PB: predicated region body
PF: predicated region fallthrough
CT: control target
= control target key end

     0   :  { %vm79_vm0 = vcmask 519168   ;;  %s171_s0 = inlined_call_operand.vmem [shape: bf16[32,64], index: 0, kind: input, shape index: {}]   ;;  %s172_s1 = inlined_call_operand.vmem [shape: f32[1,64], index: 1, kind: input, shape index: {}]   ;;  %s173_s2 = inlined_call_operand.vmem [shape: f32[1,64], index: 2, kind: input, shape index: {}]   ;;  %s174_s3 = inlined_call_operand.vmem [shape: bf16[32,64], index: 3, kind: input, shape index: {}]   ;;  %s175_s4 = inlined_call_operand.vmem [shape: bf16[32,64], index: 4, kind: output, shape index: {}]  }
   0x1   :  { %v99_v0 = vld [vmem:[%s171_s0] sm:$0xff]   ;;  %v114_v5 = vld [vmem:[%s171_s0 + $0x8] sm:$0xff]  }
   0x2   :  { %v88_v1 = vld [vmem:[%s172_s1] ss:$0 sm:$0xff]  ;;  %v100_v2 = vunpack.c.l.bf16 %v99_v0  ;;  %v101_v4 = vunpack.c.h.bf16 %v99_v0  ;;  %v115_v6 = vld [vmem:[%s174_s3 + $0x8] sm:$0xff]   ;;  %v104_v9 = vunpack.c.l.bf16 %v114_v5  ;;  %v105_v13 = vunpack.c.h.bf16 %v114_v5 }
   0x3   :  { %v107_v3 = vld [vmem:[%s174_s3] sm:$0xff]   ;;  %v112_v15 = vunpack.c.l.bf16 %v115_v6  ;;  %v113_v19 = vunpack.c.h.bf16 %v115_v6 }
   0x4   :  { %v89_v7 = vld [vmem:[%s173_s2] ss:$0 sm:$0xff]  ;;  %v108_v8 = vunpack.c.l.bf16 %v107_v3  ;;  %v32_v10 = vmul.f32 %v100_v2, %v88_v1  ;;  %v33_v11 = vmul.f32 %v101_v4, %v88_v1  ;;  %v109_v12 = vunpack.c.h.bf16 %v107_v3 }
   0x5   :  { %v34_v14 = vmul.f32 %v104_v9, %v88_v1  ;;  %v35_v18 = vmul.f32 %v105_v13, %v88_v1 }
   0x6   :  { %v43_v16 = vadd.f32 %v89_v7, %v32_v10  ;;  %v44_v17 = vadd.f32 %v89_v7, %v33_v11 }
   0x7   :  { %v45_v20 = vadd.f32 %v89_v7, %v34_v14  ;;  %v46_v23 = vadd.f32 %v89_v7, %v35_v18 }
   0x8   :  { %v55_v21 = vadd.f32 %v108_v8, %v43_v16  ;;  %v56_v22 = vadd.f32 %v109_v12, %v44_v17 }
   0x9   :  { %v57_v24 = vadd.f32 %v112_v15, %v45_v20  ;;  %v58_v27 = vadd.f32 %v113_v19, %v46_v23 }
   0xa   :  { %v59_v25 = vmax.f32 %v55_v21, 0.0  ;;  %v60_v26 = vmax.f32 %v56_v22, 0.0 }
   0xb   :  { %v61_v28 = vmax.f32 %v57_v24, 0.0  ;;  %v62_v31 = vmax.f32 %v58_v27, 0.0 }
   0xc   :  { %v94_v29 = vpack.c.bf16 %v59_v25, %v59_v25  ;;  %v95_v30 = vpack.c.bf16 %v60_v26, %v60_v26 }
   0xd   :  { %v96_v32 = vpack.c.bf16 %v61_v28, %v61_v28  ;;  %v97_v33 = vpack.c.bf16 %v62_v31, %v62_v31 }
   0xe   :  { %80 = vst.msk [vmem:[%s175_s4] sm:$0xf] %vm79_vm0, %v94_v29  ;;  %81 = vst.msk [vmem:[%s175_s4 + $0x4] sm:$0xf] %vm79_vm0, %v95_v30 }
   0xf   :  { %82 = vst.msk [vmem:[%s175_s4 + $0x8] sm:$0xf] %vm79_vm0, %v96_v32  ;;  %83 = vst.msk [vmem:[%s175_s4 + $0xc] sm:$0xf] %vm79_vm0, %v97_v33 }

// kernel: basic_block_forward.3
= control target key start
LH: loop header
LB: loop body
LE: loop exit
PB: predicated region body
PF: predicated region fallthrough
CT: control target
= control target key end

     0   :  { %s2553_s15 = smov 0   ;;  %s3606_s0 = inlined_call_operand.vmem [shape: bf16[2,18,18,4], index: 0, kind: input, shape index: {}]   ;;  %s3607_s1 = inlined_call_operand.vmem [shape: bf16[36,4], index: 1, kind: input, shape index: {}]   ;;  %s3608_s2 = inlined_call_operand.vmem [shape: bf16[2,16,16,4], index: 2, kind: output, shape index: {0}]   ;;  %s3609_s3 = inlined_call_operand.vmem [shape: f32[2,1,4], index: 3, kind: output, shape index: {1}]   ;;  %s3610_s4 = inlined_call_operand.vmem [shape: f32[2,1,4], index: 4, kind: output, shape index: {2}]  }
   0x1 LB: > { %s2243_s16 = sadd.s32 4294967295, %s2518_s15   ;;  %p2247_p0 = scmp.ge.s32.totalorder %s2518_s15, 1  ;;  %s2518_s15 = sphi %s2553_s15, %s15_s15  }
   0x2   : > { %p167_p1 = scmp.lt.s32.totalorder %s2518_s15, 3 }
   0x4   : > { %p168_p2 = pnand %p2247_p0, %p167_p1 }
   0x5   : > { %p199_p3 = scmp.lt.s32.totalorder (!%p168_p2), %s2243_s16, 1  ;;  %s2520_s21 = smov (!%p168_p2), 12  }
   0x6   : > { %171 = sbr.rel (%p168_p2) target bundleno = 615 (0x267), region = 28  ;;  %s2521_s22 = smov (!%p168_p2), 20  }
   0x7   : > { %s2522_s23 = smov (!%p168_p2), 8   ;;  %s2523_s24 = smov (!%p168_p2), 4  }
   0x8   : > { %s2524_s25 = smov (!%p168_p2), 16   ;;  %s2525_s26 = smov (!%p168_p2), 24  }
   0x9   : > { %s2526_s27 = smov (!%p168_p2), 28   ;;  %s2527_s28 = smov (!%p168_p2), 32  }
   0xb   : > { %s3616_s16 = smov (!%p199_p3, %s2243_s16), 1  ;;  %vm705_vm0 = vcmask 1042432   ;;  %vm706_vm1 = vcmask 1046532   ;;  %vm270_vm2 = vsmask.f32 3328  ;;  %vm1639_vm6 = vcmask 1041408  }
   0xc   : > { %s2474_s17 = smul.u32 216, %s3616_s16  ;;  %vm271_vm3 = vsmask.f32 7440  ;;  %vm2589_vm4 = vmor %vm705_vm0, %vm706_vm1  ;;  %vm1306_vm7 = vcmask 31744   ;;  %vm1355_vm8 = vcmask 64512   ;;  %vm1388_vm9 = vcmask 97280  }
   0xd   : > { %vm2624_vm5 = vmor %vm270_vm2, %vm271_vm3  ;;  %vm1421_vm10 = vcmask 130048   ;;  %vm1454_vm11 = vcmask 162816   ;;  %vm1487_vm12 = vcmask 195584   ;;  %vm1520_vm13 = vcmask 228352   ;;  %s2376_s9 = sshll.u32 %s3616_s16, 7 }
   0xe   : > { %s2567_s20 = scalar_lea.vmem %s3606_s0, %s2474_s17  ;;  %vm1553_vm14 = vcmask 261120   ;;  %vm1606_vm15 = vcmask 293888   ;;  %s3444_s12 = scalar_lea.vmem %s3608_s2, %s2376_s9  ;;  %vm1932_vm0 = vcmask 27648   ;;  %vm2034_vm1 = vcmask 24576  }
   0xf   : > { %v2570_v0 = vld [vmem:[%s2567_s20 + $0x18] sm:$0xf]  ;;  %v2573_v1 = vld [vmem:[%s2567_s20 + $0x1c] sm:$0xf]  ;;  %v219_v2 = vld [vmem:[%s2567_s20 + $0xc] sm:$0xf]  ;;  %s211_s17 = scalar_lea.vmem %s3609_s3, %s3616_s16 }
  0x10   : > { %v335_v3 = vshrl.u32 %v2573_v1, 16  ;;  %v2579_v4 = vcombine.low %v2570_v0, %v2573_v1  ;;  %v322_v5 = vshrl.u32 %v2570_v0, 16  ;;  %v325_v6 = vshll.u32 %v2570_v0, 16  ;;  %v220_v7 = vld [vmem:[%s2567_s20 + $0x10] sm:$0xf] }
  0x11   : > { %v307_v8 = vshll.u32 %v220_v7, 16  ;;  %v311_v9 = vshrl.u32 %v220_v7, 16  ;;  %v2584_v10 = vcombine.low %v219_v2, %v220_v7  ;;  %v298_v11 = vshrl.u32 %v219_v2, 16  ;;  %v221_v12 = vld [vmem:[%s2567_s20 + $0x14] sm:$0x1] }
  0x12   : > { %1101 = vrot.lane.b32.xlu1 %v2579_v4, %s2520_s21  ;;  %v301_v14 = vshll.u32 %v219_v2, 16  ;;  %v2252_v15 = vrot.slane %v219_v2, 9  ;;  %v717_v16 = vrot.slane %v220_v7, 5  ;;  %v720_v17 = vrot.slane %v221_v12, 5  ;;  %v2596_v18 = vld [vmem:[%s2567_s20] sm:$0xf] }
  0x13   : > { %v313_v19 = vrot.slane %v311_v9, 4  ;;  %1099 = vrot.lane.b32.xlu0 %v2584_v10, %s2520_s21  ;;  %v300_v20 = vrot.slane %v298_v11, 4  ;;  %v2601_v21 = vld [vmem:[%s2567_s20 + $0x4] sm:$0xf]  ;;  %v218_v22 = vld [vmem:[%s2567_s20 + $0x8] sm:$0x1] }
  0x14   : > { %v303_v23 = vrot.slane %v301_v14, 5  ;;  %v718_v24 = vsel %vm2589_vm4, %v2252_v15, %v717_v16  ;;  %v719_v25 = vrot.slane %v717_v16, 4  ;;  %v2251_v26 = vrot.slane %v2596_v18, 9  ;;  %v224_v35 = vld [vmem:[%s2567_s20 + $0x20] sm:$0x1] }
  0x15   : > { %v710_v27 = vrot.slane %v2601_v21, 5  ;;  %v713_v28 = vrot.slane %v218_v22, 5  ;;  %v274_v29 = vshrl.u32 %v2596_v18, 16  ;;  %v277_v30 = vshll.u32 %v2596_v18, 16  ;;  %v2638_v7 = vld [vmem:[%s2567_s20 + $0x24] sm:$0xf] }
  0x16   : > { %v721_v31 = vsel %vm2589_vm4, %v719_v25, %v720_v17  ;;  %v283_v32 = vshll.u32 %v2601_v21, 16  ;;  %v287_v33 = vshrl.u32 %v2601_v21, 16  ;;  %v293_v34 = vshll.u32 %v218_v22, 16 }
  0x17   : > { %v2302_v36 = vcombine.low %v718_v24, %v721_v31  ;;  %v711_v37 = vsel %vm2589_vm4, %v2251_v26, %v710_v27  ;;  %v712_v38 = vrot.slane %v710_v27, 4  ;;  %v276_v39 = vrot.slane %v274_v29, 4  ;;  %v227_v26 = vld [vmem:[%s2567_s20 + $0x2c] sm:$0x1] }
  0x18   : > { %v279_v40 = vrot.slane %v277_v30, 5  ;;  %v285_v41 = vrot.slane %v283_v32, 5  ;;  %v289_v42 = vrot.slane %v287_v33, 4  ;;  %v295_v43 = vrot.slane %v293_v34, 5 }
  0x19   : > { %1169 = vrot.lane.b32.xlu0 %v2302_v36, %s2521_s22  ;;  %v714_v44 = vsel %vm2589_vm4, %v712_v38, %v713_v28  ;;  %v2253_v45 = vrot.slane %v2570_v0, 9  ;;  %v724_v46 = vrot.slane %v2573_v1, 5  ;;  %v727_v47 = vrot.slane %v224_v35, 5 }
  0x1a   : > { %v2301_v48 = vcombine.low %v711_v37, %v714_v44  ;;  %v280_v49 = vor.u32 %v279_v40, %v276_v39  ;;  %v290_v50 = vor.u32 %v289_v42, %v285_v41  ;;  %v304_v51 = vor.u32 %v303_v23, %v300_v20 }
  0x1b   : > { %v725_v53 = vsel %vm2589_vm4, %v2253_v45, %v724_v46  ;;  %v726_v54 = vrot.slane %v724_v46, 4  ;;  %v309_v55 = vrot.slane %v307_v8, 5  ;;  %v317_v56 = vshll.u32 %v221_v12, 16  ;;  %v226_v12 = vld [vmem:[%s2567_s20 + $0x28] sm:$0xf] }
  0x1c   : > { %1064 = vrot.lane.b32.xlu1 %v2301_v48, %s2522_s23  ;;  %v281_v57 = vrot.slane %v280_v49, 4  ;;  %v291_v58 = vrot.slane %v290_v50, 4  ;;  %v305_v59 = vrot.slane %v304_v51, 4  ;;  %v324_v60 = vrot.slane %v322_v5, 4  ;;  %v229_v48 = vld [vmem:[%s2567_s20 + $0x34] sm:$0xf] }
  0x1d   : > { %v728_v61 = vsel %vm2589_vm4, %v726_v54, %v727_v47  ;;  %v314_v62 = vor.u32 %v313_v19, %v309_v55  ;;  %v319_v63 = vrot.slane %v317_v56, 5  ;;  %v327_v2 = vrot.slane %v325_v6, 5  ;;  %v228_v47 = vld [vmem:[%s2567_s20 + $0x30] sm:$0xf] }
  0x1e   : > { %v286_v8 = vsel %vm2624_vm5, %v281_v57, %v285_v41  ;;  %v296_v9 = vsel %vm2624_vm5, %v291_v58, %v295_v43  ;;  %v2644_v11 = vcombine.low %v725_v53, %v728_v61  ;;  %v310_v5 = vsel %vm2624_vm5, %v305_v59, %v309_v55 }
  0x1f   : > { %v2285_v14 = vcombine.low %v286_v8, %v296_v9  ;;  %v315_v15 = vrot.slane %v314_v62, 4  ;;  %v328_v16 = vor.u32 %v327_v2, %v324_v60  ;;  %v331_v0 = vshll.u32 %v2573_v1, 16  ;;  %v230_v60 = vld [vmem:[%s2567_s20 + $0x38] sm:$0x1] }
  0x20   : > { %1066 = vrot.lane.b32.xlu1 %v2302_v36, %s2522_s23  ;;  %v337_v6 = vrot.slane %v335_v3, 4  ;;  %v341_v17 = vshll.u32 %v224_v35, 16  ;;  %v346_v19 = vshrl.u32 %v2638_v7, 16  ;;  %v349_v20 = vshll.u32 %v2638_v7, 16 }
  0x21   : > { %984 = vrot.lane.b32.xlu0 %v2285_v14, %s2523_s24  ;;  %v320_v22 = vsel %vm2624_vm5, %v315_v15, %v319_v63  ;;  %v329_v23 = vrot.slane %v328_v16, 4  ;;  %v333_v24 = vrot.slane %v331_v0, 5  ;;  %v359_v25 = vshrl.u32 %v226_v12, 16  ;;  %v2696_v14 = vld [vmem:[%s2567_s20 + $0x40] sm:$0xf] }
  0x22   : > { %v2286_v27 = vcombine.low %v310_v5, %v320_v22  ;;  %v348_v28 = vrot.slane %v346_v19, 4  ;;  %v343_v1 = vrot.slane %v341_v17, 5  ;;  %v351_v3 = vrot.slane %v349_v20, 5 }
  0x23   : > { %v338_v29 = vor.u32 %v337_v6, %v333_v24  ;;  %v355_v30 = vshll.u32 %v226_v12, 16  ;;  %v361_v31 = vrot.slane %v359_v25, 4  ;;  %v365_v32 = vshll.u32 %v227_v26, 16 }
  0x24   : > { %1171 = vrot.lane.b32.xlu1 %v2644_v11, %s2521_s22  ;;  %v334_v33 = vsel %vm2624_vm5, %v329_v23, %v333_v24  ;;  %v352_v35 = vor.u32 %v351_v3, %v348_v28  ;;  %v2669_v43 = vcombine.low %v2638_v7, %v226_v12  ;;  %v731_v44 = vrot.slane %v226_v12, 5  ;;  %v2693_v12 = vld [vmem:[%s2567_s20 + $0x3c] sm:$0xf] }
  0x25   : > { %986 = vrot.lane.b32.xlu0 %v2286_v27, %s2523_s24  ;;  %v339_v34 = vrot.slane %v338_v29, 4  ;;  %v357_v36 = vrot.slane %v355_v30, 5  ;;  %v367_v40 = vrot.slane %v365_v32, 5  ;;  %v2254_v50 = vrot.slane %v2638_v7, 9 }
  0x26   : > { %v353_v38 = vrot.slane %v352_v35, 4  ;;  %v733_v51 = vrot.slane %v731_v44, 4  ;;  %v734_v53 = vrot.slane %v227_v26, 5  ;;  %v370_v54 = vshrl.u32 %v228_v47, 16 }
  0x27   : > { %v344_v37 = vsel %vm2624_vm5, %v339_v34, %v343_v1  ;;  %v362_v39 = vor.u32 %v361_v31, %v357_v36  ;;  %v373_v55 = vshll.u32 %v228_v47, 16  ;;  %v383_v56 = vshrl.u32 %v229_v48, 16  ;;  %v233_v31 = vld [vmem:[%s2567_s20 + $0x44] sm:$0x1] }
  0x28   : > { %v2287_v41 = vcombine.low %v334_v33, %v344_v37  ;;  %v358_v45 = vsel %vm2624_vm5, %v353_v38, %v357_v36  ;;  %v379_v57 = vshll.u32 %v229_v48, 16  ;;  %v732_v58 = vsel %vm2589_vm4, %v2254_v50, %v731_v44 }
  0x29   : > { %1134 = vrot.lane.b32.xlu0 %v2286_v27, %s2524_s25  ;;  %v363_v42 = vrot.slane %v362_v39, 4  ;;  %v735_v59 = vsel %vm2589_vm4, %v733_v51, %v734_v53  ;;  %v372_v61 = vrot.slane %v370_v54, 4  ;;  %v375_v62 = vrot.slane %v373_v55, 5 }
  0x2a   : > { %1136 = vrot.lane.b32.xlu1 %v2287_v41, %s2524_s25  ;;  %v381_v63 = vrot.slane %v379_v57, 5  ;;  %v385_v2 = vrot.slane %v383_v56, 4  ;;  %v2304_v7 = vcombine.low %v732_v58, %v735_v59  ;;  %v389_v8 = vshll.u32 %v230_v60, 16  ;;  %v2503_v59 = vld [vmem:[%s3607_s1 + $0x8] sm:$0xff]  }
  0x2b   : > { %v368_v46 = vsel %vm2624_vm5, %v363_v42, %v367_v40  ;;  %v376_v9 = vor.u32 %v375_v62, %v372_v61  ;;  %v738_v16 = vrot.slane %v229_v48, 5  ;;  %v394_v0 = vshrl.u32 %v2693_v12, 16 }
  0x2c   : > { %v2288_v49 = vcombine.low %v358_v45, %v368_v46  ;;  %v386_v5 = vor.u32 %v385_v2, %v381_v63  ;;  %v391_v15 = vrot.slane %v389_v8, 5  ;;  %v397_v6 = vshll.u32 %v2693_v12, 16 }
  0x2d   : > { %1204 = vrot.lane.b32.xlu0 %v2579_v4, %s2525_s26  ;;  %v377_v17 = vrot.slane %v376_v9, 4  ;;  %v407_v20 = vshrl.u32 %v2696_v14, 16  ;;  %v403_v22 = vshll.u32 %v2696_v14, 16  ;;  %v2706_v23 = vcombine.low %v228_v47, %v229_v48  ;;  %v2744_v48 = vld [vmem:[%s2567_s20 + $0x4c] sm:$0xf] }
  0x2e   : > { %1206 = vrot.lane.b32.xlu1 %v2669_v43, %s2525_s26  ;;  %v387_v19 = vrot.slane %v386_v5, 4  ;;  %v2255_v24 = vrot.slane %v228_v47, 9  ;;  %v740_v25 = vrot.slane %v738_v16, 4  ;;  %v741_v26 = vrot.slane %v230_v60, 5  ;;  %v2741_v47 = vld [vmem:[%s2567_s20 + $0x48] sm:$0xf] }
  0x2f   : > { %v396_v27 = vrot.slane %v394_v0, 4  ;;  %v399_v28 = vrot.slane %v397_v6, 5  ;;  %v382_v29 = vsel %vm2624_vm5, %v377_v17, %v381_v63  ;;  %v405_v3 = vrot.slane %v403_v22, 5  ;;  %v236_v63 = vld [vmem:[%s2567_s20 + $0x50] sm:$0x1]  ;;  %v2504_v5 = vld [vmem:[%s3607_s1] sm:$0xff]  }
  0x30   : > { %v392_v1 = vsel %vm2624_vm5, %v387_v19, %v391_v15  ;;  %v409_v30 = vrot.slane %v407_v20, 4  ;;  %v739_v32 = vsel %vm2589_vm4, %v2255_v24, %v738_v16  ;;  %v742_v33 = vsel %vm2589_vm4, %v740_v25, %v741_v26  ;;  %v2778_v0 = vld [vmem:[%s2567_s20 + $0x54] sm:$0xf]  ;;  %v2781_v6 = vld [vmem:[%s2567_s20 + $0x58] sm:$0xf] }
  0x31   : > { %1239 = vrot.lane.b32.xlu0 %v2287_v41, %s2526_s27  ;;  %v400_v34 = vor.u32 %v399_v28, %v396_v27  ;;  %v413_v36 = vshll.u32 %v233_v31, 16  ;;  %v2724_v37 = vcombine.low %v739_v32, %v742_v33  ;;  %v745_v42 = vrot.slane %v2696_v14, 5 }
  0x32   : > { %1241 = vrot.lane.b32.xlu1 %v2288_v49, %s2526_s27  ;;  %v410_v35 = vor.u32 %v409_v30, %v405_v3  ;;  %v2269_v44 = vcombine.low %v2596_v18, %v2601_v21  ;;  %v2256_v50 = vrot.slane %v2693_v12, 9  ;;  %v748_v54 = vrot.slane %v233_v31, 5 }
  0x33   : > { %v401_v38 = vrot.slane %v400_v34, 4  ;;  %v415_v40 = vrot.slane %v413_v36, 5  ;;  %v747_v53 = vrot.slane %v745_v42, 4  ;;  %v418_v55 = vshrl.u32 %v2741_v47, 16 }
  0x34   : > { %v411_v39 = vrot.slane %v410_v35, 4  ;;  %v421_v56 = vshll.u32 %v2741_v47, 16  ;;  %v431_v57 = vshrl.u32 %v2744_v48, 16  ;;  %v427_v58 = vshll.u32 %v2744_v48, 16  ;;  %v239_v35 = vld [vmem:[%s2567_s20 + $0x5c] sm:$0x1] }
  0x35   : > { %1274 = vrot.lane.b32.xlu0 %v2644_v11, %s2527_s28  ;;  %v406_v45 = vsel %vm2624_vm5, %v401_v38, %v405_v3  ;;  %v746_v61 = vsel %vm2589_vm4, %v2256_v50, %v745_v42  ;;  %v749_v62 = vsel %vm2589_vm4, %v747_v53, %v748_v54  ;;  %v420_v2 = vrot.slane %v418_v55, 4  ;;  %v240_v54 = vld [vmem:[%s2567_s20 + $0x60] sm:$0xf]  ;;  %v241_v55 = vld [vmem:[%s2567_s20 + $0x64] sm:$0xf] }
  0x36   : > { %988 = vrot.lane.b32.xlu1 %v2287_v41, %s2523_s24  ;;  %v2731_v41 = vcombine.low %v2693_v12, %v2696_v14  ;;  %v416_v46 = vsel %vm2624_vm5, %v411_v39, %v415_v40  ;;  %v429_v8 = vrot.slane %v427_v58, 5  ;;  %v433_v9 = vrot.slane %v431_v57, 4 }
  0x37   : > { %v2754_v51 = vcombine.low %v406_v45, %v416_v46  ;;  %v2306_v12 = vcombine.low %v746_v61, %v749_v62  ;;  %v437_v14 = vshll.u32 %v236_v63, 16  ;;  %v752_v19 = vrot.slane %v2744_v48, 5 }
  0x38   : > { %v434_v16 = vor.u32 %v433_v9, %v429_v8  ;;  %v442_v20 = vshrl.u32 %v2778_v0, 16  ;;  %v445_v22 = vshll.u32 %v2778_v0, 16  ;;  %v455_v26 = vshrl.u32 %v2781_v6, 16 }
  0x39   : > { %1276 = vrot.lane.b32.xlu0 %v2304_v7, %s2527_s28  ;;  %v439_v17 = vrot.slane %v437_v14, 5  ;;  %v451_v27 = vshll.u32 %v2781_v6, 16  ;;  %v2795_v28 = vcombine.low %v2741_v47, %v2744_v48  ;;  %v755_v3 = vrot.slane %v236_v63, 5 }
  0x3a   : > { %990 = vrot.lane.b32.xlu1 %v2288_v49, %s2523_s24  ;;  %v435_v25 = vrot.slane %v434_v16, 4  ;;  %v444_v30 = vrot.slane %v442_v20, 4  ;;  %v447_v31 = vrot.slane %v445_v22, 5  ;;  %v457_v34 = vrot.slane %v455_v26, 4 }
  0x3b   : > { %v453_v33 = vrot.slane %v451_v27, 5  ;;  %v461_v42 = vshll.u32 %v239_v35, 16  ;;  %v759_v50 = vrot.slane %v2781_v6, 5  ;;  %v762_v57 = vrot.slane %v239_v35, 5 }
  0x3c   : > { %v440_v32 = vsel %vm2624_vm5, %v435_v25, %v439_v17  ;;  %v448_v39 = vor.u32 %v447_v31, %v444_v30  ;;  %v469_v61 = vshll.u32 %v240_v54, 16  ;;  %v479_v62 = vshrl.u32 %v241_v55, 16  ;;  %v2843_v17 = vld [vmem:[%s2567_s20 + $0x6c] sm:$0xf] }
  0x3d   : > { %1068 = vrot.lane.b32.xlu0 %v2644_v11, %s2522_s23  ;;  %v2289_v11 = vcombine.low %v382_v29, %v392_v1  ;;  %v2257_v29 = vrot.slane %v2741_v47, 9  ;;  %v754_v1 = vrot.slane %v752_v19, 4  ;;  %v458_v40 = vor.u32 %v457_v34, %v453_v33 }
  0x3e   : > { %1070 = vrot.lane.b32.xlu1 %v2304_v7, %s2522_s23  ;;  %v449_v46 = vrot.slane %v448_v39, 4  ;;  %v463_v48 = vrot.slane %v461_v42, 5  ;;  %v475_v63 = vshll.u32 %v241_v55, 16  ;;  %v471_v9 = vrot.slane %v469_v61, 5  ;;  %v2895_v61 = vld [vmem:[%s2567_s20 + $0x7c] sm:$0xf] }
  0x3f   : > { %v756_v38 = vsel %vm2589_vm4, %v754_v1, %v755_v3  ;;  %v459_v47 = vrot.slane %v458_v40, 4  ;;  %v481_v14 = vrot.slane %v479_v62, 4  ;;  %v490_v25 = vshrl.u32 %v2843_v17, 16 }
  0x40   : > { %v454_v53 = vsel %vm2624_vm5, %v449_v46, %v453_v33  ;;  %v493_v27 = vshll.u32 %v2843_v17, 16  ;;  %v2855_v3 = vcombine.low %v240_v54, %v241_v55  ;;  %v2259_v30 = vrot.slane %v240_v54, 9 }
  0x41   : > { %1103 = vrot.lane.b32.xlu0 %v2669_v43, %s2520_s21  ;;  %v492_v33 = vrot.slane %v490_v25, 4 }
  0x42   : > { %1105 = vrot.lane.b32.xlu1 %v2706_v23, %s2520_s21  ;;  %v495_v35 = vrot.slane %v493_v27, 5 }
  0x45   : > { %1138 = vrot.lane.b32.xlu0 %v2288_v49, %s2524_s25  ;;  %v2501_v49 = vld [vmem:[%s3607_s1 + $0x10] ss:$0 sps:$4 sm:$0x33]  }
  0x46   : > { %1140 = vrot.lane.b32.xlu1 %v2289_v11, %s2524_s25  ;;  %2472 = vmatprep.subr.msk.bf16.mxu0 %vm1639_vm6, %v2501_v49  ;;  %v1641_v60 = vsel %vm1639_vm6, %v2501_v49, 0 }
  0x47   : > { %2473 = vmatprep.subr.msk.bf16.mxu1 %vm1639_vm6, %v2501_v49  ;;  %2429 = vmatpush3.bf16.msra.mxu0 %v1641_v60  ;;  %v2819_v49 = vcombine.low %v2778_v0, %v2781_v6 }
  0x48   : > { %2430 = vmatprep.subr.bf16.mxu0 %v2503_v59  ;;  %2469 = vmatpush3.bf16.msra.mxu1 %v1641_v60  ;;  %v466_v60 = vshrl.u32 %v240_v54, 16 }
  0x49   : > { %1173 = vrot.lane.b32.xlu0 %v2304_v7, %s2521_s22  ;;  %v423_v7 = vrot.slane %v421_v56, 5  ;;  %2467 = vmatprep.subr.bf16.mxu1 %v2503_v59  ;;  %v2258_v56 = vrot.slane %v2778_v0, 9 }
  0x4a   : > { %1175 = vrot.lane.b32.xlu1 %v2724_v37, %s2521_s22 }
  0x4b   : > { %2431 = vmatpush3.bf16.msra.mxu0 %v2503_v59  ;;  %v424_v15 = vor.u32 %v423_v7, %v420_v2  ;;  %v760_v2 = vsel %vm2589_vm4, %v2258_v56, %v759_v50 }
  0x4c   : > { %2432 = vmatprep.subr.bf16.mxu0 %v2504_v5  ;;  %2470 = vmatpush3.bf16.msra.mxu1 %v2503_v59  ;;  %v761_v59 = vrot.slane %v759_v50, 4 }
  0x4d   : > { %1208 = vrot.lane.b32.xlu0 %v2706_v23, %s2525_s26  ;;  %2468 = vmatprep.subr.bf16.mxu1 %v2504_v5  ;;  %v425_v24 = vrot.slane %v424_v15, 4 }
  0x4e   : > { %1210 = vrot.lane.b32.xlu1 %v2731_v41, %s2525_s26  ;;  %v763_v7 = vsel %vm2589_vm4, %v761_v59, %v762_v57 }
  0x4f   : > { %2433 = vmatpush3.bf16.msra.mxu0 %v2504_v5  ;;  %v2308_v15 = vcombine.low %v760_v2, %v763_v7 }
  0x50   : > { %2471 = vmatpush3.bf16.msra.mxu1 %v2504_v5  ;;  %v242_v5 = vld [vmem:[%s2567_s20 + $0x68] sm:$0x1] }
  0x51   : > { %1243 = vrot.lane.b32.xlu0 %v2289_v11, %s2526_s27  ;;  %v485_v0 = vshll.u32 %v242_v5, 16 }
  0x52   : > { %1245 = vrot.lane.b32.xlu1 %v2754_v51, %s2526_s27 }
  0x53   : > { %v487_v22 = vrot.slane %v485_v0, 5 }
  0x55   : > { %1278 = vrot.lane.b32.xlu0 %v2724_v37, %s2527_s28 }
  0x56   : > { %992 = vrot.lane.b32.xlu1 %v2289_v11, %s2523_s24  ;;  %v430_v11 = vsel %vm2624_vm5, %v425_v24, %v429_v8  ;;  %v468_v8 = vrot.slane %v466_v60, 4  ;;  %v766_v24 = vrot.slane %v241_v55, 5  ;;  %v2892_v60 = vld [vmem:[%s2567_s20 + $0x78] sm:$0xf] }
  0x57   : > { %v2291_v36 = vcombine.low %v430_v11, %v440_v32  ;;  %v769_v32 = vrot.slane %v242_v5, 5  ;;  %v514_v5 = vshrl.u32 %v2892_v60, 16  ;;  %v2950_v18 = vcombine.low %v2892_v60, %v2895_v61 }
  0x58   : > { %v472_v16 = vor.u32 %v471_v9, %v468_v8  ;;  %v768_v11 = vrot.slane %v766_v24, 4  ;;  %v767_v40 = vsel %vm2589_vm4, %v2259_v30, %v766_v24  ;;  %v2261_v21 = vrot.slane %v2892_v60, 9 }
  0x59   : > { %1280 = vrot.lane.b32.xlu0 %v2306_v12, %s2527_s28 }
  0x5a   : > { %994 = vrot.lane.b32.xlu1 %v2754_v51, %s2523_s24  ;;  %v473_v20 = vrot.slane %v472_v16, 4  ;;  %v770_v42 = vsel %vm2589_vm4, %v768_v11, %v769_v32  ;;  %v2926_v11 = vld [vmem:[%s2567_s20 + $0x84] sm:$0xf]  ;;  %v2929_v32 = vld [vmem:[%s2567_s20 + $0x88] sm:$0xf] }
  0x5d   : > { %1072 = vrot.lane.b32.xlu0 %v2724_v37, %s2522_s23  ;;  %v753_v37 = vsel %vm2589_vm4, %v2257_v29, %v752_v19  ;;  %v2846_v19 = vld [vmem:[%s2567_s20 + $0x70] sm:$0xf] }
  0x5e   : > { %1074 = vrot.lane.b32.xlu1 %v2306_v12, %s2522_s23  ;;  %v2307_v45 = vcombine.low %v753_v37, %v756_v38  ;;  %v503_v29 = vshrl.u32 %v2846_v19, 16  ;;  %v499_v1 = vshll.u32 %v2846_v19, 16  ;;  %v245_v38 = vld [vmem:[%s2567_s20 + $0x74] sm:$0x1]  ;;  %v2884_v56 = vcombine.low %v2843_v17, %v2846_v19 }
  0x5f   : > { %v773_v57 = vrot.slane %v2846_v19, 5  ;;  %v776_v2 = vrot.slane %v245_v38, 5 }
  0x60   : > { %v505_v37 = vrot.slane %v503_v29, 4 }
  0x61   : > { %1107 = vrot.lane.b32.xlu0 %v2731_v41, %s2520_s21  ;;  %v775_v9 = vrot.slane %v773_v57, 4 }
  0x62   : > { %1109 = vrot.lane.b32.xlu1 %v2795_v28, %s2520_s21 }
  0x65   : > { %1142 = vrot.lane.b32.xlu0 %v2754_v51, %s2524_s25  ;;  %v464_v51 = vsel %vm2624_vm5, %v459_v47, %v463_v48  ;;  %v509_v47 = vshll.u32 %v245_v38, 16  ;;  %v2873_v48 = vcombine.low %v767_v40, %v770_v42  ;;  %v551_v42 = vshrl.u32 %v2929_v32, 16 }
  0x66   : > { %1144 = vrot.lane.b32.xlu1 %v2291_v36, %s2524_s25  ;;  %v2292_v58 = vcombine.low %v454_v53, %v464_v51 }
  0x67   : > { %v511_v54 = vrot.slane %v509_v47, 5 }
  0x69   : > { %1177 = vrot.lane.b32.xlu0 %v2306_v12, %s2521_s22  ;;  %v477_v12 = vrot.slane %v475_v63, 5  ;;  %v2260_v63 = vrot.slane %v2843_v17, 9  ;;  %v516_v17 = vrot.slane %v514_v5, 4 }
  0x6a   : > { %1179 = vrot.lane.b32.xlu1 %v2307_v45, %s2521_s22 }
  0x6b   : > { %v482_v6 = vor.u32 %v481_v14, %v477_v12  ;;  %v478_v31 = vsel %vm2624_vm5, %v473_v20, %v477_v12  ;;  %v517_v12 = vshll.u32 %v2892_v60, 16  ;;  %v527_v14 = vshrl.u32 %v2895_v61, 16 }
  0x6c   : > { %v774_v0 = vsel %vm2589_vm4, %v2260_v63, %v773_v57 }
  0x6d   : > { %1212 = vrot.lane.b32.xlu0 %v2795_v28, %s2525_s26  ;;  %v483_v26 = vrot.slane %v482_v6, 4  ;;  %v777_v6 = vsel %vm2589_vm4, %v775_v9, %v776_v2  ;;  %v519_v19 = vrot.slane %v517_v12, 5  ;;  %v529_v25 = vrot.slane %v527_v14, 4  ;;  %v2962_v2 = vld [vmem:[%s2567_s20 + $0x8c] sm:$0x1] }
  0x6e   : > { %1214 = vrot.lane.b32.xlu1 %v2819_v49, %s2525_s26 }
  0x6f   : > { %v488_v34 = vsel %vm2624_vm5, %v483_v26, %v487_v22  ;;  %v248_v22 = vld [vmem:[%s2567_s20 + $0x80] sm:$0x1]  ;;  %v2920_v26 = vcombine.low %v774_v0, %v777_v6  ;;  %v520_v29 = vor.u32 %v519_v19, %v516_v17  ;;  %v557_v6 = vshll.u32 %v2962_v2, 16 }
  0x70   : > { %v2293_v39 = vcombine.low %v478_v31, %v488_v34 }
  0x71   : > { %1247 = vrot.lane.b32.xlu0 %v2291_v36, %s2526_s27  ;;  %v521_v34 = vrot.slane %v520_v29, 4 }
  0x72   : > { %1249 = vrot.lane.b32.xlu1 %v2292_v58, %s2526_s27 }
  0x75   : > { %1282 = vrot.lane.b32.xlu0 %v2307_v45, %s2527_s28 }
  0x76   : > { %996 = vrot.lane.b32.xlu1 %v2291_v36, %s2523_s24  ;;  %v501_v36 = vrot.slane %v499_v1, 5  ;;  %v533_v1 = vshll.u32 %v248_v22, 16 }
  0x78   : > { %v506_v46 = vor.u32 %v505_v37, %v501_v36  ;;  %v541_v37 = vshll.u32 %v2926_v11, 16 }
  0x79   : > { %1284 = vrot.lane.b32.xlu0 %v2308_v15, %s2527_s28 }
  0x7a   : > { %998 = vrot.lane.b32.xlu1 %v2292_v58, %s2523_s24  ;;  %v507_v51 = vrot.slane %v506_v46, 4 }
  0x7c   : > { %v512_v59 = vsel %vm2624_vm5, %v507_v51, %v511_v54 }
  0x7d   : > { %1076 = vrot.lane.b32.xlu0 %v2307_v45, %s2522_s23  ;;  %v496_v45 = vor.u32 %v495_v35, %v492_v33  ;;  %v780_v33 = vrot.slane %v2895_v61, 5  ;;  %v535_v35 = vrot.slane %v533_v1, 5  ;;  %v559_v1 = vrot.slane %v557_v6, 5 }
  0x7e   : > { %1078 = vrot.lane.b32.xlu1 %v2308_v15, %s2522_s23 }
  0x7f   : > { %v497_v53 = vrot.slane %v496_v45, 4  ;;  %v547_v45 = vshll.u32 %v2929_v32, 16  ;;  %v781_v12 = vsel %vm2589_vm4, %v2261_v21, %v780_v33 }
  0x81   : > { %1111 = vrot.lane.b32.xlu0 %v2819_v49, %s2520_s21 }
  0x82   : > { %1113 = vrot.lane.b32.xlu1 %v2855_v3, %s2520_s21 }
  0x84   : > { %v2877_v55 = vpop.permute.xlu1 %1101 }
  0x85   : > { %1146 = vrot.lane.b32.xlu0 %v2292_v58, %s2524_s25  ;;  %v2875_v50 = vpop.permute.xlu0 %1099  ;;  %v502_v58 = vsel %vm2624_vm5, %v497_v53, %v501_v36  ;;  %v538_v36 = vshrl.u32 %v2926_v11, 16 }
  0x86   : > { %1148 = vrot.lane.b32.xlu1 %v2293_v39, %s2524_s25  ;;  %v2904_v8 = vcombine.low %v502_v58, %v512_v59  ;;  %v543_v58 = vrot.slane %v541_v37, 5  ;;  %v549_v59 = vrot.slane %v547_v45, 5  ;;  %v790_v45 = vrot.slane %v2962_v2, 5 }
  0x87   : > { %v540_v54 = vrot.slane %v538_v36, 4 }
  0x89   : > { %1181 = vrot.lane.b32.xlu0 %v2308_v15, %s2521_s22  ;;  %v523_v15 = vshll.u32 %v2895_v61, 16  ;;  %v553_v61 = vrot.slane %v551_v42, 4  ;;  %v3019_v42 = vld [vmem:[%s2567_s20 + $0x94] sm:$0xf] }
  0x8a   : > { %1183 = vrot.lane.b32.xlu1 %v2873_v48, %s2521_s22 }
  0x8b   : > { %v2899_v62 = vpop.permute.xlu0 %1169  ;;  %v525_v24 = vrot.slane %v523_v15, 5  ;;  %v554_v0 = vor.u32 %v553_v61, %v549_v59  ;;  %v254_v61 = vld [vmem:[%s2567_s20 + $0x98] sm:$0x1] }
  0x8d   : > { %1216 = vrot.lane.b32.xlu0 %v2855_v3, %s2525_s26  ;;  %v530_v31 = vor.u32 %v529_v25, %v525_v24  ;;  %v526_v51 = vsel %vm2624_vm5, %v521_v34, %v525_v24  ;;  %v3004_v34 = vcombine.low %v2926_v11, %v2929_v32 }
  0x8e   : > { %1218 = vrot.lane.b32.xlu1 %v2884_v56, %s2525_s26  ;;  %v1065_v7 = vpop.permute.xlu1 %1064 }
  0x8f   : > { %v531_v40 = vrot.slane %v530_v31, 4 }
  0x91   : > { %1251 = vrot.lane.b32.xlu0 %v2293_v39, %s2526_s27 }
  0x92   : > { %1253 = vrot.lane.b32.xlu1 %v2904_v8, %s2526_s27  ;;  %v1067_v16 = vpop.permute.xlu1 %1066 }
  0x93   : > { %v985_v20 = vpop.permute.xlu0 %984 }
  0x94   : > { %v1309_v38 = vsel %vm1306_vm7, %v2269_v44, %v985_v20  ;;  %v783_v44 = vrot.slane %v248_v22, 5 }
  0x95   : > { %1286 = vrot.lane.b32.xlu0 %v2873_v48, %s2527_s28  ;;  %v1357_v53 = vsel %vm1355_vm8, %v1309_v38, %v1065_v7  ;;  %v3013_v38 = vld [vmem:[%s2567_s20 + $0x90] sm:$0xf] }
  0x96   : > { %1000 = vrot.lane.b32.xlu1 %v2293_v39, %s2523_s24  ;;  %v2923_v27 = vpop.permute.xlu1 %1171  ;;  %v1390_v7 = vsel %vm1388_vm9, %v1357_v53, %v2875_v50  ;;  %v562_v21 = vshrl.u32 %v3013_v38, 16 }
  0x97   : > { %v987_v30 = vpop.permute.xlu0 %986 }
  0x98   : > { %v1312_v47 = vsel %vm1306_vm7, %v2584_v10, %v987_v30  ;;  %v782_v10 = vrot.slane %v780_v33, 4 }
  0x99   : > { %1288 = vrot.lane.b32.xlu0 %v2920_v26, %s2527_s28  ;;  %v1359_v60 = vsel %vm1355_vm8, %v1312_v47, %v1067_v16  ;;  %v544_v16 = vor.u32 %v543_v58, %v540_v54 }
  0x9a   : > { %1002 = vrot.lane.b32.xlu1 %v2904_v8, %s2523_s24  ;;  %v784_v14 = vsel %vm2589_vm4, %v782_v10, %v783_v44  ;;  %v1392_v50 = vsel %vm1388_vm9, %v1359_v60, %v2877_v55  ;;  %v565_v44 = vshll.u32 %v3013_v38, 16  ;;  %v571_v10 = vshll.u32 %v3019_v42, 16 }
  0x9b   : > { %v1135_v39 = vpop.permute.xlu0 %1134  ;;  %v2988_v55 = vcombine.low %v781_v12, %v784_v14  ;;  %v545_v29 = vrot.slane %v544_v16, 4  ;;  %v581_v12 = vshll.u32 %v254_v61, 16 }
  0x9c   : > { %v1137_v46 = vpop.permute.xlu1 %1136  ;;  %v1423_v9 = vsel %vm1421_vm10, %v1390_v7, %v1135_v39  ;;  %v567_v58 = vrot.slane %v565_v44, 5  ;;  %v573_v60 = vrot.slane %v571_v10, 5 }
  0x9d   : > { %1080 = vrot.lane.b32.xlu0 %v2873_v48, %s2522_s23  ;;  %v536_v48 = vsel %vm2624_vm5, %v531_v40, %v535_v35  ;;  %v1456_v19 = vsel %vm1454_vm11, %v1423_v9, %v2899_v62  ;;  %v1425_v20 = vsel %vm1421_vm10, %v1392_v50, %v1137_v46  ;;  %v555_v62 = vrot.slane %v554_v0, 4  ;;  %v3055_v0 = vld [vmem:[%s2567_s20 + $0xa0] sm:$0xf] }
  0x9e   : > { %1082 = vrot.lane.b32.xlu1 %v2920_v26, %s2522_s23  ;;  %v2971_v5 = vcombine.low %v526_v51, %v536_v48  ;;  %v1458_v31 = vsel %vm1454_vm11, %v1425_v20, %v2923_v27  ;;  %v787_v35 = vrot.slane %v2929_v32, 5  ;;  %v550_v27 = vsel %vm2624_vm5, %v545_v29, %v549_v59 }
  0x9f   : > { %v1205_v57 = vpop.permute.xlu0 %1204  ;;  %v2262_v32 = vrot.slane %v2926_v11, 9  ;;  %v575_v51 = vshrl.u32 %v3019_v42, 16  ;;  %v564_v48 = vrot.slane %v562_v21, 4  ;;  %v595_v29 = vshll.u32 %v3055_v0, 16 }
  0xa0   : > { %v1207_v63 = vpop.permute.xlu1 %1206  ;;  %v1489_v22 = vsel %vm1487_vm12, %v1456_v19, %v1205_v57  ;;  %v789_v47 = vrot.slane %v787_v35, 4  ;;  %v794_v19 = vrot.slane %v3019_v42, 5 }
  0xa1   : > { %1115 = vrot.lane.b32.xlu0 %v2884_v56, %s2520_s21  ;;  %v1491_v33 = vsel %vm1487_vm12, %v1458_v31, %v1207_v63  ;;  %v788_v11 = vsel %vm2589_vm4, %v2262_v32, %v787_v35  ;;  %v577_v63 = vrot.slane %v575_v51, 4  ;;  %v568_v9 = vor.u32 %v567_v58, %v564_v48 }
  0xa2   : > { %1117 = vrot.lane.b32.xlu1 %v2950_v18, %s2520_s21  ;;  %v791_v57 = vsel %vm2589_vm4, %v789_v47, %v790_v45  ;;  %v797_v35 = vrot.slane %v254_v61, 5 }
  0xa3   : > { %v1240_v15 = vpop.permute.xlu0 %1239  ;;  %v3047_v7 = vcombine.low %v788_v11, %v791_v57  ;;  %v578_v50 = vor.u32 %v577_v63, %v573_v60  ;;  %v569_v6 = vrot.slane %v568_v9, 4 }
  0xa4   : > { %v1242_v17 = vpop.permute.xlu1 %1241  ;;  %v1522_v24 = vsel %vm1520_vm13, %v1489_v22, %v1240_v15  ;;  %v3052_v15 = vld [vmem:[%s2567_s20 + $0x9c] sm:$0xf] }
  0xa5   : > { %1150 = vrot.lane.b32.xlu0 %v2904_v8, %s2524_s25  ;;  %v1524_v36 = vsel %vm1520_vm13, %v1491_v33, %v1242_v17  ;;  %v583_v17 = vrot.slane %v581_v12, 5  ;;  %v579_v22 = vrot.slane %v578_v50, 4  ;;  %v574_v31 = vsel %vm2624_vm5, %v569_v6, %v573_v60 }
  0xa6   : > { %1152 = vrot.lane.b32.xlu1 %v2971_v5, %s2524_s25  ;;  %v796_v33 = vrot.slane %v794_v19, 4 }
  0xa7   : > { %v1275_v25 = vpop.permute.xlu0 %1274 }
  0xa8   : > { %v2991_v30 = vpop.permute.xlu1 %988  ;;  %v1555_v8 = vsel %vm1553_vm14, %v1522_v24, %v1275_v25  ;;  %v589_v24 = vshll.u32 %v3052_v15, 16  ;;  %v599_v25 = vshrl.u32 %v3055_v0, 16 }
  0xa9   : > { %1185 = vrot.lane.b32.xlu0 %v2920_v26, %s2521_s22  ;;  %2434 = vmatprep.mubr.msk.bf16.mxu0 %vm1606_vm15, %v1555_v8  ;;  %v560_v26 = vsel %vm2624_vm5, %v555_v62, %v559_v1  ;;  %v3070_v1 = vcombine.low %v3013_v38, %v3019_v42  ;;  %v2263_v8 = vrot.slane %v3013_v38, 9  ;;  %v1315_v38 = vsel %vm1306_vm7, %v2579_v4, %v2991_v30 }
  0xaa   : > { %1187 = vrot.lane.b32.xlu1 %v2988_v55, %s2521_s22  ;;  %v3028_v46 = vcombine.low %v550_v27, %v560_v26  ;;  %v584_v27 = vsel %vm2624_vm5, %v579_v22, %v583_v17  ;;  %v591_v26 = vrot.slane %v589_v24, 5  ;;  %v601_v42 = vrot.slane %v599_v25, 4  ;;  %v3136_v22 = vld [vmem:[%s2567_s20 + $0xa8] sm:$0xf] }
  0xab   : > { %v1277_v37 = vpop.permute.xlu0 %1276  ;;  %v3090_v47 = vcombine.low %v574_v31, %v584_v27  ;;  %v795_v21 = vsel %vm2589_vm4, %v2263_v8, %v794_v19  ;;  %v798_v4 = vsel %vm2589_vm4, %v796_v33, %v797_v35  ;;  %v801_v17 = vrot.slane %v3055_v0, 5 }
  0xac   : > { %v3015_v39 = vpop.permute.xlu1 %990  ;;  %v1557_v40 = vsel %vm1553_vm14, %v1524_v36, %v1277_v37  ;;  %v3110_v60 = vcombine.low %v795_v21, %v798_v4  ;;  %v610_v33 = vshrl.u32 %v3136_v22, 16  ;;  %v613_v35 = vshll.u32 %v3136_v22, 16 }
  0xad   : > { %1220 = vrot.lane.b32.xlu0 %v2950_v18, %s2525_s26  ;;  %2435 = vmatmul.mubr.msk.bf16.vlgmr.msra.gmra.mxu0 %vm1606_vm15, %v1557_v40  ;;  %v597_v40 = vrot.slane %v595_v29, 5  ;;  %v1318_v48 = vsel %vm1306_vm7, %v2669_v43, %v3015_v39  ;;  %v3142_v29 = vld [vmem:[%s2567_s20 + $0xac] sm:$0xf]  ;;  %v803_v31 = vrot.slane %v801_v17, 4 }
  0xae   : > { %1222 = vrot.lane.b32.xlu1 %v3004_v34, %s2525_s26  ;;  %v619_v27 = vshll.u32 %v3142_v29, 16 }
  0xaf   : > { %v1069_v53 = vpop.permute.xlu0 %1068  ;;  %v602_v11 = vor.u32 %v601_v42, %v597_v40  ;;  %v615_v42 = vrot.slane %v613_v35, 5 }
  0xb0   : > { %v3034_v54 = vpop.permute.xlu1 %1070  ;;  %v1361_v45 = vsel %vm1355_vm8, %v1315_v38, %v1069_v53  ;;  %v260_v38 = vld [vmem:[%s2567_s20 + $0xb0] sm:$0x1] }
  0xb1   : > { %1255 = vrot.lane.b32.xlu0 %v2971_v5, %s2526_s27  ;;  %v629_v4 = vshll.u32 %v260_v38, 16 }
  0xb2   : > { %1257 = vrot.lane.b32.xlu1 %v3028_v46, %s2526_s27 }
  0xb3   : > { %v1104_v59 = vpop.permute.xlu0 %1103 }
  0xb4   : > { %v1106_v2 = vpop.permute.xlu1 %1105  ;;  %v1394_v51 = vsel %vm1388_vm9, %v1361_v45, %v1104_v59  ;;  %v1363_v59 = vsel %vm1355_vm8, %v1318_v48, %v3034_v54  ;;  %v621_v45 = vrot.slane %v619_v27, 5  ;;  %v3178_v48 = vld [vmem:[%s2567_s20 + $0xb8] sm:$0xf] }
  0xb5   : > { %1290 = vrot.lane.b32.xlu0 %v2988_v55, %s2527_s28  ;;  %v1396_v9 = vsel %vm1388_vm9, %v1363_v59, %v1106_v2  ;;  %v631_v59 = vrot.slane %v629_v4, 5 }
  0xb6   : > { %1004 = vrot.lane.b32.xlu1 %v2971_v5, %s2523_s24  ;;  %v586_v5 = vshrl.u32 %v3052_v15, 16 }
  0xb7   : > { %v1139_v14 = vpop.permute.xlu0 %1138 }
  0xb8   : > { %v1141_v16 = vpop.permute.xlu1 %1140  ;;  %v588_v36 = vrot.slane %v586_v5, 4  ;;  %v1427_v53 = vsel %vm1421_vm10, %v1394_v51, %v1139_v14  ;;  %v603_v14 = vrot.slane %v602_v11, 4 }
  0xb9   : > { %1292 = vrot.lane.b32.xlu0 %v3047_v7, %s2527_s28 }
  0xba   : > { %1006 = vrot.lane.b32.xlu1 %v3028_v46, %s2523_s24  ;;  %v592_v30 = vor.u32 %v591_v26, %v588_v36 }
  0xbb   : > { %v1174_v20 = vpop.permute.xlu0 %1173 }
  0xbc   : > { %v1176_v62 = vpop.permute.xlu1 %1175  ;;  %v1460_v58 = vsel %vm1454_vm11, %v1427_v53, %v1174_v20  ;;  %v593_v12 = vrot.slane %v592_v30, 4  ;;  %v3175_v53 = vld [vmem:[%s2567_s20 + $0xb4] sm:$0xf] }
  0xbd   : > { %1084 = vrot.lane.b32.xlu0 %v2988_v55, %s2522_s23  ;;  %v3080_v55 = vld [vmem:[%s2567_s20 + $0xa4] sm:$0x1] }
  0xbe   : > { %1086 = vrot.lane.b32.xlu1 %v3047_v7, %s2522_s23  ;;  %v605_v44 = vshll.u32 %v3080_v55, 16  ;;  %v598_v20 = vsel %vm2624_vm5, %v593_v12, %v597_v40  ;;  %v612_v40 = vrot.slane %v610_v33, 4  ;;  %v643_v12 = vshll.u32 %v3178_v48, 16 }
  0xbf   : > { %v1209_v37 = vpop.permute.xlu0 %1208 }
  0xc0   : > { %v1211_v32 = vpop.permute.xlu1 %1210  ;;  %v1493_v61 = vsel %vm1487_vm12, %v1460_v58, %v1209_v37  ;;  %v607_v63 = vrot.slane %v605_v44, 5  ;;  %v623_v37 = vshrl.u32 %v3142_v29, 16 }
  0xc1   : > { %1119 = vrot.lane.b32.xlu0 %v3004_v34, %s2520_s21 }
  0xc2   : > { %1121 = vrot.lane.b32.xlu1 %v3070_v1, %s2520_s21  ;;  %v625_v21 = vrot.slane %v623_v37, 4 }
  0xc3   : > { %v1244_v10 = vpop.permute.xlu0 %1243 }
  0xc4   : > { %v1246_v57 = vpop.permute.xlu1 %1245  ;;  %v1526_v43 = vsel %vm1520_vm13, %v1493_v61, %v1244_v10  ;;  %v616_v10 = vor.u32 %v615_v42, %v612_v40  ;;  %v626_v11 = vor.u32 %v625_v21, %v621_v45  ;;  %v808_v61 = vrot.slane %v3142_v29, 5 }
  0xc5   : > { %1154 = vrot.lane.b32.xlu0 %v3028_v46, %s2524_s25  ;;  %v1429_v46 = vsel %vm1421_vm10, %v1396_v9, %v1141_v16  ;;  %v3127_v16 = vcombine.low %v3052_v15, %v3055_v0  ;;  %v2264_v0 = vrot.slane %v3052_v15, 9 }
  0xc6   : > { %1156 = vrot.lane.b32.xlu1 %v3090_v47, %s2524_s25  ;;  %v1462_v6 = vsel %vm1454_vm11, %v1429_v46, %v1176_v62  ;;  %v804_v62 = vrot.slane %v3080_v55, 5  ;;  %v617_v58 = vrot.slane %v616_v10, 4  ;;  %v627_v9 = vrot.slane %v626_v11, 4 }
  0xc7   : > { %v1279_v39 = vpop.permute.xlu0 %1278  ;;  %v1495_v2 = vsel %vm1487_vm12, %v1462_v6, %v1211_v32  ;;  %v802_v15 = vsel %vm2589_vm4, %v2264_v0, %v801_v17  ;;  %v3193_v46 = vcombine.low %v3136_v22, %v3142_v29  ;;  %v811_v17 = vrot.slane %v260_v38, 5 }
  0xc8   : > { %v3115_v50 = vpop.permute.xlu1 %992  ;;  %v1559_v54 = vsel %vm1553_vm14, %v1526_v43, %v1279_v39  ;;  %v1528_v19 = vsel %vm1520_vm13, %v1495_v2, %v1246_v57  ;;  %v805_v55 = vsel %vm2589_vm4, %v803_v31, %v804_v62  ;;  %v637_v43 = vshll.u32 %v3175_v53, 16 }
  0xc9   : > { %1189 = vrot.lane.b32.xlu0 %v3047_v7, %s2521_s22  ;;  %2438 = vmatprep.mubr.msk.bf16.mxu0 %vm1606_vm15, %v1559_v54  ;;  %v608_v7 = vsel %vm2624_vm5, %v603_v14, %v607_v63  ;;  %v3170_v51 = vcombine.low %v802_v15, %v805_v55  ;;  %v647_v39 = vshrl.u32 %v3178_v48, 16  ;;  %v2265_v54 = vrot.slane %v3136_v22, 9 }
  0xca   : > { %1191 = vrot.lane.b32.xlu1 %v3110_v60, %s2521_s22  ;;  %v3151_v8 = vcombine.low %v598_v20, %v608_v7  ;;  %v622_v6 = vsel %vm2624_vm5, %v617_v58, %v621_v45  ;;  %v810_v2 = vrot.slane %v808_v61, 4  ;;  %v632_v20 = vsel %vm2624_vm5, %v627_v9, %v631_v59 }
  0xcb   : > { %v1281_v5 = vpop.permute.xlu0 %1280  ;;  %v639_v7 = vrot.slane %v637_v43, 5  ;;  %v649_v29 = vrot.slane %v647_v39, 4  ;;  %v1321_v22 = vsel %vm1306_vm7, %v2706_v23, %v3115_v50  ;;  %v3213_v31 = vcombine.low %v622_v6, %v632_v20 }
  0xcc   : > { %v3138_v24 = vpop.permute.xlu1 %994  ;;  %v1561_v25 = vsel %vm1553_vm14, %v1528_v19, %v1281_v5  ;;  %v809_v33 = vsel %vm2589_vm4, %v2265_v54, %v808_v61  ;;  %v812_v23 = vsel %vm2589_vm4, %v810_v2, %v811_v17  ;;  %v815_v61 = vrot.slane %v3178_v48, 5 }
  0xcd   : > { %1224 = vrot.lane.b32.xlu0 %v3070_v1, %s2525_s26  ;;  %2439 = vmatmul.mubr.msk.bf16.gmra.mxu0 %vm1606_vm15, %v1561_v25  ;;  %v645_v25 = vrot.slane %v643_v12, 5  ;;  %v1324_v40 = vsel %vm1306_vm7, %v2731_v41, %v3138_v24  ;;  %v3233_v45 = vcombine.low %v809_v33, %v812_v23  ;;  %v2266_v17 = vrot.slane %v3175_v53, 9 }
  0xce   : > { %1226 = vrot.lane.b32.xlu1 %v3127_v16, %s2525_s26 }
  0xcf   : > { %v1073_v36 = vpop.permute.xlu0 %1072  ;;  %v650_v15 = vor.u32 %v649_v29, %v645_v25 }
  0xd0   : > { %v3157_v26 = vpop.permute.xlu1 %1074  ;;  %v1365_v62 = vsel %vm1355_vm8, %v1321_v22, %v1073_v36 }
  0xd1   : > { %1259 = vrot.lane.b32.xlu0 %v3090_v47, %s2526_s27 }
  0xd2   : > { %1261 = vrot.lane.b32.xlu1 %v3151_v8, %s2526_s27 }
  0xd3   : > { %v1108_v32 = vpop.permute.xlu0 %1107 }
  0xd4   : > { %v1110_v44 = vpop.permute.xlu1 %1109  ;;  %v1398_v37 = vsel %vm1388_vm9, %v1365_v62, %v1108_v32  ;;  %v1367_v32 = vsel %vm1355_vm8, %v1324_v40, %v3157_v26  ;;  %v266_v62 = vld [vmem:[%s2567_s20 + $0xc8] sm:$0x1] }
  0xd5   : > { %1294 = vrot.lane.b32.xlu0 %v3110_v60, %s2527_s28  ;;  %v1400_v10 = vsel %vm1388_vm9, %v1367_v32, %v1110_v44  ;;  %v3246_v44 = vld [vmem:[%s2567_s20 + $0xc0] sm:$0xf] }
  0xd6   : > { %1008 = vrot.lane.b32.xlu1 %v3090_v47, %s2523_s24  ;;  %v634_v47 = vshrl.u32 %v3175_v53, 16  ;;  %v824_v54 = vshll.u32 %v3246_v44, 16 }
  0xd7   : > { %v1143_v30 = vpop.permute.xlu0 %1142 }
  0xd8   : > { %v1145_v57 = vpop.permute.xlu1 %1144  ;;  %v636_v19 = vrot.slane %v634_v47, 4  ;;  %v1431_v36 = vsel %vm1421_vm10, %v1398_v37, %v1143_v30  ;;  %v3257_v47 = vld [vmem:[%s2567_s20 + $0xc4] sm:$0xf]  ;;  %v826_v29 = vrot.slane %v824_v54, 5 }
  0xd9   : > { %1296 = vrot.lane.b32.xlu0 %v3170_v51, %s2527_s28  ;;  %v1433_v30 = vsel %vm1421_vm10, %v1400_v10, %v1145_v57  ;;  %v3253_v57 = vcombine.low %v3175_v53, %v3178_v48  ;;  %v834_v48 = vshrl.u32 %v3257_v47, 16  ;;  %v830_v6 = vshll.u32 %v3257_v47, 16 }
  0xda   : > { %1010 = vrot.lane.b32.xlu1 %v3151_v8, %s2523_s24  ;;  %v640_v50 = vor.u32 %v639_v7, %v636_v19  ;;  %v817_v19 = vrot.slane %v815_v61, 4  ;;  %v816_v53 = vsel %vm2589_vm4, %v2266_v17, %v815_v61 }
  0xdb   : > { %v1178_v63 = vpop.permute.xlu0 %1177  ;;  %v836_v22 = vrot.slane %v834_v48, 4 }
  0xdc   : > { %v1180_v14 = vpop.permute.xlu1 %1179  ;;  %v1464_v42 = vsel %vm1454_vm11, %v1431_v36, %v1178_v63  ;;  %v641_v4 = vrot.slane %v640_v50, 4  ;;  %v840_v50 = vshll.u32 %v266_v62, 16 }
  0xdd   : > { %1088 = vrot.lane.b32.xlu0 %v3110_v60, %s2522_s23  ;;  %v3203_v60 = vld [vmem:[%s2567_s20 + $0xbc] sm:$0x1]  ;;  %v1466_v58 = vsel %vm1454_vm11, %v1433_v30, %v1180_v14  ;;  %v821_v14 = vshrl.u32 %v3246_v44, 16  ;;  %v2317_v30 = vcombine.low %v3246_v44, %v3257_v47 }
  0xde   : > { %1090 = vrot.lane.b32.xlu1 %v3170_v51, %s2522_s23  ;;  %v653_v35 = vshll.u32 %v3203_v60, 16  ;;  %v646_v9 = vsel %vm2624_vm5, %v641_v4, %v645_v25 }
  0xdf   : > { %v1213_v5 = vpop.permute.xlu0 %1212  ;;  %v823_v25 = vrot.slane %v821_v14, 4  ;;  %v269_v14 = vld [vmem:[%s2567_s20 + $0xd4] sm:$0x1] }
  0xe0   : > { %v1215_v0 = vpop.permute.xlu1 %1214  ;;  %v1497_v38 = vsel %vm1487_vm12, %v1464_v42, %v1213_v5  ;;  %v655_v21 = vrot.slane %v653_v35, 5  ;;  %v818_v5 = vrot.slane %v3203_v60, 5 }
  0xe1   : > { %1123 = vrot.lane.b32.xlu0 %v3127_v16, %s2520_s21  ;;  %v1499_v59 = vsel %vm1487_vm12, %v1466_v58, %v1215_v0  ;;  %v832_v0 = vrot.slane %v830_v6, 5  ;;  %v827_v37 = vor.u32 %v826_v29, %v823_v25  ;;  %v874_v25 = vshll.u32 %v269_v14, 16 }
  0xe2   : > { %1125 = vrot.lane.b32.xlu1 %v3193_v46, %s2520_s21  ;;  %v819_v60 = vsel %vm2589_vm4, %v817_v19, %v818_v5 }
  0xe3   : > { %v1248_v27 = vpop.permute.xlu0 %1247  ;;  %v837_v23 = vor.u32 %v836_v22, %v832_v0  ;;  %v828_v42 = vrot.slane %v827_v37, 4 }
  0xe4   : > { %v1250_v55 = vpop.permute.xlu1 %1249  ;;  %v1530_v41 = vsel %vm1520_vm13, %v1497_v38, %v1248_v27  ;;  %v3295_v27 = vcombine.low %v816_v53, %v819_v60  ;;  %v842_v38 = vrot.slane %v840_v50, 5 }
  0xe5   : > { %1158 = vrot.lane.b32.xlu0 %v3151_v8, %s2524_s25  ;;  %v651_v8 = vrot.slane %v650_v15, 4  ;;  %v1532_v63 = vsel %vm1520_vm13, %v1499_v59, %v1250_v55  ;;  %v3300_v15 = vld [vmem:[%s2567_s20 + $0xcc] sm:$0xf]  ;;  %v3303_v55 = vld [vmem:[%s2567_s20 + $0xd0] sm:$0xf]  ;;  %v838_v32 = vrot.slane %v837_v23, 4  ;;  %s214_s20 = scalar_lea.vmem %s3610_s4, %s3616_s16 }
  0xe6   : > { %1160 = vrot.lane.b32.xlu1 %v3213_v31, %s2524_s25  ;;  %v858_v10 = vshll.u32 %v3300_v15, 16  ;;  %v2267_v59 = vrot.slane %v3246_v44, 9  ;;  %v876_v23 = vrot.slane %v874_v25, 5 }
  0xe7   : > { %v1283_v24 = vpop.permute.xlu0 %1282  ;;  %v656_v43 = vsel %vm2624_vm5, %v651_v8, %v655_v21  ;;  %v855_v21 = vshrl.u32 %v3300_v15, 16  ;;  %v843_v58 = vsel %vm2624_vm5, %v838_v32, %v842_v38 }
  0xe8   : > { %v3238_v26 = vpop.permute.xlu1 %996  ;;  %v1563_v11 = vsel %vm1553_vm14, %v1530_v41, %v1283_v24  ;;  %v3276_v2 = vcombine.low %v646_v9, %v656_v43  ;;  %v868_v41 = vshrl.u32 %v3303_v55, 16  ;;  %v864_v24 = vshll.u32 %v3303_v55, 16 }
  0xe9   : > { %1193 = vrot.lane.b32.xlu0 %v3170_v51, %s2521_s22  ;;  %2442 = vmatprep.mubr.msk.bf16.mxu0 %vm1606_vm15, %v1563_v11  ;;  %v833_v11 = vsel %vm2624_vm5, %v828_v42, %v832_v0  ;;  %v857_v61 = vrot.slane %v855_v21, 4  ;;  %v852_v9 = vrot.slane %v266_v62, 5 }
  0xea   : > { %1195 = vrot.lane.b32.xlu1 %v3233_v45, %s2521_s22  ;;  %v866_v43 = vrot.slane %v864_v24, 5  ;;  %v2318_v44 = vcombine.low %v833_v11, %v843_v58  ;;  %v886_v24 = vrot.slane %v269_v14, 5 }
  0xeb   : > { %v1285_v51 = vpop.permute.xlu0 %1284 }
  0xec   : > { %v3264_v39 = vpop.permute.xlu1 %998  ;;  %v1565_v12 = vsel %vm1553_vm14, %v1532_v63, %v1285_v51  ;;  %v860_v63 = vrot.slane %v858_v10, 5 }
  0xed   : > { %1228 = vrot.lane.b32.xlu0 %v3193_v46, %s2525_s26  ;;  %2443 = vmatmul.mubr.msk.bf16.gmra.mxu0 %vm1606_vm15, %v1565_v12  ;;  %v1330_v22 = vsel %vm1306_vm7, %v2819_v49, %v3264_v39 }
  0xee   : > { %1230 = vrot.lane.b32.xlu1 %v3253_v57, %s2525_s26  ;;  %v861_v6 = vor.u32 %v860_v63, %v857_v61 }
  0xef   : > { %v1077_v20 = vpop.permute.xlu0 %1076 }
  0xf0   : > { %v3280_v7 = vpop.permute.xlu1 %1078  ;;  %v862_v60 = vrot.slane %v861_v6, 4 }
  0xf1   : > { %1263 = vrot.lane.b32.xlu0 %v3213_v31, %s2526_s27  ;;  %v1371_v62 = vsel %vm1355_vm8, %v1330_v22, %v3280_v7 }
  0xf2   : > { %1265 = vrot.lane.b32.xlu1 %v3276_v2, %s2526_s27 }
  0xf3   : > { %v1112_v33 = vpop.permute.xlu0 %1111 }
  0xf4   : > { %v3291_v35 = vpop.permute.xlu1 %1113 }
  0xf5   : > { %1298 = vrot.lane.b32.xlu0 %v3233_v45, %s2527_s28  ;;  %v1404_v50 = vsel %vm1388_vm9, %v1371_v62, %v3291_v35  ;;  %v2320_v35 = vcombine.low %v3300_v15, %v3303_v55 }
  0xf6   : > { %1012 = vrot.lane.b32.xlu1 %v3213_v31, %s2523_s24  ;;  %v849_v31 = vrot.slane %v3257_v47, 5  ;;  %v870_v47 = vrot.slane %v868_v41, 4 }
  0xf7   : > { %v1147_v36 = vpop.permute.xlu0 %1146 }
  0xf8   : > { %v1149_v40 = vpop.permute.xlu1 %1148  ;;  %v851_v51 = vrot.slane %v849_v31, 4  ;;  %v850_v48 = vsel %vm2589_vm4, %v2267_v59, %v849_v31  ;;  %v871_v5 = vor.u32 %v870_v47, %v866_v43 }
  0xf9   : > { %1300 = vrot.lane.b32.xlu0 %v3295_v27, %s2527_s28 }
  0xfa   : > { %1014 = vrot.lane.b32.xlu1 %v3276_v2, %s2523_s24  ;;  %v853_v19 = vsel %vm2589_vm4, %v851_v51, %v852_v9  ;;  %v872_v37 = vrot.slane %v871_v5, 4 }
  0xfb   : > { %v1182_v4 = vpop.permute.xlu0 %1181 }
  0xfc   : > { %v1184_v8 = vpop.permute.xlu1 %1183  ;;  %v877_v21 = vsel %vm2624_vm5, %v872_v37, %v876_v23 }
  0xfd   : > { %1092 = vrot.lane.b32.xlu0 %v3233_v45, %s2522_s23  ;;  %v1327_v45 = vsel %vm1306_vm7, %v2795_v28, %v3238_v26 }
  0xfe   : > { %1094 = vrot.lane.b32.xlu1 %v3295_v27, %s2522_s23  ;;  %v1369_v17 = vsel %vm1355_vm8, %v1327_v45, %v1077_v20  ;;  %v2319_v20 = vcombine.low %v850_v48, %v853_v19 }
  0xff   : > { %v1217_v12 = vpop.permute.xlu0 %1216  ;;  %v1402_v29 = vsel %vm1388_vm9, %v1369_v17, %v1112_v33 }
 0x100   : > { %v1219_v54 = vpop.permute.xlu1 %1218  ;;  %v1435_v26 = vsel %vm1421_vm10, %v1402_v29, %v1147_v36  ;;  %v883_v36 = vrot.slane %v3303_v55, 5 }
 0x101   : > { %1127 = vrot.lane.b32.xlu0 %v3253_v57, %s2520_s21  ;;  %v1468_v53 = vsel %vm1454_vm11, %v1435_v26, %v1182_v4 }
 0x102   : > { %1129 = vrot.lane.b32.xlu1 %v2317_v30, %s2520_s21  ;;  %v1501_v33 = vsel %vm1487_vm12, %v1468_v53, %v1217_v12  ;;  %v885_v41 = vrot.slane %v883_v36, 4 }
 0x103   : > { %v1252_v28 = vpop.permute.xlu0 %1251 }
 0x104   : > { %v1254_v0 = vpop.permute.xlu1 %1253  ;;  %v1534_v49 = vsel %vm1520_vm13, %v1501_v33, %v1252_v28  ;;  %v887_v58 = vsel %vm2589_vm4, %v885_v41, %v886_v24 }
 0x105   : > { %1162 = vrot.lane.b32.xlu0 %v3276_v2, %s2524_s25  ;;  %v1437_v2 = vsel %vm1421_vm10, %v1404_v50, %v1149_v40  ;;  %v867_v40 = vsel %vm2624_vm5, %v862_v60, %v866_v43 }
 0x106   : > { %1164 = vrot.lane.b32.xlu1 %v2318_v44, %s2524_s25  ;;  %v1470_v7 = vsel %vm1454_vm11, %v1437_v2, %v1184_v8  ;;  %v2321_v55 = vcombine.low %v867_v40, %v877_v21 }
 0x107   : > { %v1287_v39 = vpop.permute.xlu0 %1286  ;;  %v1503_v38 = vsel %vm1487_vm12, %v1470_v7, %v1219_v54 }
 0x108   : > { %v1001_v42 = vpop.permute.xlu1 %1000  ;;  %v1567_v32 = vsel %vm1553_vm14, %v1534_v49, %v1287_v39  ;;  %v1536_v10 = vsel %vm1520_vm13, %v1503_v38, %v1254_v0 }
 0x109   : > { %1197 = vrot.lane.b32.xlu0 %v3295_v27, %s2521_s22  ;;  %2446 = vmatprep.mubr.msk.bf16.mxu0 %vm1606_vm15, %v1567_v32  ;;  %v2268_v27 = vrot.slane %v3300_v15, 9  ;;  %v1333_v13 = vsel %vm1306_vm7, %v2855_v3, %v1001_v42 }
 0x10a   : > { %1199 = vrot.lane.b32.xlu1 %v2319_v20, %s2521_s22 }
 0x10b   : > { %v1289_v31 = vpop.permute.xlu0 %1288  ;;  %v884_v52 = vsel %vm2589_vm4, %v2268_v27, %v883_v36 }
 0x10c   : > { %v1003_v4 = vpop.permute.xlu1 %1002  ;;  %v1569_v8 = vsel %vm1553_vm14, %v1536_v10, %v1289_v31  ;;  %v2322_v59 = vcombine.low %v884_v52, %v887_v58 }
 0x10d   : > { %1232 = vrot.lane.b32.xlu0 %v2317_v30, %s2525_s26  ;;  %2447 = vmatmul.mubr.msk.bf16.gmra.mxu0 %vm1606_vm15, %v1569_v8  ;;  %v1336_v6 = vsel %vm1306_vm7, %v2884_v56, %v1003_v4 }
 0x10e   : > { %1234 = vrot.lane.b32.xlu1 %v2320_v35, %s2525_s26 }
 0x10f   : > { %v1081_v11 = vpop.permute.xlu0 %1080 }
 0x110   : > { %v1083_v15 = vpop.permute.xlu1 %1082  ;;  %v1373_v14 = vsel %vm1355_vm8, %v1333_v13, %v1081_v11 }
 0x111   : > { %1267 = vrot.lane.b32.xlu0 %v2318_v44, %s2526_s27  ;;  %v1375_v19 = vsel %vm1355_vm8, %v1336_v6, %v1083_v15 }
 0x112   : > { %1269 = vrot.lane.b32.xlu1 %v2321_v55, %s2526_s27 }
 0x113   : > { %v1116_v61 = vpop.permute.xlu0 %1115 }
 0x114   : > { %v1118_v30 = vpop.permute.xlu1 %1117  ;;  %v1406_v54 = vsel %vm1388_vm9, %v1373_v14, %v1116_v61 }
 0x115   : > { %1302 = vrot.lane.b32.xlu0 %v2319_v20, %s2527_s28  ;;  %v1408_v25 = vsel %vm1388_vm9, %v1375_v19, %v1118_v30 }
 0x116   : > { %1304 = vrot.lane.b32.xlu1 %v2322_v59, %s2527_s28 }
 0x117   : > { %v1151_v63 = vpop.permute.xlu0 %1150 }
 0x118   : > { %v1153_v51 = vpop.permute.xlu1 %1152  ;;  %v1439_v44 = vsel %vm1421_vm10, %v1406_v54, %v1151_v63 }
 0x119   : > { %v1441_v28 = vsel %vm1421_vm10, %v1408_v25, %v1153_v51 }
 0x11b   : > { %v1186_v9 = vpop.permute.xlu0 %1185 }
 0x11c   : > { %v1188_v43 = vpop.permute.xlu1 %1187  ;;  %v1472_v17 = vsel %vm1454_vm11, %v1439_v44, %v1186_v9 }
 0x11d   : > { %v1474_v22 = vsel %vm1454_vm11, %v1441_v28, %v1188_v43 }
 0x11f   : > { %v1221_v47 = vpop.permute.xlu0 %1220 }
 0x120   : > { %v1223_v12 = vpop.permute.xlu1 %1222  ;;  %v1505_v5 = vsel %vm1487_vm12, %v1472_v17, %v1221_v47 }
 0x121   : > { %v1507_v56 = vsel %vm1487_vm12, %v1474_v22, %v1223_v12 }
 0x123   : > { %v1256_v45 = vpop.permute.xlu0 %1255 }
 0x124   : > { %v1258_v48 = vpop.permute.xlu1 %1257  ;;  %v1538_v3 = vsel %vm1520_vm13, %v1505_v5, %v1256_v45 }
 0x125   : > { %v1540_v53 = vsel %vm1520_vm13, %v1507_v56, %v1258_v48 }
 0x127   : > { %v1291_v29 = vpop.permute.xlu0 %1290 }
 0x128   : > { %v1005_v26 = vpop.permute.xlu1 %1004  ;;  %v1571_v0 = vsel %vm1553_vm14, %v1538_v3, %v1291_v29 }
 0x129   : > { %2450 = vmatprep.mubr.msk.bf16.mxu1 %vm1606_vm15, %v1571_v0  ;;  %v1339_v7 = vsel %vm1306_vm7, %v2950_v18, %v1005_v26 }
 0x12b   : > { %v1293_v20 = vpop.permute.xlu0 %1292 }
 0x12c   : > { %v1007_v60 = vpop.permute.xlu1 %1006  ;;  %v1573_v62 = vsel %vm1553_vm14, %v1540_v53, %v1293_v20 }
 0x12d   : > { %2451 = vmatmul.mubr.msk.bf16.vlgmr.msra.gmra.mxu1 %vm1606_vm15, %v1573_v62  ;;  %v1342_v31 = vsel %vm1306_vm7, %v3004_v34, %v1007_v60 }
 0x12f   : > { %v1085_v33 = vpop.permute.xlu0 %1084 }
 0x130   : > { %v1087_v37 = vpop.permute.xlu1 %1086  ;;  %v1377_v38 = vsel %vm1355_vm8, %v1339_v7, %v1085_v33 }
 0x131   : > { %v1379_v41 = vsel %vm1355_vm8, %v1342_v31, %v1087_v37 }
 0x133   : > { %v1120_v23 = vpop.permute.xlu0 %1119 }
 0x134   : > { %v1122_v50 = vpop.permute.xlu1 %1121  ;;  %v1410_v35 = vsel %vm1388_vm9, %v1377_v38, %v1120_v23 }
 0x135   : > { %v1412_v4 = vsel %vm1388_vm9, %v1379_v41, %v1122_v50 }
 0x137   : > { %v1155_v49 = vpop.permute.xlu0 %1154 }
 0x138   : > { %v1157_v39 = vpop.permute.xlu1 %1156  ;;  %v1443_v21 = vsel %vm1421_vm10, %v1410_v35, %v1155_v49 }
 0x139   : > { %v1445_v55 = vsel %vm1421_vm10, %v1412_v4, %v1157_v39 }
 0x13b   : > { %v1190_v36 = vpop.permute.xlu0 %1189 }
 0x13c   : > { %v1192_v2 = vpop.permute.xlu1 %1191  ;;  %v1476_v27 = vsel %vm1454_vm11, %v1443_v21, %v1190_v36 }
 0x13d   : > { %v1478_v58 = vsel %vm1454_vm11, %v1445_v55, %v1192_v2 }
 0x13f   : > { %v1225_v42 = vpop.permute.xlu0 %1224 }
 0x140   : > { %v1227_v32 = vpop.permute.xlu1 %1226  ;;  %v1509_v24 = vsel %vm1487_vm12, %v1476_v27, %v1225_v42 }
 0x141   : > { %v1511_v34 = vsel %vm1487_vm12, %v1478_v58, %v1227_v32 }
 0x143   : > { %v1260_v40 = vpop.permute.xlu0 %1259 }
 0x144   : > { %v1262_v10 = vpop.permute.xlu1 %1261  ;;  %v1542_v18 = vsel %vm1520_vm13, %v1509_v24, %v1260_v40 }
 0x145   : > { %v1544_v15 = vsel %vm1520_vm13, %v1511_v34, %v1262_v10 }
 0x147   : > { %v1295_v8 = vpop.permute.xlu0 %1294 }
 0x148   : > { %v1009_v11 = vpop.permute.xlu1 %1008  ;;  %v1575_v52 = vsel %vm1553_vm14, %v1542_v18, %v1295_v8 }
 0x149   : > { %2454 = vmatprep.mubr.msk.bf16.mxu1 %vm1606_vm15, %v1575_v52  ;;  %v1345_v44 = vsel %vm1306_vm7, %v3070_v1, %v1009_v11 }
 0x14b   : > { %v1297_v59 = vpop.permute.xlu0 %1296 }
 0x14c   : > { %v1011_v61 = vpop.permute.xlu1 %1010  ;;  %v1577_v30 = vsel %vm1553_vm14, %v1544_v15, %v1297_v59 }
 0x14d   : > { %2455 = vmatmul.mubr.msk.bf16.gmra.mxu1 %vm1606_vm15, %v1577_v30  ;;  %v1348_v25 = vsel %vm1306_vm7, %v3127_v16, %v1011_v61 }
 0x14f   : > { %v1089_v63 = vpop.permute.xlu0 %1088 }
 0x150   : > { %v1091_v51 = vpop.permute.xlu1 %1090  ;;  %v1381_v48 = vsel %vm1355_vm8, %v1345_v44, %v1089_v63 }
 0x151   : > { %v1383_v29 = vsel %vm1355_vm8, %v1348_v25, %v1091_v51 }
 0x153   : > { %v1124_v9 = vpop.permute.xlu0 %1123 }
 0x154   : > { %v1126_v43 = vpop.permute.xlu1 %1125  ;;  %v1414_v6 = vsel %vm1388_vm9, %v1381_v48, %v1124_v9 }
 0x155   : > { %v1416_v1 = vsel %vm1388_vm9, %v1383_v29, %v1126_v43 }
 0x157   : > { %v1159_v47 = vpop.permute.xlu0 %1158 }
 0x158   : > { %v1161_v12 = vpop.permute.xlu1 %1160  ;;  %v1447_v19 = vsel %vm1421_vm10, %v1414_v6, %v1159_v47 }
 0x159   : > { %v1449_v22 = vsel %vm1421_vm10, %v1416_v1, %v1161_v12 }
 0x15b   : > { %v1194_v13 = vpop.permute.xlu0 %1193 }
 0x15c   : > { %v1196_v14 = vpop.permute.xlu1 %1195  ;;  %v1480_v3 = vsel %vm1454_vm11, %v1447_v19, %v1194_v13 }
 0x15d   : > { %v1482_v20 = vsel %vm1454_vm11, %v1449_v22, %v1196_v14 }
 0x15f   : > { %v1229_v54 = vpop.permute.xlu0 %1228 }
 0x160   : > { %v1231_v45 = vpop.permute.xlu1 %1230  ;;  %v1513_v28 = vsel %vm1487_vm12, %v1480_v3, %v1229_v54 }
 0x161   : > { %v1515_v16 = vsel %vm1487_vm12, %v1482_v20, %v1231_v45 }
 0x163   : > { %v1264_v17 = vpop.permute.xlu0 %1263 }
 0x164   : > { %v1266_v5 = vpop.permute.xlu1 %1265  ;;  %v1546_v26 = vsel %vm1520_vm13, %v1513_v28, %v1264_v17 }
 0x165   : > { %v1548_v60 = vsel %vm1520_vm13, %v1515_v16, %v1266_v5 }
 0x167   : > { %v1299_v0 = vpop.permute.xlu0 %1298 }
 0x168   : > { %v1013_v56 = vpop.permute.xlu1 %1012  ;;  %v1579_v53 = vsel %vm1553_vm14, %v1546_v26, %v1299_v0 }
 0x169   : > { %2458 = vmatprep.mubr.msk.bf16.mxu1 %vm1606_vm15, %v1579_v53  ;;  %v1351_v13 = vsel %vm1306_vm7, %v3193_v46, %v1013_v56 }
 0x16b   : > { %v1301_v62 = vpop.permute.xlu0 %1300 }
 0x16c   : > { %v1015_v33 = vpop.permute.xlu1 %1014  ;;  %v1581_v37 = vsel %vm1553_vm14, %v1548_v60, %v1301_v62 }
 0x16d   : > { %v2436_v23 = vpop.f32.mrf.mxu0  ;;  %2459 = vmatmul.mubr.msk.bf16.gmra.mxu1 %vm1606_vm15, %v1581_v37  ;;  %v1354_v14 = vsel %vm1306_vm7, %v3253_v57, %v1015_v33 }
 0x16e   : > { %v2379_v50 = vpack.c.bf16 %v2436_v23, %v2436_v23  ;;  %v2038_v38 = vmul.f32 %v2436_v23, %v2436_v23  ;;  %v1968_v4 = vsel %vm1306_vm7, %v2436_v23, 0.0 }
 0x16f   : > { %v1677_v49 = vpop.f32.mrf.mxu0  ;;  %v1093_v39 = vpop.permute.xlu0 %1092 }
 0x170   : > { %1935 = vst.msk [vmem:[%s3444_s12 + $0x8] sm:$0xf] %vm1932_vm0, %v2379_v50  ;;  %v1095_v36 = vpop.permute.xlu1 %1094  ;;  %v2377_v2 = vpack.c.bf16 %v1677_v49, %v1677_v49  ;;  %v2036_v32 = vmul.f32 %v1677_v49, %v1677_v49  ;;  %v1965_v21 = vsel %vm1306_vm7, %v1677_v49, 0.0  ;;  %v2071_v34 = vsel %vm1306_vm7, %v2038_v38, 0.0 }
 0x171   : > { %v2437_v42 = vpop.f32.mrf.mxu0  ;;  %v1385_v54 = vsel %vm1355_vm8, %v1351_v13, %v1093_v39  ;;  %v1387_v45 = vsel %vm1355_vm8, %v1354_v14, %v1095_v36 }
 0x172   : > { %1933 = vst.msk [vmem:[%s3444_s12] sm:$0xf] %vm1932_vm0, %v2377_v2  ;;  %v2380_v7 = vpack.c.bf16 %v2437_v42, %v2437_v42  ;;  %v2068_v18 = vsel %vm1306_vm7, %v2036_v32, 0.0  ;;  %v2039_v8 = vmul.f32 %v2437_v42, %v2437_v42  ;;  %v1970_v15 = vsel %vm1306_vm7, %v2437_v42, 0.0 }
 0x173   : > { %v1680_v35 = vpop.f32.mrf.mxu0  ;;  %v1128_v40 = vpop.permute.xlu0 %1127 }
 0x174   : > { %1936 = vst.msk [vmem:[%s3444_s12 + $0xc] sm:$0xf] %vm1932_vm0, %v2380_v7  ;;  %v1130_v10 = vpop.permute.xlu1 %1129  ;;  %v2378_v31 = vpack.c.bf16 %v1680_v35, %v1680_v35  ;;  %v1966_v27 = vsel %vm1306_vm7, %v1680_v35, 0.0  ;;  %v2037_v41 = vmul.f32 %v1680_v35, %v1680_v35  ;;  %v2073_v63 = vsel %vm1306_vm7, %v2039_v8, 0.0 }
 0x175   : > { %v1967_v24 = vadd.f32 %v1966_v27, %v1965_v21  ;;  %v1418_v44 = vsel %vm1388_vm9, %v1385_v54, %v1128_v40  ;;  %v1420_v6 = vsel %vm1388_vm9, %v1387_v45, %v1130_v10 }
 0x176   : > { %1934 = vst.msk [vmem:[%s3444_s12 + $0x4] sm:$0xf] %vm1932_vm0, %v2378_v31  ;;  %v2069_v55 = vsel %vm1306_vm7, %v2037_v41, 0.0 }
 0x177   : > { %v1969_v11 = vadd.f32 %v1968_v4, %v1967_v24  ;;  %v2070_v52 = vadd.f32 %v2069_v55, %v2068_v18  ;;  %v1163_v58 = vpop.permute.xlu0 %1162 }
 0x178   : > { %v1165_v59 = vpop.permute.xlu1 %1164  ;;  %v1451_v17 = vsel %vm1421_vm10, %v1418_v44, %v1163_v58 }
 0x179   : > { %v2072_v61 = vadd.f32 %v2071_v34, %v2070_v52  ;;  %v1971_v30 = vadd.f32 %v1970_v15, %v1969_v11  ;;  %v1453_v5 = vsel %vm1421_vm10, %v1420_v6, %v1165_v59 }
 0x17b   : > { %v1198_v51 = vpop.permute.xlu0 %1197  ;;  %v2074_v9 = vadd.f32 %v2073_v63, %v2072_v61 }
 0x17c   : > { %v1200_v43 = vpop.permute.xlu1 %1199  ;;  %v1484_v46 = vsel %vm1454_vm11, %v1451_v17, %v1198_v51 }
 0x17d   : > { %v1486_v25 = vsel %vm1454_vm11, %v1453_v5, %v1200_v43 }
 0x17f   : > { %v1233_v47 = vpop.permute.xlu0 %1232 }
 0x180   : > { %v1235_v12 = vpop.permute.xlu1 %1234  ;;  %v1517_v57 = vsel %vm1487_vm12, %v1484_v46, %v1233_v47 }
 0x181   : > { %v1519_v3 = vsel %vm1487_vm12, %v1486_v25, %v1235_v12 }
 0x183   : > { %v1268_v48 = vpop.permute.xlu0 %1267 }
 0x184   : > { %v1270_v19 = vpop.permute.xlu1 %1269  ;;  %v1550_v29 = vsel %vm1520_vm13, %v1517_v57, %v1268_v48 }
 0x185   : > { %v1552_v1 = vsel %vm1520_vm13, %v1519_v3, %v1270_v19 }
 0x187   : > { %v1303_v28 = vpop.permute.xlu0 %1302 }
 0x188   : > { %v1305_v26 = vpop.permute.xlu1 %1304  ;;  %v1583_v0 = vsel %vm1553_vm14, %v1550_v29, %v1303_v28 }
 0x189   : > { %v1585_v22 = vsel %vm1553_vm14, %v1552_v1, %v1305_v26  ;;  %2462 = vmatprep.mubr.msk.bf16.mxu1 %vm1606_vm15, %v1583_v0 }
 0x18a   : > { %2463 = vmatmul.mubr.msk.bf16.gmra.mxu1 %vm1606_vm15, %v1585_v22 }
 0x18d   : > { %v2440_v56 = vpop.f32.mrf.mxu0 }
 0x18e   : > { %v2383_v53 = vpack.c.bf16 %v2440_v56, %v2440_v56  ;;  %v2042_v36 = vmul.f32 %v2440_v56, %v2440_v56  ;;  %v1976_v38 = vsel %vm1306_vm7, %v2440_v56, 0.0 }
 0x18f   : > { %v1693_v20 = vpop.f32.mrf.mxu0 }
 0x190   : > { %1939 = vst.msk [vmem:[%s3444_s12 + $0x18] sm:$0xf] %vm1932_vm0, %v2383_v53  ;;  %v2381_v16 = vpack.c.bf16 %v1693_v20, %v1693_v20  ;;  %v1972_v60 = vsel %vm1306_vm7, %v1693_v20, 0.0  ;;  %v2040_v62 = vmul.f32 %v1693_v20, %v1693_v20  ;;  %v2079_v31 = vsel %vm1306_vm7, %v2042_v36, 0.0 }
 0x191   : > { %v1973_v33 = vadd.f32 %v1972_v60, %v1971_v30  ;;  %v2441_v37 = vpop.f32.mrf.mxu0 }
 0x192   : > { %1937 = vst.msk [vmem:[%s3444_s12 + $0x10] sm:$0xf] %vm1932_vm0, %v2381_v16  ;;  %v2075_v23 = vsel %vm1306_vm7, %v2040_v62, 0.0  ;;  %v2384_v50 = vpack.c.bf16 %v2441_v37, %v2441_v37  ;;  %v2043_v35 = vmul.f32 %v2441_v37, %v2441_v37  ;;  %v1978_v27 = vsel %vm1306_vm7, %v2441_v37, 0.0 }
 0x193   : > { %v2076_v49 = vadd.f32 %v2075_v23, %v2074_v9  ;;  %v1696_v39 = vpop.f32.mrf.mxu0 }
 0x194   : > { %1940 = vst.msk [vmem:[%s3444_s12 + $0x1c] sm:$0xf] %vm1932_vm0, %v2384_v50  ;;  %v2382_v2 = vpack.c.bf16 %v1696_v39, %v1696_v39  ;;  %v1974_v42 = vsel %vm1306_vm7, %v1696_v39, 0.0  ;;  %v2041_v32 = vmul.f32 %v1696_v39, %v1696_v39  ;;  %v2081_v4 = vsel %vm1306_vm7, %v2043_v35, 0.0 }
 0x195   : > { %v1975_v7 = vadd.f32 %v1974_v42, %v1973_v33 }
 0x196   : > { %1938 = vst.msk [vmem:[%s3444_s12 + $0x14] sm:$0xf] %vm1932_vm0, %v2382_v2  ;;  %v2077_v40 = vsel %vm1306_vm7, %v2041_v32, 0.0 }
 0x197   : > { %v1977_v21 = vadd.f32 %v1976_v38, %v1975_v7  ;;  %v2078_v10 = vadd.f32 %v2077_v40, %v2076_v49 }
 0x199   : > { %v2080_v41 = vadd.f32 %v2079_v31, %v2078_v10  ;;  %v1979_v24 = vadd.f32 %v1978_v27, %v1977_v21 }
 0x19b   : > { %v2082_v18 = vadd.f32 %v2081_v4, %v2080_v41 }
 0x1ad   : > { %v2444_v8 = vpop.f32.mrf.mxu0 }
 0x1ae   : > { %v2387_v55 = vpack.c.bf16 %v2444_v8, %v2444_v8  ;;  %v2046_v9 = vmul.f32 %v2444_v8, %v2444_v8  ;;  %v1984_v14 = vsel %vm1306_vm7, %v2444_v8, 0.0 }
 0x1af   : > { %v1709_v11 = vpop.f32.mrf.mxu0 }
 0x1b0   : > { %1943 = vst.msk [vmem:[%s3444_s12 + $0x28] sm:$0xf] %vm1932_vm0, %v2387_v55  ;;  %v2385_v52 = vpack.c.bf16 %v1709_v11, %v1709_v11  ;;  %v1980_v58 = vsel %vm1306_vm7, %v1709_v11, 0.0  ;;  %v2044_v34 = vmul.f32 %v1709_v11, %v1709_v11  ;;  %v2087_v6 = vsel %vm1306_vm7, %v2046_v9, 0.0 }
 0x1b1   : > { %v1981_v15 = vadd.f32 %v1980_v58, %v1979_v24  ;;  %v2445_v59 = vpop.f32.mrf.mxu0 }
 0x1b2   : > { %1941 = vst.msk [vmem:[%s3444_s12 + $0x20] sm:$0xf] %vm1932_vm0, %v2385_v52  ;;  %v2083_v61 = vsel %vm1306_vm7, %v2044_v34, 0.0  ;;  %v2388_v30 = vpack.c.bf16 %v2445_v59, %v2445_v59  ;;  %v2047_v54 = vmul.f32 %v2445_v59, %v2445_v59  ;;  %v1986_v17 = vsel %vm1306_vm7, %v2445_v59, 0.0 }
 0x1b3   : > { %v2084_v63 = vadd.f32 %v2083_v61, %v2082_v18  ;;  %v1712_v51 = vpop.f32.mrf.mxu0 }
 0x1b4   : > { %1944 = vst.msk [vmem:[%s3444_s12 + $0x2c] sm:$0xf] %vm1932_vm0, %v2388_v30  ;;  %v2386_v43 = vpack.c.bf16 %v1712_v51, %v1712_v51  ;;  %v1982_v47 = vsel %vm1306_vm7, %v1712_v51, 0.0  ;;  %v2045_v12 = vmul.f32 %v1712_v51, %v1712_v51  ;;  %v2089_v46 = vsel %vm1306_vm7, %v2047_v54, 0.0 }
 0x1b5   : > { %v1983_v13 = vadd.f32 %v1982_v47, %v1981_v15 }
 0x1b6   : > { %1942 = vst.msk [vmem:[%s3444_s12 + $0x24] sm:$0xf] %vm1932_vm0, %v2386_v43  ;;  %v2085_v45 = vsel %vm1306_vm7, %v2045_v12, 0.0 }
 0x1b7   : > { %v1985_v44 = vadd.f32 %v1984_v14, %v1983_v13  ;;  %v2086_v48 = vadd.f32 %v2085_v45, %v2084_v63 }
 0x1b9   : > { %v2088_v19 = vadd.f32 %v2087_v6, %v2086_v48  ;;  %v1987_v5 = vadd.f32 %v1986_v17, %v1985_v44 }
 0x1bb   : > { %v2090_v25 = vadd.f32 %v2089_v46, %v2088_v19 }
 0x1cd   : > { %v2448_v57 = vpop.f32.mrf.mxu0 }
 0x1ce   : > { %v2391_v3 = vpack.c.bf16 %v2448_v57, %v2448_v57  ;;  %v2050_v60 = vmul.f32 %v2448_v57, %v2448_v57  ;;  %v1992_v50 = vsel %vm1306_vm7, %v2448_v57, 0.0 }
 0x1cf   : > { %v1725_v29 = vpop.f32.mrf.mxu0 }
 0x1d0   : > { %1947 = vst.msk [vmem:[%s3444_s12 + $0x38] sm:$0xf] %vm1932_vm0, %v2391_v3  ;;  %v2389_v28 = vpack.c.bf16 %v1725_v29, %v1725_v29  ;;  %v1988_v1 = vsel %vm1306_vm7, %v1725_v29, 0.0  ;;  %v2048_v26 = vmul.f32 %v1725_v29, %v1725_v29  ;;  %v2095_v42 = vsel %vm1306_vm7, %v2050_v60, 0.0 }
 0x1d1   : > { %v1989_v0 = vadd.f32 %v1988_v1, %v1987_v5  ;;  %v2449_v22 = vpop.f32.mrf.mxu0 }
 0x1d2   : > { %1945 = vst.msk [vmem:[%s3444_s12 + $0x30] sm:$0xf] %vm1932_vm0, %v2389_v28  ;;  %v2091_v56 = vsel %vm1306_vm7, %v2048_v26, 0.0  ;;  %v2392_v53 = vpack.c.bf16 %v2449_v22, %v2449_v22  ;;  %v2051_v49 = vmul.f32 %v2449_v22, %v2449_v22  ;;  %v1994_v32 = vsel %vm1306_vm7, %v2449_v22, 0.0 }
 0x1d3   : > { %v2092_v20 = vadd.f32 %v2091_v56, %v2090_v25  ;;  %v1728_v16 = vpop.f32.mrf.mxu0 }
 0x1d4   : > { %1948 = vst.msk [vmem:[%s3444_s12 + $0x3c] sm:$0xf] %vm1932_vm0, %v2392_v53  ;;  %v2390_v62 = vpack.c.bf16 %v1728_v16, %v1728_v16  ;;  %v1990_v33 = vsel %vm1306_vm7, %v1728_v16, 0.0  ;;  %v2049_v37 = vmul.f32 %v1728_v16, %v1728_v16  ;;  %v2097_v35 = vsel %vm1306_vm7, %v2051_v49, 0.0 }
 0x1d5   : > { %v1991_v23 = vadd.f32 %v1990_v33, %v1989_v0 }
 0x1d6   : > { %1946 = vst.msk [vmem:[%s3444_s12 + $0x34] sm:$0xf] %vm1932_vm0, %v2390_v62  ;;  %v2093_v39 = vsel %vm1306_vm7, %v2049_v37, 0.0 }
 0x1d7   : > { %v1993_v36 = vadd.f32 %v1992_v50, %v1991_v23  ;;  %v2094_v2 = vadd.f32 %v2093_v39, %v2092_v20 }
 0x1d9   : > { %v2096_v7 = vadd.f32 %v2095_v42, %v2094_v2  ;;  %v1995_v38 = vadd.f32 %v1994_v32, %v1993_v36 }
 0x1db   : > { %v2098_v40 = vadd.f32 %v2097_v35, %v2096_v7 }
 0x1ed   : > { %v2452_v21 = vpop.f32.mrf.mxu1 }
 0x1ee   : > { %v2395_v10 = vpack.c.bf16 %v2452_v21, %v2452_v21  ;;  %v2054_v58 = vmul.f32 %v2452_v21, %v2452_v21  ;;  %v2000_v30 = vsel %vm1306_vm7, %v2452_v21, 0.0 }
 0x1ef   : > { %v1741_v31 = vpop.f32.mrf.mxu1 }
 0x1f0   : > { %1951 = vst.msk [vmem:[%s3444_s12 + $0x48] sm:$0xf] %vm1932_vm0, %v2395_v10  ;;  %v2393_v27 = vpack.c.bf16 %v1741_v31, %v1741_v31  ;;  %v1996_v41 = vsel %vm1306_vm7, %v1741_v31, 0.0  ;;  %v2052_v24 = vmul.f32 %v1741_v31, %v1741_v31  ;;  %v2103_v47 = vsel %vm1306_vm7, %v2054_v58, 0.0 }
 0x1f1   : > { %v1997_v4 = vadd.f32 %v1996_v41, %v1995_v38  ;;  %v2453_v18 = vpop.f32.mrf.mxu1 }
 0x1f2   : > { %1949 = vst.msk [vmem:[%s3444_s12 + $0x40] sm:$0xf] %vm1932_vm0, %v2393_v27  ;;  %v2099_v8 = vsel %vm1306_vm7, %v2052_v24, 0.0  ;;  %v2396_v55 = vpack.c.bf16 %v2453_v18, %v2453_v18  ;;  %v2055_v63 = vmul.f32 %v2453_v18, %v2453_v18  ;;  %v2002_v12 = vsel %vm1306_vm7, %v2453_v18, 0.0 }
 0x1f3   : > { %v2100_v11 = vadd.f32 %v2099_v8, %v2098_v40  ;;  %v1744_v52 = vpop.f32.mrf.mxu1 }
 0x1f4   : > { %1952 = vst.msk [vmem:[%s3444_s12 + $0x4c] sm:$0xf] %vm1932_vm0, %v2396_v55  ;;  %v2394_v34 = vpack.c.bf16 %v1744_v52, %v1744_v52  ;;  %v1998_v15 = vsel %vm1306_vm7, %v1744_v52, 0.0  ;;  %v2053_v59 = vmul.f32 %v1744_v52, %v1744_v52  ;;  %v2105_v54 = vsel %vm1306_vm7, %v2055_v63, 0.0 }
 0x1f5   : > { %v1999_v61 = vadd.f32 %v1998_v15, %v1997_v4 }
 0x1f6   : > { %1950 = vst.msk [vmem:[%s3444_s12 + $0x44] sm:$0xf] %vm1932_vm0, %v2394_v34  ;;  %v2101_v51 = vsel %vm1306_vm7, %v2053_v59, 0.0 }
 0x1f7   : > { %v2001_v9 = vadd.f32 %v2000_v30, %v1999_v61  ;;  %v2102_v43 = vadd.f32 %v2101_v51, %v2100_v11 }
 0x1f9   : > { %v2104_v13 = vadd.f32 %v2103_v47, %v2102_v43  ;;  %v2003_v14 = vadd.f32 %v2002_v12, %v2001_v9 }
 0x1fb   : > { %v2106_v45 = vadd.f32 %v2105_v54, %v2104_v13 }
 0x20d   : > { %v2456_v44 = vpop.f32.mrf.mxu1 }
 0x20e   : > { %v2399_v48 = vpack.c.bf16 %v2456_v44, %v2456_v44  ;;  %v2058_v50 = vmul.f32 %v2456_v44, %v2456_v44  ;;  %v2008_v39 = vsel %vm1306_vm7, %v2456_v44, 0.0 }
 0x20f   : > { %v1757_v6 = vpop.f32.mrf.mxu1 }
 0x210   : > { %1955 = vst.msk [vmem:[%s3444_s12 + $0x58] sm:$0xf] %vm1932_vm0, %v2399_v48  ;;  %v2397_v17 = vpack.c.bf16 %v1757_v6, %v1757_v6  ;;  %v2056_v0 = vmul.f32 %v1757_v6, %v1757_v6  ;;  %v2004_v53 = vsel %vm1306_vm7, %v1757_v6, 0.0  ;;  %v2111_v2 = vsel %vm1306_vm7, %v2058_v50, 0.0 }
 0x211   : > { %v2457_v19 = vpop.f32.mrf.mxu1  ;;  %v2005_v62 = vadd.f32 %v2004_v53, %v2003_v14 }
 0x212   : > { %1953 = vst.msk [vmem:[%s3444_s12 + $0x50] sm:$0xf] %vm1932_vm0, %v2397_v17  ;;  %v2400_v5 = vpack.c.bf16 %v2457_v19, %v2457_v19  ;;  %v2107_v16 = vsel %vm1306_vm7, %v2056_v0, 0.0  ;;  %v2059_v42 = vmul.f32 %v2457_v19, %v2457_v19  ;;  %v2010_v38 = vsel %vm1306_vm7, %v2457_v19, 0.0 }
 0x213   : > { %v1760_v46 = vpop.f32.mrf.mxu1  ;;  %v2108_v37 = vadd.f32 %v2107_v16, %v2106_v45 }
 0x214   : > { %1956 = vst.msk [vmem:[%s3444_s12 + $0x5c] sm:$0xf] %vm1932_vm0, %v2400_v5  ;;  %v2398_v25 = vpack.c.bf16 %v1760_v46, %v1760_v46  ;;  %v2057_v20 = vmul.f32 %v1760_v46, %v1760_v46  ;;  %v2006_v60 = vsel %vm1306_vm7, %v1760_v46, 0.0  ;;  %v2113_v10 = vsel %vm1306_vm7, %v2059_v42, 0.0 }
 0x215   : > { %v2007_v23 = vadd.f32 %v2006_v60, %v2005_v62 }
 0x216   : > { %1954 = vst.msk [vmem:[%s3444_s12 + $0x54] sm:$0xf] %vm1932_vm0, %v2398_v25  ;;  %v2109_v33 = vsel %vm1306_vm7, %v2057_v20, 0.0 }
 0x217   : > { %v2110_v49 = vadd.f32 %v2109_v33, %v2108_v37  ;;  %v2009_v36 = vadd.f32 %v2008_v39, %v2007_v23 }
 0x219   : > { %v2112_v7 = vadd.f32 %v2111_v2, %v2110_v49  ;;  %v2011_v21 = vadd.f32 %v2010_v38, %v2009_v36 }
 0x21b   : > { %v2114_v24 = vadd.f32 %v2113_v10, %v2112_v7 }
 0x22d   : > { %v2460_v57 = vpop.f32.mrf.mxu1 }
 0x22e   : > { %v2403_v3 = vpack.c.bf16 %v2460_v57, %v2460_v57  ;;  %v2062_v55 = vmul.f32 %v2460_v57, %v2460_v57  ;;  %v2016_v52 = vsel %vm1306_vm7, %v2460_v57, 0.0 }
 0x22f   : > { %v1773_v29 = vpop.f32.mrf.mxu1 }
 0x230   : > { %1959 = vst.msk [vmem:[%s3444_s12 + $0x68] sm:$0xf] %vm1932_vm0, %v2403_v3  ;;  %v2401_v28 = vpack.c.bf16 %v1773_v29, %v1773_v29  ;;  %v2060_v32 = vmul.f32 %v1773_v29, %v1773_v29  ;;  %v2012_v35 = vsel %vm1306_vm7, %v1773_v29, 0.0  ;;  %v2119_v15 = vsel %vm1306_vm7, %v2062_v55, 0.0 }
 0x231   : > { %v2461_v1 = vpop.f32.mrf.mxu1  ;;  %v2013_v41 = vadd.f32 %v2012_v35, %v2011_v21 }
 0x232   : > { %1957 = vst.msk [vmem:[%s3444_s12 + $0x60] sm:$0xf] %vm1932_vm0, %v2401_v28  ;;  %v2404_v26 = vpack.c.bf16 %v2461_v1, %v2461_v1  ;;  %v2115_v31 = vsel %vm1306_vm7, %v2060_v32, 0.0  ;;  %v2063_v59 = vmul.f32 %v2461_v1, %v2461_v1  ;;  %v2018_v51 = vsel %vm1306_vm7, %v2461_v1, 0.0 }
 0x233   : > { %v1776_v22 = vpop.f32.mrf.mxu1  ;;  %v2116_v18 = vadd.f32 %v2115_v31, %v2114_v24 }
 0x234   : > { %1960 = vst.msk [vmem:[%s3444_s12 + $0x6c] sm:$0xf] %vm1932_vm0, %v2404_v26  ;;  %v2402_v56 = vpack.c.bf16 %v1776_v22, %v1776_v22  ;;  %v2061_v40 = vmul.f32 %v1776_v22, %v1776_v22  ;;  %v2014_v27 = vsel %vm1306_vm7, %v1776_v22, 0.0  ;;  %v2121_v14 = vsel %vm1306_vm7, %v2063_v59, 0.0 }
 0x235   : > { %v2015_v8 = vadd.f32 %v2014_v27, %v2013_v41 }
 0x236   : > { %1958 = vst.msk [vmem:[%s3444_s12 + $0x64] sm:$0xf] %vm1932_vm0, %v2402_v56  ;;  %v2117_v4 = vsel %vm1306_vm7, %v2061_v40, 0.0 }
 0x237   : > { %v2118_v11 = vadd.f32 %v2117_v4, %v2116_v18  ;;  %v2017_v58 = vadd.f32 %v2016_v52, %v2015_v8 }
 0x239   : > { %v2120_v30 = vadd.f32 %v2119_v15, %v2118_v11  ;;  %v2019_v12 = vadd.f32 %v2018_v51, %v2017_v58 }
 0x23b   : > { %v2122_v48 = vadd.f32 %v2121_v14, %v2120_v30 }
 0x24a   : > { %v2464_v34 = vpop.f32.mrf.mxu1 }
 0x24b   : > { %v2407_v61 = vpack.c.bf16 %v2464_v34, %v2464_v34  ;;  %v2066_v17 = vmul.f32 %v2464_v34, %v2464_v34  ;;  %v2024_v3 = vsel %vm1306_vm7, %v2464_v34, 0.0 }
 0x24c   : > { %v1789_v63 = vpop.f32.mrf.mxu1 }
 0x24d   : > { %1963 = vst.msk [vmem:[%s3444_s12 + $0x78] sm:$0xf] %vm1932_vm0, %v2407_v61  ;;  %v2405_v9 = vpack.c.bf16 %v1789_v63, %v1789_v63  ;;  %v2020_v43 = vsel %vm1306_vm7, %v1789_v63, 0.0  ;;  %v2064_v47 = vmul.f32 %v1789_v63, %v1789_v63  ;;  %v2127_v0 = vsel %vm1306_vm7, %v2066_v17, 0.0 }
 0x24e   : > { %v2465_v13 = vpop.f32.mrf.mxu1  ;;  %v2021_v44 = vadd.f32 %v2020_v43, %v2019_v12 }
 0x24f   : > { %1961 = vst.msk [vmem:[%s3444_s12 + $0x70] sm:$0xf] %vm1932_vm0, %v2405_v9  ;;  %v2123_v54 = vsel %vm1306_vm7, %v2064_v47, 0.0  ;;  %v2408_v45 = vpack.c.bf16 %v2465_v13, %v2465_v13  ;;  %v2067_v29 = vmul.f32 %v2465_v13, %v2465_v13  ;;  %v2026_v22 = vsel %vm1306_vm7, %v2465_v13, 0.0 }
 0x250   : > { %v1792_v6 = vpop.f32.mrf.mxu1  ;;  %v2124_v25 = vadd.f32 %v2123_v54, %v2122_v48 }
 0x251   : > { %1964 = vst.msk [vmem:[%s3444_s12 + $0x7c] sm:$0xf] %vm1932_vm0, %v2408_v45  ;;  %v2406_v19 = vpack.c.bf16 %v1792_v6, %v1792_v6  ;;  %v2022_v5 = vsel %vm1306_vm7, %v1792_v6, 0.0  ;;  %v2065_v46 = vmul.f32 %v1792_v6, %v1792_v6  ;;  %v2129_v20 = vsel %vm1306_vm7, %v2067_v29, 0.0 }
 0x252   : > { %v2023_v57 = vadd.f32 %v2022_v5, %v2021_v44 }
 0x253   : > { %1962 = vst.msk [vmem:[%s3444_s12 + $0x74] sm:$0xf] %vm1932_vm0, %v2406_v19  ;;  %v2125_v28 = vsel %vm1306_vm7, %v2065_v46, 0.0 }
 0x254   : > { %v2025_v1 = vadd.f32 %v2024_v3, %v2023_v57  ;;  %v2126_v26 = vadd.f32 %v2125_v28, %v2124_v25 }
 0x256   : > { %v2027_v56 = vadd.f32 %v2026_v22, %v2025_v1  ;;  %v2128_v53 = vadd.f32 %v2127_v0, %v2126_v26 }
 0x258   : > { %v2028_v16 = vrot.slane %v2027_v56, 4  ;;  %v2130_v60 = vadd.f32 %v2129_v20, %v2128_v53 }
 0x25a   : > { %v2029_v62 = vadd.f32 %v2028_v16, %v2027_v56  ;;  %v2131_v33 = vrot.slane %v2130_v60, 4 }
 0x25c   : > { %v2030_v37 = vrot.slane %v2029_v62, 2  ;;  %v2132_v23 = vadd.f32 %v2131_v33, %v2130_v60 }
 0x25e   : > { %v2031_v50 = vadd.f32 %v2030_v37, %v2029_v62  ;;  %v2133_v49 = vrot.slane %v2132_v23, 2 }
 0x260   : > { %v2032_v39 = vrot.slane %v2031_v50, 1  ;;  %v2134_v36 = vadd.f32 %v2133_v49, %v2132_v23 }
 0x262   : > { %v2033_v2 = vadd.f32 %v2032_v39, %v2031_v50  ;;  %v2135_v42 = vrot.slane %v2134_v36, 1 }
 0x264   : > { %2035 = vst.msk [vmem:[%s211_s17] sm:$0x1] %vm2034_vm1, %v2033_v2  ;;  %v2136_v32 = vadd.f32 %v2135_v42, %v2134_v36 }
 0x266   : > { %2137 = vst.msk [vmem:[%s214_s20] sm:$0x1] %vm2034_vm1, %v2136_v32 }
 0x267 PF: > { %s15_s15 = sadd.s32 1, %s2518_s15  }
 0x268   : > { %p12_p4 = scmp.ge.s32.totalorder %s15_s15, 4  }
 0x26a   :  { %14 = sbr.rel (!%p12_p4) target bundleno = 1 (0x1), region = 82 }

// kernel: basic_block_forward.4
= control target key start
LH: loop header
LB: loop body
LE: loop exit
PB: predicated region body
PF: predicated region fallthrough
CT: control target
= control target key end

     0   :  { %s5236_s21 = smov 0   ;;  %s7253_s0 = inlined_call_operand.vmem [shape: bf16[2,16,16,4], index: 0, kind: input, shape index: {}]   ;;  %s7254_s1 = inlined_call_operand.vmem [shape: f32[1,4], index: 1, kind: input, shape index: {}]   ;;  %s7255_s2 = inlined_call_operand.vmem [shape: f32[1,4], index: 2, kind: input, shape index: {}]   ;;  %s7256_s3 = inlined_call_operand.vmem [shape: bf16[36,4], index: 3, kind: input, shape index: {}]   ;;  %s7257_s4 = inlined_call_operand.vmem [shape: bf16[2,16,16,4], index: 4, kind: output, shape index: {0}]   ;;  %s7258_s5 = inlined_call_operand.vmem [shape: f32[2,1,4], index: 5, kind: output, shape index: {1}]   ;;  %s7259_s6 = inlined_call_operand.vmem [shape: f32[2,1,4], index: 6, kind: output, shape index: {2}]  }
   0x1 LB: > { %s4600_s22 = sadd.s32 4294967295, %s5190_s21   ;;  %p4604_p0 = scmp.ge.s32.totalorder %s5190_s21, 1  ;;  %s5190_s21 = sphi %s5236_s21, %s17_s21  }
   0x2   : > { %p217_p1 = scmp.lt.s32.totalorder %s5190_s21, 3 }
   0x4   : > { %p218_p2 = pnand %p4604_p0, %p217_p1 }
   0x5   : > { %p253_p3 = scmp.lt.s32.totalorder (!%p218_p2), %s4600_s22, 1  ;;  %s5193_s7 = smov (!%p218_p2), 8  }
   0x6   : > { %221 = sbr.rel (%p218_p2) target bundleno = 797 (0x31d), region = 36  ;;  %s5194_s8 = smov (!%p218_p2), 4  }
   0x7   : > { %s5195_s9 = smov (!%p218_p2), 12   ;;  %s5196_s10 = smov (!%p218_p2), 24  }
   0x8   : > { %s5197_s11 = smov (!%p218_p2), 20   ;;  %s5198_s12 = smov (!%p218_p2), 32  }
   0x9   : > { %s5199_s13 = smov (!%p218_p2), 16   ;;  %s5200_s14 = smov (!%p218_p2), 28  }
   0xb   : > { %vm460_vm0 = vcmask 27648   ;;  %vm468_vm1 = vcmask 24576   ;;  %vm469_vm2 = vsmask.f32 256  ;;  %v5192_v0 = vmov 0   ;;  %s7275_s22 = smov (!%p253_p3, %s4600_s22), 1 }
   0xc   : > { %461 = vst.msk [vmem:[#allocation2] sm:$0xf] %vm460_vm0, %v5192_v0  ;;  %462 = vst.msk [vmem:[#allocation2 + $0x4] sm:$0xf] %vm460_vm0, %v5192_v0  ;;  %vm526_vm4 = vsmask.f32 7938 }
   0xd   : > { %463 = vst.msk [vmem:[#allocation2 + $0x8] sm:$0xf] %vm460_vm0, %v5192_v0  ;;  %465 = vst.msk [vmem:[#allocation2 + $0xcc] sm:$0xf] %vm460_vm0, %v5192_v0  ;;  %vm1596_vm5 = vcmask 1042432   ;;  %vm1597_vm6 = vcmask 1046532  }
   0xe   : > { %466 = vst.msk [vmem:[#allocation2 + $0xd0] sm:$0xf] %vm460_vm0, %v5192_v0  ;;  %467 = vst.msk [vmem:[#allocation2 + $0xd4] sm:$0xf] %vm460_vm0, %v5192_v0  ;;  %v477_v2 = vld [vmem:[#allocation2 + $0x18] sm:$0x1] }
   0xf   : > { %vm5252_vm3 = vmand %vm468_vm1, %vm469_vm2  ;;  %v474_v4 = vld [vmem:[#allocation2 + $0xc] sm:$0x1]  ;;  %v480_v5 = vld [vmem:[#allocation2 + $0x24] sm:$0x1]  ;;  %s4888_s23 = sshll.u32 %s7275_s22, 7  ;;  %vm3664_vm14 = vcmask 31744  }
  0x10   : > { %v478_v3 = vsel %vm5252_vm3, 0, %v477_v2  ;;  %v475_v6 = vsel %vm5252_vm3, 0, %v474_v4  ;;  %v481_v7 = vsel %vm5252_vm3, 0, %v480_v5  ;;  %v483_v8 = vld [vmem:[#allocation2 + $0x30] sm:$0x1]  ;;  %vm5265_vm7 = vmand %vm460_vm0, %vm526_vm4  ;;  %s5283_s26 = scalar_lea.vmem %s7253_s0, %s4888_s23  ;;  %vm3713_vm15 = vcmask 64512  }
  0x11   : > { %479 = vst [vmem:[#allocation2 + $0x18] sm:$0x1] %v478_v3  ;;  %476 = vst [vmem:[#allocation2 + $0xc] sm:$0x1] %v475_v6  ;;  %v484_v10 = vsel %vm5252_vm3, 0, %v483_v8  ;;  %v5018_v26 = vld [vmem:[%s5283_s26 + $0x8] sm:$0xff]  }
  0x12   : > { %482 = vst [vmem:[#allocation2 + $0x24] sm:$0x1] %v481_v7  ;;  %v531_v11 = vld [vmem:[#allocation2 + $0x14] sm:$0xf]  ;;  %vm5274_vm8 = vmor %vm1596_vm5, %vm1597_vm6  ;;  %v534_v14 = vld [vmem:[#allocation2 + $0x20] sm:$0xf]  ;;  %v4960_v33 = vunpack.c.l.bf16 %v5018_v26  ;;  %v4961_v36 = vunpack.c.h.bf16 %v5018_v26 }
  0x13   : > { %485 = vst [vmem:[#allocation2 + $0x30] sm:$0x1] %v484_v10  ;;  %v532_v13 = vsel %vm5265_vm7, 0, %v531_v11  ;;  %v1098_v16 = vld [vmem:[#allocation2 + $0x4] sm:$0xf]  ;;  %v5019_v28 = vld [vmem:[%s5283_s26 + $0x10] sm:$0xff]  }
  0x14   : > { %v528_v15 = vld [vmem:[#allocation2 + $0x8] sm:$0xf]  ;;  %v1532_v17 = vld [vmem:[#allocation2] sm:$0xe]  ;;  %vm1145_vm9 = vsmask.f32 3328  ;;  %v4964_v41 = vunpack.c.l.bf16 %v5019_v28  ;;  %v4965_v42 = vunpack.c.h.bf16 %v5019_v28 }
  0x15   : > { %vm1146_vm10 = vsmask.f32 7440  ;;  %v5290_v18 = vld [vmem:[%s7254_s1] ss:$0 sm:$0xff]  ;;  %533 = vst [vmem:[#allocation2 + $0x14] sm:$0xf] %v532_v13 }
  0x16   : > { %v529_v19 = vsel %vm5265_vm7, 0, %v528_v15  ;;  %v4643_v20 = vrot.slane %v1532_v17, 9  ;;  %v1601_v21 = vrot.slane %v1098_v16, 5  ;;  %v471_v22 = vld [vmem:[#allocation2] sm:$0x1]  ;;  %v1158_v23 = vshll.u32 %v1098_v16, 16  ;;  %vm5331_vm12 = vmor %vm1145_vm9, %vm1146_vm10 }
  0x17   : > { %530 = vst [vmem:[#allocation2 + $0x8] sm:$0xf] %v529_v19  ;;  %v472_v24 = vsel %vm5252_vm3, 0, %v471_v22  ;;  %v1162_v25 = vshrl.u32 %v1098_v16, 16  ;;  %v4955_v27 = vld [vmem:[%s5283_s26] sm:$0xff]   ;;  %v535_v29 = vsel %vm5265_vm7, 0, %v534_v14  ;;  %v343_v40 = vmul.f32 %v4960_v33, %v5290_v18 }
  0x18   : > { %v1602_v30 = vsel %vm5274_vm8, %v4643_v20, %v1601_v21  ;;  %v1603_v31 = vrot.slane %v1601_v21, 4  ;;  %473 = vst [vmem:[#allocation2] sm:$0x1] %v472_v24  ;;  %v5303_v32 = vrot.slane %v1158_v23, 5  ;;  %v5306_v34 = vld [vmem:[%s5283_s26 + $0x18] sm:$0xff]   ;;  %v4956_v38 = vunpack.c.l.bf16 %v4955_v27 }
  0x19   : > { %536 = vst [vmem:[#allocation2 + $0x20] sm:$0xf] %v535_v29  ;;  %v1164_v35 = vrot.slane %v1162_v25, 4  ;;  %v5311_v37 = vld [vmem:[%s7255_s2] ss:$0 sm:$0xff]  ;;  %v4957_v39 = vunpack.c.h.bf16 %v4955_v27  ;;  %v4968_v43 = vunpack.c.l.bf16 %v5306_v34  ;;  %v344_v45 = vmul.f32 %v4961_v36, %v5290_v18 }
  0x1a   : > { %vm662_vm11 = vsmask.f32 4368  ;;  %v341_v46 = vmul.f32 %v4956_v38, %v5290_v18  ;;  %v382_v48 = vadd.f32 %v5311_v37, %v343_v40  ;;  %v345_v49 = vmul.f32 %v4964_v41, %v5290_v18  ;;  %v992_v28 = vld [vmem:[#allocation2 + $0x18] sm:$0xf] }
  0x1b   : > { %v1165_v44 = vor.u32 %v1164_v35, %v5303_v32  ;;  %v342_v47 = vmul.f32 %v4957_v39, %v5290_v18  ;;  %v346_v50 = vmul.f32 %v4965_v42, %v5290_v18  ;;  %v4969_v51 = vunpack.c.h.bf16 %v5306_v34  ;;  %vm5342_vm13 = vmor %vm469_vm2, %vm662_vm11 }
  0x1c   : > { %v383_v53 = vadd.f32 %v5311_v37, %v344_v45  ;;  %v380_v54 = vadd.f32 %v5311_v37, %v341_v46  ;;  %v414_v57 = vmax.f32 %v382_v48, 0.0  ;;  %v384_v58 = vadd.f32 %v5311_v37, %v345_v49 }
  0x1d   : > { %v1166_v52 = vrot.slane %v1165_v44, 4  ;;  %v381_v55 = vadd.f32 %v5311_v37, %v342_v47  ;;  %v385_v59 = vadd.f32 %v5311_v37, %v346_v50  ;;  %v347_v60 = vmul.f32 %v4968_v43, %v5290_v18  ;;  %v985_v44 = vld [vmem:[#allocation2 + $0xc] sm:$0xf] }
  0x1e   : > { %v1129_v56 = vld [vmem:[#allocation2 + $0x8] sm:$0x1]  ;;  %v415_v0 = vmax.f32 %v383_v53, 0.0  ;;  %v412_v2 = vmax.f32 %v380_v54, 0.0  ;;  %v4892_v6 = vpack.c.bf16 %v414_v57, %v414_v57  ;;  %v989_v57 = vld [vmem:[#allocation2 + $0x14] sm:$0x1] }
  0x1f   : > { %v1604_v61 = vrot.slane %v1129_v56, 5  ;;  %v1097_v62 = vld [vmem:[#allocation2] sm:$0xf]  ;;  %v1168_v63 = vshll.u32 %v1129_v56, 16  ;;  %v413_v7 = vmax.f32 %v381_v55, 0.0  ;;  %v386_v56 = vadd.f32 %v5311_v37, %v347_v60 }
  0x20   : > { %v1149_v4 = vshrl.u32 %v1097_v62, 16  ;;  %v1152_v5 = vshll.u32 %v1097_v62, 16  ;;  %v4893_v11 = vpack.c.bf16 %v415_v0, %v415_v0  ;;  %v4890_v13 = vpack.c.bf16 %v412_v2, %v412_v2  ;;  %v537_v0 = vld [vmem:[#allocation2 + $0x2c] sm:$0xf] }
  0x21   : > { %v1605_v8 = vsel %vm5274_vm8, %v1603_v31, %v1604_v61  ;;  %v1170_v10 = vrot.slane %v1168_v63, 5  ;;  %v682_v17 = vshrl.u32 %v4892_v6, 16  ;;  %v685_v20 = vshll.u32 %v4892_v6, 16  ;;  %v5363_v6 = vld [vmem:[%s5283_s26 + $0x20] sm:$0xff]  }
  0x22   : > { %v4723_v14 = vcombine.low %v1602_v30, %v1605_v8  ;;  %v1151_v15 = vrot.slane %v1149_v4, 4  ;;  %v1154_v16 = vrot.slane %v1152_v5, 5  ;;  %v690_v21 = vshrl.u32 %v4893_v11, 16 }
  0x23   : > { %v1171_v19 = vsel %vm5331_vm12, %v1166_v52, %v1170_v10  ;;  %v693_v22 = vshll.u32 %v4893_v11, 16  ;;  %v684_v24 = vrot.slane %v682_v17, 7  ;;  %v4891_v25 = vpack.c.bf16 %v413_v7, %v413_v7 }
  0x24   : > { %3120 = vrot.lane.b32.xlu1 %v4723_v14, %s5193_s7  ;;  %v1155_v23 = vor.u32 %v1154_v16, %v1151_v15  ;;  %v665_v26 = vshrl.u32 %v4890_v13, 16  ;;  %v692_v27 = vrot.slane %v690_v21, 7  ;;  %v668_v29 = vshll.u32 %v4890_v13, 16  ;;  %v999_v13 = vld [vmem:[#allocation2 + $0x24] sm:$0xf] }
  0x25   : > { %v416_v30 = vmax.f32 %v384_v58, 0.0  ;;  %v417_v31 = vmax.f32 %v385_v59, 0.0  ;;  %v687_v36 = vor.u32 %v685_v20, %v684_v24  ;;  %v688_v38 = vrot.slane %v684_v24, 4  ;;  %v996_v58 = vld [vmem:[#allocation2 + $0x20] sm:$0x1] }
  0x26   : > { %v1156_v33 = vrot.slane %v1155_v23, 4  ;;  %v667_v39 = vrot.slane %v665_v26, 7  ;;  %v695_v40 = vor.u32 %v693_v22, %v692_v27  ;;  %v697_v41 = vrot.slane %v692_v27, 4 }
  0x27   : > { %v673_v42 = vshrl.u32 %v4891_v25, 16  ;;  %v676_v43 = vshll.u32 %v4891_v25, 16  ;;  %v993_v46 = vsel %vm5265_vm7, %v687_v36, %v992_v28  ;;  %v4894_v53 = vpack.c.bf16 %v416_v30, %v416_v30 }
  0x28   : > { %v1161_v45 = vsel %vm5331_vm12, %v1156_v33, %v5303_v32  ;;  %v670_v47 = vor.u32 %v668_v29, %v667_v39  ;;  %v671_v48 = vrot.slane %v667_v39, 4  ;;  %v696_v50 = vsel %vm5342_vm13, %v688_v38, %v695_v40  ;;  %994 = vst [vmem:[#allocation2 + $0x18] sm:$0xf] %v993_v46 }
  0x29   : > { %v4707_v49 = vcombine.low %v1161_v45, %v1171_v19  ;;  %v675_v52 = vrot.slane %v673_v42, 7  ;;  %995 = vst.msk [vmem:[#allocation2 + $0x1c] sm:$0xf] %vm460_vm0, %v696_v50  ;;  %v4895_v55 = vpack.c.bf16 %v417_v31, %v417_v31  ;;  %v348_v32 = vmul.f32 %v4969_v51, %v5290_v18  ;;  %v540_v51 = vld [vmem:[#allocation2 + $0x38] sm:$0xf] }
  0x2a   : > { %v986_v54 = vsel %vm5265_vm7, %v670_v47, %v985_v44  ;;  %v699_v62 = vshrl.u32 %v4894_v53, 16  ;;  %v702_v63 = vshll.u32 %v4894_v53, 16  ;;  %v418_v34 = vmax.f32 %v386_v56, 0.0  ;;  %v1006_v53 = vld [vmem:[#allocation2 + $0x30] sm:$0xf] }
  0x2b   : > { %3040 = vrot.lane.b32.xlu0 %v4707_v49, %s5194_s8  ;;  %v678_v59 = vor.u32 %v676_v43, %v675_v52  ;;  %v680_v61 = vrot.slane %v675_v52, 4  ;;  %987 = vst [vmem:[#allocation2 + $0xc] sm:$0xf] %v986_v54  ;;  %v707_v2 = vshrl.u32 %v4895_v55, 16  ;;  %v710_v4 = vshll.u32 %v4895_v55, 16 }
  0x2c   : > { %v387_v5 = vadd.f32 %v5311_v37, %v348_v32  ;;  %v701_v7 = vrot.slane %v699_v62, 7  ;;  %v997_v10 = vsel %vm5252_vm3, %v697_v41, %v996_v58  ;;  %v4896_v15 = vpack.c.bf16 %v418_v34, %v418_v34 }
  0x2d   : > { %v679_v60 = vsel %vm5342_vm13, %v671_v48, %v678_v59  ;;  %v990_v8 = vsel %vm5252_vm3, %v680_v61, %v989_v57  ;;  %v5372_v11 = vrot.slane %v707_v2, 7  ;;  %998 = vst [vmem:[#allocation2 + $0x20] sm:$0x1] %v997_v10  ;;  %v538_v16 = vsel %vm5265_vm7, 0, %v537_v0 }
  0x2e   : > { %988 = vst.msk [vmem:[#allocation2 + $0x10] sm:$0xf] %vm460_vm0, %v679_v60  ;;  %v419_v14 = vmax.f32 %v387_v5, 0.0  ;;  %991 = vst [vmem:[#allocation2 + $0x14] sm:$0x1] %v990_v8  ;;  %v704_v17 = vor.u32 %v702_v63, %v701_v7  ;;  %v705_v19 = vrot.slane %v701_v7, 4 }
  0x2f   : > { %539 = vst [vmem:[#allocation2 + $0x2c] sm:$0xf] %v538_v16  ;;  %v541_v20 = vsel %vm5265_vm7, 0, %v540_v51  ;;  %v1713_v22 = vld [vmem:[#allocation2 + $0x18] sm:$0xf]  ;;  %v712_v23 = vor.u32 %v710_v4, %v5372_v11  ;;  %v714_v24 = vrot.slane %v5372_v11, 4 }
  0x30   : > { %v5381_v25 = vld [vmem:[#allocation2 + $0x18] sm:$0xf]  ;;  %v4897_v26 = vpack.c.bf16 %v419_v14, %v419_v14  ;;  %v716_v27 = vshrl.u32 %v4896_v15, 16  ;;  %542 = vst [vmem:[#allocation2 + $0x38] sm:$0xf] %v541_v20  ;;  %v1784_v29 = vshrl.u32 %v1713_v22, 16  ;;  %v1000_v31 = vsel %vm5265_vm7, %v704_v17, %v999_v13 }
  0x31   : > { %v5383_v28 = vld [vmem:[#allocation2 + $0x1c] sm:$0xf]  ;;  %v1787_v30 = vshll.u32 %v1713_v22, 16  ;;  %v713_v41 = vsel %vm5342_vm13, %v705_v19, %v712_v23  ;;  %1001 = vst [vmem:[#allocation2 + $0x24] sm:$0xf] %v1000_v31  ;;  %v2369_v42 = vshrl.u32 %v5381_v25, 16 }
  0x32   : > { %v5387_v33 = vld [vmem:[#allocation2 + $0x1c] sm:$0xf]  ;;  %v1797_v38 = vshrl.u32 %v5383_v28, 16  ;;  %v4740_v39 = vcombine.low %v1713_v22, %v5383_v28  ;;  %v1711_v40 = vld [vmem:[#allocation2 + $0xc] sm:$0xf]  ;;  %v5395_v43 = vrot.slane %v1784_v29, 4 }
  0x33   : > { %v5397_v44 = vrot.slane %v1787_v30, 5  ;;  %v1760_v45 = vshrl.u32 %v1711_v40, 16  ;;  %v1763_v46 = vshll.u32 %v1711_v40, 16  ;;  %1002 = vst.msk [vmem:[#allocation2 + $0x28] sm:$0xf] %vm460_vm0, %v713_v41  ;;  %v5401_v48 = vrot.slane %v2369_v42, 4 }
  0x34   : > { %v2143_v47 = vld [vmem:[#allocation2 + $0xc] sm:$0xe]  ;;  %3218 = vrot.lane.b32.xlu1 %v4740_v39, %s5195_s9  ;;  %v2372_v49 = vshll.u32 %v5381_v25, 16  ;;  %v2382_v50 = vshrl.u32 %v5387_v33, 16  ;;  %v4787_v52 = vcombine.low %v5381_v25, %v5387_v33  ;;  %v718_v57 = vrot.slane %v716_v27, 7 }
  0x35   : > { %v1533_v54 = vld [vmem:[#allocation2 + $0xc] sm:$0xe]  ;;  %v5407_v55 = vld [vmem:[#allocation2 + $0x10] sm:$0xf]  ;;  %v5409_v32 = vrot.slane %v1760_v45, 4  ;;  %v5411_v56 = vrot.slane %v1763_v46, 5  ;;  %v1790_v22 = vor.u32 %v5397_v44, %v5395_v43 }
  0x36   : > { %v719_v58 = vshll.u32 %v4896_v15, 16  ;;  %v1773_v59 = vshrl.u32 %v5407_v55, 16  ;;  %v4739_v61 = vcombine.low %v1711_v40, %v5407_v55  ;;  %v5415_v62 = vrot.slane %v2372_v49, 5  ;;  %v5417_v0 = vld [vmem:[#allocation2 + $0x14] sm:$0x1] }
  0x37   : > { %v724_v63 = vshrl.u32 %v4897_v26, 16  ;;  %v722_v4 = vrot.slane %v718_v57, 4  ;;  %v727_v5 = vshll.u32 %v4897_v26, 16  ;;  %v4659_v34 = vrot.slane %v2143_v47, 9  ;;  %v5419_v51 = vld [vmem:[#allocation2 + $0x10] sm:$0xf] }
  0x38   : > { %v721_v2 = vor.u32 %v719_v58, %v718_v57  ;;  %3216 = vrot.lane.b32.xlu0 %v4739_v61, %s5195_s9  ;;  %v2209_v7 = vrot.slane %v5407_v55, 5  ;;  %v2212_v8 = vrot.slane %v5417_v0, 5  ;;  %v5426_v10 = vld [vmem:[#allocation2 + $0x14] sm:$0x1]  ;;  %v4644_v13 = vrot.slane %v1533_v54, 9 }
  0x39   : > { %v5422_v60 = vrot.slane %v724_v63, 7  ;;  %v2322_v14 = vld [vmem:[#allocation2 + $0x24] sm:$0xf]  ;;  %v1608_v17 = vrot.slane %v5419_v51, 5  ;;  %v1611_v19 = vrot.slane %v5426_v10, 5  ;;  %vm3746_vm2 = vcmask 97280  }
  0x3a   : > { %v1007_v15 = vsel %vm5265_vm7, %v721_v2, %v1006_v53  ;;  %v1715_v16 = vld [vmem:[#allocation2 + $0x24] sm:$0xf]  ;;  %v2752_v20 = vld [vmem:[#allocation2 + $0x18] sm:$0xe]  ;;  %v5434_v23 = vld [vmem:[#allocation2 + $0x28] sm:$0xf] }
  0x3b   : > { %v2393_v25 = vshrl.u32 %v2322_v14, 16  ;;  %v2396_v26 = vshll.u32 %v2322_v14, 16  ;;  %v729_v27 = vor.u32 %v727_v5, %v5422_v60  ;;  %v731_v29 = vrot.slane %v5422_v60, 4  ;;  %1008 = vst [vmem:[#allocation2 + $0x30] sm:$0xf] %v1007_v15 }
  0x3c   : > { %v2406_v30 = vshrl.u32 %v5434_v23, 16  ;;  %v4788_v31 = vcombine.low %v2322_v14, %v5434_v23  ;;  %v5440_v39 = vld [vmem:[#allocation2 + $0x28] sm:$0xf]  ;;  %v1808_v40 = vshrl.u32 %v1715_v16, 16  ;;  %v1811_v41 = vshll.u32 %v1715_v16, 16  ;;  %3472 = vrot.lane.b32.xlu0 %v4787_v52, %s5196_s10 }
  0x3d   : > { %v5442_v42 = vrot.slane %v2393_v25, 4  ;;  %v5444_v45 = vrot.slane %v2396_v26, 5  ;;  %v730_v46 = vsel %vm5342_vm13, %v722_v4, %v729_v27  ;;  %v5450_v49 = vld [vmem:[#allocation2 + $0x20] sm:$0x1]  ;;  %v4741_v57 = vcombine.low %v1715_v16, %v5440_v39  ;;  %v2144_v61 = vld [vmem:[#allocation2 + $0x18] sm:$0xe] }
  0x3e   : > { %3474 = vrot.lane.b32.xlu1 %v4788_v31, %s5196_s10  ;;  %1009 = vst.msk [vmem:[#allocation2 + $0x34] sm:$0xf] %vm460_vm0, %v730_v46  ;;  %v5454_v53 = vrot.slane %v1808_v40, 4  ;;  %v5456_v54 = vrot.slane %v1811_v41, 5  ;;  %v2210_v52 = vsel %vm5274_vm8, %v4659_v34, %v2209_v7  ;;  %v5461_v58 = vld [vmem:[#allocation2 + $0x20] sm:$0x1]  ;;  %v5465_v2 = vsel %vm5274_vm8, %v4644_v13, %v1608_v17 }
  0x3f   : > { %v2211_v63 = vrot.slane %v2209_v7, 4  ;;  %v1610_v4 = vrot.slane %v1608_v17, 4  ;;  %v4675_v5 = vrot.slane %v2752_v20, 9  ;;  %v1003_v14 = vld [vmem:[#allocation2 + $0x2c] sm:$0x1]  ;;  %v2818_v15 = vrot.slane %v5387_v33, 5 }
  0x40   : > { %v2821_v25 = vrot.slane %v5450_v49, 5  ;;  %v4660_v26 = vrot.slane %v2144_v61, 9  ;;  %v2216_v16 = vrot.slane %v5383_v28, 5  ;;  %3220 = vrot.lane.b32.xlu0 %v4741_v57, %s5195_s9  ;;  %v2219_v13 = vrot.slane %v5461_v58, 5  ;;  %v2753_v20 = vld [vmem:[#allocation2 + $0x24] sm:$0xe] }
  0x41   : > { %v2213_v34 = vsel %vm5274_vm8, %v2211_v63, %v2212_v8  ;;  %v1612_v7 = vsel %vm5274_vm8, %v1610_v4, %v1611_v19  ;;  %v1004_v17 = vsel %vm5252_vm3, %v714_v24, %v1003_v14  ;;  %v1535_v27 = vld [vmem:[#allocation2 + $0x24] sm:$0xe]  ;;  %v2819_v46 = vsel %vm5274_vm8, %v4675_v5, %v2818_v15  ;;  %v5483_v57 = vld [vmem:[#allocation2 + $0x28] sm:$0xf]  ;;  %v5489_v63 = vld [vmem:[#allocation2 + $0x1c] sm:$0xf] }
  0x42   : > { %v1717_v31 = vld [vmem:[#allocation2 + $0x30] sm:$0xf]  ;;  %v4771_v40 = vcombine.low %v2210_v52, %v2213_v34  ;;  %v4724_v41 = vcombine.low %v5465_v2, %v1612_v7  ;;  %v2820_v8 = vrot.slane %v2818_v15, 4  ;;  %1005 = vst [vmem:[#allocation2 + $0x2c] sm:$0x1] %v1004_v17  ;;  %v5487_v11 = vsel %vm5274_vm8, %v4660_v26, %v2216_v16 }
  0x43   : > { %v1832_v19 = vshrl.u32 %v1717_v31, 16  ;;  %v1835_v61 = vshll.u32 %v1717_v31, 16  ;;  %v2218_v24 = vrot.slane %v2216_v16, 4  ;;  %v4676_v2 = vrot.slane %v2753_v20, 9  ;;  %v1534_v14 = vld [vmem:[#allocation2 + $0x18] sm:$0xe] }
  0x44   : > { %v2822_v52 = vsel %vm5274_vm8, %v2820_v8, %v2821_v25  ;;  %v2825_v4 = vrot.slane %v5434_v23, 5  ;;  %v4646_v5 = vrot.slane %v1535_v27, 9  ;;  %3376 = vrot.lane.b32.xlu0 %v4771_v40, %s5197_s11  ;;  %v5503_v17 = vld [vmem:[#allocation2 + $0x20] sm:$0x1]  ;;  %v4645_v36 = vrot.slane %v1534_v14, 9 }
  0x45   : > { %v5494_v15 = vld [vmem:[#allocation2 + $0x34] sm:$0xf]  ;;  %v5496_v34 = vrot.slane %v1832_v19, 4  ;;  %v5498_v7 = vrot.slane %v1835_v61, 5  ;;  %v4819_v26 = vcombine.low %v2819_v46, %v2822_v52  ;;  %v2220_v16 = vsel %vm5274_vm8, %v2218_v24, %v2219_v13  ;;  %v2146_v60 = vld [vmem:[#allocation2 + $0x30] sm:$0xe] }
  0x46   : > { %v4742_v20 = vcombine.low %v1717_v31, %v5494_v15  ;;  %v4772_v27 = vcombine.low %v5487_v11, %v2220_v16  ;;  %v2826_v8 = vsel %vm5274_vm8, %v4676_v2, %v2825_v4  ;;  %v2827_v19 = vrot.slane %v2825_v4, 4 }
  0x47   : > { %v1622_v61 = vrot.slane %v5483_v57, 5  ;;  %v1615_v40 = vrot.slane %v5489_v63, 5  ;;  %v1618_v13 = vrot.slane %v5503_v17, 5  ;;  %v1791_v46 = vrot.slane %v1790_v22, 4 }
  0x48   : > { %3222 = vrot.lane.b32.xlu1 %v4742_v20, %s5195_s9  ;;  %v1793_v31 = vshll.u32 %v5383_v28, 16  ;;  %v1799_v11 = vrot.slane %v1797_v38, 4  ;;  %3632 = vrot.lane.b32.xlu0 %v4819_v26, %s5198_s12  ;;  %v1803_v28 = vshll.u32 %v5461_v58, 16  ;;  %v2399_v26 = vor.u32 %v5444_v45, %v5442_v42 }
  0x49   : > { %v2353_v24 = vld [vmem:[#allocation2 + $0x2c] sm:$0x1]  ;;  %v1623_v2 = vsel %vm5274_vm8, %v4646_v5, %v1622_v61  ;;  %v1624_v4 = vrot.slane %v1622_v61, 4  ;;  %v1616_v14 = vsel %vm5274_vm8, %v4645_v36, %v1615_v40  ;;  %v1617_v43 = vrot.slane %v1615_v40, 4 }
  0x4a   : > { %v5521_v52 = vld [vmem:[#allocation2 + $0x2c] sm:$0x1]  ;;  %v2828_v44 = vrot.slane %v2353_v24, 5  ;;  %v1795_v16 = vrot.slane %v1793_v31, 5  ;;  %v2402_v20 = vshll.u32 %v5434_v23, 16  ;;  %v2408_v5 = vrot.slane %v2406_v30, 4 }
  0x4b   : > { %v1625_v22 = vrot.slane %v5521_v52, 5  ;;  %v1619_v38 = vsel %vm5274_vm8, %v1617_v43, %v1618_v13  ;;  %v1099_v61 = vld [vmem:[#allocation2 + $0xc] sm:$0xf]  ;;  %v1805_v43 = vrot.slane %v1803_v28, 5  ;;  %v2400_v21 = vrot.slane %v2399_v26, 4 }
  0x4c   : > { %3122 = vrot.lane.b32.xlu1 %v4724_v41, %s5193_s7  ;;  %v2829_v36 = vsel %vm5274_vm8, %v2827_v19, %v2828_v44  ;;  %v4725_v40 = vcombine.low %v1616_v14, %v1619_v38  ;;  %v1796_v13 = vsel %vm5331_vm12, %v1791_v46, %v1795_v16  ;;  %v1800_v45 = vor.u32 %v1799_v11, %v1795_v16  ;;  %v1101_v14 = vld [vmem:[#allocation2 + $0x18] sm:$0xf] }
  0x4d   : > { %v1626_v58 = vsel %vm5274_vm8, %v1624_v4, %v1625_v22  ;;  %v4820_v31 = vcombine.low %v2826_v8, %v2829_v36  ;;  %v2404_v23 = vrot.slane %v2402_v20, 5  ;;  %v2412_v30 = vshll.u32 %v2353_v24, 16 }
  0x4e   : > { %v4726_v42 = vcombine.low %v1623_v2, %v1626_v58  ;;  %v1173_v47 = vshrl.u32 %v1099_v61, 16  ;;  %v1801_v41 = vrot.slane %v1800_v45, 4  ;;  %v1176_v25 = vshll.u32 %v1099_v61, 16 }
  0x4f   : > { %3634 = vrot.lane.b32.xlu0 %v4820_v31, %s5198_s12  ;;  %v1182_v19 = vshll.u32 %v5419_v51, 16  ;;  %v1186_v4 = vshrl.u32 %v5419_v51, 16  ;;  %v2405_v8 = vsel %vm5331_vm12, %v2400_v21, %v2404_v23  ;;  %v2409_v46 = vor.u32 %v2408_v5, %v2404_v23 }
  0x50   : > { %3378 = vrot.lane.b32.xlu1 %v4772_v27, %s5197_s11  ;;  %v2414_v11 = vrot.slane %v2412_v30, 5  ;;  %v1175_v2 = vrot.slane %v1173_v47, 4  ;;  %v1806_v24 = vsel %vm5331_vm12, %v1801_v41, %v1805_v43  ;;  %v1178_v44 = vrot.slane %v1176_v25, 5 }
  0x51   : > { %v1184_v22 = vrot.slane %v1182_v19, 5  ;;  %v1188_v16 = vrot.slane %v1186_v4, 4  ;;  %v4756_v28 = vcombine.low %v1796_v13, %v1806_v24  ;;  %v2410_v38 = vrot.slane %v2409_v46, 4  ;;  %v1103_v19 = vld [vmem:[#allocation2 + $0x24] sm:$0xf] }
  0x52   : > { %v1192_v26 = vshll.u32 %v5426_v10, 16  ;;  %v1197_v51 = vshrl.u32 %v1101_v14, 16  ;;  %v1179_v27 = vor.u32 %v1178_v44, %v1175_v2  ;;  %v1200_v61 = vshll.u32 %v1101_v14, 16 }
  0x53   : > { %3124 = vrot.lane.b32.xlu0 %v4725_v40, %s5193_s7  ;;  %v1189_v20 = vor.u32 %v1188_v16, %v1184_v22  ;;  %v1206_v21 = vshll.u32 %v5489_v63, 16  ;;  %v2415_v47 = vsel %vm5331_vm12, %v2410_v38, %v2414_v11  ;;  %v1210_v36 = vshrl.u32 %v5489_v63, 16 }
  0x54   : > { %3126 = vrot.lane.b32.xlu1 %v4726_v42, %s5193_s7  ;;  %v1194_v25 = vrot.slane %v1192_v26, 5  ;;  %v1199_v5 = vrot.slane %v1197_v51, 4  ;;  %v4804_v58 = vcombine.low %v2405_v8, %v2415_v47  ;;  %v1180_v13 = vrot.slane %v1179_v27, 4 }
  0x55   : > { %v1190_v10 = vrot.slane %v1189_v20, 4  ;;  %v1202_v31 = vrot.slane %v1200_v61, 5  ;;  %v1208_v45 = vrot.slane %v1206_v21, 5  ;;  %v1212_v40 = vrot.slane %v1210_v36, 4 }
  0x56   : > { %v1216_v43 = vshll.u32 %v5503_v17, 16  ;;  %v1766_v23 = vor.u32 %v5411_v56, %v5409_v32  ;;  %v1185_v42 = vsel %vm5331_vm12, %v1180_v13, %v1184_v22  ;;  %v1769_v63 = vshll.u32 %v5407_v55, 16 }
  0x57   : > { %v1195_v30 = vsel %vm5331_vm12, %v1190_v10, %v1194_v25  ;;  %v1203_v41 = vor.u32 %v1202_v31, %v1199_v5  ;;  %v1213_v14 = vor.u32 %v1212_v40, %v1208_v45  ;;  %v1775_v32 = vrot.slane %v1773_v59, 4 }
  0x58   : > { %3298 = vrot.lane.b32.xlu1 %v4756_v28, %s5199_s13  ;;  %v4708_v4 = vcombine.low %v1185_v42, %v1195_v30  ;;  %v1218_v8 = vrot.slane %v1216_v43, 5  ;;  %v1767_v17 = vrot.slane %v1766_v23, 4  ;;  %v1771_v11 = vrot.slane %v1769_v63, 5 }
  0x59   : > { %v1204_v46 = vrot.slane %v1203_v41, 4  ;;  %v1779_v56 = vshll.u32 %v5417_v0, 16  ;;  %v1214_v2 = vrot.slane %v1213_v14, 4  ;;  %v1221_v24 = vshrl.u32 %v1103_v19, 16  ;;  %v1745_v41 = vld [vmem:[#allocation2 + $0x2c] sm:$0x1] }
  0x5a   : > { %3042 = vrot.lane.b32.xlu0 %v4708_v4, %s5194_s8  ;;  %v1224_v44 = vshll.u32 %v1103_v19, 16  ;;  %v1230_v22 = vshll.u32 %v5483_v57, 16  ;;  %v1772_v28 = vsel %vm5331_vm12, %v1767_v17, %v1771_v11  ;;  %v1776_v38 = vor.u32 %v1775_v32, %v1771_v11 }
  0x5b   : > { %v1209_v16 = vsel %vm5331_vm12, %v1204_v46, %v1208_v45  ;;  %v1781_v26 = vrot.slane %v1779_v56, 5  ;;  %v1219_v55 = vsel %vm5331_vm12, %v1214_v2, %v1218_v8  ;;  %v1223_v59 = vrot.slane %v1221_v24, 4  ;;  %v2145_v24 = vld [vmem:[#allocation2 + $0x24] sm:$0xe] }
  0x5c   : > { %3554 = vrot.lane.b32.xlu1 %v4804_v58, %s5200_s14  ;;  %v1226_v0 = vrot.slane %v1224_v44, 5  ;;  %v1232_v51 = vrot.slane %v1230_v22, 5  ;;  %v4709_v27 = vcombine.low %v1209_v16, %v1219_v55  ;;  %v1777_v20 = vrot.slane %v1776_v38, 4  ;;  %v1010_v58 = vld [vmem:[#allocation2 + $0x38] sm:$0x1] }
  0x5d   : > { %v1234_v61 = vshrl.u32 %v5483_v57, 16  ;;  %v1240_v21 = vshll.u32 %v5521_v52, 16  ;;  %v2375_v25 = vor.u32 %v5415_v62, %v5401_v48  ;;  %v2378_v5 = vshll.u32 %v5387_v33, 16 }
  0x5e   : > { %v1227_v47 = vor.u32 %v1226_v0, %v1223_v59  ;;  %v2384_v36 = vrot.slane %v2382_v50, 4  ;;  %v1782_v13 = vsel %vm5331_vm12, %v1777_v20, %v1781_v26  ;;  %v2388_v45 = vshll.u32 %v5450_v49, 16 }
  0x5f   : > { %v1236_v10 = vrot.slane %v1234_v61, 4  ;;  %v1242_v31 = vrot.slane %v1240_v21, 5  ;;  %v4755_v57 = vcombine.low %v1772_v28, %v1782_v13  ;;  %v2376_v40 = vrot.slane %v2375_v25, 4 }
  0x60   : > { %3044 = vrot.lane.b32.xlu1 %v4709_v27, %s5194_s8  ;;  %v1228_v52 = vrot.slane %v1227_v47, 4  ;;  %v2380_v43 = vrot.slane %v2378_v5, 5  ;;  %v2390_v62 = vrot.slane %v2388_v45, 5  ;;  %v1011_v33 = vsel %vm5252_vm3, %v731_v29, %v1010_v58  ;;  %v486_v27 = vld [vmem:[#allocation2 + $0x3c] sm:$0x1] }
  0x61   : > { %v1237_v48 = vor.u32 %v1236_v10, %v1232_v51  ;;  %v1838_v50 = vor.u32 %v5498_v7, %v5496_v34  ;;  %3296 = vrot.lane.b32.xlu0 %v4755_v57, %s5199_s13  ;;  %1012 = vst [vmem:[#allocation2 + $0x38] sm:$0x1] %v1011_v33  ;;  %v1841_v30 = vshll.u32 %v5494_v15, 16  ;;  %v7270_v29 = vshrl.u32 %v5494_v15, 16 }
  0x62   : > { %v1233_v49 = vsel %vm5331_vm12, %v1228_v52, %v1232_v51  ;;  %v2381_v23 = vsel %vm5331_vm12, %v2376_v40, %v2380_v43  ;;  %v2385_v42 = vor.u32 %v2384_v36, %v2380_v43  ;;  %v1814_v34 = vor.u32 %v5456_v54, %v5454_v53 }
  0x63   : > { %v1238_v63 = vrot.slane %v1237_v48, 4  ;;  %v1839_v19 = vrot.slane %v1838_v50, 4  ;;  %v1847_v4 = vrot.slane %v7270_v29, 4  ;;  %v1843_v14 = vrot.slane %v1841_v30, 5 }
  0x64   : > { %v2386_v7 = vrot.slane %v2385_v42, 4  ;;  %v1817_v8 = vshll.u32 %v5440_v39, 16  ;;  %v7271_v17 = vshrl.u32 %v5440_v39, 16  ;;  %v1815_v32 = vrot.slane %v1814_v34, 4 }
  0x65   : > { %v1243_v11 = vsel %vm5331_vm12, %v1238_v63, %v1242_v31  ;;  %v1827_v56 = vshll.u32 %v1745_v41, 16  ;;  %v4662_v2 = vrot.slane %v2146_v60, 9  ;;  %v1844_v53 = vsel %vm5331_vm12, %v1839_v19, %v1843_v14 }
  0x66   : > { %v1823_v46 = vrot.slane %v7271_v17, 4  ;;  %v4710_v44 = vcombine.low %v1233_v49, %v1243_v11  ;;  %v2391_v22 = vsel %vm5331_vm12, %v2386_v7, %v2390_v62  ;;  %v1848_v54 = vor.u32 %v1847_v4, %v1843_v14  ;;  %v5639_v62 = vld [vmem:[#allocation2 + $0x34] sm:$0xf]  ;;  %v1105_v7 = vld [vmem:[#allocation2 + $0x30] sm:$0xf] }
  0x67   : > { %v4803_v16 = vcombine.low %v2381_v23, %v2391_v22  ;;  %v1819_v28 = vrot.slane %v1817_v8, 5  ;;  %v1829_v38 = vrot.slane %v1827_v56, 5  ;;  %v2230_v26 = vrot.slane %v5494_v15, 5  ;;  %v5623_v15 = vld [vmem:[#allocation2 + $0x30] sm:$0xf] }
  0x68   : > { %3046 = vrot.lane.b32.xlu1 %v4710_v44, %s5194_s8  ;;  %v1849_v55 = vrot.slane %v1848_v54, 4  ;;  %v4661_v59 = vrot.slane %v2145_v24, 9  ;;  %v2223_v0 = vrot.slane %v5440_v39, 5  ;;  %v2226_v51 = vrot.slane %v1745_v41, 5  ;;  %v1746_v20 = vld [vmem:[#allocation2 + $0x38] sm:$0x1] }
  0x69   : > { %3552 = vrot.lane.b32.xlu0 %v4803_v16, %s5200_s14  ;;  %v1820_v61 = vsel %vm5331_vm12, %v1815_v32, %v1819_v28  ;;  %v1824_v21 = vor.u32 %v1823_v46, %v1819_v28  ;;  %v2231_v47 = vsel %vm5274_vm8, %v4662_v2, %v2230_v26  ;;  %v2232_v25 = vrot.slane %v2230_v26, 4  ;;  %v543_v23 = vld [vmem:[#allocation2 + $0x44] sm:$0xf]  ;;  %v5648_v63 = vld [vmem:[#allocation2 + $0x38] sm:$0x1] }
  0x6a   : > { %v1851_v5 = vshll.u32 %v1746_v20, 16  ;;  %v2233_v36 = vrot.slane %v1746_v20, 5  ;;  %v2224_v39 = vsel %vm5274_vm8, %v4661_v59, %v2223_v0  ;;  %v2225_v58 = vrot.slane %v2223_v0, 4  ;;  %v5660_v44 = vld [vmem:[#allocation2 + $0x34] sm:$0xf] }
  0x6b   : > { %v1825_v13 = vrot.slane %v1824_v21, 4  ;;  %v7272_v10 = vunpack.c.l.bf16 %v5363_v6  ;;  %v7273_v45 = vunpack.c.h.bf16 %v5363_v6  ;;  %v487_v52 = vsel %vm5252_vm3, 0, %v486_v27  ;;  %v5662_v26 = vld [vmem:[#allocation2 + $0x38] sm:$0x1] }
  0x6c   : > { %v1853_v40 = vrot.slane %v1851_v5, 5  ;;  %v2234_v43 = vsel %vm5274_vm8, %v2232_v25, %v2233_v36  ;;  %v2227_v48 = vsel %vm5274_vm8, %v2225_v58, %v2226_v51  ;;  %488 = vst [vmem:[#allocation2 + $0x3c] sm:$0x1] %v487_v52  ;;  %v2417_v33 = vshrl.u32 %v5623_v15, 16 }
  0x6d   : > { %v349_v31 = vmul.f32 %v7272_v10, %v5290_v18  ;;  %v350_v57 = vmul.f32 %v7273_v45, %v5290_v18  ;;  %v1830_v50 = vsel %vm5331_vm12, %v1825_v13, %v1829_v38  ;;  %v4774_v6 = vcombine.low %v2231_v47, %v2234_v43 }
  0x6e   : > { %v4773_v18 = vcombine.low %v2224_v39, %v2227_v48  ;;  %v1854_v42 = vsel %vm5331_vm12, %v1849_v55, %v1853_v40  ;;  %v4757_v30 = vcombine.low %v1820_v61, %v1830_v50  ;;  %v2419_v60 = vrot.slane %v2417_v33, 4 }
  0x6f   : > { %v388_v49 = vadd.f32 %v5311_v37, %v349_v31  ;;  %v389_v41 = vadd.f32 %v5311_v37, %v350_v57  ;;  %v4758_v19 = vcombine.low %v1844_v53, %v1854_v42  ;;  %v2420_v4 = vshll.u32 %v5623_v15, 16  ;;  %v2754_v31 = vld [vmem:[#allocation2 + $0x30] sm:$0xe] }
  0x70   : > { %v2430_v34 = vshrl.u32 %v5639_v62, 16  ;;  %3300 = vrot.lane.b32.xlu0 %v4757_v30, %s5199_s13  ;;  %v4789_v8 = vcombine.low %v5623_v15, %v5639_v62  ;;  %v544_v17 = vsel %vm5265_vm7, 0, %v543_v23  ;;  %v2426_v37 = vshll.u32 %v5639_v62, 16 }
  0x71   : > { %v420_v29 = vmax.f32 %v388_v49, 0.0  ;;  %v421_v14 = vmax.f32 %v389_v41, 0.0  ;;  %3302 = vrot.lane.b32.xlu1 %v4758_v19, %s5199_s13  ;;  %v2422_v11 = vrot.slane %v2420_v4, 5  ;;  %545 = vst [vmem:[#allocation2 + $0x44] sm:$0xf] %v544_v17  ;;  %v2436_v56 = vshll.u32 %v5648_v63, 16 }
  0x72   : > { %v2432_v32 = vrot.slane %v2430_v34, 4  ;;  %v2428_v24 = vrot.slane %v2426_v37, 5  ;;  %v1245_v22 = vshrl.u32 %v1105_v7, 16  ;;  %v1248_v53 = vshll.u32 %v1105_v7, 16  ;;  %v5022_v49 = vld [vmem:[%s5283_s26 + $0x28] sm:$0xff]  }
  0x73   : > { %v4898_v46 = vpack.c.bf16 %v420_v29, %v420_v29  ;;  %v4899_v2 = vpack.c.bf16 %v421_v14, %v421_v14  ;;  %v2423_v28 = vor.u32 %v2422_v11, %v2419_v60  ;;  %v2438_v38 = vrot.slane %v2436_v56, 5  ;;  %v1013_v25 = vld [vmem:[#allocation2 + $0x3c] sm:$0xf]  ;;  %v489_v34 = vld [vmem:[#allocation2 + $0x48] sm:$0x1] }
  0x74   : > { %3380 = vrot.lane.b32.xlu0 %v4773_v18, %s5197_s11  ;;  %v2433_v0 = vor.u32 %v2432_v32, %v2428_v24  ;;  %v1247_v51 = vrot.slane %v1245_v22, 4  ;;  %v1250_v61 = vrot.slane %v1248_v53, 5  ;;  %v1254_v21 = vshll.u32 %v5660_v44, 16  ;;  %v1536_v18 = vld [vmem:[#allocation2 + $0x30] sm:$0xe] }
  0x75   : > { %v733_v54 = vshrl.u32 %v4898_v46, 16  ;;  %v736_v16 = vshll.u32 %v4898_v46, 16  ;;  %v741_v55 = vshrl.u32 %v4899_v2, 16  ;;  %v744_v59 = vshll.u32 %v4899_v2, 16  ;;  %3382 = vrot.lane.b32.xlu1 %v4774_v6, %s5197_s11  ;;  %v546_v37 = vld [vmem:[#allocation2 + $0x50] sm:$0xf] }
  0x76   : > { %v2424_v20 = vrot.slane %v2423_v28, 4  ;;  %v2434_v15 = vrot.slane %v2433_v0, 4  ;;  %v1258_v5 = vshrl.u32 %v5660_v44, 16  ;;  %v1264_v36 = vshll.u32 %v5662_v26, 16  ;;  %v5698_v2 = vld [vmem:[%s7254_s1] ss:$0 sm:$0xff] }
  0x77   : > { %v735_v27 = vrot.slane %v733_v54, 7  ;;  %v743_v47 = vrot.slane %v741_v55, 7  ;;  %v1251_v10 = vor.u32 %v1250_v61, %v1247_v51  ;;  %v1256_v43 = vrot.slane %v1254_v21, 5  ;;  %v5704_v22 = vld [vmem:[%s5283_s26 + $0x30] sm:$0xff]   ;;  %v5725_v0 = vld [vmem:[%s7255_s2] ss:$0 sm:$0xff] }
  0x78   : > { %v2429_v13 = vsel %vm5331_vm12, %v2424_v20, %v2428_v24  ;;  %3476 = vrot.lane.b32.xlu0 %v4789_v8, %s5196_s10  ;;  %v1017_v52 = vld [vmem:[#allocation2 + $0x44] sm:$0x1]  ;;  %v2439_v40 = vsel %vm5331_vm12, %v2434_v15, %v2438_v38  ;;  %v1260_v6 = vrot.slane %v1258_v5, 4  ;;  %v1266_v30 = vrot.slane %v1264_v36, 5  ;;  %v5714_v38 = vld [vmem:[%s5283_s26 + $0x38] sm:$0xff]  }
  0x79   : > { %v738_v39 = vor.u32 %v736_v16, %v735_v27  ;;  %v739_v58 = vrot.slane %v735_v27, 4  ;;  %v746_v45 = vor.u32 %v744_v59, %v743_v47  ;;  %v748_v57 = vrot.slane %v743_v47, 4 }
  0x7a   : > { %v4805_v33 = vcombine.low %v2429_v13, %v2439_v40  ;;  %v1252_v50 = vrot.slane %v1251_v10, 4  ;;  %v4677_v41 = vrot.slane %v2754_v31, 9  ;;  %v1261_v19 = vor.u32 %v1260_v6, %v1256_v43 }
  0x7b   : > { %v1014_v48 = vsel %vm5265_vm7, %v738_v39, %v1013_v25  ;;  %v747_v23 = vsel %vm5342_vm13, %v739_v58, %v746_v45  ;;  %v1018_v42 = vsel %vm5252_vm3, %v748_v57, %v1017_v52  ;;  %v2832_v29 = vrot.slane %v5639_v62, 5 }
  0x7c   : > { %1015 = vst [vmem:[#allocation2 + $0x3c] sm:$0xf] %v1014_v48  ;;  %1016 = vst.msk [vmem:[#allocation2 + $0x40] sm:$0xf] %vm460_vm0, %v747_v23  ;;  %v1257_v60 = vsel %vm5331_vm12, %v1252_v50, %v1256_v43  ;;  %v2835_v4 = vrot.slane %v5648_v63, 5  ;;  %3556 = vrot.lane.b32.xlu0 %v4805_v33, %s5200_s14  ;;  %v4647_v7 = vrot.slane %v1536_v18, 9  ;;  %v4976_v17 = vunpack.c.l.bf16 %v5022_v49 }
  0x7d   : > { %1019 = vst [vmem:[#allocation2 + $0x44] sm:$0x1] %v1018_v42  ;;  %v1629_v14 = vrot.slane %v5660_v44, 5  ;;  %v1632_v8 = vrot.slane %v5662_v26, 5  ;;  %v1262_v46 = vrot.slane %v1261_v19, 4  ;;  %v2833_v11 = vsel %vm5274_vm8, %v4677_v41, %v2832_v29 }
  0x7e   : > { %v2834_v32 = vrot.slane %v2832_v29, 4  ;;  %v4977_v62 = vunpack.c.h.bf16 %v5022_v49  ;;  %v351_v24 = vmul.f32 %v5698_v2, %v4976_v17  ;;  %v490_v44 = vsel %vm5252_vm3, 0, %v489_v34 }
  0x7f   : > { %v5693_v63 = vsel %vm5274_vm8, %v4647_v7, %v1629_v14  ;;  %v1631_v56 = vrot.slane %v1629_v14, 4  ;;  %v1267_v53 = vsel %vm5331_vm12, %v1262_v46, %v1266_v30  ;;  %491 = vst [vmem:[#allocation2 + $0x48] sm:$0x1] %v490_v44  ;;  %v547_v28 = vsel %vm5265_vm7, 0, %v546_v37 }
  0x80   : > { %v2836_v54 = vsel %vm5274_vm8, %v2834_v32, %v2835_v4  ;;  %v352_v16 = vmul.f32 %v5698_v2, %v4977_v62  ;;  %v5716_v26 = vcombine.low %v1257_v60, %v1267_v53  ;;  %v5728_v51 = vadd.f32 %v5725_v0, %v351_v24  ;;  %548 = vst [vmem:[#allocation2 + $0x50] sm:$0xf] %v547_v28 }
  0x81   : > { %v4821_v55 = vcombine.low %v2833_v11, %v2836_v54  ;;  %v5720_v59 = vsel %vm5274_vm8, %v1631_v56, %v1632_v8  ;;  %v4980_v47 = vunpack.c.l.bf16 %v5704_v22  ;;  %v4981_v25 = vunpack.c.h.bf16 %v5704_v22  ;;  %v495_v22 = vld [vmem:[#allocation2 + $0x60] sm:$0x1] }
  0x82   : > { %v4727_v61 = vcombine.low %v5693_v63, %v5720_v59  ;;  %v5733_v21 = vadd.f32 %v5725_v0, %v352_v16  ;;  %v4984_v13 = vunpack.c.l.bf16 %v5714_v38  ;;  %v4985_v10 = vunpack.c.h.bf16 %v5714_v38  ;;  %v492_v59 = vld [vmem:[#allocation2 + $0x54] sm:$0x1] }
  0x83   : > { %v2326_v27 = vld [vmem:[#allocation2 + $0x3c] sm:$0xf]  ;;  %v2327_v15 = vld [vmem:[#allocation2 + $0x40] sm:$0xf]  ;;  %3636 = vrot.lane.b32.xlu0 %v4821_v55, %s5198_s12  ;;  %v353_v63 = vmul.f32 %v5698_v2, %v4980_v47  ;;  %vm3997_vm4 = vcmask 1041408   ;;  %vm3779_vm5 = vcmask 130048  }
  0x84   : > { %v1107_v20 = vld [vmem:[#allocation2 + $0x3c] sm:$0xf]  ;;  %v2441_v5 = vshrl.u32 %v2326_v27, 16  ;;  %v2444_v36 = vshll.u32 %v2326_v27, 16  ;;  %v2355_v39 = vld [vmem:[#allocation2 + $0x44] sm:$0x1]  ;;  %v4790_v45 = vcombine.low %v2326_v27, %v2327_v15 }
  0x85   : > { %v2755_v58 = vld [vmem:[#allocation2 + $0x3c] sm:$0xe]  ;;  %v2454_v31 = vshrl.u32 %v2327_v15, 16  ;;  %v2450_v57 = vshll.u32 %v2327_v15, 16  ;;  %v2460_v52 = vshll.u32 %v2355_v39, 16  ;;  %v1269_v50 = vshrl.u32 %v1107_v20, 16 }
  0x86   : > { %v1108_v40 = vld [vmem:[#allocation2 + $0x40] sm:$0xf]  ;;  %v2443_v43 = vrot.slane %v2441_v5, 4  ;;  %v2446_v48 = vrot.slane %v2444_v36, 5  ;;  %v1134_v33 = vld [vmem:[#allocation2 + $0x44] sm:$0x1]  ;;  %3478 = vrot.lane.b32.xlu1 %v4790_v45, %s5196_s10 }
  0x87   : > { %v1272_v6 = vshll.u32 %v1107_v20, 16  ;;  %v2452_v18 = vrot.slane %v2450_v57, 5  ;;  %v2456_v49 = vrot.slane %v2454_v31, 4  ;;  %v2462_v23 = vrot.slane %v2460_v52, 5  ;;  %v1537_v29 = vld [vmem:[#allocation2 + $0x3c] sm:$0xe] }
  0x88   : > { %v1278_v42 = vshll.u32 %v1108_v40, 16  ;;  %v2447_v30 = vor.u32 %v2446_v48, %v2443_v43  ;;  %v1271_v41 = vrot.slane %v1269_v50, 4  ;;  %v1282_v19 = vshrl.u32 %v1108_v40, 16  ;;  %v5747_v20 = vld [vmem:[#allocation2 + $0x3c] sm:$0xf] }
  0x89   : > { %v1274_v60 = vrot.slane %v1272_v6, 5  ;;  %v2457_v4 = vor.u32 %v2456_v49, %v2452_v18  ;;  %v1288_v7 = vshll.u32 %v1134_v33, 16  ;;  %v4678_v14 = vrot.slane %v2755_v58, 9  ;;  %v1720_v48 = vld [vmem:[#allocation2 + $0x40] sm:$0xf] }
  0x8a   : > { %v1280_v34 = vrot.slane %v1278_v42, 5  ;;  %v2448_v8 = vrot.slane %v2447_v30, 4  ;;  %v1284_v37 = vrot.slane %v1282_v19, 4  ;;  %v2839_v46 = vrot.slane %v2327_v15, 5  ;;  %v1747_v49 = vld [vmem:[#allocation2 + $0x44] sm:$0x1] }
  0x8b   : > { %v1275_v17 = vor.u32 %v1274_v60, %v1271_v41  ;;  %v2458_v11 = vrot.slane %v2457_v4, 4  ;;  %v1290_v32 = vrot.slane %v1288_v7, 5  ;;  %v2842_v62 = vrot.slane %v2355_v39, 5  ;;  %v2147_v41 = vld [vmem:[#allocation2 + $0x3c] sm:$0xe] }
  0x8c   : > { %v4648_v56 = vrot.slane %v1537_v29, 9  ;;  %v2453_v24 = vsel %vm5331_vm12, %v2448_v8, %v2452_v18  ;;  %v1285_v53 = vor.u32 %v1284_v37, %v1280_v34  ;;  %v2840_v54 = vsel %vm5274_vm8, %v4678_v14, %v2839_v46  ;;  %v1020_v37 = vld [vmem:[#allocation2 + $0x48] sm:$0xf] }
  0x8d   : > { %v1276_v44 = vrot.slane %v1275_v17, 4  ;;  %v2463_v16 = vsel %vm5331_vm12, %v2458_v11, %v2462_v23  ;;  %v2841_v28 = vrot.slane %v2839_v46, 4  ;;  %v1636_v55 = vrot.slane %v1108_v40, 5 }
  0x8e   : > { %v1639_v27 = vrot.slane %v1134_v33, 5  ;;  %v4806_v15 = vcombine.low %v2453_v24, %v2463_v16  ;;  %v1286_v36 = vrot.slane %v1285_v53, 4  ;;  %v422_v39 = vmax.f32 %v5728_v51, 0.0  ;;  %v1024_v24 = vld [vmem:[#allocation2 + $0x50] sm:$0x1] }
  0x8f   : > { %v1281_v5 = vsel %vm5331_vm12, %v1276_v44, %v1280_v34  ;;  %v2843_v58 = vsel %vm5274_vm8, %v2841_v28, %v2842_v62  ;;  %v5756_v31 = vsel %vm5274_vm8, %v4648_v56, %v1636_v55  ;;  %v1638_v45 = vrot.slane %v1636_v55, 4 }
  0x90   : > { %v423_v57 = vmax.f32 %v5733_v21, 0.0  ;;  %3558 = vrot.lane.b32.xlu1 %v4806_v15, %s5200_s14  ;;  %v1291_v52 = vsel %vm5331_vm12, %v1286_v36, %v1290_v32  ;;  %v4822_v40 = vcombine.low %v2840_v54, %v2843_v58  ;;  %v4900_v43 = vpack.c.bf16 %v422_v39, %v422_v39 }
  0x91   : > { %v1856_v51 = vshrl.u32 %v5747_v20, 16  ;;  %v4712_v33 = vcombine.low %v1281_v5, %v1291_v52  ;;  %v1640_v50 = vsel %vm5274_vm8, %v1638_v45, %v1639_v27  ;;  %v1859_v18 = vshll.u32 %v5747_v20, 16 }
  0x92   : > { %v4901_v6 = vpack.c.bf16 %v423_v57, %v423_v57  ;;  %3638 = vrot.lane.b32.xlu0 %v4822_v40, %s5198_s12  ;;  %v4728_v21 = vcombine.low %v5756_v31, %v1640_v50  ;;  %v750_v23 = vshrl.u32 %v4900_v43, 16  ;;  %v753_v42 = vshll.u32 %v4900_v43, 16 }
  0x93   : > { %v1858_v30 = vrot.slane %v1856_v51, 4  ;;  %v1861_v29 = vrot.slane %v1859_v18, 5  ;;  %v1869_v4 = vshrl.u32 %v1720_v48, 16  ;;  %v4743_v7 = vcombine.low %v5747_v20, %v1720_v48 }
  0x94   : > { %v758_v60 = vshrl.u32 %v4901_v6, 16  ;;  %v761_v19 = vshll.u32 %v4901_v6, 16  ;;  %3048 = vrot.lane.b32.xlu1 %v5716_v26, %s5194_s8  ;;  %v752_v34 = vrot.slane %v750_v23, 7  ;;  %v1865_v14 = vshll.u32 %v1720_v48, 16  ;;  %v5814_v6 = vld [vmem:[%s5283_s26 + $0x40] sm:$0xff]  }
  0x95   : > { %v1875_v8 = vshll.u32 %v1747_v49, 16  ;;  %v1862_v46 = vor.u32 %v1861_v29, %v1858_v30  ;;  %v1871_v11 = vrot.slane %v1869_v4, 4  ;;  %v4663_v32 = vrot.slane %v2147_v41, 9 }
  0x96   : > { %v760_v17 = vrot.slane %v758_v60, 7  ;;  %3128 = vrot.lane.b32.xlu0 %v4727_v61, %s5193_s7  ;;  %v755_v62 = vor.u32 %v753_v42, %v752_v34  ;;  %v756_v56 = vrot.slane %v752_v34, 4  ;;  %v1867_v44 = vrot.slane %v1865_v14, 5  ;;  %v549_v61 = vld [vmem:[#allocation2 + $0x5c] sm:$0xf] }
  0x97   : > { %v1877_v26 = vrot.slane %v1875_v8, 5  ;;  %v1863_v16 = vrot.slane %v1862_v46, 4  ;;  %v2237_v28 = vrot.slane %v1720_v48, 5  ;;  %v2240_v20 = vrot.slane %v1747_v49, 5  ;;  %v552_v48 = vld [vmem:[#allocation2 + $0x68] sm:$0xf] }
  0x98   : > { %v763_v53 = vor.u32 %v761_v19, %v760_v17  ;;  %v765_v54 = vrot.slane %v760_v17, 4  ;;  %3050 = vrot.lane.b32.xlu1 %v4712_v33, %s5194_s8  ;;  %v1021_v55 = vsel %vm5265_vm7, %v755_v62, %v1020_v37  ;;  %v1872_v27 = vor.u32 %v1871_v11, %v1867_v44  ;;  %v5821_v60 = vld [vmem:[#allocation2 + $0x4] sm:$0xf]  ;;  %v5823_v19 = vld [vmem:[#allocation2] sm:$0xf] }
  0x99   : > { %1022 = vst [vmem:[#allocation2 + $0x48] sm:$0xf] %v1021_v55  ;;  %v1868_v36 = vsel %vm5331_vm12, %v1863_v16, %v1867_v44  ;;  %v2238_v39 = vsel %vm5274_vm8, %v4663_v32, %v2237_v28  ;;  %v2239_v58 = vrot.slane %v2237_v28, 4  ;;  %v354_v31 = vmul.f32 %v5698_v2, %v4981_v25 }
  0x9a   : > { %v764_v15 = vsel %vm5342_vm13, %v756_v56, %v763_v53  ;;  %v1025_v5 = vsel %vm5252_vm3, %v765_v54, %v1024_v24  ;;  %3224 = vrot.lane.b32.xlu0 %v4743_v7, %s5195_s9  ;;  %v1873_v47 = vrot.slane %v1872_v27, 4  ;;  %v392_v45 = vadd.f32 %v5725_v0, %v353_v63 }
  0x9b   : > { %1023 = vst.msk [vmem:[#allocation2 + $0x4c] sm:$0xf] %vm460_vm0, %v764_v15  ;;  %1026 = vst [vmem:[#allocation2 + $0x50] sm:$0x1] %v1025_v5  ;;  %v493_v57 = vsel %vm5252_vm3, 0, %v492_v59  ;;  %v550_v52 = vsel %vm5265_vm7, 0, %v549_v61  ;;  %v355_v40 = vmul.f32 %v5698_v2, %v4984_v13  ;;  %v356_v43 = vmul.f32 %v5698_v2, %v4985_v10 }
  0x9c   : > { %3130 = vrot.lane.b32.xlu1 %v4728_v21, %s5193_s7  ;;  %v1878_v25 = vsel %vm5331_vm12, %v1873_v47, %v1877_v26  ;;  %v2241_v51 = vsel %vm5274_vm8, %v2239_v58, %v2240_v20  ;;  %v393_v33 = vadd.f32 %v5725_v0, %v354_v31  ;;  %v424_v50 = vmax.f32 %v392_v45, 0.0  ;;  %494 = vst [vmem:[#allocation2 + $0x54] sm:$0x1] %v493_v57 }
  0x9d   : > { %551 = vst [vmem:[#allocation2 + $0x5c] sm:$0xf] %v550_v52  ;;  %v4759_v13 = vcombine.low %v1868_v36, %v1878_v25  ;;  %v394_v38 = vadd.f32 %v5725_v0, %v355_v40  ;;  %v395_v10 = vadd.f32 %v5725_v0, %v356_v43  ;;  %v496_v21 = vsel %vm5252_vm3, 0, %v495_v22 }
  0x9e   : > { %v425_v18 = vmax.f32 %v393_v33, 0.0  ;;  %v4902_v49 = vpack.c.bf16 %v424_v50, %v424_v50  ;;  %v553_v23 = vsel %vm5265_vm7, 0, %v552_v48  ;;  %v4775_v42 = vcombine.low %v2238_v39, %v2241_v51  ;;  %497 = vst [vmem:[#allocation2 + $0x60] sm:$0x1] %v496_v21 }
  0x9f   : > { %3304 = vrot.lane.b32.xlu0 %v4759_v13, %s5199_s13  ;;  %v426_v30 = vmax.f32 %v394_v38, 0.0  ;;  %v427_v41 = vmax.f32 %v395_v10, 0.0  ;;  %554 = vst [vmem:[#allocation2 + $0x68] sm:$0xf] %v553_v23  ;;  %v4691_v29 = vcombine.low %v5823_v19, %v5821_v60  ;;  %v4988_v17 = vunpack.c.l.bf16 %v5814_v6 }
  0xa0   : > { %v1721_v4 = vld [vmem:[#allocation2 + $0x48] sm:$0xf]  ;;  %v4903_v7 = vpack.c.bf16 %v425_v18, %v425_v18  ;;  %v767_v14 = vshrl.u32 %v4902_v49, 16  ;;  %v770_v8 = vshll.u32 %v4902_v49, 16  ;;  %vm3812_vm6 = vcmask 162816  }
  0xa1   : > { %v2148_v34 = vld [vmem:[#allocation2 + $0x48] sm:$0xe]  ;;  %v1880_v46 = vshrl.u32 %v1721_v4, 16  ;;  %v1883_v11 = vshll.u32 %v1721_v4, 16  ;;  %v5828_v62 = vpack.c.bf16 %v426_v30, %v426_v30  ;;  %v5830_v56 = vpack.c.bf16 %v427_v41, %v427_v41 }
  0xa2   : > { %v1722_v37 = vld [vmem:[#allocation2 + $0x4c] sm:$0xf]  ;;  %v1748_v32 = vld [vmem:[#allocation2 + $0x50] sm:$0x1]  ;;  %v4664_v28 = vrot.slane %v2148_v34, 9  ;;  %v769_v39 = vrot.slane %v767_v14, 7 }
  0xa3   : > { %v1893_v24 = vshrl.u32 %v1722_v37, 16  ;;  %v4744_v44 = vcombine.low %v1721_v4, %v1722_v37  ;;  %v1889_v26 = vshll.u32 %v1722_v37, 16  ;;  %v1899_v53 = vshll.u32 %v1748_v32, 16  ;;  %3384 = vrot.lane.b32.xlu0 %v4775_v42, %s5197_s11  ;;  %v2328_v27 = vld [vmem:[#allocation2 + $0x48] sm:$0xf] }
  0xa4   : > { %v1882_v54 = vrot.slane %v1880_v46, 4  ;;  %v1885_v16 = vrot.slane %v1883_v11, 5  ;;  %v2244_v55 = vrot.slane %v1722_v37, 5  ;;  %v2247_v61 = vrot.slane %v1748_v32, 5  ;;  %v1027_v47 = vld [vmem:[#allocation2 + $0x54] sm:$0xf] }
  0xa5   : > { %3226 = vrot.lane.b32.xlu1 %v4744_v44, %s5195_s9  ;;  %v1891_v20 = vrot.slane %v1889_v26, 5  ;;  %v1895_v63 = vrot.slane %v1893_v24, 4  ;;  %v1901_v59 = vrot.slane %v1899_v53, 5  ;;  %v775_v31 = vshrl.u32 %v4903_v7, 16  ;;  %v5836_v57 = vld [vmem:[#allocation2 + $0x4c] sm:$0xf] }
  0xa6   : > { %v1886_v15 = vor.u32 %v1885_v16, %v1882_v54  ;;  %v2245_v5 = vsel %vm5274_vm8, %v4664_v28, %v2244_v55  ;;  %v2246_v36 = vrot.slane %v2244_v55, 4  ;;  %v778_v45 = vshll.u32 %v4903_v7, 16  ;;  %v1031_v13 = vld [vmem:[#allocation2 + $0x5c] sm:$0x1]  ;;  %v5845_v21 = vld [vmem:[#allocation2 + $0x50] sm:$0x1] }
  0xa7   : > { %v1896_v58 = vor.u32 %v1895_v63, %v1891_v20  ;;  %v2465_v52 = vshrl.u32 %v2328_v27, 16  ;;  %v772_v22 = vor.u32 %v770_v8, %v769_v39  ;;  %v773_v48 = vrot.slane %v769_v39, 4  ;;  %v1109_v23 = vld [vmem:[#allocation2 + $0x48] sm:$0xf]  ;;  %v5850_v34 = vld [vmem:[#allocation2 + $0x4c] sm:$0xf] }
  0xa8   : > { %v1887_v40 = vrot.slane %v1886_v15, 4  ;;  %v2248_v43 = vsel %vm5274_vm8, %v2246_v36, %v2247_v61  ;;  %v777_v33 = vrot.slane %v775_v31, 7  ;;  %v2468_v18 = vshll.u32 %v2328_v27, 16  ;;  %v5853_v46 = vld [vmem:[#allocation2 + $0x50] sm:$0x1] }
  0xa9   : > { %v1897_v25 = vrot.slane %v1896_v58, 4  ;;  %v4776_v51 = vcombine.low %v2245_v5, %v2248_v43  ;;  %v2467_v50 = vrot.slane %v2465_v52, 4  ;;  %v1028_v10 = vsel %vm5265_vm7, %v772_v22, %v1027_v47  ;;  %v2756_v28 = vld [vmem:[#allocation2 + $0x48] sm:$0xe] }
  0xaa   : > { %v1892_v38 = vsel %vm5331_vm12, %v1887_v40, %v1891_v20  ;;  %v2478_v49 = vshrl.u32 %v5836_v57, 16  ;;  %v780_v30 = vor.u32 %v778_v45, %v777_v33  ;;  %v782_v41 = vrot.slane %v777_v33, 4  ;;  %1029 = vst [vmem:[#allocation2 + $0x54] sm:$0xf] %v1028_v10 }
  0xab   : > { %v1902_v42 = vsel %vm5331_vm12, %v1897_v25, %v1901_v59  ;;  %v4791_v4 = vcombine.low %v2328_v27, %v5836_v57  ;;  %v2470_v14 = vrot.slane %v2468_v18, 5  ;;  %v2474_v8 = vshll.u32 %v5836_v57, 16 }
  0xac   : > { %v4760_v7 = vcombine.low %v1892_v38, %v1902_v42  ;;  %v2480_v37 = vrot.slane %v2478_v49, 4  ;;  %v781_v11 = vsel %vm5342_vm13, %v773_v48, %v780_v30  ;;  %v1032_v32 = vsel %vm5252_vm3, %v782_v41, %v1031_v13  ;;  %v3041_v48 = vpop.permute.xlu0 %3040 }
  0xad   : > { %3480 = vrot.lane.b32.xlu0 %v4791_v4, %s5196_s10  ;;  %v2484_v24 = vshll.u32 %v5845_v21, 16  ;;  %v1293_v44 = vshrl.u32 %v1109_v23, 16  ;;  %1030 = vst.msk [vmem:[#allocation2 + $0x58] sm:$0xf] %vm460_vm0, %v781_v11  ;;  %1033 = vst [vmem:[#allocation2 + $0x5c] sm:$0x1] %v1032_v32  ;;  %v2471_v26 = vor.u32 %v2470_v14, %v2467_v50 }
  0xae   : > { %3306 = vrot.lane.b32.xlu1 %v4760_v7, %s5199_s13  ;;  %v2476_v53 = vrot.slane %v2474_v8, 5  ;;  %v1296_v54 = vshll.u32 %v1109_v23, 16  ;;  %v1302_v16 = vshll.u32 %v5850_v34, 16  ;;  %v1306_v20 = vshrl.u32 %v5850_v34, 16 }
  0xaf   : > { %v2486_v55 = vrot.slane %v2484_v24, 5  ;;  %v1295_v27 = vrot.slane %v1293_v44, 4  ;;  %v1312_v63 = vshll.u32 %v5853_v46, 16  ;;  %v2472_v59 = vrot.slane %v2471_v26, 4 }
  0xb0   : > { %v2481_v61 = vor.u32 %v2480_v37, %v2476_v53  ;;  %v1298_v15 = vrot.slane %v1296_v54, 5  ;;  %v1304_v5 = vrot.slane %v1302_v16, 5  ;;  %v1308_v36 = vrot.slane %v1306_v20, 4 }
  0xb1   : > { %v1314_v39 = vrot.slane %v1312_v63, 5  ;;  %v4679_v47 = vrot.slane %v2756_v28, 9  ;;  %v2846_v58 = vrot.slane %v5836_v57, 5  ;;  %v2330_v31 = vld [vmem:[#allocation2 + $0x54] sm:$0xf]  ;;  %v2477_v45 = vsel %vm5331_vm12, %v2472_v59, %v2476_v53 }
  0xb2   : > { %3386 = vrot.lane.b32.xlu1 %v4776_v51, %s5197_s11  ;;  %v2482_v52 = vrot.slane %v2481_v61, 4  ;;  %v1299_v40 = vor.u32 %v1298_v15, %v1295_v27  ;;  %v2849_v43 = vrot.slane %v5845_v21, 5  ;;  %v1111_v22 = vld [vmem:[#allocation2 + $0x54] sm:$0xf]  ;;  %v2489_v25 = vshrl.u32 %v2330_v31, 16 }
  0xb3   : > { %v2492_v33 = vshll.u32 %v2330_v31, 16  ;;  %v1309_v50 = vor.u32 %v1308_v36, %v1304_v5  ;;  %v2847_v13 = vsel %vm5274_vm8, %v4679_v47, %v2846_v58  ;;  %v2848_v38 = vrot.slane %v2846_v58, 4  ;;  %v2757_v44 = vld [vmem:[#allocation2 + $0x54] sm:$0xe] }
  0xb4   : > { %v2487_v57 = vsel %vm5331_vm12, %v2482_v52, %v2486_v55  ;;  %v1300_v51 = vrot.slane %v1299_v40, 4  ;;  %v1317_v10 = vshrl.u32 %v1111_v22, 16  ;;  %v2331_v18 = vld [vmem:[#allocation2 + $0x58] sm:$0xf]  ;;  %v2491_v49 = vrot.slane %v2489_v25, 4 }
  0xb5   : > { %v2494_v23 = vrot.slane %v2492_v33, 5  ;;  %v2357_v42 = vld [vmem:[#allocation2 + $0x5c] sm:$0x1]  ;;  %v4807_v30 = vcombine.low %v2477_v45, %v2487_v57  ;;  %v5879_v21 = vsel %vm3664_vm14, %v4691_v29, %v3041_v48  ;;  %v2502_v41 = vshrl.u32 %v2331_v18, 16  ;;  %v1112_v24 = vld [vmem:[#allocation2 + $0x58] sm:$0xf]  ;;  %v5896_v57 = vpop.permute.xlu1 %3120 }
  0xb6   : > { %v4792_v4 = vcombine.low %v2330_v31, %v2331_v18  ;;  %v2498_v7 = vshll.u32 %v2331_v18, 16  ;;  %v2508_v14 = vshll.u32 %v2357_v42, 16  ;;  %v1305_v37 = vsel %vm5331_vm12, %v1300_v51, %v1304_v5  ;;  %v1136_v53 = vld [vmem:[#allocation2 + $0x5c] sm:$0x1]  ;;  %v1539_v61 = vld [vmem:[#allocation2 + $0x54] sm:$0xe] }
  0xb7   : > { %v2495_v8 = vor.u32 %v2494_v23, %v2491_v49  ;;  %3560 = vrot.lane.b32.xlu0 %v4807_v30, %s5200_s14  ;;  %v1310_v11 = vrot.slane %v1309_v50, 4  ;;  %v2850_v32 = vsel %vm5274_vm8, %v2848_v38, %v2849_v43  ;;  %v2504_v19 = vrot.slane %v2502_v41, 4  ;;  %v1538_v48 = vld [vmem:[#allocation2 + $0x48] sm:$0xe] }
  0xb8   : > { %3482 = vrot.lane.b32.xlu1 %v4792_v4, %s5196_s10  ;;  %v2500_v60 = vrot.slane %v2498_v7, 5  ;;  %v2510_v29 = vrot.slane %v2508_v14, 5  ;;  %v4823_v26 = vcombine.low %v2847_v13, %v2850_v32  ;;  %v1319_v28 = vrot.slane %v1317_v10, 4 }
  0xb9   : > { %v2496_v54 = vrot.slane %v2495_v8, 4  ;;  %v1315_v16 = vsel %vm5331_vm12, %v1310_v11, %v1314_v39  ;;  %v1320_v55 = vshll.u32 %v1111_v22, 16  ;;  %v1326_v63 = vshll.u32 %v1112_v24, 16 }
  0xba   : > { %v2505_v27 = vor.u32 %v2504_v19, %v2500_v60  ;;  %v4713_v20 = vcombine.low %v1305_v37, %v1315_v16  ;;  %v1330_v59 = vshrl.u32 %v1112_v24, 16  ;;  %v1336_v36 = vshll.u32 %v1136_v53, 16 }
  0xbb   : > { %v2501_v15 = vsel %vm5331_vm12, %v2496_v54, %v2500_v60  ;;  %3640 = vrot.lane.b32.xlu0 %v4823_v26, %s5198_s12  ;;  %v1322_v5 = vrot.slane %v1320_v55, 5  ;;  %v4680_v47 = vrot.slane %v2757_v44, 9  ;;  %v1328_v31 = vrot.slane %v1326_v63, 5  ;;  %v1724_v26 = vld [vmem:[#allocation2 + $0x58] sm:$0xf]  ;;  %v5925_v55 = vpop.permute.xlu1 %3218 }
  0xbc   : > { %v2506_v58 = vrot.slane %v2505_v27, 4  ;;  %v1332_v45 = vrot.slane %v1330_v59, 4  ;;  %v2853_v52 = vrot.slane %v2331_v18, 5  ;;  %v1338_v40 = vrot.slane %v1336_v36, 5  ;;  %v5898_v18 = vpop.permute.xlu0 %3216 }
  0xbd   : > { %v1323_v39 = vor.u32 %v1322_v5, %v1319_v28  ;;  %v2856_v43 = vrot.slane %v2357_v42, 5  ;;  %v4650_v22 = vrot.slane %v1539_v61, 9  ;;  %v1650_v10 = vrot.slane %v1112_v24, 5  ;;  %v1723_v24 = vld [vmem:[#allocation2 + $0x54] sm:$0xf] }
  0xbe   : > { %v2511_v25 = vsel %vm5331_vm12, %v2506_v58, %v2510_v29  ;;  %v1333_v33 = vor.u32 %v1332_v45, %v1328_v31  ;;  %v2854_v50 = vsel %vm5274_vm8, %v4680_v47, %v2853_v52  ;;  %v2855_v13 = vrot.slane %v2853_v52, 4  ;;  %v1034_v28 = vld [vmem:[#allocation2 + $0x60] sm:$0xf] }
  0xbf   : > { %v4808_v51 = vcombine.low %v2501_v15, %v2511_v25  ;;  %v1324_v38 = vrot.slane %v1323_v39, 4  ;;  %v1653_v49 = vrot.slane %v1136_v53, 5  ;;  %v4649_v30 = vrot.slane %v1538_v48, 9 }
  0xc0   : > { %v1334_v23 = vrot.slane %v1333_v33, 4  ;;  %v2857_v42 = vsel %vm5274_vm8, %v2855_v13, %v2856_v43  ;;  %v1643_v41 = vrot.slane %v5850_v34, 5  ;;  %v5908_v14 = vsel %vm5274_vm8, %v4650_v22, %v1650_v10  ;;  %v5928_v15 = vpop.permute.xlu0 %3472 }
  0xc1   : > { %3562 = vrot.lane.b32.xlu1 %v4808_v51, %s5200_s14  ;;  %v1329_v4 = vsel %vm5331_vm12, %v1324_v38, %v1328_v31  ;;  %v4824_v7 = vcombine.low %v2854_v50, %v2857_v42  ;;  %v1652_v8 = vrot.slane %v1650_v10, 4  ;;  %v1646_v34 = vrot.slane %v5853_v46, 5  ;;  %v2149_v31 = vld [vmem:[#allocation2 + $0x54] sm:$0xe]  ;;  %v5938_v42 = vpop.permute.xlu1 %3474 }
  0xc2   : > { %v1339_v37 = vsel %vm5331_vm12, %v1334_v23, %v1338_v40  ;;  %v1644_v11 = vsel %vm5274_vm8, %v4649_v30, %v1643_v41  ;;  %v1645_v32 = vrot.slane %v1643_v41, 4  ;;  %v784_v19 = vshrl.u32 %v5828_v62, 16  ;;  %v1038_v40 = vld [vmem:[#allocation2 + $0x68] sm:$0x1]  ;;  %v498_v23 = vld [vmem:[#allocation2 + $0x6c] sm:$0x1] }
  0xc3   : > { %v4714_v44 = vcombine.low %v1329_v4, %v1339_v37  ;;  %3642 = vrot.lane.b32.xlu0 %v4824_v7, %s5198_s12  ;;  %v1654_v60 = vsel %vm5274_vm8, %v1652_v8, %v1653_v49  ;;  %v787_v29 = vshll.u32 %v5828_v62, 16  ;;  %v792_v16 = vshrl.u32 %v5830_v56, 16  ;;  %v1749_v62 = vld [vmem:[#allocation2 + $0x5c] sm:$0x1] }
  0xc4   : > { %v4730_v53 = vcombine.low %v5908_v14, %v1654_v60  ;;  %v1647_v54 = vsel %vm5274_vm8, %v1645_v32, %v1646_v34  ;;  %v795_v46 = vshll.u32 %v5830_v56, 16  ;;  %v786_v63 = vrot.slane %v784_v19, 7  ;;  %v5943_v14 = vpop.permute.xlu0 %3220  ;;  %v555_v60 = vld [vmem:[#allocation2 + $0x74] sm:$0xf]  ;;  %v5957_v19 = vld [vmem:[%s5283_s26 + $0x48] sm:$0xff]  }
  0xc5   : > { %3052 = vrot.lane.b32.xlu1 %v4713_v20, %s5194_s8  ;;  %v4729_v27 = vcombine.low %v1644_v11, %v1647_v54  ;;  %v1904_v59 = vshrl.u32 %v1723_v24, 16  ;;  %v1907_v61 = vshll.u32 %v1723_v24, 16  ;;  %v794_v5 = vrot.slane %v792_v16, 7 }
  0xc6   : > { %v1917_v36 = vshrl.u32 %v1724_v26, 16  ;;  %v4745_v47 = vcombine.low %v1723_v24, %v1724_v26  ;;  %v1913_v58 = vshll.u32 %v1724_v26, 16  ;;  %v789_v56 = vor.u32 %v787_v29, %v786_v63 }
  0xc7   : > { %3132 = vrot.lane.b32.xlu0 %v4729_v27, %s5193_s7  ;;  %v790_v45 = vrot.slane %v786_v63, 4  ;;  %v1906_v52 = vrot.slane %v1904_v59, 4  ;;  %v1909_v39 = vrot.slane %v1907_v61, 5  ;;  %v797_v20 = vor.u32 %v795_v46, %v794_v5  ;;  %v5972_v63 = vpop.permute.xlu1 %3222 }
  0xc8   : > { %v799_v43 = vrot.slane %v794_v5, 4  ;;  %v1915_v22 = vrot.slane %v1913_v58, 5  ;;  %v1919_v48 = vrot.slane %v1917_v36, 4  ;;  %v1035_v25 = vsel %vm5265_vm7, %v789_v56, %v1034_v28  ;;  %v5981_v36 = vld [vmem:[#allocation2 + $0x10] sm:$0xf] }
  0xc9   : > { %3054 = vrot.lane.b32.xlu1 %v4714_v44, %s5194_s8  ;;  %v1910_v33 = vor.u32 %v1909_v39, %v1906_v52  ;;  %v1923_v50 = vshll.u32 %v1749_v62, 16  ;;  %v4665_v13 = vrot.slane %v2149_v31, 9  ;;  %v798_v51 = vsel %vm5342_vm13, %v790_v45, %v797_v20  ;;  %1036 = vst [vmem:[#allocation2 + $0x60] sm:$0xf] %v1035_v25 }
  0xca   : > { %v1039_v38 = vsel %vm5252_vm3, %v799_v43, %v1038_v40  ;;  %v1920_v10 = vor.u32 %v1919_v48, %v1915_v22  ;;  %v2251_v49 = vrot.slane %v1724_v26, 5  ;;  %1037 = vst.msk [vmem:[#allocation2 + $0x64] sm:$0xf] %vm460_vm0, %v798_v51  ;;  %v2254_v4 = vrot.slane %v1749_v62, 5  ;;  %v501_v26 = vld [vmem:[#allocation2 + $0x78] sm:$0x1] }
  0xcb   : > { %3228 = vrot.lane.b32.xlu0 %v4745_v47, %s5195_s9  ;;  %1040 = vst [vmem:[#allocation2 + $0x68] sm:$0x1] %v1039_v38  ;;  %v1911_v30 = vrot.slane %v1910_v33, 4  ;;  %v1925_v41 = vrot.slane %v1923_v50, 5  ;;  %v4989_v7 = vunpack.c.h.bf16 %v5814_v6  ;;  %v357_v32 = vmul.f32 %v5698_v2, %v4988_v17  ;;  %v5983_v47 = vld [vmem:[#allocation2 + $0xc] sm:$0xf] }
  0xcc   : > { %v1921_v8 = vrot.slane %v1920_v10, 4  ;;  %v2252_v37 = vsel %vm5274_vm8, %v4665_v13, %v2251_v49  ;;  %v2253_v11 = vrot.slane %v2251_v49, 4  ;;  %v499_v44 = vsel %vm5252_vm3, 0, %v498_v23 }
  0xcd   : > { %3134 = vrot.lane.b32.xlu1 %v4730_v53, %s5193_s7  ;;  %v1916_v34 = vsel %vm5331_vm12, %v1911_v30, %v1915_v22  ;;  %v358_v24 = vmul.f32 %v5698_v2, %v4989_v7  ;;  %v396_v17 = vadd.f32 %v5725_v0, %v357_v32  ;;  %500 = vst [vmem:[#allocation2 + $0x6c] sm:$0x1] %v499_v44  ;;  %v556_v27 = vsel %vm5265_vm7, 0, %v555_v60  ;;  %v5996_v7 = vpop.permute.xlu1 %3122 }
  0xce   : > { %v1926_v29 = vsel %vm5331_vm12, %v1921_v8, %v1925_v41  ;;  %v2255_v6 = vsel %vm5274_vm8, %v2253_v11, %v2254_v4  ;;  %v5968_v16 = vsel %vm3713_vm15, %v5879_v21, %v5896_v57  ;;  %v4992_v59 = vunpack.c.l.bf16 %v5957_v19  ;;  %557 = vst [vmem:[#allocation2 + $0x74] sm:$0xf] %v556_v27 }
  0xcf   : > { %v4761_v53 = vcombine.low %v1916_v34, %v1926_v29  ;;  %v397_v54 = vadd.f32 %v5725_v0, %v358_v24  ;;  %v4777_v46 = vcombine.low %v2252_v37, %v2255_v6  ;;  %v428_v28 = vmax.f32 %v396_v17, 0.0  ;;  %v5976_v0 = vpop.permute.xlu0 %3376 }
  0xd0   : > { %v1725_v61 = vld [vmem:[#allocation2 + $0x60] sm:$0xf]  ;;  %v4993_v21 = vunpack.c.h.bf16 %v5957_v19  ;;  %v502_v57 = vsel %vm5252_vm3, 0, %v501_v26  ;;  %v4692_v58 = vcombine.low %v5983_v47, %v5981_v36  ;;  %v5988_v40 = vmul.f32 %v5698_v2, %v4992_v59 }
  0xd1   : > { %3308 = vrot.lane.b32.xlu0 %v4761_v53, %s5199_s13  ;;  %v2150_v62 = vld [vmem:[#allocation2 + $0x60] sm:$0xe]  ;;  %v429_v5 = vmax.f32 %v397_v54, 0.0  ;;  %v1726_v31 = vld [vmem:[#allocation2 + $0x64] sm:$0xf]  ;;  %v1928_v56 = vshrl.u32 %v1725_v61, 16  ;;  %v4906_v39 = vpack.c.bf16 %v428_v28, %v428_v28 }
  0xd2   : > { %v1931_v45 = vshll.u32 %v1725_v61, 16  ;;  %v1750_v52 = vld [vmem:[#allocation2 + $0x68] sm:$0x1]  ;;  %503 = vst [vmem:[#allocation2 + $0x78] sm:$0x1] %v502_v57  ;;  %v1941_v20 = vshrl.u32 %v1726_v31, 16  ;;  %v4746_v43 = vcombine.low %v1725_v61, %v1726_v31 }
  0xd3   : > { %v1937_v22 = vshll.u32 %v1726_v31, 16  ;;  %v1947_v48 = vshll.u32 %v1750_v52, 16  ;;  %v1930_v25 = vrot.slane %v1928_v56, 4  ;;  %v4666_v50 = vrot.slane %v2150_v62, 9  ;;  %v2332_v51 = vld [vmem:[#allocation2 + $0x60] sm:$0xf]  ;;  %v6000_v24 = vpop.permute.xlu0 %3632 }
  0xd4   : > { %v1933_v33 = vrot.slane %v1931_v45, 5  ;;  %v2258_v13 = vrot.slane %v1726_v31, 5  ;;  %3230 = vrot.lane.b32.xlu1 %v4746_v43, %s5195_s9  ;;  %v1943_v10 = vrot.slane %v1941_v20, 4  ;;  %v2261_v23 = vrot.slane %v1750_v52, 5  ;;  %v5998_v32 = vld [vmem:[#allocation2 + $0x64] sm:$0xf] }
  0xd5   : > { %v1939_v38 = vrot.slane %v1937_v22, 5  ;;  %v1949_v49 = vrot.slane %v1947_v48, 5  ;;  %3388 = vrot.lane.b32.xlu0 %v4777_v46, %s5197_s11  ;;  %v4907_v4 = vpack.c.bf16 %v429_v5, %v429_v5  ;;  %v801_v37 = vshrl.u32 %v4906_v39, 16  ;;  %v1041_v54 = vld [vmem:[#allocation2 + $0x6c] sm:$0xf] }
  0xd6   : > { %v1934_v2 = vor.u32 %v1933_v33, %v1930_v25  ;;  %v5994_v30 = vsel %vm5274_vm8, %v4666_v50, %v2258_v13  ;;  %v2260_v41 = vrot.slane %v2258_v13, 4  ;;  %v804_v11 = vshll.u32 %v4906_v39, 16  ;;  %v6008_v62 = vld [vmem:[#allocation2 + $0x68] sm:$0x1]  ;;  %v1045_v45 = vld [vmem:[#allocation2 + $0x74] sm:$0x1]  ;;  %v6015_v25 = vpop.permute.xlu1 %3378 }
  0xd7   : > { %v1944_v8 = vor.u32 %v1943_v10, %v1939_v38  ;;  %v2513_v34 = vshrl.u32 %v2332_v51, 16  ;;  %v809_v29 = vshrl.u32 %v4907_v4, 16  ;;  %v812_v6 = vshll.u32 %v4907_v4, 16  ;;  %v1113_v52 = vld [vmem:[#allocation2 + $0x60] sm:$0xf]  ;;  %v6024_v10 = vpop.permute.xlu0 %3634 }
  0xd8   : > { %v1935_v44 = vrot.slane %v1934_v2, 4  ;;  %v2262_v60 = vsel %vm5274_vm8, %v2260_v41, %v2261_v23  ;;  %v803_v53 = vrot.slane %v801_v37, 7  ;;  %v2516_v59 = vshll.u32 %v2332_v51, 16  ;;  %v6013_v48 = vld [vmem:[#allocation2 + $0x64] sm:$0xf] }
  0xd9   : > { %v1945_v17 = vrot.slane %v1944_v8, 4  ;;  %v4778_v26 = vcombine.low %v5994_v30, %v2262_v60  ;;  %v2515_v46 = vrot.slane %v2513_v34, 4  ;;  %v811_v27 = vrot.slane %v809_v29, 7  ;;  %v2758_v41 = vld [vmem:[#allocation2 + $0x60] sm:$0xe] }
  0xda   : > { %v1940_v28 = vsel %vm5331_vm12, %v1935_v44, %v1939_v38  ;;  %v2526_v61 = vshrl.u32 %v5998_v32, 16  ;;  %v806_v57 = vor.u32 %v804_v11, %v803_v53  ;;  %v807_v31 = vrot.slane %v803_v53, 4  ;;  %v6022_v38 = vld [vmem:[#allocation2 + $0x68] sm:$0x1] }
  0xdb   : > { %v1950_v5 = vsel %vm5331_vm12, %v1945_v17, %v1949_v49  ;;  %v4793_v56 = vcombine.low %v2332_v51, %v5998_v32  ;;  %v814_v20 = vor.u32 %v812_v6, %v811_v27  ;;  %v816_v43 = vrot.slane %v811_v27, 4  ;;  %v6035_v6 = vld [vmem:[#allocation2 + $0x60] sm:$0xe] }
  0xdc   : > { %v4762_v39 = vcombine.low %v1940_v28, %v1950_v5  ;;  %v2518_v22 = vrot.slane %v2516_v59, 5  ;;  %v1042_v33 = vsel %vm5265_vm7, %v806_v57, %v1041_v54  ;;  %v2522_v50 = vshll.u32 %v5998_v32, 16  ;;  %v6041_v5 = vpop.permute.xlu1 %3126 }
  0xdd   : > { %3484 = vrot.lane.b32.xlu0 %v4793_v56, %s5196_s10  ;;  %v2528_v13 = vrot.slane %v2526_v61, 4  ;;  %v2532_v51 = vshll.u32 %v6008_v62, 16  ;;  %v815_v49 = vsel %vm5342_vm13, %v807_v31, %v814_v20  ;;  %1043 = vst [vmem:[#allocation2 + $0x6c] sm:$0xf] %v1042_v33  ;;  %v1046_v23 = vsel %vm5252_vm3, %v816_v43, %v1045_v45 }
  0xde   : > { %3310 = vrot.lane.b32.xlu1 %v4762_v39, %s5199_s13  ;;  %v2519_v2 = vor.u32 %v2518_v22, %v2515_v46  ;;  %v1341_v30 = vshrl.u32 %v1113_v52, 16  ;;  %1044 = vst.msk [vmem:[#allocation2 + $0x70] sm:$0xf] %vm460_vm0, %v815_v49  ;;  %1047 = vst [vmem:[#allocation2 + $0x74] sm:$0x1] %v1046_v23  ;;  %v2524_v4 = vrot.slane %v2522_v50, 5 }
  0xdf   : > { %v2534_v8 = vrot.slane %v2532_v51, 5  ;;  %v1344_v37 = vshll.u32 %v1113_v52, 16  ;;  %v1350_v11 = vshll.u32 %v6013_v48, 16  ;;  %v1354_v60 = vshrl.u32 %v6013_v48, 16  ;;  %v6045_v52 = vpop.permute.xlu0 %3124 }
  0xe0   : > { %v2520_v34 = vrot.slane %v2519_v2, 4  ;;  %v1343_v44 = vrot.slane %v1341_v30, 4  ;;  %v1360_v29 = vshll.u32 %v6022_v38, 16  ;;  %v2529_v17 = vor.u32 %v2528_v13, %v2524_v4 }
  0xe1   : > { %v1346_v53 = vrot.slane %v1344_v37, 5  ;;  %v1352_v54 = vrot.slane %v1350_v11, 5  ;;  %v4681_v46 = vrot.slane %v2758_v41, 9  ;;  %v1356_v27 = vrot.slane %v1354_v60, 4 }
  0xe2   : > { %3390 = vrot.lane.b32.xlu1 %v4778_v26, %s5197_s11  ;;  %v2525_v28 = vsel %vm5331_vm12, %v2520_v34, %v2524_v4  ;;  %v1362_v59 = vrot.slane %v1360_v29, 5  ;;  %v2860_v61 = vrot.slane %v5998_v32, 5  ;;  %v2530_v57 = vrot.slane %v2529_v17, 4  ;;  %v6071_v17 = vpop.permute.xlu1 %3298 }
  0xe3   : > { %v1347_v31 = vor.u32 %v1346_v53, %v1343_v44  ;;  %v2863_v56 = vrot.slane %v6008_v62, 5  ;;  %v4651_v45 = vrot.slane %v6035_v6, 9  ;;  %v1357_v39 = vor.u32 %v1356_v27, %v1352_v54  ;;  %v6056_v62 = vld [vmem:[%s7254_s1] ss:$0 sm:$0xff] }
  0xe4   : > { %v2861_v26 = vsel %vm5274_vm8, %v4681_v46, %v2860_v61  ;;  %v2862_v20 = vrot.slane %v2860_v61, 4  ;;  %v1657_v43 = vrot.slane %v6013_v48, 5  ;;  %v2334_v22 = vld [vmem:[#allocation2 + $0x6c] sm:$0xf]  ;;  %v2535_v32 = vsel %vm5331_vm12, %v2530_v57, %v2534_v8  ;;  %v6074_v57 = vpop.permute.xlu0 %3042 }
  0xe5   : > { %v1348_v33 = vrot.slane %v1347_v31, 4  ;;  %v1660_v50 = vrot.slane %v6022_v38, 5  ;;  %v6061_v13 = vmul.f32 %v6056_v62, %v4993_v21  ;;  %v2335_v51 = vld [vmem:[#allocation2 + $0x70] sm:$0xf]  ;;  %v2537_v49 = vshrl.u32 %v2334_v22, 16 }
  0xe6   : > { %v2540_v23 = vshll.u32 %v2334_v22, 16  ;;  %v6063_v2 = vld [vmem:[#allocation2 + $0x74] sm:$0x1]  ;;  %v4809_v30 = vcombine.low %v2525_v28, %v2535_v32  ;;  %v2864_v41 = vsel %vm5274_vm8, %v2862_v20, %v2863_v56  ;;  %v2550_v4 = vshrl.u32 %v2335_v51, 16  ;;  %v1115_v34 = vld [vmem:[#allocation2 + $0x6c] sm:$0xf] }
  0xe7   : > { %v4794_v8 = vcombine.low %v2334_v22, %v2335_v51  ;;  %v2546_v37 = vshll.u32 %v2335_v51, 16  ;;  %v2556_v11 = vshll.u32 %v6063_v2, 16  ;;  %v2539_v44 = vrot.slane %v2537_v49, 4  ;;  %v1116_v29 = vld [vmem:[#allocation2 + $0x70] sm:$0xf] }
  0xe8   : > { %v2542_v19 = vrot.slane %v2540_v23, 5  ;;  %3564 = vrot.lane.b32.xlu0 %v4809_v30, %s5200_s14  ;;  %v1353_v21 = vsel %vm5331_vm12, %v1348_v33, %v1352_v54  ;;  %v1358_v60 = vrot.slane %v1357_v39, 4  ;;  %v2552_v46 = vrot.slane %v2550_v4, 4  ;;  %v1138_v61 = vld [vmem:[#allocation2 + $0x74] sm:$0x1] }
  0xe9   : > { %3486 = vrot.lane.b32.xlu1 %v4794_v8, %s5196_s10  ;;  %v2548_v53 = vrot.slane %v2546_v37, 5  ;;  %v2558_v28 = vrot.slane %v2556_v11, 5  ;;  %v4825_v27 = vcombine.low %v2861_v26, %v2864_v41  ;;  %v1365_v20 = vshrl.u32 %v1115_v34, 16  ;;  %v2759_v54 = vld [vmem:[#allocation2 + $0x6c] sm:$0xe] }
  0xea   : > { %v2543_v31 = vor.u32 %v2542_v19, %v2539_v44  ;;  %v1363_v56 = vsel %vm5331_vm12, %v1358_v60, %v1362_v59  ;;  %v1368_v22 = vshll.u32 %v1115_v34, 16  ;;  %v1374_v33 = vshll.u32 %v1116_v29, 16  ;;  %v1541_v41 = vld [vmem:[#allocation2 + $0x6c] sm:$0xe] }
  0xeb   : > { %v2553_v39 = vor.u32 %v2552_v46, %v2548_v53  ;;  %v4715_v32 = vcombine.low %v1353_v21, %v1363_v56  ;;  %v1378_v49 = vshrl.u32 %v1116_v29, 16  ;;  %v1367_v30 = vrot.slane %v1365_v20, 4  ;;  %v6081_v21 = vpop.permute.xlu1 %3554  ;;  %v6086_v20 = vpop.permute.xlu0 %3296 }
  0xec   : > { %v2544_v23 = vrot.slane %v2543_v31, 4  ;;  %3644 = vrot.lane.b32.xlu0 %v4825_v27, %s5198_s12  ;;  %v1370_v4 = vrot.slane %v1368_v22, 5  ;;  %v1384_v26 = vshll.u32 %v1138_v61, 16  ;;  %v1376_v37 = vrot.slane %v1374_v33, 5 }
  0xed   : > { %v2554_v8 = vrot.slane %v2553_v39, 4  ;;  %v1380_v11 = vrot.slane %v1378_v49, 4  ;;  %v4682_v44 = vrot.slane %v2759_v54, 9  ;;  %v2867_v60 = vrot.slane %v2335_v51, 5 }
  0xee   : > { %v2549_v59 = vsel %vm5331_vm12, %v2544_v23, %v2548_v53  ;;  %v1371_v34 = vor.u32 %v1370_v4, %v1367_v30  ;;  %v1386_v19 = vrot.slane %v1384_v26, 5  ;;  %v2870_v31 = vrot.slane %v6063_v2, 5 }
  0xef   : > { %v2559_v46 = vsel %vm5331_vm12, %v2554_v8, %v2558_v28  ;;  %v1381_v27 = vor.u32 %v1380_v11, %v1376_v37  ;;  %v4652_v56 = vrot.slane %v1541_v41, 9  ;;  %v2868_v54 = vsel %vm5274_vm8, %v4682_v44, %v2867_v60  ;;  %v6114_v8 = vld [vmem:[#allocation2 + $0x70] sm:$0xf]  ;;  %v558_v11 = vld [vmem:[#allocation2 + $0x80] sm:$0xf]  ;;  %v6122_v44 = vpop.permute.xlu1 %3044 }
  0xf0   : > { %v4810_v22 = vcombine.low %v2549_v59, %v2559_v46  ;;  %v1372_v39 = vrot.slane %v1371_v34, 4  ;;  %v2869_v53 = vrot.slane %v2867_v60, 4  ;;  %v1664_v49 = vrot.slane %v1116_v29, 5  ;;  %v6127_v46 = vpop.permute.xlu0 %3552 }
  0xf1   : > { %v1382_v33 = vrot.slane %v1381_v27, 4  ;;  %v1667_v51 = vrot.slane %v1138_v61, 5  ;;  %v1658_v28 = vsel %vm5274_vm8, %v4651_v45, %v1657_v43  ;;  %v1659_v29 = vrot.slane %v1657_v43, 4  ;;  %v6106_v61 = vld [vmem:[%s7255_s2] ss:$0 sm:$0xff] }
  0xf2   : > { %3566 = vrot.lane.b32.xlu1 %v4810_v22, %s5200_s14  ;;  %v1377_v2 = vsel %vm5331_vm12, %v1372_v39, %v1376_v37  ;;  %v2871_v23 = vsel %vm5274_vm8, %v2869_v53, %v2870_v31  ;;  %v398_v6 = vadd.f32 %v6106_v61, %v5988_v40  ;;  %v1727_v45 = vld [vmem:[#allocation2 + $0x6c] sm:$0xf]  ;;  %v1665_v26 = vsel %vm5274_vm8, %v4652_v56, %v1664_v49  ;;  %v1751_v31 = vld [vmem:[#allocation2 + $0x74] sm:$0x1] }
  0xf3   : > { %v1387_v30 = vsel %vm5331_vm12, %v1382_v33, %v1386_v19  ;;  %v4826_v4 = vcombine.low %v2868_v54, %v2871_v23  ;;  %v1666_v41 = vrot.slane %v1664_v49, 4  ;;  %v1661_v43 = vsel %vm5274_vm8, %v1659_v29, %v1660_v50  ;;  %v2151_v56 = vld [vmem:[#allocation2 + $0x6c] sm:$0xe] }
  0xf4   : > { %v4716_v48 = vcombine.low %v1377_v2, %v1387_v30  ;;  %v399_v40 = vadd.f32 %v6106_v61, %v6061_v13  ;;  %v430_v37 = vmax.f32 %v398_v6, 0.0  ;;  %v4731_v34 = vcombine.low %v1658_v28, %v1661_v43  ;;  %v5133_v6 = vld [vmem:[%s7256_s3 + $0x10] ss:$0 sps:$4 sm:$0x33]   ;;  %v1048_v43 = vld [vmem:[#allocation2 + $0x78] sm:$0xf] }
  0xf5   : > { %3646 = vrot.lane.b32.xlu0 %v4826_v4, %s5198_s12  ;;  %v1668_v59 = vsel %vm5274_vm8, %v1666_v41, %v1667_v51  ;;  %v1952_v19 = vshrl.u32 %v1727_v45, 16  ;;  %v1955_v60 = vshll.u32 %v1727_v45, 16  ;;  %v1965_v13 = vshrl.u32 %v6114_v8, 16  ;;  %v6140_v41 = vpop.permute.xlu1 %3046  ;;  %5096 = vmatprep.subr.msk.bf16.mxu0 %vm3997_vm4, %v5133_v6 }
  0xf6   : > { %3056 = vrot.lane.b32.xlu1 %v4715_v32, %s5194_s8  ;;  %v4732_v38 = vcombine.low %v1665_v26, %v1668_v59  ;;  %v431_v50 = vmax.f32 %v399_v40, 0.0  ;;  %v4908_v27 = vpack.c.bf16 %v430_v37, %v430_v37  ;;  %v4747_v54 = vcombine.low %v1727_v45, %v6114_v8  ;;  %5097 = vmatprep.subr.msk.bf16.mxu1 %vm3997_vm4, %v5133_v6 }
  0xf7   : > { %v1954_v22 = vrot.slane %v1952_v19, 4  ;;  %v1957_v39 = vrot.slane %v1955_v60, 5  ;;  %v559_v53 = vsel %vm5265_vm7, 0, %v558_v11  ;;  %v1961_v32 = vshll.u32 %v6114_v8, 16 }
  0xf8   : > { %v4909_v33 = vpack.c.bf16 %v431_v50, %v431_v50  ;;  %v818_v49 = vshrl.u32 %v4908_v27, 16  ;;  %v821_v51 = vshll.u32 %v4908_v27, 16  ;;  %560 = vst [vmem:[#allocation2 + $0x80] sm:$0xf] %v559_v53  ;;  %v1967_v2 = vrot.slane %v1965_v13, 4 }
  0xf9   : > { %3136 = vrot.lane.b32.xlu0 %v4731_v34, %s5193_s7  ;;  %v1958_v28 = vor.u32 %v1957_v39, %v1954_v22  ;;  %v1971_v23 = vshll.u32 %v1751_v31, 16  ;;  %v4667_v29 = vrot.slane %v2151_v56, 9  ;;  %v1963_v26 = vrot.slane %v1961_v32, 5  ;;  %v6143_v34 = vpop.permute.xlu0 %3300 }
  0xfa   : > { %3058 = vrot.lane.b32.xlu1 %v4716_v48, %s5194_s8  ;;  %v820_v45 = vrot.slane %v818_v49, 7  ;;  %v826_v30 = vshrl.u32 %v4909_v33, 16  ;;  %v829_v4 = vshll.u32 %v4909_v33, 16  ;;  %v2265_v11 = vrot.slane %v6114_v8, 5  ;;  %v5136_v8 = vld [vmem:[%s7256_s3 + $0x8] sm:$0xff]  }
  0xfb   : > { %v1959_v40 = vrot.slane %v1958_v28, 4  ;;  %v1973_v37 = vrot.slane %v1971_v23, 5  ;;  %v2268_v59 = vrot.slane %v1751_v31, 5  ;;  %v1968_v27 = vor.u32 %v1967_v2, %v1963_v26  ;;  %v6176_v23 = vpop.permute.xlu1 %3302 }
  0xfc   : > { %v823_v19 = vor.u32 %v821_v51, %v820_v45  ;;  %v824_v60 = vrot.slane %v820_v45, 4  ;;  %v828_v50 = vrot.slane %v826_v30, 7  ;;  %v3748_v48 = vsel %vm3746_vm2, %v5968_v16, %v5898_v18  ;;  %v5027_v18 = vld [vmem:[%s5283_s26 + $0x50] sm:$0xff]   ;;  %v504_v51 = vld [vmem:[#allocation2 + $0x84] sm:$0x1] }
  0xfd   : > { %3232 = vrot.lane.b32.xlu0 %v4747_v54, %s5195_s9  ;;  %v1964_v13 = vsel %vm5331_vm12, %v1959_v40, %v1963_v26  ;;  %v2267_v56 = vrot.slane %v2265_v11, 4  ;;  %v1969_v53 = vrot.slane %v1968_v27, 4  ;;  %v2266_v54 = vsel %vm5274_vm8, %v4667_v29, %v2265_v11  ;;  %v561_v29 = vld [vmem:[#allocation2 + $0x8c] sm:$0xf]  ;;  %v6184_v45 = vpop.permute.xlu0 %3380  ;;  %v5158_v26 = vld [vmem:[#allocation2 + $0x1c] sm:$0xf] }
  0xfe   : > { %3138 = vrot.lane.b32.xlu1 %v4732_v38, %s5193_s7  ;;  %v831_v31 = vor.u32 %v829_v4, %v828_v50  ;;  %v833_v22 = vrot.slane %v828_v50, 4  ;;  %v1049_v39 = vsel %vm5265_vm7, %v823_v19, %v1048_v43  ;;  %v3670_v38 = vsel %vm3664_vm14, %v4692_v58, %v6074_v57  ;;  %v5159_v43 = vld [vmem:[#allocation2 + $0x18] sm:$0xf]  ;;  %v5160_v50 = vld [vmem:[#allocation2 + $0x28] sm:$0xf] }
  0xff   : > { %1050 = vst [vmem:[#allocation2 + $0x78] sm:$0xf] %v1049_v39  ;;  %v1052_v16 = vld [vmem:[#allocation2 + $0x80] sm:$0x1]  ;;  %v2269_v33 = vsel %vm5274_vm8, %v2267_v56, %v2268_v59  ;;  %v3999_v49 = vsel %vm3997_vm4, %v5133_v6, 0  ;;  %v1974_v2 = vsel %vm5331_vm12, %v1969_v53, %v1973_v37  ;;  %v3717_v47 = vsel %vm3713_vm15, %v3670_v38, %v5996_v7  ;;  %v6217_v53 = vpop.permute.xlu1 %3382 }
 0x100   : > { %v832_v32 = vsel %vm5342_vm13, %v824_v60, %v831_v31  ;;  %v1053_v28 = vsel %vm5252_vm3, %v833_v22, %v1052_v16  ;;  %5053 = vmatpush3.bf16.msra.mxu0 %v3999_v49  ;;  %v4763_v36 = vcombine.low %v1964_v13, %v1974_v2  ;;  %v4996_v58 = vunpack.c.l.bf16 %v5027_v18  ;;  %v5137_v6 = vld [vmem:[%s7256_s3] sm:$0xff]   ;;  %5093 = vmatpush3.bf16.msra.mxu1 %v3999_v49 }
 0x101   : > { %1051 = vst.msk [vmem:[#allocation2 + $0x7c] sm:$0xf] %vm460_vm0, %v832_v32  ;;  %1054 = vst [vmem:[#allocation2 + $0x80] sm:$0x1] %v1053_v28  ;;  %v4997_v57 = vunpack.c.h.bf16 %v5027_v18  ;;  %5054 = vmatprep.subr.bf16.mxu0 %v5136_v8  ;;  %v3750_v30 = vsel %vm3746_vm2, %v3717_v47, %v5925_v55  ;;  %v505_v4 = vsel %vm5252_vm3, 0, %v504_v51  ;;  %v4693_v7 = vcombine.low %v5159_v43, %v5158_v26 }
 0x102   : > { %5091 = vmatprep.subr.bf16.mxu1 %v5136_v8  ;;  %3312 = vrot.lane.b32.xlu0 %v4763_v36, %s5199_s13  ;;  %v4779_v40 = vcombine.low %v2266_v54, %v2269_v33  ;;  %v361_v37 = vmul.f32 %v6056_v62, %v4996_v58  ;;  %506 = vst [vmem:[#allocation2 + $0x84] sm:$0x1] %v505_v4  ;;  %v562_v60 = vsel %vm5265_vm7, 0, %v561_v29  ;;  %v5161_v27 = vld [vmem:[#allocation2 + $0x24] sm:$0xf]  ;;  %vm3845_vm9 = vcmask 195584   ;;  %v6220_v33 = vpop.permute.xlu0 %3476 }
 0x103   : > { %v362_v11 = vmul.f32 %v6056_v62, %v4997_v57  ;;  %v3781_v59 = vsel %vm3779_vm5, %v3748_v48, %v6086_v20  ;;  %v3673_v55 = vsel %vm3664_vm14, %v4693_v7, %v6122_v44  ;;  %v4694_v13 = vcombine.low %v5161_v27, %v5160_v50  ;;  %563 = vst [vmem:[#allocation2 + $0x8c] sm:$0xf] %v562_v60 }
 0x104   : > { %v3814_v19 = vsel %vm3812_vm6, %v3781_v59, %v5976_v0  ;;  %5055 = vmatpush3.bf16.msra.mxu0 %v5136_v8  ;;  %v3783_v56 = vsel %vm3779_vm5, %v3750_v30, %v6071_v17  ;;  %v400_v31 = vadd.f32 %v6106_v61, %v361_v37  ;;  %5094 = vmatpush3.bf16.msra.mxu1 %v5136_v8  ;;  %v6236_v37 = vpop.permute.xlu1 %3478  ;;  %vm3878_vm10 = vcmask 228352  }
 0x105   : > { %v401_v20 = vadd.f32 %v6106_v61, %v362_v11  ;;  %5056 = vmatprep.subr.bf16.mxu0 %v5137_v6  ;;  %v6209_v22 = vsel %vm3713_vm15, %v3673_v55, %v6045_v52  ;;  %v3676_v39 = vsel %vm3664_vm14, %v4694_v13, %v6140_v41  ;;  %v6215_v17 = vsel %vm3845_vm9, %v3814_v19, %v5928_v15 }
 0x106   : > { %v1729_v44 = vld [vmem:[#allocation2 + $0x78] sm:$0xf]  ;;  %5092 = vmatprep.subr.bf16.mxu1 %v5137_v6  ;;  %3392 = vrot.lane.b32.xlu0 %v4779_v40, %s5197_s11  ;;  %v432_v54 = vmax.f32 %v400_v31, 0.0  ;;  %v6225_v15 = vsel %vm3713_vm15, %v3676_v39, %v6041_v5  ;;  %v6229_v51 = vsel %vm3812_vm6, %v3783_v56, %v6015_v25  ;;  %v6240_v60 = vpop.permute.xlu0 %3556  ;;  %vm3911_vm11 = vcmask 261120  }
 0x107   : > { %v2152_v0 = vld [vmem:[#allocation2 + $0x78] sm:$0xe]  ;;  %v1976_v18 = vshrl.u32 %v1729_v44, 16  ;;  %v1979_v8 = vshll.u32 %v1729_v44, 16  ;;  %v433_v49 = vmax.f32 %v401_v20, 0.0  ;;  %vm3964_vm4 = vcmask 293888  }
 0x108   : > { %v6205_v48 = vld [vmem:[#allocation2 + $0x78] sm:$0xf]  ;;  %v4668_v16 = vrot.slane %v2152_v0, 9  ;;  %v1730_v52 = vld [vmem:[#allocation2 + $0x7c] sm:$0xf]  ;;  %5057 = vmatpush3.bf16.msra.mxu0 %v5137_v6  ;;  %5095 = vmatpush3.bf16.msra.mxu1 %v5137_v6  ;;  %v4910_v5 = vpack.c.bf16 %v432_v54, %v432_v54 }
 0x109   : > { %v1752_v38 = vld [vmem:[#allocation2 + $0x80] sm:$0x1]  ;;  %v2561_v41 = vshrl.u32 %v6205_v48, 16  ;;  %v1978_v32 = vrot.slane %v1976_v18, 4  ;;  %v1981_v28 = vrot.slane %v1979_v8, 5  ;;  %v1989_v2 = vshrl.u32 %v1730_v52, 16 }
 0x10a   : > { %v4748_v36 = vcombine.low %v1729_v44, %v1730_v52  ;;  %v1985_v47 = vshll.u32 %v1730_v52, 16  ;;  %v1995_v58 = vshll.u32 %v1752_v38, 16  ;;  %v2272_v57 = vrot.slane %v1730_v52, 5  ;;  %v6238_v19 = vld [vmem:[#allocation2 + $0x7c] sm:$0xf] }
 0x10b   : > { %v2275_v29 = vrot.slane %v1752_v38, 5  ;;  %v1982_v30 = vor.u32 %v1981_v28, %v1978_v32  ;;  %v1991_v4 = vrot.slane %v1989_v2, 4  ;;  %v4911_v26 = vpack.c.bf16 %v433_v49, %v433_v49  ;;  %v1055_v39 = vld [vmem:[#allocation2 + $0x84] sm:$0xf]  ;;  %v1059_v52 = vld [vmem:[#allocation2 + $0x8c] sm:$0x1] }
 0x10c   : > { %3234 = vrot.lane.b32.xlu1 %v4748_v36, %s5195_s9  ;;  %v1987_v43 = vrot.slane %v1985_v47, 5  ;;  %v1997_v7 = vrot.slane %v1995_v58, 5  ;;  %v6234_v25 = vsel %vm5274_vm8, %v4668_v16, %v2272_v57  ;;  %v2274_v40 = vrot.slane %v2272_v57, 4  ;;  %v6251_v28 = vld [vmem:[#allocation2 + $0x80] sm:$0x1] }
 0x10d   : > { %v1983_v6 = vrot.slane %v1982_v30, 4  ;;  %v835_v11 = vshrl.u32 %v4910_v5, 16  ;;  %v838_v59 = vshll.u32 %v4910_v5, 16  ;;  %v843_v55 = vshrl.u32 %v4911_v26, 16  ;;  %v1117_v2 = vld [vmem:[#allocation2 + $0x78] sm:$0xf] }
 0x10e   : > { %v1992_v50 = vor.u32 %v1991_v4, %v1987_v43  ;;  %v2276_v27 = vsel %vm5274_vm8, %v2274_v40, %v2275_v29  ;;  %v846_v13 = vshll.u32 %v4911_v26, 16  ;;  %v2563_v56 = vrot.slane %v2561_v41, 4  ;;  %v6257_v29 = vld [vmem:[#allocation2 + $0x7c] sm:$0xf] }
 0x10f   : > { %v1988_v31 = vsel %vm5331_vm12, %v1983_v6, %v1987_v43  ;;  %v4780_v20 = vcombine.low %v6234_v25, %v2276_v27  ;;  %v837_v44 = vrot.slane %v835_v11, 7  ;;  %v845_v0 = vrot.slane %v843_v55, 7  ;;  %v6267_v43 = vpop.permute.xlu0 %3636  ;;  %v6271_v6 = vld [vmem:[#allocation2 + $0x80] sm:$0x1]  ;;  %v2760_v27 = vld [vmem:[#allocation2 + $0x78] sm:$0xe] }
 0x110   : > { %v1993_v18 = vrot.slane %v1992_v50, 4  ;;  %v2564_v8 = vshll.u32 %v6205_v48, 16  ;;  %v2574_v16 = vshrl.u32 %v6238_v19, 16  ;;  %v4795_v54 = vcombine.low %v6205_v48, %v6238_v19  ;;  %v6259_v48 = vpop.permute.xlu1 %3558 }
 0x111   : > { %v840_v38 = vor.u32 %v838_v59, %v837_v44  ;;  %v841_v49 = vrot.slane %v837_v44, 4  ;;  %v848_v41 = vor.u32 %v846_v13, %v845_v0  ;;  %v850_v32 = vrot.slane %v845_v0, 4 }
 0x112   : > { %v1998_v36 = vsel %vm5331_vm12, %v1993_v18, %v1997_v7  ;;  %v2566_v47 = vrot.slane %v2564_v8, 5  ;;  %3488 = vrot.lane.b32.xlu0 %v4795_v54, %s5196_s10  ;;  %v2570_v58 = vshll.u32 %v6238_v19, 16  ;;  %v2576_v57 = vrot.slane %v2574_v16, 4 }
 0x113   : > { %v4764_v30 = vcombine.low %v1988_v31, %v1998_v36  ;;  %v849_v4 = vsel %vm5342_vm13, %v841_v49, %v848_v41  ;;  %v1056_v5 = vsel %vm5265_vm7, %v840_v38, %v1055_v39  ;;  %v1060_v26 = vsel %vm5252_vm3, %v850_v32, %v1059_v52 }
 0x114   : > { %1057 = vst [vmem:[#allocation2 + $0x84] sm:$0xf] %v1056_v5  ;;  %1058 = vst.msk [vmem:[#allocation2 + $0x88] sm:$0xf] %vm460_vm0, %v849_v4  ;;  %v2567_v7 = vor.u32 %v2566_v47, %v2563_v56  ;;  %v2572_v25 = vrot.slane %v2570_v58, 5  ;;  %v2580_v40 = vshll.u32 %v6251_v28, 16  ;;  %v3880_v11 = vsel %vm3878_vm10, %v6215_v17, %v6127_v46  ;;  %v6282_v52 = vpop.permute.xlu1 %3048 }
 0x115   : > { %1061 = vst [vmem:[#allocation2 + $0x8c] sm:$0x1] %v1060_v26  ;;  %3314 = vrot.lane.b32.xlu1 %v4764_v30, %s5199_s13  ;;  %v1389_v59 = vshrl.u32 %v1117_v2, 16  ;;  %v1392_v55 = vshll.u32 %v1117_v2, 16  ;;  %v1398_v50 = vshll.u32 %v6257_v29, 16  ;;  %v1402_v44 = vshrl.u32 %v6257_v29, 16  ;;  %v6287_v2 = vpop.permute.xlu0 %3638 }
 0x116   : > { %v2568_v13 = vrot.slane %v2567_v7, 4  ;;  %v2577_v31 = vor.u32 %v2576_v57, %v2572_v25  ;;  %v2582_v56 = vrot.slane %v2580_v40, 5  ;;  %v1408_v8 = vshll.u32 %v6271_v6, 16 }
 0x117   : > { %v1391_v0 = vrot.slane %v1389_v59, 4  ;;  %v1394_v39 = vrot.slane %v1392_v55, 5  ;;  %v1400_v18 = vrot.slane %v1398_v50, 5  ;;  %v1404_v46 = vrot.slane %v1402_v44, 4 }
 0x118   : > { %v2573_v16 = vsel %vm5331_vm12, %v2568_v13, %v2572_v25  ;;  %v2578_v54 = vrot.slane %v2577_v31, 4  ;;  %v4683_v17 = vrot.slane %v2760_v27, 9  ;;  %v1410_v49 = vrot.slane %v1408_v8, 5  ;;  %v6309_v27 = vpop.permute.xlu1 %3050 }
 0x119   : > { %3394 = vrot.lane.b32.xlu1 %v4780_v20, %s5197_s11  ;;  %v1395_v38 = vor.u32 %v1394_v39, %v1391_v0  ;;  %v2874_v41 = vrot.slane %v6238_v19, 5  ;;  %v2877_v32 = vrot.slane %v6251_v28, 5  ;;  %v1405_v47 = vor.u32 %v1404_v46, %v1400_v18  ;;  %v6318_v39 = vpop.permute.xlu0 %3128 }
 0x11a   : > { %v2583_v36 = vsel %vm5331_vm12, %v2578_v54, %v2582_v56  ;;  %v3913_v19 = vsel %vm3911_vm11, %v3880_v11, %v6000_v24  ;;  %v3849_v28 = vsel %vm3845_vm9, %v6229_v51, %v5938_v42  ;;  %v3752_v44 = vsel %vm3746_vm2, %v6209_v22, %v5943_v14 }
 0x11b   : > { %v2338_v58 = vld [vmem:[#allocation2 + $0x84] sm:$0xf]  ;;  %v6291_v57 = vld [vmem:[#allocation2 + $0x88] sm:$0xf]  ;;  %v4811_v20 = vcombine.low %v2573_v16, %v2583_v36  ;;  %v2875_v4 = vsel %vm5274_vm8, %v4683_v17, %v2874_v41  ;;  %5058 = vmatprep.mubr.msk.bf16.mxu0 %vm3964_vm4, %v3913_v19  ;;  %v1396_v55 = vrot.slane %v1395_v38, 4  ;;  %v1406_v24 = vrot.slane %v1405_v47, 4 }
 0x11c   : > { %v6293_v30 = vld [vmem:[#allocation2 + $0x8c] sm:$0x1]  ;;  %v2585_v5 = vshrl.u32 %v2338_v58, 16  ;;  %v2588_v26 = vshll.u32 %v2338_v58, 16  ;;  %v2598_v7 = vshrl.u32 %v6291_v57, 16  ;;  %v4796_v25 = vcombine.low %v2338_v58, %v6291_v57 }
 0x11d   : > { %v2594_v40 = vshll.u32 %v6291_v57, 16  ;;  %v2604_v59 = vshll.u32 %v6293_v30, 16  ;;  %3568 = vrot.lane.b32.xlu0 %v4811_v20, %s5200_s14  ;;  %v2876_v51 = vrot.slane %v2874_v41, 4  ;;  %v1401_v31 = vsel %vm5331_vm12, %v1396_v55, %v1400_v18  ;;  %v1119_v0 = vld [vmem:[#allocation2 + $0x84] sm:$0xf]  ;;  %v6339_v55 = vpop.permute.xlu0 %3224 }
 0x11e   : > { %v2587_v11 = vrot.slane %v2585_v5, 4  ;;  %v2590_v50 = vrot.slane %v2588_v26, 5  ;;  %3490 = vrot.lane.b32.xlu1 %v4796_v25, %s5196_s10  ;;  %v2600_v42 = vrot.slane %v2598_v7, 4  ;;  %v1411_v56 = vsel %vm5331_vm12, %v1406_v24, %v1410_v49  ;;  %v1120_v18 = vld [vmem:[#allocation2 + $0x88] sm:$0xf]  ;;  %v6333_v7 = vpop.permute.xlu1 %3130 }
 0x11f   : > { %v2596_v13 = vrot.slane %v2594_v40, 5  ;;  %v2606_v16 = vrot.slane %v2604_v59, 5  ;;  %v2878_v54 = vsel %vm5274_vm8, %v2876_v51, %v2877_v32  ;;  %v3754_v46 = vsel %vm3746_vm2, %v6225_v15, %v5972_v63  ;;  %v1140_v17 = vld [vmem:[#allocation2 + $0x8c] sm:$0x1]  ;;  %v2761_v22 = vld [vmem:[#allocation2 + $0x84] sm:$0xe] }
 0x120   : > { %v2591_v8 = vor.u32 %v2590_v50, %v2587_v11  ;;  %v4717_v49 = vcombine.low %v1401_v31, %v1411_v56  ;;  %v4827_v41 = vcombine.low %v2875_v4, %v2878_v54  ;;  %v3882_v14 = vsel %vm3878_vm10, %v3849_v28, %v6081_v21  ;;  %v1543_v26 = vld [vmem:[#allocation2 + $0x84] sm:$0xe]  ;;  %v1542_v51 = vld [vmem:[#allocation2 + $0x78] sm:$0xe] }
 0x121   : > { %v2601_v38 = vor.u32 %v2600_v42, %v2596_v13  ;;  %v3915_v47 = vsel %vm3911_vm11, %v3882_v14, %v6024_v10  ;;  %v1413_v58 = vshrl.u32 %v1119_v0, 16  ;;  %v1416_v20 = vshll.u32 %v1119_v0, 16 }
 0x122   : > { %v2592_v36 = vrot.slane %v2591_v8, 4  ;;  %3648 = vrot.lane.b32.xlu0 %v4827_v41, %s5198_s12  ;;  %5059 = vmatmul.mubr.msk.bf16.vlgmr.msra.gmra.mxu0 %vm3964_vm4, %v3915_v47  ;;  %v1422_v63 = vshll.u32 %v1120_v18, 16  ;;  %v1426_v15 = vshrl.u32 %v1120_v18, 16  ;;  %v1432_v19 = vshll.u32 %v1140_v17, 16 }
 0x123   : > { %v2602_v32 = vrot.slane %v2601_v38, 4  ;;  %v1415_v5 = vrot.slane %v1413_v58, 4  ;;  %v1418_v21 = vrot.slane %v1416_v20, 5  ;;  %v4684_v28 = vrot.slane %v2761_v22, 9  ;;  %v5028_v22 = vld [vmem:[%s5283_s26 + $0x58] sm:$0xff]  }
 0x124   : > { %v2597_v4 = vsel %vm5331_vm12, %v2592_v36, %v2596_v13  ;;  %v3787_v25 = vsel %vm3779_vm5, %v3754_v46, %v6176_v23  ;;  %v1424_v40 = vrot.slane %v1422_v63, 5  ;;  %v1428_v59 = vrot.slane %v1426_v15, 4  ;;  %v6356_v36 = vpop.permute.xlu1 %3226  ;;  %v507_v58 = vld [vmem:[#allocation2 + $0x90] sm:$0x1]  ;;  %v1731_v20 = vld [vmem:[#allocation2 + $0x84] sm:$0xf] }
 0x125   : > { %v2607_v10 = vsel %vm5331_vm12, %v2602_v32, %v2606_v16  ;;  %v1419_v11 = vor.u32 %v1418_v21, %v1415_v5  ;;  %v2881_v50 = vrot.slane %v6291_v57, 5  ;;  %v2884_v42 = vrot.slane %v6293_v30, 5  ;;  %v6362_v32 = vpop.permute.xlu0 %3304  ;;  %v6370_v5 = vld [vmem:[#allocation2 + $0x88] sm:$0xf] }
 0x126   : > { %v4812_v24 = vcombine.low %v2597_v4, %v2607_v10  ;;  %v3785_v13 = vsel %vm3779_vm5, %v3752_v44, %v6143_v34  ;;  %v1429_v31 = vor.u32 %v1428_v59, %v1424_v40  ;;  %v1434_v56 = vrot.slane %v1432_v19, 5  ;;  %v564_v59 = vld [vmem:[#allocation2 + $0x98] sm:$0xf] }
 0x127   : > { %v4654_v0 = vrot.slane %v1543_v26, 9  ;;  %v1420_v23 = vrot.slane %v1419_v11, 4  ;;  %v2882_v8 = vsel %vm5274_vm8, %v4684_v28, %v2881_v50  ;;  %v2883_v16 = vrot.slane %v2881_v50, 4  ;;  %v6382_v50 = vld [vmem:[#allocation2 + $0x8c] sm:$0x1] }
 0x128   : > { %3570 = vrot.lane.b32.xlu1 %v4812_v24, %s5200_s14  ;;  %v1678_v54 = vrot.slane %v1120_v18, 5  ;;  %v1430_v46 = vrot.slane %v1429_v31, 4  ;;  %v1681_v57 = vrot.slane %v1140_v17, 5  ;;  %v4653_v38 = vrot.slane %v1542_v51, 9 }
 0x129   : > { %v1671_v30 = vrot.slane %v6257_v29, 5  ;;  %v1425_v34 = vsel %vm5331_vm12, %v1420_v23, %v1424_v40  ;;  %v2885_v44 = vsel %vm5274_vm8, %v2883_v16, %v2884_v42  ;;  %v3820_v29 = vsel %vm3812_vm6, %v3787_v25, %v6217_v53 }
 0x12a   : > { %v1679_v41 = vsel %vm5274_vm8, %v4654_v0, %v1678_v54  ;;  %v1680_v14 = vrot.slane %v1678_v54, 4  ;;  %v1435_v18 = vsel %vm5331_vm12, %v1430_v46, %v1434_v56  ;;  %v4828_v17 = vcombine.low %v2882_v8, %v2885_v44  ;;  %v6388_v56 = vpop.permute.xlu1 %3306  ;;  %v2153_v54 = vld [vmem:[#allocation2 + $0x84] sm:$0xe] }
 0x12b   : > { %v1673_v47 = vrot.slane %v1671_v30, 4  ;;  %v4718_v63 = vcombine.low %v1425_v34, %v1435_v18  ;;  %v1672_v19 = vsel %vm5274_vm8, %v4653_v38, %v1671_v30  ;;  %v1674_v4 = vrot.slane %v6271_v6, 5 }
 0x12c   : > { %3060 = vrot.lane.b32.xlu1 %v4717_v49, %s5194_s8  ;;  %v1682_v15 = vsel %vm5274_vm8, %v1680_v14, %v1681_v57  ;;  %3650 = vrot.lane.b32.xlu0 %v4828_v17, %s5198_s12  ;;  %v3818_v53 = vsel %vm3812_vm6, %v3785_v13, %v6184_v45  ;;  %v5000_v28 = vunpack.c.l.bf16 %v5028_v22  ;;  %v5001_v26 = vunpack.c.h.bf16 %v5028_v22 }
 0x12d   : > { %v4734_v21 = vcombine.low %v1679_v41, %v1682_v15  ;;  %v1675_v49 = vsel %vm5274_vm8, %v1673_v47, %v1674_v4  ;;  %v508_v10 = vsel %vm5252_vm3, 0, %v507_v58  ;;  %v2000_v25 = vshrl.u32 %v1731_v20, 16  ;;  %v5029_v4 = vld [vmem:[%s5283_s26 + $0x60] sm:$0xff]  }
 0x12e   : > { %v2003_v40 = vshll.u32 %v1731_v20, 16  ;;  %v4733_v6 = vcombine.low %v1672_v19, %v1675_v49  ;;  %v363_v24 = vmul.f32 %v6056_v62, %v5000_v28  ;;  %v364_v11 = vmul.f32 %v6056_v62, %v5001_v26  ;;  %509 = vst [vmem:[#allocation2 + $0x90] sm:$0x1] %v508_v10  ;;  %v510_v10 = vld [vmem:[#allocation2 + $0x9c] sm:$0x1] }
 0x12f   : > { %v2013_v45 = vshrl.u32 %v6370_v5, 16  ;;  %v3851_v42 = vsel %vm3845_vm9, %v3818_v53, %v6220_v33  ;;  %v2002_v51 = vrot.slane %v2000_v25, 4  ;;  %v4749_v31 = vcombine.low %v1731_v20, %v6370_v5  ;;  %v6397_v33 = vpop.permute.xlu0 %3384  ;;  %v6415_v53 = vpop.permute.xlu1 %3386 }
 0x130   : > { %3062 = vrot.lane.b32.xlu1 %v4718_v63, %s5194_s8  ;;  %v2005_v13 = vrot.slane %v2003_v40, 5  ;;  %3140 = vrot.lane.b32.xlu0 %v4733_v6, %s5193_s7  ;;  %v402_v0 = vadd.f32 %v6106_v61, %v363_v24  ;;  %v403_v23 = vadd.f32 %v6106_v61, %v364_v11  ;;  %v3884_v8 = vsel %vm3878_vm10, %v3851_v42, %v6240_v60  ;;  %v5164_v6 = vld [vmem:[#allocation2 + $0x3c] sm:$0xf]  ;;  %v5165_v24 = vld [vmem:[#allocation2 + $0x40] sm:$0xf] }
 0x131   : > { %v565_v16 = vsel %vm5265_vm7, 0, %v564_v59  ;;  %v2009_v57 = vshll.u32 %v6370_v5, 16  ;;  %v2015_v38 = vrot.slane %v2013_v45, 4  ;;  %v2019_v30 = vshll.u32 %v6382_v50, 16 }
 0x132   : > { %566 = vst [vmem:[#allocation2 + $0x98] sm:$0xf] %v565_v16  ;;  %v2006_v46 = vor.u32 %v2005_v13, %v2002_v51  ;;  %v3853_v34 = vsel %vm3845_vm9, %v3820_v29, %v6236_v37  ;;  %v434_v44 = vmax.f32 %v402_v0, 0.0  ;;  %v435_v41 = vmax.f32 %v403_v23, 0.0  ;;  %v5162_v37 = vld [vmem:[#allocation2 + $0x30] sm:$0xf] }
 0x133   : > { %v3917_v60 = vsel %vm3911_vm11, %v3884_v8, %v6267_v43  ;;  %v3886_v14 = vsel %vm3878_vm10, %v3853_v34, %v6259_v48  ;;  %v2011_v18 = vrot.slane %v2009_v57, 5  ;;  %v4669_v17 = vrot.slane %v2153_v54, 9  ;;  %v5163_v29 = vld [vmem:[#allocation2 + $0x34] sm:$0xf]  ;;  %v6417_v25 = vpop.permute.xlu0 %3480 }
 0x134   : > { %3142 = vrot.lane.b32.xlu1 %v4734_v21, %s5193_s7  ;;  %v2007_v22 = vrot.slane %v2006_v46, 4  ;;  %5062 = vmatprep.mubr.msk.bf16.mxu0 %vm3964_vm4, %v3917_v60  ;;  %v4912_v47 = vpack.c.bf16 %v434_v44, %v434_v44  ;;  %v4913_v58 = vpack.c.bf16 %v435_v41, %v435_v41  ;;  %v4695_v20 = vcombine.low %v5162_v37, %v5163_v29  ;;  %v3483_v60 = vpop.permute.xlu1 %3482 }
 0x135   : > { %3236 = vrot.lane.b32.xlu0 %v4749_v31, %s5195_s9  ;;  %v2279_v43 = vrot.slane %v6370_v5, 5  ;;  %v2016_v15 = vor.u32 %v2015_v38, %v2011_v18  ;;  %v2021_v48 = vrot.slane %v2019_v30, 5  ;;  %v2282_v19 = vrot.slane %v6382_v50, 5  ;;  %v1062_v13 = vld [vmem:[#allocation2 + $0x90] sm:$0xf] }
 0x136   : > { %v2012_v63 = vsel %vm5331_vm12, %v2007_v22, %v2011_v18  ;;  %v852_v21 = vshrl.u32 %v4912_v47, 16  ;;  %v855_v28 = vshll.u32 %v4912_v47, 16  ;;  %v860_v26 = vshrl.u32 %v4913_v58, 16  ;;  %v567_v38 = vld [vmem:[#allocation2 + $0xa4] sm:$0xf] }
 0x137   : > { %v863_v49 = vshll.u32 %v4913_v58, 16  ;;  %v2017_v40 = vrot.slane %v2016_v15, 4  ;;  %v2280_v5 = vsel %vm5274_vm8, %v4669_v17, %v2279_v43  ;;  %v2281_v59 = vrot.slane %v2279_v43, 4  ;;  %v3561_v58 = vpop.permute.xlu0 %3560 }
 0x138   : > { %v4696_v11 = vcombine.low %v5164_v6, %v5165_v24  ;;  %v854_v45 = vrot.slane %v852_v21, 7  ;;  %v862_v50 = vrot.slane %v860_v26, 7  ;;  %v3919_v42 = vsel %vm3911_vm11, %v3886_v14, %v6287_v2  ;;  %v5030_v14 = vld [vmem:[%s5283_s26 + $0x68] sm:$0xff]  }
 0x139   : > { %v5004_v51 = vunpack.c.l.bf16 %v5029_v4  ;;  %v1066_v31 = vld [vmem:[#allocation2 + $0x98] sm:$0x1]  ;;  %v2022_v0 = vsel %vm5331_vm12, %v2017_v40, %v2021_v48  ;;  %v2283_v23 = vsel %vm5274_vm8, %v2281_v59, %v2282_v19  ;;  %v5005_v8 = vunpack.c.h.bf16 %v5029_v4  ;;  %5063 = vmatmul.mubr.msk.bf16.gmra.mxu0 %vm3964_vm4, %v3919_v42  ;;  %v513_v21 = vld [vmem:[#allocation2 + $0xa8] sm:$0x1] }
 0x13a   : > { %v511_v16 = vsel %vm5252_vm3, 0, %v510_v10  ;;  %v857_v54 = vor.u32 %v855_v28, %v854_v45  ;;  %v858_v46 = vrot.slane %v854_v45, 4  ;;  %v865_v57 = vor.u32 %v863_v49, %v862_v50 }
 0x13b   : > { %v867_v2 = vrot.slane %v862_v50, 4  ;;  %512 = vst [vmem:[#allocation2 + $0x9c] sm:$0x1] %v511_v16  ;;  %v4765_v30 = vcombine.low %v2012_v63, %v2022_v0  ;;  %v3679_v34 = vsel %vm3664_vm14, %v4695_v20, %v6282_v52  ;;  %v365_v44 = vmul.f32 %v6056_v62, %v5004_v51  ;;  %v6481_v24 = vpop.permute.xlu0 %3640  ;;  %v6492_v0 = vld [vmem:[#allocation2 + $0x48] sm:$0xf] }
 0x13c   : > { %v366_v41 = vmul.f32 %v6056_v62, %v5005_v8  ;;  %v866_v22 = vsel %vm5342_vm13, %v858_v46, %v865_v57  ;;  %v1063_v18 = vsel %vm5265_vm7, %v857_v54, %v1062_v13  ;;  %v3682_v47 = vsel %vm3664_vm14, %v4696_v11, %v6309_v27 }
 0x13d   : > { %v1067_v17 = vsel %vm5252_vm3, %v867_v2, %v1066_v31  ;;  %1064 = vst [vmem:[#allocation2 + $0x90] sm:$0xf] %v1063_v18  ;;  %1065 = vst.msk [vmem:[#allocation2 + $0x94] sm:$0xf] %vm460_vm0, %v866_v22  ;;  %3316 = vrot.lane.b32.xlu0 %v4765_v30, %s5199_s13  ;;  %v4781_v62 = vcombine.low %v2280_v5, %v2283_v23  ;;  %v404_v52 = vadd.f32 %v6106_v61, %v365_v44  ;;  %v6494_v23 = vld [vmem:[#allocation2 + $0x4c] sm:$0xf] }
 0x13e   : > { %1068 = vst [vmem:[#allocation2 + $0x98] sm:$0x1] %v1067_v17  ;;  %v405_v37 = vadd.f32 %v6106_v61, %v366_v41  ;;  %v568_v29 = vsel %vm5265_vm7, 0, %v567_v38  ;;  %v3725_v20 = vsel %vm3713_vm15, %v3682_v47, %v6333_v7  ;;  %v3723_v27 = vsel %vm3713_vm15, %v3679_v34, %v6318_v39  ;;  %v6464_v39 = vld [vmem:[%s7254_s1] ss:$0 sm:$0xff] }
 0x13f   : > { %569 = vst [vmem:[#allocation2 + $0xa4] sm:$0xf] %v568_v29  ;;  %v5008_v43 = vunpack.c.l.bf16 %v5030_v14  ;;  %v5009_v63 = vunpack.c.h.bf16 %v5030_v14  ;;  %v436_v15 = vmax.f32 %v404_v52, 0.0  ;;  %v3758_v19 = vsel %vm3746_vm2, %v3725_v20, %v6356_v36  ;;  %v6505_v52 = vpop.permute.xlu0 %3642 }
 0x140   : > { %v437_v48 = vmax.f32 %v405_v37, 0.0  ;;  %v3756_v4 = vsel %vm3746_vm2, %v3723_v27, %v6339_v55  ;;  %v3791_v28 = vsel %vm3779_vm5, %v3758_v19, %v6388_v56  ;;  %v514_v6 = vsel %vm5252_vm3, 0, %v513_v21 }
 0x141   : > { %v3789_v7 = vsel %vm3779_vm5, %v3756_v4, %v6362_v32  ;;  %v367_v26 = vmul.f32 %v6464_v39, %v5008_v43  ;;  %v368_v49 = vmul.f32 %v6464_v39, %v5009_v63  ;;  %3396 = vrot.lane.b32.xlu0 %v4781_v62, %s5197_s11  ;;  %v4914_v36 = vpack.c.bf16 %v436_v15, %v436_v15  ;;  %v3563_v32 = vpop.permute.xlu1 %3562 }
 0x142   : > { %v4915_v55 = vpack.c.bf16 %v437_v48, %v437_v48  ;;  %v3824_v10 = vsel %vm3812_vm6, %v3791_v28, %v6415_v53  ;;  %v3822_v56 = vsel %vm3812_vm6, %v3789_v7, %v6397_v33  ;;  %515 = vst [vmem:[#allocation2 + $0xa8] sm:$0x1] %v514_v6  ;;  %v4697_v8 = vcombine.low %v6492_v0, %v6494_v23  ;;  %v1069_v15 = vld [vmem:[#allocation2 + $0x9c] sm:$0xf] }
 0x143   : > { %v3857_v40 = vsel %vm3845_vm9, %v3824_v10, %v3483_v60  ;;  %v3855_v5 = vsel %vm3845_vm9, %v3822_v56, %v6417_v25  ;;  %v6477_v59 = vadd.f32 %v6106_v61, %v367_v26  ;;  %v869_v11 = vshrl.u32 %v4914_v36, 16 }
 0x144   : > { %v872_v45 = vshll.u32 %v4914_v36, 16  ;;  %v877_v53 = vshrl.u32 %v4915_v55, 16  ;;  %v880_v50 = vshll.u32 %v4915_v55, 16  ;;  %v1733_v33 = vld [vmem:[#allocation2 + $0x90] sm:$0xf]  ;;  %v6484_v13 = vadd.f32 %v6106_v61, %v368_v49 }
 0x145   : > { %v1734_v42 = vld [vmem:[#allocation2 + $0x94] sm:$0xf]  ;;  %v1754_v51 = vld [vmem:[#allocation2 + $0x98] sm:$0x1]  ;;  %v6487_v25 = vsel %vm3878_vm10, %v3857_v40, %v3563_v32  ;;  %v6490_v31 = vsel %vm3878_vm10, %v3855_v5, %v3561_v58  ;;  %v2024_v16 = vshrl.u32 %v1733_v33, 16  ;;  %v2027_v54 = vshll.u32 %v1733_v33, 16  ;;  %v6511_v49 = vpop.permute.xlu1 %3052 }
 0x146   : > { %v2037_v46 = vshrl.u32 %v1734_v42, 16  ;;  %v4750_v57 = vcombine.low %v1733_v33, %v1734_v42  ;;  %v2154_v2 = vld [vmem:[#allocation2 + $0x90] sm:$0xe]  ;;  %v2033_v61 = vshll.u32 %v1734_v42, 16  ;;  %v2043_v38 = vshll.u32 %v1754_v51, 16 }
 0x147   : > { %v4670_v30 = vrot.slane %v2154_v2, 9  ;;  %v2286_v34 = vrot.slane %v1734_v42, 5  ;;  %v2340_v44 = vld [vmem:[#allocation2 + $0x90] sm:$0xf]  ;;  %v2026_v41 = vrot.slane %v2024_v16, 4  ;;  %v2029_v60 = vrot.slane %v2027_v54, 5  ;;  %v6531_v54 = vpop.permute.xlu0 %3132 }
 0x148   : > { %3238 = vrot.lane.b32.xlu1 %v4750_v57, %s5195_s9  ;;  %v2039_v14 = vrot.slane %v2037_v46, 4  ;;  %v2289_v22 = vrot.slane %v1754_v51, 5  ;;  %v6499_v18 = vld [vmem:[#allocation2 + $0x94] sm:$0xf]  ;;  %v2035_v17 = vrot.slane %v2033_v61, 5  ;;  %v2045_v47 = vrot.slane %v2043_v38, 5 }
 0x149   : > { %v6503_v58 = vsel %vm5274_vm8, %v4670_v30, %v2286_v34  ;;  %v2288_v62 = vrot.slane %v2286_v34, 4  ;;  %v2030_v37 = vor.u32 %v2029_v60, %v2026_v41  ;;  %v871_v29 = vrot.slane %v869_v11, 7  ;;  %v1073_v26 = vld [vmem:[#allocation2 + $0xa4] sm:$0x1]  ;;  %v6513_v32 = vld [vmem:[#allocation2 + $0x98] sm:$0x1] }
 0x14a   : > { %v879_v20 = vrot.slane %v877_v53, 7  ;;  %v2609_v27 = vshrl.u32 %v2340_v44, 16  ;;  %v2040_v43 = vor.u32 %v2039_v14, %v2035_v17  ;;  %v2612_v48 = vshll.u32 %v2340_v44, 16  ;;  %v6520_v53 = vld [vmem:[#allocation2 + $0x94] sm:$0xf] }
 0x14b   : > { %v2290_v63 = vsel %vm5274_vm8, %v2288_v62, %v2289_v22  ;;  %v2622_v19 = vshrl.u32 %v6499_v18, 16  ;;  %v2031_v4 = vrot.slane %v2030_v37, 4  ;;  %v874_v28 = vor.u32 %v872_v45, %v871_v29  ;;  %v1121_v45 = vld [vmem:[#allocation2 + $0x90] sm:$0xf]  ;;  %v6529_v16 = vld [vmem:[#allocation2 + $0x98] sm:$0x1] }
 0x14c   : > { %v4782_v21 = vcombine.low %v6503_v58, %v2290_v63  ;;  %v875_v7 = vrot.slane %v871_v29, 4  ;;  %v2041_v36 = vrot.slane %v2040_v43, 4  ;;  %v882_v55 = vor.u32 %v880_v50, %v879_v20 }
 0x14d   : > { %v884_v10 = vrot.slane %v879_v20, 4  ;;  %v2611_v56 = vrot.slane %v2609_v27, 4  ;;  %v2036_v40 = vsel %vm5331_vm12, %v2031_v4, %v2035_v17  ;;  %v1070_v5 = vsel %vm5265_vm7, %v874_v28, %v1069_v15  ;;  %v2762_v17 = vld [vmem:[#allocation2 + $0x90] sm:$0xe]  ;;  %v6546_v15 = vld [vmem:[#allocation2 + $0x54] sm:$0xf] }
 0x14e   : > { %v2614_v6 = vrot.slane %v2612_v48, 5  ;;  %v4797_v11 = vcombine.low %v2340_v44, %v6499_v18  ;;  %v2046_v33 = vsel %vm5331_vm12, %v2041_v36, %v2045_v47  ;;  %v883_v50 = vsel %vm5342_vm13, %v875_v7, %v882_v55  ;;  %1071 = vst [vmem:[#allocation2 + $0x9c] sm:$0xf] %v1070_v5  ;;  %v6540_v47 = vpop.permute.xlu1 %3054  ;;  %v6542_v20 = vld [vmem:[#allocation2 + $0x90] sm:$0xe]  ;;  %v6553_v36 = vpop.permute.xlu0 %3228 }
 0x14f   : > { %v1074_v42 = vsel %vm5252_vm3, %v884_v10, %v1073_v26  ;;  %v2618_v51 = vshll.u32 %v6499_v18, 16  ;;  %v4766_v46 = vcombine.low %v2036_v40, %v2046_v33  ;;  %1072 = vst.msk [vmem:[#allocation2 + $0xa0] sm:$0xf] %vm460_vm0, %v883_v50  ;;  %v2624_v2 = vrot.slane %v2622_v19, 4  ;;  %v6548_v48 = vld [vmem:[#allocation2 + $0x58] sm:$0xf] }
 0x150   : > { %3492 = vrot.lane.b32.xlu0 %v4797_v11, %s5196_s10  ;;  %1075 = vst [vmem:[#allocation2 + $0xa4] sm:$0x1] %v1074_v42  ;;  %v2615_v57 = vor.u32 %v2614_v6, %v2611_v56  ;;  %v2628_v61 = vshll.u32 %v6513_v32, 16  ;;  %v1437_v30 = vshrl.u32 %v1121_v45, 16  ;;  %v1440_v34 = vshll.u32 %v1121_v45, 16 }
 0x151   : > { %v2620_v38 = vrot.slane %v2618_v51, 5  ;;  %v1446_v44 = vshll.u32 %v6520_v53, 16  ;;  %3318 = vrot.lane.b32.xlu1 %v4766_v46, %s5199_s13  ;;  %v1450_v14 = vshrl.u32 %v6520_v53, 16  ;;  %v1456_v22 = vshll.u32 %v6529_v16, 16 }
 0x152   : > { %v2616_v41 = vrot.slane %v2615_v57, 4  ;;  %v2630_v60 = vrot.slane %v2628_v61, 5  ;;  %v1439_v62 = vrot.slane %v1437_v30, 4  ;;  %v1442_v37 = vrot.slane %v1440_v34, 5 }
 0x153   : > { %v2625_v58 = vor.u32 %v2624_v2, %v2620_v38  ;;  %v1448_v29 = vrot.slane %v1446_v44, 5  ;;  %v1452_v43 = vrot.slane %v1450_v14, 4  ;;  %v1458_v63 = vrot.slane %v1456_v22, 5 }
 0x154   : > { %v2621_v27 = vsel %vm5331_vm12, %v2616_v41, %v2620_v38  ;;  %v4698_v19 = vcombine.low %v6546_v15, %v6548_v48  ;;  %v1443_v28 = vor.u32 %v1442_v37, %v1439_v62  ;;  %v4685_v7 = vrot.slane %v2762_v17, 9  ;;  %v6572_v37 = vpop.permute.xlu0 %3308  ;;  %v6686_v48 = vld [vmem:[%s5283_s26 + $0x78] sm:$0xff]  }
 0x155   : > { %v2626_v4 = vrot.slane %v2625_v58, 4  ;;  %v2888_v26 = vrot.slane %v6499_v18, 5  ;;  %3398 = vrot.lane.b32.xlu1 %v4782_v21, %s5197_s11  ;;  %v2342_v55 = vld [vmem:[#allocation2 + $0x9c] sm:$0xf]  ;;  %v1453_v10 = vor.u32 %v1452_v43, %v1448_v29  ;;  %v1688_v56 = vrot.slane %v6529_v16, 5 }
 0x156   : > { %v2891_v40 = vrot.slane %v6513_v32, 5  ;;  %v4655_v5 = vrot.slane %v6542_v20, 9  ;;  %v2343_v6 = vld [vmem:[#allocation2 + $0xa0] sm:$0xf]  ;;  %v2633_v11 = vshrl.u32 %v2342_v55, 16  ;;  %v2636_v45 = vshll.u32 %v2342_v55, 16  ;;  %v6566_v32 = vpop.permute.xlu1 %3134 }
 0x157   : > { %v6559_v33 = vld [vmem:[#allocation2 + $0xa4] sm:$0x1]  ;;  %v2631_v18 = vsel %vm5331_vm12, %v2626_v4, %v2630_v60  ;;  %v2889_v50 = vsel %vm5274_vm8, %v4685_v7, %v2888_v26  ;;  %v2646_v21 = vshrl.u32 %v2343_v6, 16  ;;  %v4798_v42 = vcombine.low %v2342_v55, %v2343_v6  ;;  %v1123_v57 = vld [vmem:[#allocation2 + $0x9c] sm:$0xf] }
 0x158   : > { %v2642_v51 = vshll.u32 %v2343_v6, 16  ;;  %v2652_v46 = vshll.u32 %v6559_v33, 16  ;;  %v2635_v2 = vrot.slane %v2633_v11, 4  ;;  %v2638_v61 = vrot.slane %v2636_v45, 5  ;;  %v1124_v34 = vld [vmem:[#allocation2 + $0xa0] sm:$0xf] }
 0x159   : > { %v4813_v38 = vcombine.low %v2621_v27, %v2631_v18  ;;  %v1444_v30 = vrot.slane %v1443_v28, 4  ;;  %3494 = vrot.lane.b32.xlu1 %v4798_v42, %s5196_s10  ;;  %v2648_v41 = vrot.slane %v2646_v21, 4  ;;  %v1454_v14 = vrot.slane %v1453_v10, 4  ;;  %v1142_v4 = vld [vmem:[#allocation2 + $0xa4] sm:$0x1] }
 0x15a   : > { %v2644_v44 = vrot.slane %v2642_v51, 5  ;;  %v2654_v60 = vrot.slane %v2652_v46, 5  ;;  %v2639_v22 = vor.u32 %v2638_v61, %v2635_v2  ;;  %v2890_v58 = vrot.slane %v2888_v26, 4  ;;  %v2763_v18 = vld [vmem:[#allocation2 + $0x9c] sm:$0xe]  ;;  %v6578_v51 = vpop.permute.xlu1 %3230 }
 0x15b   : > { %3572 = vrot.lane.b32.xlu0 %v4813_v38, %s5200_s14  ;;  %v1449_v17 = vsel %vm5331_vm12, %v1444_v30, %v1448_v29  ;;  %v1461_v62 = vshrl.u32 %v1123_v57, 16  ;;  %v1459_v27 = vsel %vm5331_vm12, %v1454_v14, %v1458_v63  ;;  %v1464_v28 = vshll.u32 %v1123_v57, 16  ;;  %v1545_v61 = vld [vmem:[#allocation2 + $0x9c] sm:$0xe] }
 0x15c   : > { %v2649_v43 = vor.u32 %v2648_v41, %v2644_v44  ;;  %v1470_v7 = vshll.u32 %v1124_v34, 16  ;;  %v2640_v55 = vrot.slane %v2639_v22, 4  ;;  %v4719_v11 = vcombine.low %v1449_v17, %v1459_v27 }
 0x15d   : > { %v2892_v10 = vsel %vm5274_vm8, %v2890_v58, %v2891_v40  ;;  %v1463_v45 = vrot.slane %v1461_v62, 4  ;;  %v1466_v26 = vrot.slane %v1464_v28, 5  ;;  %v1474_v63 = vshrl.u32 %v1124_v34, 16  ;;  %v6586_v58 = vld [vmem:[#allocation2 + $0x9c] sm:$0xf] }
 0x15e   : > { %v2650_v21 = vrot.slane %v2649_v43, 4  ;;  %v4829_v29 = vcombine.low %v2889_v50, %v2892_v10  ;;  %v1472_v42 = vrot.slane %v1470_v7, 5  ;;  %v2645_v46 = vsel %vm5331_vm12, %v2640_v55, %v2644_v44  ;;  %v6588_v44 = vpop.permute.xlu0 %3388 }
 0x15f   : > { %v1480_v2 = vshll.u32 %v1142_v4, 16  ;;  %v1695_v57 = vrot.slane %v1142_v4, 5  ;;  %v1467_v40 = vor.u32 %v1466_v26, %v1463_v45  ;;  %v4686_v30 = vrot.slane %v2763_v18, 9  ;;  %v6601_v18 = vpop.permute.xlu1 %3310 }
 0x160   : > { %v2655_v38 = vsel %vm5331_vm12, %v2650_v21, %v2654_v60  ;;  %3652 = vrot.lane.b32.xlu0 %v4829_v29, %s5198_s12  ;;  %v2895_v41 = vrot.slane %v2343_v6, 5  ;;  %v1476_v14 = vrot.slane %v1474_v63, 4  ;;  %v2898_v17 = vrot.slane %v6559_v33, 5 }
 0x161   : > { %v4814_v50 = vcombine.low %v2645_v46, %v2655_v38  ;;  %v1482_v22 = vrot.slane %v1480_v2, 5  ;;  %v1468_v62 = vrot.slane %v1467_v40, 4  ;;  %v4656_v60 = vrot.slane %v1545_v61, 9  ;;  %v6615_v2 = vld [vmem:[#allocation2 + $0xa0] sm:$0xf] }
 0x162   : > { %v2896_v43 = vsel %vm5274_vm8, %v4686_v30, %v2895_v41  ;;  %v2897_v27 = vrot.slane %v2895_v41, 4  ;;  %v1477_v4 = vor.u32 %v1476_v14, %v1472_v42  ;;  %v1692_v28 = vrot.slane %v1124_v34, 5  ;;  %v6618_v38 = vpop.permute.xlu0 %3484  ;;  %v570_v41 = vld [vmem:[#allocation2 + $0xb0] sm:$0xf] }
 0x163   : > { %3574 = vrot.lane.b32.xlu1 %v4814_v50, %s5200_s14  ;;  %v1685_v6 = vrot.slane %v6520_v53, 5  ;;  %v438_v7 = vmax.f32 %v6477_v59, 0.0  ;;  %v1473_v33 = vsel %vm5331_vm12, %v1468_v62, %v1472_v42  ;;  %v439_v10 = vmax.f32 %v6484_v13, 0.0  ;;  %v6624_v50 = vld [vmem:[#allocation2 + $0xa4] sm:$0x1]  ;;  %v6629_v16 = vpop.permute.xlu1 %3390 }
 0x164   : > { %v2899_v55 = vsel %vm5274_vm8, %v2897_v27, %v2898_v17  ;;  %v2048_v45 = vshrl.u32 %v6586_v58, 16  ;;  %v1478_v21 = vrot.slane %v1477_v4, 4  ;;  %v1693_v34 = vsel %vm5274_vm8, %v4656_v60, %v1692_v28 }
 0x165   : > { %v4830_v29 = vcombine.low %v2896_v43, %v2899_v55  ;;  %v1694_v53 = vrot.slane %v1692_v28, 4  ;;  %v1686_v59 = vsel %vm5274_vm8, %v4655_v5, %v1685_v6  ;;  %v1687_v26 = vrot.slane %v1685_v6, 4  ;;  %v1076_v43 = vld [vmem:[#allocation2 + $0xa8] sm:$0xf] }
 0x166   : > { %v4916_v42 = vpack.c.bf16 %v438_v7, %v438_v7  ;;  %v4917_v46 = vpack.c.bf16 %v439_v10, %v439_v10  ;;  %v1483_v13 = vsel %vm5331_vm12, %v1478_v21, %v1482_v22  ;;  %v2050_v61 = vrot.slane %v2048_v45, 4 }
 0x167   : > { %3064 = vrot.lane.b32.xlu1 %v4719_v11, %s5194_s8  ;;  %3654 = vrot.lane.b32.xlu0 %v4830_v29, %s5198_s12  ;;  %v1696_v63 = vsel %vm5274_vm8, %v1694_v53, %v1695_v57  ;;  %v2051_v20 = vshll.u32 %v6586_v58, 16  ;;  %v4720_v5 = vcombine.low %v1473_v33, %v1483_v13  ;;  %v1689_v11 = vsel %vm5274_vm8, %v1687_v26, %v1688_v56  ;;  %v2155_v33 = vld [vmem:[#allocation2 + $0x9c] sm:$0xe]  ;;  %v6641_v26 = vpop.permute.xlu0 %3564 }
 0x168   : > { %v4736_v40 = vcombine.low %v1693_v34, %v1696_v63  ;;  %v886_v30 = vshrl.u32 %v4916_v42, 16  ;;  %v4735_v14 = vcombine.low %v1686_v59, %v1689_v11  ;;  %v889_v57 = vshll.u32 %v4916_v42, 16  ;;  %v5031_v59 = vld [vmem:[%s5283_s26 + $0x70] sm:$0xff]  }
 0x169   : > { %v894_v22 = vshrl.u32 %v4917_v46, 16  ;;  %v897_v17 = vshll.u32 %v4917_v46, 16  ;;  %v2053_v27 = vrot.slane %v2051_v20, 5  ;;  %v2061_v60 = vshrl.u32 %v6615_v2, 16 }
 0x16a   : > { %v888_v62 = vrot.slane %v886_v30, 7  ;;  %v4751_v4 = vcombine.low %v6586_v58, %v6615_v2  ;;  %v571_v28 = vsel %vm5265_vm7, 0, %v570_v41  ;;  %v2057_v6 = vshll.u32 %v6615_v2, 16  ;;  %v573_v30 = vld [vmem:[#allocation2 + $0xbc] sm:$0xf]  ;;  %v6661_v41 = vpop.permute.xlu1 %3486 }
 0x16b   : > { %3066 = vrot.lane.b32.xlu1 %v4720_v5, %s5194_s8  ;;  %3144 = vrot.lane.b32.xlu0 %v4735_v14, %s5193_s7  ;;  %v896_v56 = vrot.slane %v894_v22, 7  ;;  %v2067_v7 = vshll.u32 %v6624_v50, 16  ;;  %572 = vst [vmem:[#allocation2 + $0xb0] sm:$0xf] %v571_v28  ;;  %v2054_v58 = vor.u32 %v2053_v27, %v2050_v61  ;;  %v2063_v45 = vrot.slane %v2061_v60, 4 }
 0x16c   : > { %v891_v55 = vor.u32 %v889_v57, %v888_v62  ;;  %v892_v10 = vrot.slane %v888_v62, 4  ;;  %v2059_v29 = vrot.slane %v2057_v6, 5  ;;  %v3923_v53 = vsel %vm3911_vm11, %v6487_v25, %v6505_v52  ;;  %v516_v61 = vld [vmem:[#allocation2 + $0xb4] sm:$0x1]  ;;  %v6695_v60 = vld [vmem:[%s7255_s2] ss:$0 sm:$0xff] }
 0x16d   : > { %v899_v21 = vor.u32 %v897_v17, %v896_v56  ;;  %v2069_v34 = vrot.slane %v2067_v7, 5  ;;  %v2055_v46 = vrot.slane %v2054_v58, 4  ;;  %v3921_v13 = vsel %vm3911_vm11, %v6490_v31, %v6481_v24 }
 0x16e   : > { %v1077_v42 = vsel %vm5265_vm7, %v891_v55, %v1076_v43  ;;  %v4671_v63 = vrot.slane %v2155_v33, 9  ;;  %v2064_v25 = vor.u32 %v2063_v45, %v2059_v29  ;;  %v2293_v52 = vrot.slane %v6615_v2, 5  ;;  %5066 = vmatprep.mubr.msk.bf16.mxu0 %vm3964_vm4, %v3921_v13 }
 0x16f   : > { %3146 = vrot.lane.b32.xlu1 %v4736_v40, %s5193_s7  ;;  %v900_v20 = vsel %vm5342_vm13, %v892_v10, %v899_v21  ;;  %1078 = vst [vmem:[#allocation2 + $0xa8] sm:$0xf] %v1077_v42  ;;  %3240 = vrot.lane.b32.xlu0 %v4751_v4, %s5195_s9  ;;  %v2296_v5 = vrot.slane %v6624_v50, 5  ;;  %v901_v11 = vrot.slane %v896_v56, 4  ;;  %v3685_v24 = vsel %vm3664_vm14, %v4697_v8, %v6511_v49  ;;  %v6715_v21 = vpop.permute.xlu1 %3566 }
 0x170   : > { %1079 = vst.msk [vmem:[#allocation2 + $0xac] sm:$0xf] %vm460_vm0, %v900_v20  ;;  %v5012_v31 = vunpack.c.l.bf16 %v5031_v59  ;;  %v5013_v40 = vunpack.c.h.bf16 %v5031_v59  ;;  %v2060_v2 = vsel %vm5331_vm12, %v2055_v46, %v2059_v29  ;;  %v2065_v50 = vrot.slane %v2064_v25, 4  ;;  %5067 = vmatmul.mubr.msk.bf16.gmra.mxu0 %vm3964_vm4, %v3923_v53 }
 0x171   : > { %v2295_v14 = vrot.slane %v2293_v52, 4  ;;  %v517_v57 = vsel %vm5252_vm3, 0, %v516_v61  ;;  %v2294_v0 = vsel %vm5274_vm8, %v4671_v63, %v2293_v52  ;;  %v3688_v23 = vsel %vm3664_vm14, %v4698_v19, %v6540_v47  ;;  %v6688_v47 = vpop.permute.xlu0 %3644 }
 0x172   : > { %v369_v8 = vmul.f32 %v6464_v39, %v5012_v31  ;;  %v370_v49 = vmul.f32 %v6464_v39, %v5013_v40  ;;  %518 = vst [vmem:[#allocation2 + $0xb4] sm:$0x1] %v517_v57  ;;  %v1080_v22 = vld [vmem:[#allocation2 + $0xb0] sm:$0x1]  ;;  %v2070_v17 = vsel %vm5331_vm12, %v2065_v50, %v2069_v34  ;;  %v3729_v43 = vsel %vm3713_vm15, %v3688_v23, %v6566_v32 }
 0x173   : > { %v2297_v62 = vsel %vm5274_vm8, %v2295_v14, %v2296_v5  ;;  %v574_v15 = vsel %vm5265_vm7, 0, %v573_v30  ;;  %v1081_v19 = vsel %vm5252_vm3, %v901_v11, %v1080_v22  ;;  %v4767_v27 = vcombine.low %v2060_v2, %v2070_v17 }
 0x174   : > { %v408_v4 = vadd.f32 %v6695_v60, %v369_v8  ;;  %v3727_v32 = vsel %vm3713_vm15, %v3685_v24, %v6531_v54  ;;  %575 = vst [vmem:[#allocation2 + $0xbc] sm:$0xf] %v574_v15  ;;  %1082 = vst [vmem:[#allocation2 + $0xb0] sm:$0x1] %v1081_v19  ;;  %v4783_v56 = vcombine.low %v2294_v0, %v2297_v62  ;;  %v5016_v45 = vunpack.c.l.bf16 %v6686_v48  ;;  %v6725_v8 = vpop.permute.xlu1 %3056 }
 0x175   : > { %v409_v28 = vadd.f32 %v6695_v60, %v370_v49  ;;  %v3762_v6 = vsel %vm3746_vm2, %v3729_v43, %v6578_v51  ;;  %v3760_v7 = vsel %vm3746_vm2, %v3727_v32, %v6553_v36  ;;  %3320 = vrot.lane.b32.xlu0 %v4767_v27, %s5199_s13 }
 0x176   : > { %v1737_v33 = vld [vmem:[#allocation2 + $0xa8] sm:$0xf]  ;;  %v440_v10 = vmax.f32 %v408_v4, 0.0  ;;  %v6708_v58 = vsel %vm3779_vm5, %v3762_v6, %v6601_v18  ;;  %v6712_v54 = vsel %vm3779_vm5, %v3760_v7, %v6572_v37  ;;  %v6717_v37 = vpop.permute.xlu0 %3646 }
 0x177   : > { %v2156_v55 = vld [vmem:[#allocation2 + $0xa8] sm:$0xe]  ;;  %v1738_v51 = vld [vmem:[#allocation2 + $0xac] sm:$0xf]  ;;  %v2072_v29 = vshrl.u32 %v1737_v33, 16  ;;  %v2075_v36 = vshll.u32 %v1737_v33, 16 }
 0x178   : > { %v4672_v34 = vrot.slane %v2156_v55, 9  ;;  %v441_v53 = vmax.f32 %v409_v28, 0.0  ;;  %v2085_v59 = vshrl.u32 %v1738_v51, 16  ;;  %v4752_v42 = vcombine.low %v1737_v33, %v1738_v51  ;;  %v2344_v25 = vld [vmem:[#allocation2 + $0xa8] sm:$0xf] }
 0x179   : > { %v2081_v46 = vshll.u32 %v1738_v51, 16  ;;  %v2300_v13 = vrot.slane %v1738_v51, 5  ;;  %v2074_v63 = vrot.slane %v2072_v29, 4  ;;  %v2077_v18 = vrot.slane %v2075_v36, 5  ;;  %3400 = vrot.lane.b32.xlu0 %v4783_v56, %s5197_s11  ;;  %v1083_v43 = vld [vmem:[#allocation2 + $0xb4] sm:$0xf] }
 0x17a   : > { %v4918_v61 = vpack.c.bf16 %v440_v10, %v440_v10  ;;  %v4919_v20 = vpack.c.bf16 %v441_v53, %v441_v53  ;;  %3242 = vrot.lane.b32.xlu1 %v4752_v42, %s5195_s9  ;;  %v2087_v5 = vrot.slane %v2085_v59, 4  ;;  %v2657_v0 = vshrl.u32 %v2344_v25, 16  ;;  %v6727_v27 = vld [vmem:[#allocation2 + $0xac] sm:$0xf]  ;;  %v6733_v55 = vpop.permute.xlu0 %3136  ;;  %v6738_v53 = vld [vmem:[#allocation2 + $0xa8] sm:$0xf] }
 0x17b   : > { %v2083_v52 = vrot.slane %v2081_v46, 5  ;;  %v6722_v11 = vsel %vm5274_vm8, %v4672_v34, %v2300_v13  ;;  %v2302_v24 = vrot.slane %v2300_v13, 4  ;;  %v2078_v31 = vor.u32 %v2077_v18, %v2074_v63  ;;  %v1756_v50 = vld [vmem:[#allocation2 + $0xb0] sm:$0x1]  ;;  %v1087_v33 = vld [vmem:[#allocation2 + $0xbc] sm:$0x1] }
 0x17c   : > { %v903_v40 = vshrl.u32 %v4918_v61, 16  ;;  %v906_v30 = vshll.u32 %v4918_v61, 16  ;;  %v911_v2 = vshrl.u32 %v4919_v20, 16  ;;  %v914_v57 = vshll.u32 %v4919_v20, 16  ;;  %v6736_v34 = vld [vmem:[#allocation2 + $0xb0] sm:$0x1] }
 0x17d   : > { %v2088_v14 = vor.u32 %v2087_v5, %v2083_v52  ;;  %v2660_v23 = vshll.u32 %v2344_v25, 16  ;;  %v2079_v49 = vrot.slane %v2078_v31, 4  ;;  %v2091_v22 = vshll.u32 %v1756_v50, 16  ;;  %v6746_v63 = vld [vmem:[#allocation2 + $0xac] sm:$0xf] }
 0x17e   : > { %v2303_v17 = vrot.slane %v1756_v50, 5  ;;  %v905_v62 = vrot.slane %v903_v40, 7  ;;  %v913_v19 = vrot.slane %v911_v2, 7  ;;  %v2659_v4 = vrot.slane %v2657_v0, 4  ;;  %v6752_v5 = vld [vmem:[#allocation2 + $0xb0] sm:$0x1] }
 0x17f   : > { %v2089_v15 = vrot.slane %v2088_v14, 4  ;;  %v2662_v32 = vrot.slane %v2660_v23, 5  ;;  %v2084_v56 = vsel %vm5331_vm12, %v2079_v49, %v2083_v52  ;;  %v2093_v28 = vrot.slane %v2091_v22, 5 }
 0x180   : > { %v2304_v6 = vsel %vm5274_vm8, %v2302_v24, %v2303_v17  ;;  %v908_v7 = vor.u32 %v906_v30, %v905_v62  ;;  %v909_v51 = vrot.slane %v905_v62, 4  ;;  %v916_v29 = vor.u32 %v914_v57, %v913_v19  ;;  %v2764_v30 = vld [vmem:[#allocation2 + $0xa8] sm:$0xe]  ;;  %v6771_v17 = vpop.permute.xlu0 %3232 }
 0x181   : > { %v4784_v10 = vcombine.low %v6722_v11, %v2304_v6  ;;  %v918_v36 = vrot.slane %v913_v19, 4  ;;  %v2094_v59 = vsel %vm5331_vm12, %v2089_v15, %v2093_v28  ;;  %v2670_v46 = vshrl.u32 %v6727_v27, 16  ;;  %v6754_v11 = vpop.permute.xlu1 %3058 }
 0x182   : > { %v1084_v42 = vsel %vm5265_vm7, %v908_v7, %v1083_v43  ;;  %v4799_v13 = vcombine.low %v2344_v25, %v6727_v27  ;;  %v4768_v18 = vcombine.low %v2084_v56, %v2094_v59  ;;  %v917_v61 = vsel %vm5342_vm13, %v909_v51, %v916_v29 }
 0x183   : > { %1085 = vst [vmem:[#allocation2 + $0xb4] sm:$0xf] %v1084_v42  ;;  %v1088_v20 = vsel %vm5252_vm3, %v918_v36, %v1087_v33  ;;  %v2663_v52 = vor.u32 %v2662_v32, %v2659_v4  ;;  %1086 = vst.msk [vmem:[#allocation2 + $0xb8] sm:$0xf] %vm460_vm0, %v917_v61  ;;  %v2666_v25 = vshll.u32 %v6727_v27, 16  ;;  %v2672_v24 = vrot.slane %v2670_v46, 4 }
 0x184   : > { %3496 = vrot.lane.b32.xlu0 %v4799_v13, %s5196_s10  ;;  %1089 = vst [vmem:[#allocation2 + $0xbc] sm:$0x1] %v1088_v20  ;;  %v2676_v31 = vshll.u32 %v6736_v34, 16  ;;  %v1485_v40 = vshrl.u32 %v6738_v53, 16  ;;  %3322 = vrot.lane.b32.xlu1 %v4768_v18, %s5199_s13  ;;  %v1488_v50 = vshll.u32 %v6738_v53, 16  ;;  %v1494_v14 = vshll.u32 %v6746_v63, 16 }
 0x185   : > { %v2664_v2 = vrot.slane %v2663_v52, 4  ;;  %v1498_v57 = vshrl.u32 %v6746_v63, 16  ;;  %v2668_v0 = vrot.slane %v2666_v25, 5  ;;  %v1504_v49 = vshll.u32 %v6752_v5, 16  ;;  %v6778_v33 = vpop.permute.xlu1 %3138 }
 0x186   : > { %v1487_v23 = vrot.slane %v1485_v40, 4  ;;  %v6769_v22 = vsel %vm3812_vm6, %v6708_v58, %v6629_v16  ;;  %v1490_v62 = vrot.slane %v1488_v50, 5  ;;  %v1496_v43 = vrot.slane %v1494_v14, 5 }
 0x187   : > { %v1500_v15 = vrot.slane %v1498_v57, 4  ;;  %v4687_v19 = vrot.slane %v2764_v30, 9  ;;  %v2673_v4 = vor.u32 %v2672_v24, %v2668_v0  ;;  %v2678_v32 = vrot.slane %v2676_v31, 5 }
 0x188   : > { %v2902_v56 = vrot.slane %v6727_v27, 5  ;;  %v5017_v28 = vunpack.c.h.bf16 %v6686_v48  ;;  %3402 = vrot.lane.b32.xlu1 %v4784_v10, %s5197_s11  ;;  %v2669_v6 = vsel %vm5331_vm12, %v2664_v2, %v2668_v0  ;;  %v1491_v7 = vor.u32 %v1490_v62, %v1487_v23 }
 0x189   : > { %v1501_v16 = vor.u32 %v1500_v15, %v1496_v43  ;;  %v1506_v58 = vrot.slane %v1504_v49, 5  ;;  %v2674_v29 = vrot.slane %v2673_v4, 4  ;;  %v2905_v59 = vrot.slane %v6736_v34, 5  ;;  %v6809_v15 = vpop.permute.xlu1 %3234 }
 0x18a   : > { %v2346_v51 = vld [vmem:[#allocation2 + $0xb4] sm:$0xf]  ;;  %v2904_v36 = vrot.slane %v2902_v56, 4  ;;  %v6784_v27 = vsel %vm3812_vm6, %v6712_v54, %v6588_v44  ;;  %v2347_v42 = vld [vmem:[#allocation2 + $0xb8] sm:$0xf]  ;;  %v2903_v18 = vsel %vm5274_vm8, %v4687_v19, %v2902_v56  ;;  %v6793_v61 = vmul.f32 %v6464_v39, %v5016_v45  ;;  %v6796_v44 = vpop.permute.xlu0 %3312 }
 0x18b   : > { %v2681_v10 = vshrl.u32 %v2346_v51, 16  ;;  %v2684_v46 = vshll.u32 %v2346_v51, 16  ;;  %v6786_v13 = vld [vmem:[#allocation2 + $0xbc] sm:$0x1]  ;;  %v2694_v20 = vshrl.u32 %v2347_v42, 16  ;;  %v4800_v34 = vcombine.low %v2346_v51, %v2347_v42 }
 0x18c   : > { %v2690_v52 = vshll.u32 %v2347_v42, 16  ;;  %v2700_v25 = vshll.u32 %v6786_v13, 16  ;;  %v2679_v31 = vsel %vm5331_vm12, %v2674_v29, %v2678_v32  ;;  %v1492_v40 = vrot.slane %v1491_v7, 4  ;;  %v6800_v30 = vld [vmem:[#allocation2 + $0xb4] sm:$0xf] }
 0x18d   : > { %v2683_v54 = vrot.slane %v2681_v10, 4  ;;  %v2686_v24 = vrot.slane %v2684_v46, 5  ;;  %3498 = vrot.lane.b32.xlu1 %v4800_v34, %s5196_s10  ;;  %v2696_v45 = vrot.slane %v2694_v20, 4  ;;  %v4815_v14 = vcombine.low %v2669_v6, %v2679_v31  ;;  %v6803_v57 = vld [vmem:[#allocation2 + $0xb8] sm:$0xf] }
 0x18e   : > { %v2692_v2 = vrot.slane %v2690_v52, 5  ;;  %v2702_v50 = vrot.slane %v2700_v25, 5  ;;  %v1497_v23 = vsel %vm5331_vm12, %v1492_v40, %v1496_v43  ;;  %v1502_v49 = vrot.slane %v1501_v16, 4  ;;  %v1144_v32 = vld [vmem:[#allocation2 + $0xbc] sm:$0x1]  ;;  %v6818_v20 = vpop.permute.xlu0 %3392 }
 0x18f   : > { %v2687_v0 = vor.u32 %v2686_v24, %v2683_v54  ;;  %v2906_v62 = vsel %vm5274_vm8, %v2904_v36, %v2905_v59  ;;  %3576 = vrot.lane.b32.xlu0 %v4815_v14, %s5200_s14  ;;  %v1509_v56 = vshrl.u32 %v6800_v30, 16  ;;  %v1512_v6 = vshll.u32 %v6800_v30, 16  ;;  %v2765_v29 = vld [vmem:[#allocation2 + $0xb4] sm:$0xe] }
 0x190   : > { %v2697_v19 = vor.u32 %v2696_v45, %v2692_v2  ;;  %v4831_v4 = vcombine.low %v2903_v18, %v2906_v62  ;;  %v1507_v51 = vsel %vm5331_vm12, %v1502_v49, %v1506_v58  ;;  %v1518_v43 = vshll.u32 %v6803_v57, 16  ;;  %v1547_v54 = vld [vmem:[#allocation2 + $0xb4] sm:$0xe]  ;;  %v1546_v45 = vld [vmem:[#allocation2 + $0xa8] sm:$0xe]  ;;  %v6826_v62 = vpop.permute.xlu1 %3314 }
 0x191   : > { %v2688_v7 = vrot.slane %v2687_v0, 4  ;;  %v1522_v16 = vshrl.u32 %v6803_v57, 16  ;;  %v4721_v59 = vcombine.low %v1497_v23, %v1507_v51  ;;  %v1511_v10 = vrot.slane %v1509_v56, 4 }
 0x192   : > { %v2698_v36 = vrot.slane %v2697_v19, 4  ;;  %v1514_v46 = vrot.slane %v1512_v6, 5  ;;  %v1520_v34 = vrot.slane %v1518_v43, 5  ;;  %v1528_v25 = vshll.u32 %v1144_v32, 16 }
 0x193   : > { %v2693_v18 = vsel %vm5331_vm12, %v2688_v7, %v2692_v2  ;;  %v1524_v52 = vrot.slane %v1522_v16, 4  ;;  %3656 = vrot.lane.b32.xlu0 %v4831_v4, %s5198_s12  ;;  %v4688_v31 = vrot.slane %v2765_v29, 9  ;;  %v2909_v40 = vrot.slane %v2347_v42, 5  ;;  %v519_v29 = vld [vmem:[#allocation2 + $0xc0] sm:$0x1] }
 0x194   : > { %v2703_v58 = vsel %vm5331_vm12, %v2698_v36, %v2702_v50  ;;  %v1515_v24 = vor.u32 %v1514_v46, %v1511_v10  ;;  %v1530_v23 = vrot.slane %v1528_v25, 5  ;;  %v2912_v49 = vrot.slane %v6786_v13, 5  ;;  %v1739_v36 = vld [vmem:[#allocation2 + $0xb4] sm:$0xf]  ;;  %v6838_v10 = vpop.permute.xlu0 %3488 }
 0x195   : > { %v4816_v14 = vcombine.low %v2693_v18, %v2703_v58  ;;  %v1525_v0 = vor.u32 %v1524_v52, %v1520_v34  ;;  %v2910_v19 = vsel %vm5274_vm8, %v4688_v31, %v2909_v40  ;;  %v2911_v56 = vrot.slane %v2909_v40, 4  ;;  %v6849_v58 = vld [vmem:[#allocation2 + $0xb8] sm:$0xf] }
 0x196   : > { %v1516_v2 = vrot.slane %v1515_v24, 4  ;;  %v4658_v6 = vrot.slane %v1547_v54, 9  ;;  %v1706_v4 = vrot.slane %v6803_v57, 5  ;;  %v1709_v42 = vrot.slane %v1144_v32, 5 }
 0x197   : > { %3578 = vrot.lane.b32.xlu1 %v4816_v14, %s5200_s14  ;;  %v1526_v50 = vrot.slane %v1525_v0, 4  ;;  %v4657_v7 = vrot.slane %v1546_v45, 9  ;;  %v2913_v13 = vsel %vm5274_vm8, %v2911_v56, %v2912_v49  ;;  %v1699_v43 = vrot.slane %v6746_v63, 5  ;;  %v6859_v14 = vpop.permute.xlu1 %3394  ;;  %v576_v0 = vld [vmem:[#allocation2 + $0xc8] sm:$0xf] }
 0x198   : > { %v1521_v51 = vsel %vm5331_vm12, %v1516_v2, %v1520_v34  ;;  %v1702_v16 = vrot.slane %v6752_v5, 5  ;;  %v4832_v18 = vcombine.low %v2910_v19, %v2913_v13  ;;  %v1707_v32 = vsel %vm5274_vm8, %v4658_v6, %v1706_v4  ;;  %v6868_v19 = vld [vmem:[#allocation2 + $0xbc] sm:$0x1] }
 0x199   : > { %v1531_v46 = vsel %vm5331_vm12, %v1526_v50, %v1530_v23  ;;  %v1708_v52 = vrot.slane %v1706_v4, 4  ;;  %v1700_v25 = vsel %vm5274_vm8, %v4657_v7, %v1699_v43  ;;  %v1701_v54 = vrot.slane %v1699_v43, 4 }
 0x19a   : > { %v4722_v34 = vcombine.low %v1521_v51, %v1531_v46  ;;  %v372_v5 = vmul.f32 %v6464_v39, %v5017_v28  ;;  %3658 = vrot.lane.b32.xlu0 %v4832_v18, %s5198_s12  ;;  %v410_v31 = vadd.f32 %v6695_v60, %v6793_v61  ;;  %v520_v40 = vsel %vm5252_vm3, 0, %v519_v29  ;;  %v2157_v18 = vld [vmem:[#allocation2 + $0xb4] sm:$0xe] }
 0x19b   : > { %3068 = vrot.lane.b32.xlu1 %v4721_v59, %s5194_s8  ;;  %v1710_v24 = vsel %vm5274_vm8, %v1708_v52, %v1709_v42  ;;  %v2096_v45 = vshrl.u32 %v1739_v36, 16  ;;  %v1703_v39 = vsel %vm5274_vm8, %v1701_v54, %v1702_v16  ;;  %v3861_v48 = vsel %vm3845_vm9, %v6769_v22, %v6661_v41  ;;  %521 = vst [vmem:[#allocation2 + $0xc0] sm:$0x1] %v520_v40  ;;  %v6873_v41 = vpop.permute.xlu0 %3568 }
 0x19c   : > { %v411_v28 = vadd.f32 %v6695_v60, %v372_v5  ;;  %v2099_v59 = vshll.u32 %v1739_v36, 16  ;;  %v4737_v23 = vcombine.low %v1700_v25, %v1703_v39  ;;  %v442_v61 = vmax.f32 %v410_v31, 0.0 }
 0x19d   : > { %v2098_v49 = vrot.slane %v2096_v45, 4  ;;  %v2109_v2 = vshrl.u32 %v6849_v58, 16  ;;  %v4738_v56 = vcombine.low %v1707_v32, %v1710_v24  ;;  %v3859_v6 = vsel %vm3845_vm9, %v6784_v27, %v6618_v38  ;;  %v6884_v32 = vpop.permute.xlu1 %3490 }
 0x19e   : > { %v443_v50 = vmax.f32 %v411_v28, 0.0  ;;  %v2101_v4 = vrot.slane %v2099_v59, 5  ;;  %3148 = vrot.lane.b32.xlu0 %v4737_v23, %s5193_s7  ;;  %v4920_v60 = vpack.c.bf16 %v442_v61, %v442_v61  ;;  %v4753_v22 = vcombine.low %v1739_v36, %v6849_v58 }
 0x19f   : > { %3070 = vrot.lane.b32.xlu1 %v4722_v34, %s5194_s8  ;;  %v577_v42 = vsel %vm5265_vm7, 0, %v576_v0  ;;  %v2105_v7 = vshll.u32 %v6849_v58, 16  ;;  %v2111_v38 = vrot.slane %v2109_v2, 4  ;;  %v2115_v27 = vshll.u32 %v6868_v19, 16  ;;  %s7062_s8 = scalar_lea.vmem %s7257_s4, %s4888_s23 }
 0x1a0   : > { %v4921_v51 = vpack.c.bf16 %v443_v50, %v443_v50  ;;  %578 = vst [vmem:[#allocation2 + $0xc8] sm:$0xf] %v577_v42  ;;  %v2102_v13 = vor.u32 %v2101_v4, %v2098_v49  ;;  %v920_v43 = vshrl.u32 %v4920_v60, 16  ;;  %v923_v16 = vshll.u32 %v4920_v60, 16  ;;  %v5172_v4 = vld [vmem:[#allocation2 + $0x6c] sm:$0xf] }
 0x1a1   : > { %v3894_v29 = vsel %vm3878_vm10, %v3861_v48, %v6715_v21  ;;  %v2107_v46 = vrot.slane %v2105_v7, 5  ;;  %v3892_v34 = vsel %vm3878_vm10, %v3859_v6, %v6641_v26  ;;  %v2117_v24 = vrot.slane %v2115_v27, 5  ;;  %v6896_v26 = vpop.permute.xlu0 %3648  ;;  %v5173_v60 = vld [vmem:[#allocation2 + $0x70] sm:$0xf]  ;;  %v579_v42 = vld [vmem:[#allocation2 + $0xd4] sm:$0xf]  ;;  %v6907_v7 = vpop.permute.xlu1 %3570 }
 0x1a2   : > { %v928_v36 = vshrl.u32 %v4921_v51, 16  ;;  %v931_v52 = vshll.u32 %v4921_v51, 16  ;;  %v2103_v25 = vrot.slane %v2102_v13, 4  ;;  %v922_v54 = vrot.slane %v920_v43, 7  ;;  %3244 = vrot.lane.b32.xlu0 %v4753_v22, %s5195_s9  ;;  %v1090_v40 = vld [vmem:[#allocation2 + $0xc0] sm:$0xf] }
 0x1a3   : > { %3150 = vrot.lane.b32.xlu1 %v4738_v56, %s5193_s7  ;;  %v2112_v5 = vor.u32 %v2111_v38, %v2107_v46  ;;  %v3925_v21 = vsel %vm3911_vm11, %v3892_v34, %v6688_v47  ;;  %v4673_v39 = vrot.slane %v2157_v18, 9  ;;  %v2307_v48 = vrot.slane %v6849_v58, 5  ;;  %v522_v56 = vld [vmem:[#allocation2 + $0xcc] sm:$0x1]  ;;  %v6915_v43 = vld [vmem:[#allocation2 + $0xd0] sm:$0xf] }
 0x1a4   : > { %v930_v31 = vrot.slane %v928_v36, 7  ;;  %v2108_v45 = vsel %vm5331_vm12, %v2103_v25, %v2107_v46  ;;  %5070 = vmatprep.mubr.msk.bf16.mxu0 %vm3964_vm4, %v3925_v21  ;;  %v925_v28 = vor.u32 %v923_v16, %v922_v54  ;;  %v926_v59 = vrot.slane %v922_v54, 4  ;;  %v5175_v16 = vld [vmem:[#allocation2 + $0x64] sm:$0xf] }
 0x1a5   : > { %v2113_v0 = vrot.slane %v2112_v5, 4  ;;  %v2310_v23 = vrot.slane %v6868_v19, 5  ;;  %v2308_v47 = vsel %vm5274_vm8, %v4673_v39, %v2307_v48  ;;  %v2309_v2 = vrot.slane %v2307_v48, 4  ;;  %v6924_v36 = vpop.permute.xlu0 %3650  ;;  %v6934_v5 = vpop.permute.xlu1 %3060 }
 0x1a6   : > { %v933_v61 = vor.u32 %v931_v52, %v930_v31  ;;  %v935_v49 = vrot.slane %v930_v31, 4  ;;  %v1091_v6 = vsel %vm5265_vm7, %v925_v28, %v1090_v40  ;;  %v4700_v22 = vcombine.low %v5172_v4, %v5173_v60 }
 0x1a7   : > { %v1094_v58 = vld [vmem:[#allocation2 + $0xc8] sm:$0x1]  ;;  %v2118_v50 = vsel %vm5331_vm12, %v2113_v0, %v2117_v24  ;;  %v3927_v19 = vsel %vm3911_vm11, %v3894_v29, %v6717_v37  ;;  %1092 = vst [vmem:[#allocation2 + $0xc0] sm:$0xf] %v1091_v6  ;;  %v2311_v27 = vsel %vm5274_vm8, %v2309_v2, %v2310_v23  ;;  %v5174_v37 = vld [vmem:[#allocation2 + $0x60] sm:$0xf] }
 0x1a8   : > { %v934_v51 = vsel %vm5342_vm13, %v926_v59, %v933_v61  ;;  %v1095_v13 = vsel %vm5252_vm3, %v935_v49, %v1094_v58  ;;  %v4769_v38 = vcombine.low %v2108_v45, %v2118_v50  ;;  %5071 = vmatmul.mubr.msk.bf16.gmra.mxu0 %vm3964_vm4, %v3927_v19  ;;  %v4699_v29 = vcombine.low %v5174_v37, %v5175_v16 }
 0x1a9   : > { %1093 = vst.msk [vmem:[#allocation2 + $0xc4] sm:$0xf] %vm460_vm0, %v934_v51  ;;  %1096 = vst [vmem:[#allocation2 + $0xc8] sm:$0x1] %v1095_v13  ;;  %v523_v35 = vsel %vm5252_vm3, 0, %v522_v56  ;;  %v4785_v46 = vcombine.low %v2308_v47, %v2311_v27  ;;  %v580_v18 = vsel %vm5265_vm7, 0, %v579_v42  ;;  %v3694_v25 = vsel %vm3664_vm14, %v4700_v22, %v6754_v11  ;;  %v6953_v59 = vpop.permute.xlu0 %3140  ;;  %v6962_v4 = vpop.permute.xlu1 %3062 }
 0x1aa   : > { %3324 = vrot.lane.b32.xlu0 %v4769_v38, %s5199_s13  ;;  %524 = vst [vmem:[#allocation2 + $0xcc] sm:$0x1] %v523_v35  ;;  %v2742_v52 = vshrl.u32 %v6915_v43, 16  ;;  %581 = vst [vmem:[#allocation2 + $0xd4] sm:$0xf] %v580_v18  ;;  %v2738_v34 = vshll.u32 %v6915_v43, 16  ;;  %v3691_v1 = vsel %vm3664_vm14, %v4699_v29, %v6725_v8  ;;  %v3733_v54 = vsel %vm3713_vm15, %v3694_v25, %v6778_v33 }
 0x1ab   : > { %v3731_v9 = vsel %vm3713_vm15, %v3691_v1, %v6733_v55  ;;  %v3766_v24 = vsel %vm3746_vm2, %v3733_v54, %v6809_v15 }
 0x1ac   : > { %v6941_v40 = vrot.slane %v2738_v34, 5  ;;  %v6943_v11 = vrot.slane %v2742_v52, 4  ;;  %v3764_v8 = vsel %vm3746_vm2, %v3731_v9, %v6771_v17  ;;  %v3799_v33 = vsel %vm3779_vm5, %v3766_v24, %v6826_v62 }
 0x1ad   : > { %v3797_v55 = vsel %vm3779_vm5, %v3764_v8, %v6796_v44  ;;  %v3832_v15 = vsel %vm3812_vm6, %v3799_v33, %v6859_v14  ;;  %v6972_v18 = vpop.permute.xlu0 %3236 }
 0x1ae   : > { %3404 = vrot.lane.b32.xlu0 %v4785_v46, %s5197_s11  ;;  %v1741_v21 = vld [vmem:[#allocation2 + $0xc0] sm:$0xf]  ;;  %v3830_v6 = vsel %vm3812_vm6, %v3797_v55, %v6818_v20  ;;  %v2745_v50 = vor.u32 %v6943_v11, %v6941_v40  ;;  %v3865_v46 = vsel %vm3845_vm9, %v3832_v15, %v6884_v32 }
 0x1af   : > { %v2158_v31 = vld [vmem:[#allocation2 + $0xc0] sm:$0xe]  ;;  %v2120_v39 = vshrl.u32 %v1741_v21, 16  ;;  %v2123_v48 = vshll.u32 %v1741_v21, 16 }
 0x1b0   : > { %v1742_v45 = vld [vmem:[#allocation2 + $0xc4] sm:$0xf]  ;;  %v1758_v28 = vld [vmem:[#allocation2 + $0xc8] sm:$0x1]  ;;  %v2348_v56 = vld [vmem:[#allocation2 + $0xc0] sm:$0xf] }
 0x1b1   : > { %v2133_v0 = vshrl.u32 %v1742_v45, 16  ;;  %v4754_v23 = vcombine.low %v1741_v21, %v1742_v45  ;;  %v2129_v61 = vshll.u32 %v1742_v45, 16  ;;  %v2139_v49 = vshll.u32 %v1758_v28, 16  ;;  %v6955_v17 = vld [vmem:[#allocation2 + $0xcc] sm:$0xf] }
 0x1b2   : > { %v2122_v47 = vrot.slane %v2120_v39, 4  ;;  %v2125_v62 = vrot.slane %v2123_v48, 5  ;;  %v2314_v2 = vrot.slane %v1742_v45, 5  ;;  %v4674_v14 = vrot.slane %v2158_v31, 9  ;;  %v6966_v20 = vld [vmem:[#allocation2 + $0xc4] sm:$0xf]  ;;  %v6985_v45 = vpop.permute.xlu1 %3142 }
 0x1b3   : > { %3246 = vrot.lane.b32.xlu1 %v4754_v23, %s5195_s9  ;;  %v2131_v44 = vrot.slane %v2129_v61, 5  ;;  %v2135_v58 = vrot.slane %v2133_v0, 4  ;;  %v2141_v22 = vrot.slane %v2139_v49, 5  ;;  %v2317_v19 = vrot.slane %v1758_v28, 5  ;;  %v6968_v35 = vld [vmem:[#allocation2 + $0xd4] sm:$0x1] }
 0x1b4   : > { %v2126_v60 = vor.u32 %v2125_v62, %v2122_v47  ;;  %v2729_v42 = vshrl.u32 %v6955_v17, 16  ;;  %v2316_v13 = vrot.slane %v2314_v2, 4  ;;  %v2732_v38 = vshll.u32 %v6955_v17, 16  ;;  %v2366_v31 = vld [vmem:[#allocation2 + $0xc8] sm:$0x1] }
 0x1b5   : > { %v2136_v51 = vor.u32 %v2135_v58, %v2131_v44  ;;  %v2705_v27 = vshrl.u32 %v2348_v56, 16  ;;  %v2708_v29 = vshll.u32 %v2348_v56, 16  ;;  %v2315_v34 = vsel %vm5274_vm8, %v4674_v14, %v2314_v2  ;;  %v2766_v23 = vld [vmem:[#allocation2 + $0xc0] sm:$0xe] }
 0x1b6   : > { %v2127_v37 = vrot.slane %v2126_v60, 4  ;;  %v2731_v16 = vrot.slane %v2729_v42, 4  ;;  %v2734_v25 = vrot.slane %v2732_v38, 5  ;;  %v2718_v24 = vshrl.u32 %v6966_v20, 16 }
 0x1b7   : > { %v2137_v52 = vrot.slane %v2136_v51, 4  ;;  %v2707_v1 = vrot.slane %v2705_v27, 4  ;;  %v2710_v9 = vrot.slane %v2708_v29, 5  ;;  %v4801_v21 = vcombine.low %v2348_v56, %v6966_v20 }
 0x1b8   : > { %v2132_v54 = vsel %vm5331_vm12, %v2127_v37, %v2131_v44  ;;  %v2318_v11 = vsel %vm5274_vm8, %v2316_v13, %v2317_v19  ;;  %v2735_v8 = vor.u32 %v2734_v25, %v2731_v16  ;;  %v2748_v33 = vshll.u32 %v6968_v35, 16  ;;  %v3317_v44 = vpop.permute.xlu0 %3316 }
 0x1b9   : > { %v2142_v32 = vsel %vm5331_vm12, %v2137_v52, %v2141_v22  ;;  %3500 = vrot.lane.b32.xlu0 %v4801_v21, %s5196_s10  ;;  %v2711_v48 = vor.u32 %v2710_v9, %v2707_v1  ;;  %v2714_v28 = vshll.u32 %v6966_v20, 16  ;;  %v2720_v55 = vrot.slane %v2718_v24, 4  ;;  %v2767_v22 = vld [vmem:[#allocation2 + $0xcc] sm:$0xe] }
 0x1ba   : > { %v4770_v39 = vcombine.low %v2132_v54, %v2142_v32  ;;  %v2724_v15 = vshll.u32 %v2366_v31, 16  ;;  %v2923_v0 = vrot.slane %v6915_v43, 5  ;;  %v3863_v61 = vsel %vm3845_vm9, %v3830_v6, %v6838_v10  ;;  %v5177_v32 = vld [vmem:[#allocation2 + $0x7c] sm:$0xf] }
 0x1bb   : > { %v3898_v49 = vsel %vm3878_vm10, %v3865_v46, %v6907_v7  ;;  %v4786_v47 = vcombine.low %v2315_v34, %v2318_v11  ;;  %v2712_v62 = vrot.slane %v2711_v48, 4  ;;  %v2716_v2 = vrot.slane %v2714_v28, 5  ;;  %v5178_v28 = vld [vmem:[#allocation2 + $0x84] sm:$0xf] }
 0x1bc   : > { %3326 = vrot.lane.b32.xlu1 %v4770_v39, %s5199_s13  ;;  %v2916_v56 = vrot.slane %v6966_v20, 5  ;;  %v2736_v58 = vrot.slane %v2735_v8, 4  ;;  %v2746_v14 = vrot.slane %v2745_v50, 4  ;;  %v2750_v60 = vrot.slane %v2748_v33, 5  ;;  %v3239_v20 = vpop.permute.xlu1 %3238  ;;  %v3397_v52 = vpop.permute.xlu0 %3396  ;;  %s268_s13 = scalar_lea.vmem %s7259_s6, %s7275_s22 }
 0x1bd   : > { %v3896_v19 = vsel %vm3878_vm10, %v3863_v61, %v6873_v41  ;;  %v2721_v42 = vor.u32 %v2720_v55, %v2716_v2  ;;  %v2726_v10 = vrot.slane %v2724_v15, 5  ;;  %v4689_v6 = vrot.slane %v2766_v23, 9  ;;  %v5179_v55 = vld [vmem:[#allocation2 + $0x88] sm:$0xf] }
 0x1be   : > { %v3931_v7 = vsel %vm3911_vm11, %v3898_v49, %v6924_v36  ;;  %v2918_v51 = vrot.slane %v2916_v56, 4  ;;  %v2919_v13 = vrot.slane %v2366_v31, 5  ;;  %v3929_v38 = vsel %vm3911_vm11, %v3896_v19, %v6896_v26  ;;  %v5176_v31 = vld [vmem:[#allocation2 + $0x78] sm:$0xf] }
 0x1bf   : > { %v4802_v50 = vcombine.low %v6955_v17, %v6915_v43  ;;  %v2717_v41 = vsel %vm5331_vm12, %v2712_v62, %v2716_v2  ;;  %v2722_v27 = vrot.slane %v2721_v42, 4  ;;  %v4690_v37 = vrot.slane %v2767_v22, 9  ;;  %5074 = vmatprep.mubr.msk.bf16.mxu1 %vm3964_vm4, %v3929_v38 }
 0x1c0   : > { %3406 = vrot.lane.b32.xlu1 %v4786_v47, %s5197_s11  ;;  %v2741_v36 = vsel %vm5331_vm12, %v2736_v58, %v6941_v40  ;;  %v2751_v26 = vsel %vm5331_vm12, %v2746_v14, %v2750_v60  ;;  %v2925_v16 = vrot.slane %v2923_v0, 4  ;;  %v2926_v29 = vrot.slane %v6968_v35, 5  ;;  %5075 = vmatmul.mubr.msk.bf16.vlgmr.msra.gmra.mxu1 %vm3964_vm4, %v3931_v7 }
 0x1c1   : > { %v2727_v43 = vsel %vm5331_vm12, %v2722_v27, %v2726_v10  ;;  %v2917_v17 = vsel %vm5274_vm8, %v4689_v6, %v2916_v56  ;;  %v2920_v46 = vsel %vm5274_vm8, %v2918_v51, %v2919_v13  ;;  %v4705_v40 = vcombine.low %v6738_v53, %v6746_v63 }
 0x1c2   : > { %v4817_v34 = vcombine.low %v2717_v41, %v2727_v43  ;;  %v4706_v25 = vcombine.low %v6800_v30, %v6803_v57  ;;  %v4818_v35 = vcombine.low %v2741_v36, %v2751_v26  ;;  %v2924_v3 = vsel %vm5274_vm8, %v4690_v37, %v2923_v0  ;;  %v3493_v21 = vpop.permute.xlu0 %3492 }
 0x1c3   : > { %v2927_v1 = vsel %vm5274_vm8, %v2925_v16, %v2926_v29  ;;  %v4833_v54 = vcombine.low %v2917_v17, %v2920_v46  ;;  %v3319_v9 = vpop.permute.xlu1 %3318  ;;  %v4701_v11 = vcombine.low %v5176_v31, %v5177_v32  ;;  %v4702_v15 = vcombine.low %v5178_v28, %v5179_v55 }
 0x1c4   : > { %3502 = vrot.lane.b32.xlu1 %v4802_v50, %s5196_s10  ;;  %3580 = vrot.lane.b32.xlu0 %v4817_v34, %s5200_s14  ;;  %v4834_v24 = vcombine.low %v2924_v3, %v2927_v1  ;;  %s265_s10 = scalar_lea.vmem %s7258_s5, %s7275_s22 }
 0x1c5   : > { %v3697_v33 = vsel %vm3664_vm14, %v4701_v11, %v6934_v5 }
 0x1c6   : > { %v3735_v12 = vsel %vm3713_vm15, %v3697_v33, %v6953_v59  ;;  %v3700_v59 = vsel %vm3664_vm14, %v4702_v15, %v6962_v4 }
 0x1c7   : > { %v3399_v8 = vpop.permute.xlu1 %3398  ;;  %v3768_v48 = vsel %vm3746_vm2, %v3735_v12, %v6972_v18  ;;  %v3737_v18 = vsel %vm3713_vm15, %v3700_v59, %v6985_v45  ;;  %v5180_v12 = vld [vmem:[#allocation2 + $0x90] sm:$0xf] }
 0x1c8   : > { %3582 = vrot.lane.b32.xlu1 %v4818_v35, %s5200_s14  ;;  %3660 = vrot.lane.b32.xlu0 %v4833_v54, %s5198_s12  ;;  %v3801_v0 = vsel %vm3779_vm5, %v3768_v48, %v3317_v44  ;;  %v3770_v2 = vsel %vm3746_vm2, %v3737_v18, %v3239_v20 }
 0x1c9   : > { %v3834_v23 = vsel %vm3812_vm6, %v3801_v0, %v3397_v52  ;;  %v3803_v56 = vsel %vm3779_vm5, %v3770_v2, %v3319_v9 }
 0x1ca   : > { %v3867_v49 = vsel %vm3845_vm9, %v3834_v23, %v3493_v21  ;;  %v3836_v58 = vsel %vm3812_vm6, %v3803_v56, %v3399_v8 }
 0x1cb   : > { %v3495_v61 = vpop.permute.xlu1 %3494 }
 0x1cc   : > { %3662 = vrot.lane.b32.xlu1 %v4834_v24, %s5198_s12  ;;  %v3869_v14 = vsel %vm3845_vm9, %v3836_v58, %v3495_v61 }
 0x1cd   : > { %v3573_v39 = vpop.permute.xlu0 %3572 }
 0x1ce   : > { %v3900_v47 = vsel %vm3878_vm10, %v3867_v49, %v3573_v39  ;;  %v5181_v39 = vld [vmem:[#allocation2 + $0x94] sm:$0xf] }
 0x1cf   : > { %v4703_v48 = vcombine.low %v5180_v12, %v5181_v39 }
 0x1d2   : > { %v3653_v5 = vpop.permute.xlu0 %3652 }
 0x1d3   : > { %v3933_v62 = vsel %vm3911_vm11, %v3900_v47, %v3653_v5 }
 0x1d4   : > { %5078 = vmatprep.mubr.msk.bf16.mxu1 %vm3964_vm4, %v3933_v62 }
 0x1d5   : > { %v3575_v44 = vpop.permute.xlu1 %3574 }
 0x1d6   : > { %v3902_v60 = vsel %vm3878_vm10, %v3869_v14, %v3575_v44 }
 0x1d9   : > { %v3655_v22 = vpop.permute.xlu0 %3654  ;;  %v3065_v19 = vpop.permute.xlu1 %3064 }
 0x1da   : > { %v3935_v4 = vsel %vm3911_vm11, %v3902_v60, %v3655_v22  ;;  %v3703_v5 = vsel %vm3664_vm14, %v4703_v48, %v3065_v19 }
 0x1db   : > { %5079 = vmatmul.mubr.msk.bf16.gmra.mxu1 %vm3964_vm4, %v3935_v4 }
 0x1dd   : > { %v3145_v45 = vpop.permute.xlu0 %3144  ;;  %v7064_v6 = vpop.permute.xlu1 %3066 }
 0x1de   : > { %v3739_v18 = vsel %vm3713_vm15, %v3703_v5, %v3145_v45  ;;  %v5183_v45 = vld [vmem:[#allocation2 + $0xa0] sm:$0xf] }
 0x1e1   : > { %v3241_v50 = vpop.permute.xlu0 %3240  ;;  %v7074_v29 = vpop.permute.xlu1 %3146 }
 0x1e2   : > { %v5060_v42 = vpop.f32.mrf.mxu0  ;;  %v3772_v44 = vsel %vm3746_vm2, %v3739_v18, %v3241_v50 }
 0x1e3   : > { %v4924_v10 = vpack.c.bf16 %v5060_v42, %v5060_v42  ;;  %v4395_v41 = vmul.f32 %v5060_v42, %v5060_v42  ;;  %v4325_v17 = vsel %vm3664_vm14, %v5060_v42, 0.0 }
 0x1e4   : > { %v4035_v7 = vpop.f32.mrf.mxu0 }
 0x1e5   : > { %4292 = vst.msk [vmem:[%s7062_s8 + $0x8] sm:$0xf] %vm460_vm0, %v4924_v10  ;;  %v4922_v51 = vpack.c.bf16 %v4035_v7, %v4035_v7  ;;  %v4393_v38 = vmul.f32 %v4035_v7, %v4035_v7  ;;  %v4322_v37 = vsel %vm3664_vm14, %v4035_v7, 0.0  ;;  %v4428_v1 = vsel %vm3664_vm14, %v4395_v41, 0.0  ;;  %v5182_v10 = vld [vmem:[#allocation2 + $0x9c] sm:$0xf] }
 0x1e6   : > { %v5061_v13 = vpop.f32.mrf.mxu0  ;;  %v4704_v7 = vcombine.low %v5182_v10, %v5183_v45 }
 0x1e7   : > { %4290 = vst.msk [vmem:[%s7062_s8] sm:$0xf] %vm460_vm0, %v4922_v51  ;;  %v4925_v20 = vpack.c.bf16 %v5061_v13, %v5061_v13  ;;  %v4425_v46 = vsel %vm3664_vm14, %v4393_v38, 0.0  ;;  %v4396_v52 = vmul.f32 %v5061_v13, %v5061_v13  ;;  %v4327_v54 = vsel %vm3664_vm14, %v5061_v13, 0.0  ;;  %v3321_v9 = vpop.permute.xlu0 %3320 }
 0x1e8   : > { %v4038_v27 = vpop.f32.mrf.mxu0  ;;  %v3805_v51 = vsel %vm3779_vm5, %v3772_v44, %v3321_v9 }
 0x1e9   : > { %4293 = vst.msk [vmem:[%s7062_s8 + $0xc] sm:$0xf] %vm460_vm0, %v4925_v20  ;;  %v4923_v36 = vpack.c.bf16 %v4038_v27, %v4038_v27  ;;  %v4323_v26 = vsel %vm3664_vm14, %v4038_v27, 0.0  ;;  %v4394_v16 = vmul.f32 %v4038_v27, %v4038_v27  ;;  %v4430_v31 = vsel %vm3664_vm14, %v4396_v52, 0.0 }
 0x1ea   : > { %v4324_v43 = vadd.f32 %v4323_v26, %v4322_v37  ;;  %v3706_v52 = vsel %vm3664_vm14, %v4704_v7, %v7064_v6 }
 0x1eb   : > { %4291 = vst.msk [vmem:[%s7062_s8 + $0x4] sm:$0xf] %vm460_vm0, %v4923_v36  ;;  %v4426_v34 = vsel %vm3664_vm14, %v4394_v16, 0.0  ;;  %v3401_v8 = vpop.permute.xlu0 %3400 }
 0x1ec   : > { %v4326_v35 = vadd.f32 %v4325_v17, %v4324_v43  ;;  %v4427_v3 = vadd.f32 %v4426_v34, %v4425_v46  ;;  %v3243_v32 = vpop.permute.xlu1 %3242  ;;  %v3838_v38 = vsel %vm3812_vm6, %v3805_v51, %v3401_v8 }
 0x1ee   : > { %v4429_v24 = vadd.f32 %v4428_v1, %v4427_v3  ;;  %v4328_v21 = vadd.f32 %v4327_v54, %v4326_v35  ;;  %v3741_v1 = vsel %vm3713_vm15, %v3706_v52, %v7074_v29 }
 0x1ef   : > { %v3774_v9 = vsel %vm3746_vm2, %v3741_v1, %v3243_v32 }
 0x1f0   : > { %v4431_v11 = vadd.f32 %v4430_v31, %v4429_v24 }
 0x1f6   : > { %v3323_v33 = vpop.permute.xlu1 %3322  ;;  %v3497_v55 = vpop.permute.xlu0 %3496 }
 0x1f7   : > { %v3871_v37 = vsel %vm3845_vm9, %v3838_v38, %v3497_v55 }
 0x1f9   : > { %v5064_v28 = vpop.f32.mrf.mxu0 }
 0x1fa   : > { %v4928_v15 = vpack.c.bf16 %v5064_v28, %v5064_v28  ;;  %v3403_v23 = vpop.permute.xlu1 %3402  ;;  %v4399_v22 = vmul.f32 %v5064_v28, %v5064_v28  ;;  %v4333_v50 = vsel %vm3664_vm14, %v5064_v28, 0.0 }
 0x1fb   : > { %v4051_v0 = vpop.f32.mrf.mxu0 }
 0x1fc   : > { %4296 = vst.msk [vmem:[%s7062_s8 + $0x18] sm:$0xf] %vm460_vm0, %v4928_v15  ;;  %v4926_v61 = vpack.c.bf16 %v4051_v0, %v4051_v0  ;;  %v4329_v49 = vsel %vm3664_vm14, %v4051_v0, 0.0  ;;  %v4397_v47 = vmul.f32 %v4051_v0, %v4051_v0  ;;  %v4436_v17 = vsel %vm3664_vm14, %v4399_v22, 0.0 }
 0x1fd   : > { %v4330_v59 = vadd.f32 %v4329_v49, %v4328_v21  ;;  %v5065_v62 = vpop.f32.mrf.mxu0  ;;  %v3807_v21 = vsel %vm3779_vm5, %v3774_v9, %v3323_v33 }
 0x1fe   : > { %4294 = vst.msk [vmem:[%s7062_s8 + $0x10] sm:$0xf] %vm460_vm0, %v4926_v61  ;;  %v4432_v2 = vsel %vm3664_vm14, %v4397_v47, 0.0  ;;  %v4929_v56 = vpack.c.bf16 %v5065_v62, %v5065_v62  ;;  %v4400_v41 = vmul.f32 %v5065_v62, %v5065_v62  ;;  %v4335_v46 = vsel %vm3664_vm14, %v5065_v62, 0.0 }
 0x1ff   : > { %v4433_v58 = vadd.f32 %v4432_v2, %v4431_v11  ;;  %v4054_v14 = vpop.f32.mrf.mxu0  ;;  %v3499_v20 = vpop.permute.xlu1 %3498  ;;  %v3840_v11 = vsel %vm3812_vm6, %v3807_v21, %v3403_v23 }
 0x200   : > { %4297 = vst.msk [vmem:[%s7062_s8 + $0x1c] sm:$0xf] %vm460_vm0, %v4929_v56  ;;  %v4927_v4 = vpack.c.bf16 %v4054_v14, %v4054_v14  ;;  %v4331_v19 = vsel %vm3664_vm14, %v4054_v14, 0.0  ;;  %v4398_v42 = vmul.f32 %v4054_v14, %v4054_v14  ;;  %v4438_v54 = vsel %vm3664_vm14, %v4400_v41, 0.0 }
 0x201   : > { %v3577_v60 = vpop.permute.xlu0 %3576  ;;  %v4332_v13 = vadd.f32 %v4331_v19, %v4330_v59  ;;  %v3873_v6 = vsel %vm3845_vm9, %v3840_v11, %v3499_v20 }
 0x202   : > { %4295 = vst.msk [vmem:[%s7062_s8 + $0x14] sm:$0xf] %vm460_vm0, %v4927_v4  ;;  %v4434_v27 = vsel %vm3664_vm14, %v4398_v42, 0.0  ;;  %v3904_v16 = vsel %vm3878_vm10, %v3871_v37, %v3577_v60 }
 0x203   : > { %v4334_v36 = vadd.f32 %v4333_v50, %v4332_v13  ;;  %v4435_v26 = vadd.f32 %v4434_v27, %v4433_v58 }
 0x205   : > { %v3657_v43 = vpop.permute.xlu0 %3656  ;;  %v4437_v35 = vadd.f32 %v4436_v17, %v4435_v26  ;;  %v4336_v3 = vadd.f32 %v4335_v46, %v4334_v36 }
 0x206   : > { %v3937_v34 = vsel %vm3911_vm11, %v3904_v16, %v3657_v43 }
 0x207   : > { %5082 = vmatprep.mubr.msk.bf16.mxu1 %vm3964_vm4, %v3937_v34  ;;  %v4439_v24 = vadd.f32 %v4438_v54, %v4437_v35 }
 0x209   : > { %v3579_v31 = vpop.permute.xlu1 %3578 }
 0x20a   : > { %v3906_v8 = vsel %vm3878_vm10, %v3873_v6, %v3579_v31 }
 0x20c   : > { %v3659_v12 = vpop.permute.xlu0 %3658 }
 0x20d   : > { %v3939_v39 = vsel %vm3911_vm11, %v3906_v8, %v3659_v12  ;;  %v3069_v29 = vpop.permute.xlu1 %3068 }
 0x20e   : > { %5083 = vmatmul.mubr.msk.bf16.gmra.mxu1 %vm3964_vm4, %v3939_v39  ;;  %v3709_v59 = vsel %vm3664_vm14, %v4705_v40, %v3069_v29 }
 0x210   : > { %v3149_v48 = vpop.permute.xlu0 %3148 }
 0x211   : > { %v3071_v28 = vpop.permute.xlu1 %3070  ;;  %v3743_v18 = vsel %vm3713_vm15, %v3709_v59, %v3149_v48 }
 0x212   : > { %v3712_v58 = vsel %vm3664_vm14, %v4706_v25, %v3071_v28 }
 0x214   : > { %v3245_v32 = vpop.permute.xlu0 %3244 }
 0x215   : > { %v3151_v55 = vpop.permute.xlu1 %3150  ;;  %v3776_v53 = vsel %vm3746_vm2, %v3743_v18, %v3245_v32 }
 0x216   : > { %v3745_v60 = vsel %vm3713_vm15, %v3712_v58, %v3151_v55 }
 0x21c   : > { %v3325_v15 = vpop.permute.xlu0 %3324 }
 0x21d   : > { %v3809_v22 = vsel %vm3779_vm5, %v3776_v53, %v3325_v15 }
 0x220   : > { %v3405_v0 = vpop.permute.xlu0 %3404 }
 0x221   : > { %v3842_v57 = vsel %vm3812_vm6, %v3809_v22, %v3405_v0 }
 0x225   : > { %v3247_v33 = vpop.permute.xlu1 %3246 }
 0x226   : > { %v3778_v30 = vsel %vm3746_vm2, %v3745_v60, %v3247_v33 }
 0x22b   : > { %v3501_v23 = vpop.permute.xlu0 %3500 }
 0x22c   : > { %v3875_v20 = vsel %vm3845_vm9, %v3842_v57, %v3501_v23 }
 0x22e   : > { %v3327_v61 = vpop.permute.xlu1 %3326 }
 0x22f   : > { %v3811_v38 = vsel %vm3779_vm5, %v3778_v30, %v3327_v61 }
 0x230   : > { %v5068_v47 = vpop.f32.mrf.mxu0 }
 0x231   : > { %v4932_v5 = vpack.c.bf16 %v5068_v47, %v5068_v47  ;;  %v4403_v45 = vmul.f32 %v5068_v47, %v5068_v47  ;;  %v4341_v36 = vsel %vm3664_vm14, %v5068_v47, 0.0 }
 0x232   : > { %v3407_v49 = vpop.permute.xlu1 %3406  ;;  %v4067_v62 = vpop.f32.mrf.mxu0 }
 0x233   : > { %4300 = vst.msk [vmem:[%s7062_s8 + $0x28] sm:$0xf] %vm460_vm0, %v4932_v5  ;;  %v4930_v2 = vpack.c.bf16 %v4067_v62, %v4067_v62  ;;  %v4337_v56 = vsel %vm3664_vm14, %v4067_v62, 0.0  ;;  %v4401_v44 = vmul.f32 %v4067_v62, %v4067_v62  ;;  %v3844_v43 = vsel %vm3812_vm6, %v3811_v38, %v3407_v49 }
 0x234   : > { %v4338_v14 = vadd.f32 %v4337_v56, %v4336_v3  ;;  %v5069_v40 = vpop.f32.mrf.mxu0  ;;  %v4444_v35 = vsel %vm3664_vm14, %v4403_v45, 0.0 }
 0x235   : > { %4298 = vst.msk [vmem:[%s7062_s8 + $0x20] sm:$0xf] %vm460_vm0, %v4930_v2  ;;  %v4440_v19 = vsel %vm3664_vm14, %v4401_v44, 0.0  ;;  %v4933_v42 = vpack.c.bf16 %v5069_v40, %v5069_v40  ;;  %v4404_v26 = vmul.f32 %v5069_v40, %v5069_v40  ;;  %v4343_v3 = vsel %vm3664_vm14, %v5069_v40, 0.0 }
 0x236   : > { %v3503_v63 = vpop.permute.xlu1 %3502  ;;  %v3581_v4 = vpop.permute.xlu0 %3580  ;;  %v4441_v25 = vadd.f32 %v4440_v19, %v4439_v24 }
 0x237   : > { %v4070_v10 = vpop.f32.mrf.mxu0  ;;  %4301 = vst.msk [vmem:[%s7062_s8 + $0x2c] sm:$0xf] %vm460_vm0, %v4933_v42  ;;  %v3908_v27 = vsel %vm3878_vm10, %v3875_v20, %v3581_v4  ;;  %v3877_v34 = vsel %vm3845_vm9, %v3844_v43, %v3503_v63  ;;  %v4446_v31 = vsel %vm3664_vm14, %v4404_v26, 0.0 }
 0x238   : > { %v4931_v7 = vpack.c.bf16 %v4070_v10, %v4070_v10  ;;  %v4339_v51 = vsel %vm3664_vm14, %v4070_v10, 0.0  ;;  %v4402_v13 = vmul.f32 %v4070_v10, %v4070_v10 }
 0x239   : > { %v4340_v41 = vadd.f32 %v4339_v51, %v4338_v14 }
 0x23a   : > { %v3583_v50 = vpop.permute.xlu1 %3582  ;;  %v3661_v37 = vpop.permute.xlu0 %3660  ;;  %4299 = vst.msk [vmem:[%s7062_s8 + $0x24] sm:$0xf] %vm460_vm0, %v4931_v7  ;;  %v4442_v16 = vsel %vm3664_vm14, %v4402_v13, 0.0 }
 0x23b   : > { %v3941_v17 = vsel %vm3911_vm11, %v3908_v27, %v3661_v37  ;;  %v4342_v46 = vadd.f32 %v4341_v36, %v4340_v41  ;;  %v4443_v52 = vadd.f32 %v4442_v16, %v4441_v25  ;;  %v3910_v1 = vsel %vm3878_vm10, %v3877_v34, %v3583_v50 }
 0x23c   : > { %5086 = vmatprep.mubr.msk.bf16.mxu1 %vm3964_vm4, %v3941_v17 }
 0x23d   : > { %v4445_v9 = vadd.f32 %v4444_v35, %v4443_v52  ;;  %v4344_v24 = vadd.f32 %v4343_v3, %v4342_v46 }
 0x23e   : > { %v3663_v54 = vpop.permute.xlu1 %3662 }
 0x23f   : > { %v3943_v21 = vsel %vm3911_vm11, %v3910_v1, %v3663_v54  ;;  %v4447_v11 = vadd.f32 %v4446_v31, %v4445_v9 }
 0x240   : > { %5087 = vmatmul.mubr.msk.bf16.gmra.mxu1 %vm3964_vm4, %v3943_v21 }
 0x268   : > { %v5072_v6 = vpop.f32.mrf.mxu0 }
 0x269   : > { %v4936_v8 = vpack.c.bf16 %v5072_v6, %v5072_v6  ;;  %v4407_v61 = vmul.f32 %v5072_v6, %v5072_v6  ;;  %v4349_v59 = vsel %vm3664_vm14, %v5072_v6, 0.0 }
 0x26a   : > { %v4083_v12 = vpop.f32.mrf.mxu0 }
 0x26b   : > { %4304 = vst.msk [vmem:[%s7062_s8 + $0x38] sm:$0xf] %vm460_vm0, %v4936_v8  ;;  %v4934_v39 = vpack.c.bf16 %v4083_v12, %v4083_v12  ;;  %v4345_v29 = vsel %vm3664_vm14, %v4083_v12, 0.0  ;;  %v4405_v48 = vmul.f32 %v4083_v12, %v4083_v12  ;;  %v4452_v44 = vsel %vm3664_vm14, %v4407_v61, 0.0 }
 0x26c   : > { %v4346_v28 = vadd.f32 %v4345_v29, %v4344_v24  ;;  %v5073_v32 = vpop.f32.mrf.mxu0 }
 0x26d   : > { %4302 = vst.msk [vmem:[%s7062_s8 + $0x30] sm:$0xf] %vm460_vm0, %v4934_v39  ;;  %v4448_v55 = vsel %vm3664_vm14, %v4405_v48, 0.0  ;;  %v4937_v15 = vpack.c.bf16 %v5073_v32, %v5073_v32  ;;  %v4408_v62 = vmul.f32 %v5073_v32, %v5073_v32  ;;  %v4351_v58 = vsel %vm3664_vm14, %v5073_v32, 0.0 }
 0x26e   : > { %v4449_v33 = vadd.f32 %v4448_v55, %v4447_v11  ;;  %v4086_v0 = vpop.f32.mrf.mxu0 }
 0x26f   : > { %4305 = vst.msk [vmem:[%s7062_s8 + $0x3c] sm:$0xf] %vm460_vm0, %v4937_v15  ;;  %v4935_v23 = vpack.c.bf16 %v4086_v0, %v4086_v0  ;;  %v4347_v49 = vsel %vm3664_vm14, %v4086_v0, 0.0  ;;  %v4406_v47 = vmul.f32 %v4086_v0, %v4086_v0  ;;  %v4454_v14 = vsel %vm3664_vm14, %v4408_v62, 0.0 }
 0x270   : > { %v4348_v5 = vadd.f32 %v4347_v49, %v4346_v28 }
 0x271   : > { %4303 = vst.msk [vmem:[%s7062_s8 + $0x34] sm:$0xf] %vm460_vm0, %v4935_v23  ;;  %v4450_v18 = vsel %vm3664_vm14, %v4406_v47, 0.0 }
 0x272   : > { %v4350_v2 = vadd.f32 %v4349_v59, %v4348_v5  ;;  %v4451_v56 = vadd.f32 %v4450_v18, %v4449_v33 }
 0x274   : > { %v4453_v53 = vadd.f32 %v4452_v44, %v4451_v56  ;;  %v4352_v63 = vadd.f32 %v4351_v58, %v4350_v2 }
 0x276   : > { %v4455_v40 = vadd.f32 %v4454_v14, %v4453_v53 }
 0x280   : > { %v5076_v60 = vpop.f32.mrf.mxu1 }
 0x281   : > { %v4940_v22 = vpack.c.bf16 %v5076_v60, %v5076_v60  ;;  %v4411_v13 = vmul.f32 %v5076_v60, %v5076_v60  ;;  %v4357_v27 = vsel %vm3664_vm14, %v5076_v60, 0.0 }
 0x282   : > { %v4099_v4 = vpop.f32.mrf.mxu1 }
 0x283   : > { %4308 = vst.msk [vmem:[%s7062_s8 + $0x48] sm:$0xf] %vm460_vm0, %v4940_v22  ;;  %v4938_v19 = vpack.c.bf16 %v4099_v4, %v4099_v4  ;;  %v4353_v42 = vsel %vm3664_vm14, %v4099_v4, 0.0  ;;  %v4409_v30 = vmul.f32 %v4099_v4, %v4099_v4  ;;  %v4460_v43 = vsel %vm3664_vm14, %v4411_v13, 0.0 }
 0x284   : > { %v4354_v57 = vadd.f32 %v4353_v42, %v4352_v63  ;;  %v5077_v25 = vpop.f32.mrf.mxu1 }
 0x285   : > { %4306 = vst.msk [vmem:[%s7062_s8 + $0x40] sm:$0xf] %vm460_vm0, %v4938_v19  ;;  %v4456_v10 = vsel %vm3664_vm14, %v4409_v30, 0.0  ;;  %v4941_v45 = vpack.c.bf16 %v5077_v25, %v5077_v25  ;;  %v4412_v37 = vmul.f32 %v5077_v25, %v5077_v25  ;;  %v4359_v17 = vsel %vm3664_vm14, %v5077_v25, 0.0 }
 0x286   : > { %v4457_v7 = vadd.f32 %v4456_v10, %v4455_v40  ;;  %v4102_v51 = vpop.f32.mrf.mxu1 }
 0x287   : > { %4309 = vst.msk [vmem:[%s7062_s8 + $0x4c] sm:$0xf] %vm460_vm0, %v4941_v45  ;;  %v4939_v38 = vpack.c.bf16 %v4102_v51, %v4102_v51  ;;  %v4355_v20 = vsel %vm3664_vm14, %v4102_v51, 0.0  ;;  %v4410_v50 = vmul.f32 %v4102_v51, %v4102_v51  ;;  %v4462_v34 = vsel %vm3664_vm14, %v4412_v37, 0.0 }
 0x288   : > { %v4356_v41 = vadd.f32 %v4355_v20, %v4354_v57 }
 0x289   : > { %4307 = vst.msk [vmem:[%s7062_s8 + $0x44] sm:$0xf] %vm460_vm0, %v4939_v38  ;;  %v4458_v36 = vsel %vm3664_vm14, %v4410_v50, 0.0 }
 0x28a   : > { %v4358_v26 = vadd.f32 %v4357_v27, %v4356_v41  ;;  %v4459_v16 = vadd.f32 %v4458_v36, %v4457_v7 }
 0x28c   : > { %v4461_v46 = vadd.f32 %v4460_v43, %v4459_v16  ;;  %v4360_v52 = vadd.f32 %v4359_v17, %v4358_v26 }
 0x28e   : > { %v4463_v35 = vadd.f32 %v4462_v34, %v4461_v46 }
 0x29b   : > { %v5080_v3 = vpop.f32.mrf.mxu1 }
 0x29c   : > { %v4944_v1 = vpack.c.bf16 %v5080_v3, %v5080_v3  ;;  %v4415_v29 = vmul.f32 %v5080_v3, %v5080_v3  ;;  %v4365_v15 = vsel %vm3664_vm14, %v5080_v3, 0.0 }
 0x29d   : > { %v4115_v54 = vpop.f32.mrf.mxu1 }
 0x29e   : > { %4312 = vst.msk [vmem:[%s7062_s8 + $0x58] sm:$0xf] %vm460_vm0, %v4944_v1  ;;  %v4942_v9 = vpack.c.bf16 %v4115_v54, %v4115_v54  ;;  %v4361_v24 = vsel %vm3664_vm14, %v4115_v54, 0.0  ;;  %v4413_v21 = vmul.f32 %v4115_v54, %v4115_v54  ;;  %v4468_v49 = vsel %vm3664_vm14, %v4415_v29, 0.0 }
 0x29f   : > { %v4362_v31 = vadd.f32 %v4361_v24, %v4360_v52  ;;  %v5081_v11 = vpop.f32.mrf.mxu1 }
 0x2a0   : > { %4310 = vst.msk [vmem:[%s7062_s8 + $0x50] sm:$0xf] %vm460_vm0, %v4942_v9  ;;  %v4464_v6 = vsel %vm3664_vm14, %v4413_v21, 0.0  ;;  %v4945_v8 = vpack.c.bf16 %v5081_v11, %v5081_v11  ;;  %v4416_v33 = vmul.f32 %v5081_v11, %v5081_v11  ;;  %v4367_v47 = vsel %vm3664_vm14, %v5081_v11, 0.0 }
 0x2a1   : > { %v4465_v12 = vadd.f32 %v4464_v6, %v4463_v35  ;;  %v4118_v39 = vpop.f32.mrf.mxu1 }
 0x2a2   : > { %4313 = vst.msk [vmem:[%s7062_s8 + $0x5c] sm:$0xf] %vm460_vm0, %v4945_v8  ;;  %v4943_v48 = vpack.c.bf16 %v4118_v39, %v4118_v39  ;;  %v4363_v28 = vsel %vm3664_vm14, %v4118_v39, 0.0  ;;  %v4414_v32 = vmul.f32 %v4118_v39, %v4118_v39  ;;  %v4470_v62 = vsel %vm3664_vm14, %v4416_v33, 0.0 }
 0x2a3   : > { %v4364_v55 = vadd.f32 %v4363_v28, %v4362_v31 }
 0x2a4   : > { %4311 = vst.msk [vmem:[%s7062_s8 + $0x54] sm:$0xf] %vm460_vm0, %v4943_v48  ;;  %v4466_v0 = vsel %vm3664_vm14, %v4414_v32, 0.0 }
 0x2a5   : > { %v4366_v61 = vadd.f32 %v4365_v15, %v4364_v55  ;;  %v4467_v23 = vadd.f32 %v4466_v0, %v4465_v12 }
 0x2a7   : > { %v4469_v5 = vadd.f32 %v4468_v49, %v4467_v23  ;;  %v4368_v59 = vadd.f32 %v4367_v47, %v4366_v61 }
 0x2a9   : > { %v4471_v18 = vadd.f32 %v4470_v62, %v4469_v5 }
 0x2ce   : > { %v5084_v2 = vpop.f32.mrf.mxu1 }
 0x2cf   : > { %v4948_v56 = vpack.c.bf16 %v5084_v2, %v5084_v2  ;;  %v4419_v45 = vmul.f32 %v5084_v2, %v5084_v2  ;;  %v4373_v51 = vsel %vm3664_vm14, %v5084_v2, 0.0 }
 0x2d0   : > { %v4131_v44 = vpop.f32.mrf.mxu1 }
 0x2d1   : > { %4316 = vst.msk [vmem:[%s7062_s8 + $0x68] sm:$0xf] %vm460_vm0, %v4948_v56  ;;  %v4946_v58 = vpack.c.bf16 %v4131_v44, %v4131_v44  ;;  %v4417_v60 = vmul.f32 %v4131_v44, %v4131_v44  ;;  %v4369_v22 = vsel %vm3664_vm14, %v4131_v44, 0.0  ;;  %v4476_v20 = vsel %vm3664_vm14, %v4419_v45, 0.0 }
 0x2d2   : > { %v5085_v53 = vpop.f32.mrf.mxu1  ;;  %v4370_v30 = vadd.f32 %v4369_v22, %v4368_v59 }
 0x2d3   : > { %4314 = vst.msk [vmem:[%s7062_s8 + $0x60] sm:$0xf] %vm460_vm0, %v4946_v58  ;;  %v4949_v63 = vpack.c.bf16 %v5085_v53, %v5085_v53  ;;  %v4472_v19 = vsel %vm3664_vm14, %v4417_v60, 0.0  ;;  %v4420_v50 = vmul.f32 %v5085_v53, %v5085_v53  ;;  %v4375_v36 = vsel %vm3664_vm14, %v5085_v53, 0.0 }
 0x2d4   : > { %v4134_v14 = vpop.f32.mrf.mxu1  ;;  %v4473_v25 = vadd.f32 %v4472_v19, %v4471_v18 }
 0x2d5   : > { %4317 = vst.msk [vmem:[%s7062_s8 + $0x6c] sm:$0xf] %vm460_vm0, %v4949_v63  ;;  %v4947_v40 = vpack.c.bf16 %v4134_v14, %v4134_v14  ;;  %v4418_v4 = vmul.f32 %v4134_v14, %v4134_v14  ;;  %v4371_v42 = vsel %vm3664_vm14, %v4134_v14, 0.0  ;;  %v4478_v52 = vsel %vm3664_vm14, %v4420_v50, 0.0 }
 0x2d6   : > { %v4372_v10 = vadd.f32 %v4371_v42, %v4370_v30 }
 0x2d7   : > { %4315 = vst.msk [vmem:[%s7062_s8 + $0x64] sm:$0xf] %vm460_vm0, %v4947_v40  ;;  %v4474_v57 = vsel %vm3664_vm14, %v4418_v4, 0.0 }
 0x2d8   : > { %v4475_v7 = vadd.f32 %v4474_v57, %v4473_v25  ;;  %v4374_v13 = vadd.f32 %v4373_v51, %v4372_v10 }
 0x2da   : > { %v4477_v27 = vadd.f32 %v4476_v20, %v4475_v7  ;;  %v4376_v17 = vadd.f32 %v4375_v36, %v4374_v13 }
 0x2dc   : > { %v4479_v1 = vadd.f32 %v4478_v52, %v4477_v27 }
 0x300   : > { %v5088_v38 = vpop.f32.mrf.mxu1 }
 0x301   : > { %v4952_v41 = vpack.c.bf16 %v5088_v38, %v5088_v38  ;;  %v4423_v9 = vmul.f32 %v5088_v38, %v5088_v38  ;;  %v4381_v8 = vsel %vm3664_vm14, %v5088_v38, 0.0 }
 0x302   : > { %v4147_v37 = vpop.f32.mrf.mxu1 }
 0x303   : > { %4320 = vst.msk [vmem:[%s7062_s8 + $0x78] sm:$0xf] %vm460_vm0, %v4952_v41  ;;  %v4950_v26 = vpack.c.bf16 %v4147_v37, %v4147_v37  ;;  %v4377_v16 = vsel %vm3664_vm14, %v4147_v37, 0.0  ;;  %v4421_v43 = vmul.f32 %v4147_v37, %v4147_v37  ;;  %v4484_v28 = vsel %vm3664_vm14, %v4423_v9, 0.0 }
 0x304   : > { %v5089_v46 = vpop.f32.mrf.mxu1  ;;  %v4378_v3 = vadd.f32 %v4377_v16, %v4376_v17 }
 0x305   : > { %4318 = vst.msk [vmem:[%s7062_s8 + $0x70] sm:$0xf] %vm460_vm0, %v4950_v26  ;;  %v4480_v34 = vsel %vm3664_vm14, %v4421_v43, 0.0  ;;  %v4953_v35 = vpack.c.bf16 %v5089_v46, %v5089_v46  ;;  %v4424_v12 = vmul.f32 %v5089_v46, %v5089_v46  ;;  %v4383_v32 = vsel %vm3664_vm14, %v5089_v46, 0.0 }
 0x306   : > { %v4150_v54 = vpop.f32.mrf.mxu1  ;;  %v4481_v11 = vadd.f32 %v4480_v34, %v4479_v1 }
 0x307   : > { %4321 = vst.msk [vmem:[%s7062_s8 + $0x7c] sm:$0xf] %vm460_vm0, %v4953_v35  ;;  %v4951_v24 = vpack.c.bf16 %v4150_v54, %v4150_v54  ;;  %v4379_v21 = vsel %vm3664_vm14, %v4150_v54, 0.0  ;;  %v4422_v31 = vmul.f32 %v4150_v54, %v4150_v54  ;;  %v4486_v33 = vsel %vm3664_vm14, %v4424_v12, 0.0 }
 0x308   : > { %v4380_v6 = vadd.f32 %v4379_v21, %v4378_v3 }
 0x309   : > { %4319 = vst.msk [vmem:[%s7062_s8 + $0x74] sm:$0xf] %vm460_vm0, %v4951_v24  ;;  %v4482_v39 = vsel %vm3664_vm14, %v4422_v31, 0.0 }
 0x30a   : > { %v4382_v29 = vadd.f32 %v4381_v8, %v4380_v6  ;;  %v4483_v48 = vadd.f32 %v4482_v39, %v4481_v11 }
 0x30c   : > { %v4384_v55 = vadd.f32 %v4383_v32, %v4382_v29  ;;  %v4485_v15 = vadd.f32 %v4484_v28, %v4483_v48 }
 0x30e   : > { %v4385_v0 = vrot.slane %v4384_v55, 4  ;;  %v4487_v61 = vadd.f32 %v4486_v33, %v4485_v15 }
 0x310   : > { %v4386_v23 = vadd.f32 %v4385_v0, %v4384_v55  ;;  %v4488_v49 = vrot.slane %v4487_v61, 4 }
 0x312   : > { %v4387_v47 = vrot.slane %v4386_v23, 2  ;;  %v4489_v5 = vadd.f32 %v4488_v49, %v4487_v61 }
 0x314   : > { %v4388_v59 = vadd.f32 %v4387_v47, %v4386_v23  ;;  %v4490_v62 = vrot.slane %v4489_v5, 2 }
 0x316   : > { %v4389_v18 = vrot.slane %v4388_v59, 1  ;;  %v4491_v2 = vadd.f32 %v4490_v62, %v4489_v5 }
 0x318   : > { %v4390_v56 = vadd.f32 %v4389_v18, %v4388_v59  ;;  %v4492_v44 = vrot.slane %v4491_v2, 1 }
 0x31a   : > { %4392 = vst.msk [vmem:[%s265_s10] sm:$0x1] %vm468_vm1, %v4390_v56  ;;  %v4493_v58 = vadd.f32 %v4492_v44, %v4491_v2 }
 0x31c   : > { %4494 = vst.msk [vmem:[%s268_s13] sm:$0x1] %vm468_vm1, %v4493_v58 }
 0x31d PF: > { %s17_s21 = sadd.s32 1, %s5190_s21  }
 0x31e   : > { %p14_p4 = scmp.ge.s32.totalorder %s17_s21, 4  }
 0x320   :  { %16 = sbr.rel (!%p14_p4) target bundleno = 1 (0x1), region = 93 }

</bundles_post_ra>
